<compile_context>
chip_gen: v6e
topology: v6e:2x2x1
jax: 0.10.0
libtpu: 0.0.40
codegen_flags: <defaults>
</compile_context>

<pallas_src>
import functools

import jax
import jax.numpy as jnp
from jax import lax
from jax.experimental import pallas as pl
from jax.experimental.pallas import tpu as pltpu

_INV_SQRT2 = 0.7071067811865476


def _residual_kernel(x_ref, w_ref, shift_ref, mask_ref, out_ref, patches_ref,
                     *, w_spatial):
    # x_ref      : (B, C, H*W)   B images, NCHW with spatial flattened on lanes
    # w_ref      : (C, 9*C)      conv2 weights, tap-major K, BN scale folded in
    # shift_ref  : (C, 1)        folded BN shift = beta - mean * scale
    # mask_ref   : (9*C, H*W)    border masks per tap, pre-broadcast over C
    # out_ref    : (B, C, H*W)
    # patches_ref: (9*C, B*H*W)  VMEM scratch slab (im2col patch matrix)
    B, C, HW = x_ref.shape
    W = w_spatial

    # Stream the nine shifted taps of each image into the patch slab.  Each tap
    # is a pure XLU lane rotation plus a masked multiply; writing straight to
    # VMEM scratch keeps the vreg live range small (no concat, no spills).
    for b in range(B):
        xb = x_ref[b]                                            # (C, HW)
        for ky in range(3):
            for kx in range(3):
                t = ky * 3 + kx
                d = (ky - 1) * W + (kx - 1)
                if d == 0:
                    tap = xb
                else:
                    shifted = pltpu.roll(xb, shift=(-d) % HW, axis=1)
                    tap = shifted * mask_ref[t * C:(t + 1) * C, :]
                patches_ref[t * C:(t + 1) * C, b * HW:(b + 1) * HW] = tap

    # ONE fused MXU matmul over the whole block: (C, 9C) @ (9C, B*HW).
    acc = jnp.dot(w_ref[...], patches_ref[...],
                  preferred_element_type=jnp.float32)

    # Epilogue per image on lane-aligned slices: folded BN shift + residual +
    # exact GELU (matches nn.GELU()), then a lane-dense store.
    shift = shift_ref[...]
    for b in range(B):
        yb = acc[:, b * HW:(b + 1) * HW] + shift + x_ref[b]
        out_ref[b] = 0.5 * yb * (1.0 + lax.erf(yb * _INV_SQRT2))


@functools.partial(jax.jit, static_argnames=("eps",))
def residual_forward(x_nchw, w2, gamma, beta, run_mean, run_var, eps=1e-5):
    """Forward of Residual: gelu(BN2(conv2(x)) + x).  x is NCHW (PyTorch layout)."""
    N, C, H, W = x_nchw.shape
    HW = H * W

    # Per-step batch B: largest divisor of N that is <= 8, preferring a grid of
    # >= 2 steps so both v7x TensorCores get work.
    divisors = [c for c in (8, 4, 2, 1) if N % c == 0]
    multi_step = [c for c in divisors if N // c >= 2]
    block_b = multi_step[0] if multi_step else divisors[0]
    grid = (N // block_b,)

    # Lane-dense view: NCHW with spatial flattened (free reshape, no transpose).
    x_flat = x_nchw.reshape(N, C, HW).astype(jnp.float32)

    # Fold BN (eval-mode) scale into the conv weights; keep only the shift.
    scale = gamma / jnp.sqrt(run_var + eps)
    # (Cout, Cin, kH, kW) -> (Cout, kH, kW, Cin) -> (Cout, 9*Cin), tap-major K.
    w_folded = (jnp.transpose(w2, (0, 2, 3, 1)).reshape(C, 9 * C)
                * scale[:, None]).astype(jnp.float32)
    shift = (beta - run_mean * scale).reshape(C, 1).astype(jnp.float32)

    # Hoisted border masks: valid(tap, position) for the zero-padded 3x3 conv,
    # per-image flattened positions, pre-broadcast over channels so the kernel
    # slice (C, HW) matches the tap shape with no sublane broadcast.
    pos = jnp.arange(HW, dtype=jnp.int32)
    col = pos % W
    rows = []
    for ky in range(3):
        for kx in range(3):
            dy, dx = ky - 1, kx - 1
            d = dy * W + dx
            valid = ((pos + d >= 0) & (pos + d < HW) &
                     (col + dx >= 0) & (col + dx < W))
            rows.append(valid)
    mask9 = jnp.stack(rows, axis=0).astype(jnp.float32)          # (9, HW)
    masks = jnp.repeat(mask9, C, axis=0)                         # (9*C, HW)

    kernel = functools.partial(_residual_kernel, w_spatial=W)

    cost = pl.CostEstimate(
        flops=2 * N * C * (9 * C) * HW,
        transcendentals=N * C * HW,
        bytes_accessed=(2 * N * C * HW + C * 9 * C + 9 * C * HW + C) * 4,
    )

    out_flat = pl.pallas_call(
        kernel,
        out_shape=jax.ShapeDtypeStruct((N, C, HW), jnp.float32),
        grid_spec=pltpu.PrefetchScalarGridSpec(
            num_scalar_prefetch=0,
            grid=grid,
            in_specs=[
                pl.BlockSpec((block_b, C, HW), lambda n: (n, 0, 0)),
                pl.BlockSpec((C, 9 * C), lambda n: (0, 0)),
                pl.BlockSpec((C, 1), lambda n: (0, 0)),
                pl.BlockSpec((9 * C, HW), lambda n: (0, 0)),
            ],
            out_specs=pl.BlockSpec((block_b, C, HW), lambda n: (n, 0, 0)),
            scratch_shapes=[pltpu.VMEM((9 * C, block_b * HW), jnp.float32)],
        ),
        compiler_params=pltpu.CompilerParams(
            dimension_semantics=("parallel",),
        ),
        cost_estimate=cost,
    )(x_flat, w_folded, shift, masks)

    return out_flat.reshape(N, C, H, W)


def _reference_forward(x_nchw, w2, gamma, beta, run_mean, run_var, eps=1e-5):
    """Pure-JAX reference mirroring the PyTorch forward (eval-mode BN)."""
    out = lax.conv_general_dilated(
        x_nchw, w2,
        window_strides=(1, 1),
        padding=((1, 1), (1, 1)),
        dimension_numbers=("NCHW", "OIHW", "NCHW"),
        precision=lax.Precision.HIGHEST,
    )
    scale = gamma / jnp.sqrt(run_var + eps)
    shift = beta - run_mean * scale
    out = out * scale[None, :, None, None] + shift[None, :, None, None]
    out = out + x_nchw
    return 0.5 * out * (1.0 + lax.erf(out * _INV_SQRT2))


if __name__ == "__main__":
    # Small shapes consistent with the module: channels=32, spatial=16.
    # batch=16 -> per-step batch B=8, grid=(2,) so both v7x cores get work.
    N, C, H, W = 16, 32, 16, 16
    key = jax.random.PRNGKey(0)
    kx, kw2, kg, kb, km, kv = jax.random.split(key, 6)

    x = jax.random.normal(kx, (N, C, H, W), dtype=jnp.float32)

    # conv2 branch parameters (conv weight, BN affine + running stats).
    w2 = jax.random.normal(kw2, (C, C, 3, 3), dtype=jnp.float32) * 0.1
    gamma = 1.0 + 0.1 * jax.random.normal(kg, (C,), dtype=jnp.float32)
    beta = 0.1 * jax.random.normal(kb, (C,), dtype=jnp.float32)
    run_mean = 0.1 * jax.random.normal(km, (C,), dtype=jnp.float32)
    run_var = jnp.abs(1.0 + 0.1 * jax.random.normal(kv, (C,), dtype=jnp.float32))

    # (conv1 parameters would be initialized here too, but the reference
    #  forward overwrites conv1's output, so they never affect the result.)

    out = residual_forward(x, w2, gamma, beta, run_mean, run_var)
    out = jax.block_until_ready(out)

    ref = _reference_forward(x, w2, gamma, beta, run_mean, run_var)
    assert out.shape == (N, C, H, W) and out.dtype == jnp.float32
    assert jnp.allclose(out, ref, atol=1e-3, rtol=1e-3), (
        f"max abs err = {jnp.max(jnp.abs(out - ref))}"
    )

    print("KERNEL_OK")
</pallas_src>

<mosaic_0001>
module attributes {stable_mosaic.version = 11 : i64} {
  func.func @_residual_kernel(%arg0: i32, %arg1: memref<8x32x256xf32, #tpu.memory_space<vmem>>, %arg2: memref<32x288xf32, #tpu.memory_space<vmem>>, %arg3: memref<32x1xf32, #tpu.memory_space<vmem>>, %arg4: memref<288x256xf32, #tpu.memory_space<vmem>>, %arg5: memref<8x32x256xf32, #tpu.memory_space<vmem>>, %arg6: memref<288x2048xf32, #tpu.memory_space<vmem>>) attributes {dimension_semantics = [#tpu.dimension_semantics<parallel>], iteration_bounds = array<i64: 2>, scalar_prefetch = 0 : i64, scratch_operands = 1 : i64, tpu.core_type = #tpu.core_type<tc>, window_params = [{transform_indices = @transform_0, window_bounds = array<i64: 8, 32, 256>}, {pipeline_mode = #tpu.pipeline_mode<synchronous>, transform_indices = @transform_1, window_bounds = array<i64: 32, 288>}, {pipeline_mode = #tpu.pipeline_mode<synchronous>, transform_indices = @transform_2, window_bounds = array<i64: 32, 1>}, {pipeline_mode = #tpu.pipeline_mode<synchronous>, transform_indices = @transform_3, window_bounds = array<i64: 288, 256>}, {transform_indices = @transform_4, window_bounds = array<i64: 8, 32, 256>}]} {
    %c0 = arith.constant 0 : index
    %c0_0 = arith.constant 0 : index
    %c0_1 = arith.constant 0 : index
    %0 = vector.load %arg1[%c0, %c0_0, %c0_1] : memref<8x32x256xf32, #tpu.memory_space<vmem>>, vector<1x32x256xf32>
    %1 = vector.shape_cast %0 : vector<1x32x256xf32> to vector<32x256xf32>
    %c17_i32 = arith.constant 17 : i32
    %2 = tpu.dynamic_rotate %1 by %c17_i32 dim 1 : vector<32x256xf32>, i32 -> vector<32x256xf32>
    %c0_2 = arith.constant 0 : index
    %c0_3 = arith.constant 0 : index
    %3 = vector.load %arg4[%c0_2, %c0_3] : memref<288x256xf32, #tpu.memory_space<vmem>>, vector<32x256xf32>
    %4 = arith.mulf %2, %3 : vector<32x256xf32>
    %c0_4 = arith.constant 0 : index
    %c0_5 = arith.constant 0 : index
    %5 = vector.load %arg6[%c0_4, %c0_5] : memref<288x2048xf32, #tpu.memory_space<vmem>>, vector<32x256xf32>
    tpu.vector_store %arg6[%c0_4, %c0_5], %4 {strides = array<i32>} : memref<288x2048xf32, #tpu.memory_space<vmem>>, vector<32x256xf32>,
    %c16_i32 = arith.constant 16 : i32
    %6 = tpu.dynamic_rotate %1 by %c16_i32 dim 1 : vector<32x256xf32>, i32 -> vector<32x256xf32>
    %c32 = arith.constant 32 : index
    %c0_6 = arith.constant 0 : index
    %7 = vector.load %arg4[%c32, %c0_6] : memref<288x256xf32, #tpu.memory_space<vmem>>, vector<32x256xf32>
    %8 = arith.mulf %6, %7 : vector<32x256xf32>
    %c32_7 = arith.constant 32 : index
    %c0_8 = arith.constant 0 : index
    %9 = vector.load %arg6[%c32_7, %c0_8] : memref<288x2048xf32, #tpu.memory_space<vmem>>, vector<32x256xf32>
    tpu.vector_store %arg6[%c32_7, %c0_8], %8 {strides = array<i32>} : memref<288x2048xf32, #tpu.memory_space<vmem>>, vector<32x256xf32>,
    %c15_i32 = arith.constant 15 : i32
    %10 = tpu.dynamic_rotate %1 by %c15_i32 dim 1 : vector<32x256xf32>, i32 -> vector<32x256xf32>
    %c64 = arith.constant 64 : index
    %c0_9 = arith.constant 0 : index
    %11 = vector.load %arg4[%c64, %c0_9] : memref<288x256xf32, #tpu.memory_space<vmem>>, vector<32x256xf32>
    %12 = arith.mulf %10, %11 : vector<32x256xf32>
    %c64_10 = arith.constant 64 : index
    %c0_11 = arith.constant 0 : index
    %13 = vector.load %arg6[%c64_10, %c0_11] : memref<288x2048xf32, #tpu.memory_space<vmem>>, vector<32x256xf32>
    tpu.vector_store %arg6[%c64_10, %c0_11], %12 {strides = array<i32>} : memref<288x2048xf32, #tpu.memory_space<vmem>>, vector<32x256xf32>,
    %c1_i32 = arith.constant 1 : i32
    %14 = tpu.dynamic_rotate %1 by %c1_i32 dim 1 : vector<32x256xf32>, i32 -> vector<32x256xf32>
    %c96 = arith.constant 96 : index
    %c0_12 = arith.constant 0 : index
    %15 = vector.load %arg4[%c96, %c0_12] : memref<288x256xf32, #tpu.memory_space<vmem>>, vector<32x256xf32>
    %16 = arith.mulf %14, %15 : vector<32x256xf32>
    %c96_13 = arith.constant 96 : index
    %c0_14 = arith.constant 0 : index
    %17 = vector.load %arg6[%c96_13, %c0_14] : memref<288x2048xf32, #tpu.memory_space<vmem>>, vector<32x256xf32>
    tpu.vector_store %arg6[%c96_13, %c0_14], %16 {strides = array<i32>} : memref<288x2048xf32, #tpu.memory_space<vmem>>, vector<32x256xf32>,
    %c128 = arith.constant 128 : index
    %c0_15 = arith.constant 0 : index
    %18 = vector.load %arg6[%c128, %c0_15] : memref<288x2048xf32, #tpu.memory_space<vmem>>, vector<32x256xf32>
    tpu.vector_store %arg6[%c128, %c0_15], %1 {strides = array<i32>} : memref<288x2048xf32, #tpu.memory_space<vmem>>, vector<32x256xf32>,
    %c255_i32 = arith.constant 255 : i32
    %19 = tpu.dynamic_rotate %1 by %c255_i32 dim 1 : vector<32x256xf32>, i32 -> vector<32x256xf32>
    %c160 = arith.constant 160 : index
    %c0_16 = arith.constant 0 : index
    %20 = vector.load %arg4[%c160, %c0_16] : memref<288x256xf32, #tpu.memory_space<vmem>>, vector<32x256xf32>
    %21 = arith.mulf %19, %20 : vector<32x256xf32>
    %c160_17 = arith.constant 160 : index
    %c0_18 = arith.constant 0 : index
    %22 = vector.load %arg6[%c160_17, %c0_18] : memref<288x2048xf32, #tpu.memory_space<vmem>>, vector<32x256xf32>
    tpu.vector_store %arg6[%c160_17, %c0_18], %21 {strides = array<i32>} : memref<288x2048xf32, #tpu.memory_space<vmem>>, vector<32x256xf32>,
    %c241_i32 = arith.constant 241 : i32
    %23 = tpu.dynamic_rotate %1 by %c241_i32 dim 1 : vector<32x256xf32>, i32 -> vector<32x256xf32>
    %c192 = arith.constant 192 : index
    %c0_19 = arith.constant 0 : index
    %24 = vector.load %arg4[%c192, %c0_19] : memref<288x256xf32, #tpu.memory_space<vmem>>, vector<32x256xf32>
    %25 = arith.mulf %23, %24 : vector<32x256xf32>
    %c192_20 = arith.constant 192 : index
    %c0_21 = arith.constant 0 : index
    %26 = vector.load %arg6[%c192_20, %c0_21] : memref<288x2048xf32, #tpu.memory_space<vmem>>, vector<32x256xf32>
    tpu.vector_store %arg6[%c192_20, %c0_21], %25 {strides = array<i32>} : memref<288x2048xf32, #tpu.memory_space<vmem>>, vector<32x256xf32>,
    %c240_i32 = arith.constant 240 : i32
    %27 = tpu.dynamic_rotate %1 by %c240_i32 dim 1 : vector<32x256xf32>, i32 -> vector<32x256xf32>
    %c224 = arith.constant 224 : index
    %c0_22 = arith.constant 0 : index
    %28 = vector.load %arg4[%c224, %c0_22] : memref<288x256xf32, #tpu.memory_space<vmem>>, vector<32x256xf32>
    %29 = arith.mulf %27, %28 : vector<32x256xf32>
    %c224_23 = arith.constant 224 : index
    %c0_24 = arith.constant 0 : index
    %30 = vector.load %arg6[%c224_23, %c0_24] : memref<288x2048xf32, #tpu.memory_space<vmem>>, vector<32x256xf32>
    tpu.vector_store %arg6[%c224_23, %c0_24], %29 {strides = array<i32>} : memref<288x2048xf32, #tpu.memory_space<vmem>>, vector<32x256xf32>,
    %c239_i32 = arith.constant 239 : i32
    %31 = tpu.dynamic_rotate %1 by %c239_i32 dim 1 : vector<32x256xf32>, i32 -> vector<32x256xf32>
    %c256 = arith.constant 256 : index
    %c0_25 = arith.constant 0 : index
    %32 = vector.load %arg4[%c256, %c0_25] : memref<288x256xf32, #tpu.memory_space<vmem>>, vector<32x256xf32>
    %33 = arith.mulf %31, %32 : vector<32x256xf32>
    %c256_26 = arith.constant 256 : index
    %c0_27 = arith.constant 0 : index
    %34 = vector.load %arg6[%c256_26, %c0_27] : memref<288x2048xf32, #tpu.memory_space<vmem>>, vector<32x256xf32>
    tpu.vector_store %arg6[%c256_26, %c0_27], %33 {strides = array<i32>} : memref<288x2048xf32, #tpu.memory_space<vmem>>, vector<32x256xf32>,
    %c1 = arith.constant 1 : index
    %c0_28 = arith.constant 0 : index
    %c0_29 = arith.constant 0 : index
    %35 = vector.load %arg1[%c1, %c0_28, %c0_29] : memref<8x32x256xf32, #tpu.memory_space<vmem>>, vector<1x32x256xf32>
    %36 = vector.shape_cast %35 : vector<1x32x256xf32> to vector<32x256xf32>
    %c17_i32_30 = arith.constant 17 : i32
    %37 = tpu.dynamic_rotate %36 by %c17_i32_30 dim 1 : vector<32x256xf32>, i32 -> vector<32x256xf32>
    %c0_31 = arith.constant 0 : index
    %c0_32 = arith.constant 0 : index
    %38 = vector.load %arg4[%c0_31, %c0_32] : memref<288x256xf32, #tpu.memory_space<vmem>>, vector<32x256xf32>
    %39 = arith.mulf %37, %38 : vector<32x256xf32>
    %c0_33 = arith.constant 0 : index
    %c256_34 = arith.constant 256 : index
    %40 = vector.load %arg6[%c0_33, %c256_34] : memref<288x2048xf32, #tpu.memory_space<vmem>>, vector<32x256xf32>
    tpu.vector_store %arg6[%c0_33, %c256_34], %39 {strides = array<i32>} : memref<288x2048xf32, #tpu.memory_space<vmem>>, vector<32x256xf32>,
    %c16_i32_35 = arith.constant 16 : i32
    %41 = tpu.dynamic_rotate %36 by %c16_i32_35 dim 1 : vector<32x256xf32>, i32 -> vector<32x256xf32>
    %c32_36 = arith.constant 32 : index
    %c0_37 = arith.constant 0 : index
    %42 = vector.load %arg4[%c32_36, %c0_37] : memref<288x256xf32, #tpu.memory_space<vmem>>, vector<32x256xf32>
    %43 = arith.mulf %41, %42 : vector<32x256xf32>
    %c32_38 = arith.constant 32 : index
    %c256_39 = arith.constant 256 : index
    %44 = vector.load %arg6[%c32_38, %c256_39] : memref<288x2048xf32, #tpu.memory_space<vmem>>, vector<32x256xf32>
    tpu.vector_store %arg6[%c32_38, %c256_39], %43 {strides = array<i32>} : memref<288x2048xf32, #tpu.memory_space<vmem>>, vector<32x256xf32>,
    %c15_i32_40 = arith.constant 15 : i32
    %45 = tpu.dynamic_rotate %36 by %c15_i32_40 dim 1 : vector<32x256xf32>, i32 -> vector<32x256xf32>
    %c64_41 = arith.constant 64 : index
    %c0_42 = arith.constant 0 : index
    %46 = vector.load %arg4[%c64_41, %c0_42] : memref<288x256xf32, #tpu.memory_space<vmem>>, vector<32x256xf32>
    %47 = arith.mulf %45, %46 : vector<32x256xf32>
    %c64_43 = arith.constant 64 : index
    %c256_44 = arith.constant 256 : index
    %48 = vector.load %arg6[%c64_43, %c256_44] : memref<288x2048xf32, #tpu.memory_space<vmem>>, vector<32x256xf32>
    tpu.vector_store %arg6[%c64_43, %c256_44], %47 {strides = array<i32>} : memref<288x2048xf32, #tpu.memory_space<vmem>>, vector<32x256xf32>,
    %c1_i32_45 = arith.constant 1 : i32
    %49 = tpu.dynamic_rotate %36 by %c1_i32_45 dim 1 : vector<32x256xf32>, i32 -> vector<32x256xf32>
    %c96_46 = arith.constant 96 : index
    %c0_47 = arith.constant 0 : index
    %50 = vector.load %arg4[%c96_46, %c0_47] : memref<288x256xf32, #tpu.memory_space<vmem>>, vector<32x256xf32>
    %51 = arith.mulf %49, %50 : vector<32x256xf32>
    %c96_48 = arith.constant 96 : index
    %c256_49 = arith.constant 256 : index
    %52 = vector.load %arg6[%c96_48, %c256_49] : memref<288x2048xf32, #tpu.memory_space<vmem>>, vector<32x256xf32>
    tpu.vector_store %arg6[%c96_48, %c256_49], %51 {strides = array<i32>} : memref<288x2048xf32, #tpu.memory_space<vmem>>, vector<32x256xf32>,
    %c128_50 = arith.constant 128 : index
    %c256_51 = arith.constant 256 : index
    %53 = vector.load %arg6[%c128_50, %c256_51] : memref<288x2048xf32, #tpu.memory_space<vmem>>, vector<32x256xf32>
    tpu.vector_store %arg6[%c128_50, %c256_51], %36 {strides = array<i32>} : memref<288x2048xf32, #tpu.memory_space<vmem>>, vector<32x256xf32>,
    %c255_i32_52 = arith.constant 255 : i32
    %54 = tpu.dynamic_rotate %36 by %c255_i32_52 dim 1 : vector<32x256xf32>, i32 -> vector<32x256xf32>
    %c160_53 = arith.constant 160 : index
    %c0_54 = arith.constant 0 : index
    %55 = vector.load %arg4[%c160_53, %c0_54] : memref<288x256xf32, #tpu.memory_space<vmem>>, vector<32x256xf32>
    %56 = arith.mulf %54, %55 : vector<32x256xf32>
    %c160_55 = arith.constant 160 : index
    %c256_56 = arith.constant 256 : index
    %57 = vector.load %arg6[%c160_55, %c256_56] : memref<288x2048xf32, #tpu.memory_space<vmem>>, vector<32x256xf32>
    tpu.vector_store %arg6[%c160_55, %c256_56], %56 {strides = array<i32>} : memref<288x2048xf32, #tpu.memory_space<vmem>>, vector<32x256xf32>,
    %c241_i32_57 = arith.constant 241 : i32
    %58 = tpu.dynamic_rotate %36 by %c241_i32_57 dim 1 : vector<32x256xf32>, i32 -> vector<32x256xf32>
    %c192_58 = arith.constant 192 : index
    %c0_59 = arith.constant 0 : index
    %59 = vector.load %arg4[%c192_58, %c0_59] : memref<288x256xf32, #tpu.memory_space<vmem>>, vector<32x256xf32>
    %60 = arith.mulf %58, %59 : vector<32x256xf32>
    %c192_60 = arith.constant 192 : index
    %c256_61 = arith.constant 256 : index
    %61 = vector.load %arg6[%c192_60, %c256_61] : memref<288x2048xf32, #tpu.memory_space<vmem>>, vector<32x256xf32>
    tpu.vector_store %arg6[%c192_60, %c256_61], %60 {strides = array<i32>} : memref<288x2048xf32, #tpu.memory_space<vmem>>, vector<32x256xf32>,
    %c240_i32_62 = arith.constant 240 : i32
    %62 = tpu.dynamic_rotate %36 by %c240_i32_62 dim 1 : vector<32x256xf32>, i32 -> vector<32x256xf32>
    %c224_63 = arith.constant 224 : index
    %c0_64 = arith.constant 0 : index
    %63 = vector.load %arg4[%c224_63, %c0_64] : memref<288x256xf32, #tpu.memory_space<vmem>>, vector<32x256xf32>
    %64 = arith.mulf %62, %63 : vector<32x256xf32>
    %c224_65 = arith.constant 224 : index
    %c256_66 = arith.constant 256 : index
    %65 = vector.load %arg6[%c224_65, %c256_66] : memref<288x2048xf32, #tpu.memory_space<vmem>>, vector<32x256xf32>
    tpu.vector_store %arg6[%c224_65, %c256_66], %64 {strides = array<i32>} : memref<288x2048xf32, #tpu.memory_space<vmem>>, vector<32x256xf32>,
    %c239_i32_67 = arith.constant 239 : i32
    %66 = tpu.dynamic_rotate %36 by %c239_i32_67 dim 1 : vector<32x256xf32>, i32 -> vector<32x256xf32>
    %c256_68 = arith.constant 256 : index
    %c0_69 = arith.constant 0 : index
    %67 = vector.load %arg4[%c256_68, %c0_69] : memref<288x256xf32, #tpu.memory_space<vmem>>, vector<32x256xf32>
    %68 = arith.mulf %66, %67 : vector<32x256xf32>
    %c256_70 = arith.constant 256 : index
    %c256_71 = arith.constant 256 : index
    %69 = vector.load %arg6[%c256_70, %c256_71] : memref<288x2048xf32, #tpu.memory_space<vmem>>, vector<32x256xf32>
    tpu.vector_store %arg6[%c256_70, %c256_71], %68 {strides = array<i32>} : memref<288x2048xf32, #tpu.memory_space<vmem>>, vector<32x256xf32>,
    %c2 = arith.constant 2 : index
    %c0_72 = arith.constant 0 : index
    %c0_73 = arith.constant 0 : index
    %70 = vector.load %arg1[%c2, %c0_72, %c0_73] : memref<8x32x256xf32, #tpu.memory_space<vmem>>, vector<1x32x256xf32>
    %71 = vector.shape_cast %70 : vector<1x32x256xf32> to vector<32x256xf32>
    %c17_i32_74 = arith.constant 17 : i32
    %72 = tpu.dynamic_rotate %71 by %c17_i32_74 dim 1 : vector<32x256xf32>, i32 -> vector<32x256xf32>
    %c0_75 = arith.constant 0 : index
    %c0_76 = arith.constant 0 : index
    %73 = vector.load %arg4[%c0_75, %c0_76] : memref<288x256xf32, #tpu.memory_space<vmem>>, vector<32x256xf32>
    %74 = arith.mulf %72, %73 : vector<32x256xf32>
    %c0_77 = arith.constant 0 : index
    %c512 = arith.constant 512 : index
    %75 = vector.load %arg6[%c0_77, %c512] : memref<288x2048xf32, #tpu.memory_space<vmem>>, vector<32x256xf32>
    tpu.vector_store %arg6[%c0_77, %c512], %74 {strides = array<i32>} : memref<288x2048xf32, #tpu.memory_space<vmem>>, vector<32x256xf32>,
    %c16_i32_78 = arith.constant 16 : i32
    %76 = tpu.dynamic_rotate %71 by %c16_i32_78 dim 1 : vector<32x256xf32>, i32 -> vector<32x256xf32>
    %c32_79 = arith.constant 32 : index
    %c0_80 = arith.constant 0 : index
    %77 = vector.load %arg4[%c32_79, %c0_80] : memref<288x256xf32, #tpu.memory_space<vmem>>, vector<32x256xf32>
    %78 = arith.mulf %76, %77 : vector<32x256xf32>
    %c32_81 = arith.constant 32 : index
    %c512_82 = arith.constant 512 : index
    %79 = vector.load %arg6[%c32_81, %c512_82] : memref<288x2048xf32, #tpu.memory_space<vmem>>, vector<32x256xf32>
    tpu.vector_store %arg6[%c32_81, %c512_82], %78 {strides = array<i32>} : memref<288x2048xf32, #tpu.memory_space<vmem>>, vector<32x256xf32>,
    %c15_i32_83 = arith.constant 15 : i32
    %80 = tpu.dynamic_rotate %71 by %c15_i32_83 dim 1 : vector<32x256xf32>, i32 -> vector<32x256xf32>
    %c64_84 = arith.constant 64 : index
    %c0_85 = arith.constant 0 : index
    %81 = vector.load %arg4[%c64_84, %c0_85] : memref<288x256xf32, #tpu.memory_space<vmem>>, vector<32x256xf32>
    %82 = arith.mulf %80, %81 : vector<32x256xf32>
    %c64_86 = arith.constant 64 : index
    %c512_87 = arith.constant 512 : index
    %83 = vector.load %arg6[%c64_86, %c512_87] : memref<288x2048xf32, #tpu.memory_space<vmem>>, vector<32x256xf32>
    tpu.vector_store %arg6[%c64_86, %c512_87], %82 {strides = array<i32>} : memref<288x2048xf32, #tpu.memory_space<vmem>>, vector<32x256xf32>,
    %c1_i32_88 = arith.constant 1 : i32
    %84 = tpu.dynamic_rotate %71 by %c1_i32_88 dim 1 : vector<32x256xf32>, i32 -> vector<32x256xf32>
    %c96_89 = arith.constant 96 : index
    %c0_90 = arith.constant 0 : index
    %85 = vector.load %arg4[%c96_89, %c0_90] : memref<288x256xf32, #tpu.memory_space<vmem>>, vector<32x256xf32>
    %86 = arith.mulf %84, %85 : vector<32x256xf32>
    %c96_91 = arith.constant 96 : index
    %c512_92 = arith.constant 512 : index
    %87 = vector.load %arg6[%c96_91, %c512_92] : memref<288x2048xf32, #tpu.memory_space<vmem>>, vector<32x256xf32>
    tpu.vector_store %arg6[%c96_91, %c512_92], %86 {strides = array<i32>} : memref<288x2048xf32, #tpu.memory_space<vmem>>, vector<32x256xf32>,
    %c128_93 = arith.constant 128 : index
    %c512_94 = arith.constant 512 : index
    %88 = vector.load %arg6[%c128_93, %c512_94] : memref<288x2048xf32, #tpu.memory_space<vmem>>, vector<32x256xf32>
    tpu.vector_store %arg6[%c128_93, %c512_94], %71 {strides = array<i32>} : memref<288x2048xf32, #tpu.memory_space<vmem>>, vector<32x256xf32>,
    %c255_i32_95 = arith.constant 255 : i32
    %89 = tpu.dynamic_rotate %71 by %c255_i32_95 dim 1 : vector<32x256xf32>, i32 -> vector<32x256xf32>
    %c160_96 = arith.constant 160 : index
    %c0_97 = arith.constant 0 : index
    %90 = vector.load %arg4[%c160_96, %c0_97] : memref<288x256xf32, #tpu.memory_space<vmem>>, vector<32x256xf32>
    %91 = arith.mulf %89, %90 : vector<32x256xf32>
    %c160_98 = arith.constant 160 : index
    %c512_99 = arith.constant 512 : index
    %92 = vector.load %arg6[%c160_98, %c512_99] : memref<288x2048xf32, #tpu.memory_space<vmem>>, vector<32x256xf32>
    tpu.vector_store %arg6[%c160_98, %c512_99], %91 {strides = array<i32>} : memref<288x2048xf32, #tpu.memory_space<vmem>>, vector<32x256xf32>,
    %c241_i32_100 = arith.constant 241 : i32
    %93 = tpu.dynamic_rotate %71 by %c241_i32_100 dim 1 : vector<32x256xf32>, i32 -> vector<32x256xf32>
    %c192_101 = arith.constant 192 : index
    %c0_102 = arith.constant 0 : index
    %94 = vector.load %arg4[%c192_101, %c0_102] : memref<288x256xf32, #tpu.memory_space<vmem>>, vector<32x256xf32>
    %95 = arith.mulf %93, %94 : vector<32x256xf32>
    %c192_103 = arith.constant 192 : index
    %c512_104 = arith.constant 512 : index
    %96 = vector.load %arg6[%c192_103, %c512_104] : memref<288x2048xf32, #tpu.memory_space<vmem>>, vector<32x256xf32>
    tpu.vector_store %arg6[%c192_103, %c512_104], %95 {strides = array<i32>} : memref<288x2048xf32, #tpu.memory_space<vmem>>, vector<32x256xf32>,
    %c240_i32_105 = arith.constant 240 : i32
    %97 = tpu.dynamic_rotate %71 by %c240_i32_105 dim 1 : vector<32x256xf32>, i32 -> vector<32x256xf32>
    %c224_106 = arith.constant 224 : index
    %c0_107 = arith.constant 0 : index
    %98 = vector.load %arg4[%c224_106, %c0_107] : memref<288x256xf32, #tpu.memory_space<vmem>>, vector<32x256xf32>
    %99 = arith.mulf %97, %98 : vector<32x256xf32>
    %c224_108 = arith.constant 224 : index
    %c512_109 = arith.constant 512 : index
    %100 = vector.load %arg6[%c224_108, %c512_109] : memref<288x2048xf32, #tpu.memory_space<vmem>>, vector<32x256xf32>
    tpu.vector_store %arg6[%c224_108, %c512_109], %99 {strides = array<i32>} : memref<288x2048xf32, #tpu.memory_space<vmem>>, vector<32x256xf32>,
    %c239_i32_110 = arith.constant 239 : i32
    %101 = tpu.dynamic_rotate %71 by %c239_i32_110 dim 1 : vector<32x256xf32>, i32 -> vector<32x256xf32>
    %c256_111 = arith.constant 256 : index
    %c0_112 = arith.constant 0 : index
    %102 = vector.load %arg4[%c256_111, %c0_112] : memref<288x256xf32, #tpu.memory_space<vmem>>, vector<32x256xf32>
    %103 = arith.mulf %101, %102 : vector<32x256xf32>
    %c256_113 = arith.constant 256 : index
    %c512_114 = arith.constant 512 : index
    %104 = vector.load %arg6[%c256_113, %c512_114] : memref<288x2048xf32, #tpu.memory_space<vmem>>, vector<32x256xf32>
    tpu.vector_store %arg6[%c256_113, %c512_114], %103 {strides = array<i32>} : memref<288x2048xf32, #tpu.memory_space<vmem>>, vector<32x256xf32>,
    %c3 = arith.constant 3 : index
    %c0_115 = arith.constant 0 : index
    %c0_116 = arith.constant 0 : index
    %105 = vector.load %arg1[%c3, %c0_115, %c0_116] : memref<8x32x256xf32, #tpu.memory_space<vmem>>, vector<1x32x256xf32>
    %106 = vector.shape_cast %105 : vector<1x32x256xf32> to vector<32x256xf32>
    %c17_i32_117 = arith.constant 17 : i32
    %107 = tpu.dynamic_rotate %106 by %c17_i32_117 dim 1 : vector<32x256xf32>, i32 -> vector<32x256xf32>
    %c0_118 = arith.constant 0 : index
    %c0_119 = arith.constant 0 : index
    %108 = vector.load %arg4[%c0_118, %c0_119] : memref<288x256xf32, #tpu.memory_space<vmem>>, vector<32x256xf32>
    %109 = arith.mulf %107, %108 : vector<32x256xf32>
    %c0_120 = arith.constant 0 : index
    %c768 = arith.constant 768 : index
    %110 = vector.load %arg6[%c0_120, %c768] : memref<288x2048xf32, #tpu.memory_space<vmem>>, vector<32x256xf32>
    tpu.vector_store %arg6[%c0_120, %c768], %109 {strides = array<i32>} : memref<288x2048xf32, #tpu.memory_space<vmem>>, vector<32x256xf32>,
    %c16_i32_121 = arith.constant 16 : i32
    %111 = tpu.dynamic_rotate %106 by %c16_i32_121 dim 1 : vector<32x256xf32>, i32 -> vector<32x256xf32>
    %c32_122 = arith.constant 32 : index
    %c0_123 = arith.constant 0 : index
    %112 = vector.load %arg4[%c32_122, %c0_123] : memref<288x256xf32, #tpu.memory_space<vmem>>, vector<32x256xf32>
    %113 = arith.mulf %111, %112 : vector<32x256xf32>
    %c32_124 = arith.constant 32 : index
    %c768_125 = arith.constant 768 : index
    %114 = vector.load %arg6[%c32_124, %c768_125] : memref<288x2048xf32, #tpu.memory_space<vmem>>, vector<32x256xf32>
    tpu.vector_store %arg6[%c32_124, %c768_125], %113 {strides = array<i32>} : memref<288x2048xf32, #tpu.memory_space<vmem>>, vector<32x256xf32>,
    %c15_i32_126 = arith.constant 15 : i32
    %115 = tpu.dynamic_rotate %106 by %c15_i32_126 dim 1 : vector<32x256xf32>, i32 -> vector<32x256xf32>
    %c64_127 = arith.constant 64 : index
    %c0_128 = arith.constant 0 : index
    %116 = vector.load %arg4[%c64_127, %c0_128] : memref<288x256xf32, #tpu.memory_space<vmem>>, vector<32x256xf32>
    %117 = arith.mulf %115, %116 : vector<32x256xf32>
    %c64_129 = arith.constant 64 : index
    %c768_130 = arith.constant 768 : index
    %118 = vector.load %arg6[%c64_129, %c768_130] : memref<288x2048xf32, #tpu.memory_space<vmem>>, vector<32x256xf32>
    tpu.vector_store %arg6[%c64_129, %c768_130], %117 {strides = array<i32>} : memref<288x2048xf32, #tpu.memory_space<vmem>>, vector<32x256xf32>,
    %c1_i32_131 = arith.constant 1 : i32
    %119 = tpu.dynamic_rotate %106 by %c1_i32_131 dim 1 : vector<32x256xf32>, i32 -> vector<32x256xf32>
    %c96_132 = arith.constant 96 : index
    %c0_133 = arith.constant 0 : index
    %120 = vector.load %arg4[%c96_132, %c0_133] : memref<288x256xf32, #tpu.memory_space<vmem>>, vector<32x256xf32>
    %121 = arith.mulf %119, %120 : vector<32x256xf32>
    %c96_134 = arith.constant 96 : index
    %c768_135 = arith.constant 768 : index
    %122 = vector.load %arg6[%c96_134, %c768_135] : memref<288x2048xf32, #tpu.memory_space<vmem>>, vector<32x256xf32>
    tpu.vector_store %arg6[%c96_134, %c768_135], %121 {strides = array<i32>} : memref<288x2048xf32, #tpu.memory_space<vmem>>, vector<32x256xf32>,
    %c128_136 = arith.constant 128 : index
    %c768_137 = arith.constant 768 : index
    %123 = vector.load %arg6[%c128_136, %c768_137] : memref<288x2048xf32, #tpu.memory_space<vmem>>, vector<32x256xf32>
    tpu.vector_store %arg6[%c128_136, %c768_137], %106 {strides = array<i32>} : memref<288x2048xf32, #tpu.memory_space<vmem>>, vector<32x256xf32>,
    %c255_i32_138 = arith.constant 255 : i32
    %124 = tpu.dynamic_rotate %106 by %c255_i32_138 dim 1 : vector<32x256xf32>, i32 -> vector<32x256xf32>
    %c160_139 = arith.constant 160 : index
    %c0_140 = arith.constant 0 : index
    %125 = vector.load %arg4[%c160_139, %c0_140] : memref<288x256xf32, #tpu.memory_space<vmem>>, vector<32x256xf32>
    %126 = arith.mulf %124, %125 : vector<32x256xf32>
    %c160_141 = arith.constant 160 : index
    %c768_142 = arith.constant 768 : index
    %127 = vector.load %arg6[%c160_141, %c768_142] : memref<288x2048xf32, #tpu.memory_space<vmem>>, vector<32x256xf32>
    tpu.vector_store %arg6[%c160_141, %c768_142], %126 {strides = array<i32>} : memref<288x2048xf32, #tpu.memory_space<vmem>>, vector<32x256xf32>,
    %c241_i32_143 = arith.constant 241 : i32
    %128 = tpu.dynamic_rotate %106 by %c241_i32_143 dim 1 : vector<32x256xf32>, i32 -> vector<32x256xf32>
    %c192_144 = arith.constant 192 : index
    %c0_145 = arith.constant 0 : index
    %129 = vector.load %arg4[%c192_144, %c0_145] : memref<288x256xf32, #tpu.memory_space<vmem>>, vector<32x256xf32>
    %130 = arith.mulf %128, %129 : vector<32x256xf32>
    %c192_146 = arith.constant 192 : index
    %c768_147 = arith.constant 768 : index
    %131 = vector.load %arg6[%c192_146, %c768_147] : memref<288x2048xf32, #tpu.memory_space<vmem>>, vector<32x256xf32>
    tpu.vector_store %arg6[%c192_146, %c768_147], %130 {strides = array<i32>} : memref<288x2048xf32, #tpu.memory_space<vmem>>, vector<32x256xf32>,
    %c240_i32_148 = arith.constant 240 : i32
    %132 = tpu.dynamic_rotate %106 by %c240_i32_148 dim 1 : vector<32x256xf32>, i32 -> vector<32x256xf32>
    %c224_149 = arith.constant 224 : index
    %c0_150 = arith.constant 0 : index
    %133 = vector.load %arg4[%c224_149, %c0_150] : memref<288x256xf32, #tpu.memory_space<vmem>>, vector<32x256xf32>
    %134 = arith.mulf %132, %133 : vector<32x256xf32>
    %c224_151 = arith.constant 224 : index
    %c768_152 = arith.constant 768 : index
    %135 = vector.load %arg6[%c224_151, %c768_152] : memref<288x2048xf32, #tpu.memory_space<vmem>>, vector<32x256xf32>
    tpu.vector_store %arg6[%c224_151, %c768_152], %134 {strides = array<i32>} : memref<288x2048xf32, #tpu.memory_space<vmem>>, vector<32x256xf32>,
    %c239_i32_153 = arith.constant 239 : i32
    %136 = tpu.dynamic_rotate %106 by %c239_i32_153 dim 1 : vector<32x256xf32>, i32 -> vector<32x256xf32>
    %c256_154 = arith.constant 256 : index
    %c0_155 = arith.constant 0 : index
    %137 = vector.load %arg4[%c256_154, %c0_155] : memref<288x256xf32, #tpu.memory_space<vmem>>, vector<32x256xf32>
    %138 = arith.mulf %136, %137 : vector<32x256xf32>
    %c256_156 = arith.constant 256 : index
    %c768_157 = arith.constant 768 : index
    %139 = vector.load %arg6[%c256_156, %c768_157] : memref<288x2048xf32, #tpu.memory_space<vmem>>, vector<32x256xf32>
    tpu.vector_store %arg6[%c256_156, %c768_157], %138 {strides = array<i32>} : memref<288x2048xf32, #tpu.memory_space<vmem>>, vector<32x256xf32>,
    %c4 = arith.constant 4 : index
    %c0_158 = arith.constant 0 : index
    %c0_159 = arith.constant 0 : index
    %140 = vector.load %arg1[%c4, %c0_158, %c0_159] : memref<8x32x256xf32, #tpu.memory_space<vmem>>, vector<1x32x256xf32>
    %141 = vector.shape_cast %140 : vector<1x32x256xf32> to vector<32x256xf32>
    %c17_i32_160 = arith.constant 17 : i32
    %142 = tpu.dynamic_rotate %141 by %c17_i32_160 dim 1 : vector<32x256xf32>, i32 -> vector<32x256xf32>
    %c0_161 = arith.constant 0 : index
    %c0_162 = arith.constant 0 : index
    %143 = vector.load %arg4[%c0_161, %c0_162] : memref<288x256xf32, #tpu.memory_space<vmem>>, vector<32x256xf32>
    %144 = arith.mulf %142, %143 : vector<32x256xf32>
    %c0_163 = arith.constant 0 : index
    %c1024 = arith.constant 1024 : index
    %145 = vector.load %arg6[%c0_163, %c1024] : memref<288x2048xf32, #tpu.memory_space<vmem>>, vector<32x256xf32>
    tpu.vector_store %arg6[%c0_163, %c1024], %144 {strides = array<i32>} : memref<288x2048xf32, #tpu.memory_space<vmem>>, vector<32x256xf32>,
    %c16_i32_164 = arith.constant 16 : i32
    %146 = tpu.dynamic_rotate %141 by %c16_i32_164 dim 1 : vector<32x256xf32>, i32 -> vector<32x256xf32>
    %c32_165 = arith.constant 32 : index
    %c0_166 = arith.constant 0 : index
    %147 = vector.load %arg4[%c32_165, %c0_166] : memref<288x256xf32, #tpu.memory_space<vmem>>, vector<32x256xf32>
    %148 = arith.mulf %146, %147 : vector<32x256xf32>
    %c32_167 = arith.constant 32 : index
    %c1024_168 = arith.constant 1024 : index
    %149 = vector.load %arg6[%c32_167, %c1024_168] : memref<288x2048xf32, #tpu.memory_space<vmem>>, vector<32x256xf32>
    tpu.vector_store %arg6[%c32_167, %c1024_168], %148 {strides = array<i32>} : memref<288x2048xf32, #tpu.memory_space<vmem>>, vector<32x256xf32>,
    %c15_i32_169 = arith.constant 15 : i32
    %150 = tpu.dynamic_rotate %141 by %c15_i32_169 dim 1 : vector<32x256xf32>, i32 -> vector<32x256xf32>
    %c64_170 = arith.constant 64 : index
    %c0_171 = arith.constant 0 : index
    %151 = vector.load %arg4[%c64_170, %c0_171] : memref<288x256xf32, #tpu.memory_space<vmem>>, vector<32x256xf32>
    %152 = arith.mulf %150, %151 : vector<32x256xf32>
    %c64_172 = arith.constant 64 : index
    %c1024_173 = arith.constant 1024 : index
    %153 = vector.load %arg6[%c64_172, %c1024_173] : memref<288x2048xf32, #tpu.memory_space<vmem>>, vector<32x256xf32>
    tpu.vector_store %arg6[%c64_172, %c1024_173], %152 {strides = array<i32>} : memref<288x2048xf32, #tpu.memory_space<vmem>>, vector<32x256xf32>,
    %c1_i32_174 = arith.constant 1 : i32
    %154 = tpu.dynamic_rotate %141 by %c1_i32_174 dim 1 : vector<32x256xf32>, i32 -> vector<32x256xf32>
    %c96_175 = arith.constant 96 : index
    %c0_176 = arith.constant 0 : index
    %155 = vector.load %arg4[%c96_175, %c0_176] : memref<288x256xf32, #tpu.memory_space<vmem>>, vector<32x256xf32>
    %156 = arith.mulf %154, %155 : vector<32x256xf32>
    %c96_177 = arith.constant 96 : index
    %c1024_178 = arith.constant 1024 : index
    %157 = vector.load %arg6[%c96_177, %c1024_178] : memref<288x2048xf32, #tpu.memory_space<vmem>>, vector<32x256xf32>
    tpu.vector_store %arg6[%c96_177, %c1024_178], %156 {strides = array<i32>} : memref<288x2048xf32, #tpu.memory_space<vmem>>, vector<32x256xf32>,
    %c128_179 = arith.constant 128 : index
    %c1024_180 = arith.constant 1024 : index
    %158 = vector.load %arg6[%c128_179, %c1024_180] : memref<288x2048xf32, #tpu.memory_space<vmem>>, vector<32x256xf32>
    tpu.vector_store %arg6[%c128_179, %c1024_180], %141 {strides = array<i32>} : memref<288x2048xf32, #tpu.memory_space<vmem>>, vector<32x256xf32>,
    %c255_i32_181 = arith.constant 255 : i32
    %159 = tpu.dynamic_rotate %141 by %c255_i32_181 dim 1 : vector<32x256xf32>, i32 -> vector<32x256xf32>
    %c160_182 = arith.constant 160 : index
    %c0_183 = arith.constant 0 : index
    %160 = vector.load %arg4[%c160_182, %c0_183] : memref<288x256xf32, #tpu.memory_space<vmem>>, vector<32x256xf32>
    %161 = arith.mulf %159, %160 : vector<32x256xf32>
    %c160_184 = arith.constant 160 : index
    %c1024_185 = arith.constant 1024 : index
    %162 = vector.load %arg6[%c160_184, %c1024_185] : memref<288x2048xf32, #tpu.memory_space<vmem>>, vector<32x256xf32>
    tpu.vector_store %arg6[%c160_184, %c1024_185], %161 {strides = array<i32>} : memref<288x2048xf32, #tpu.memory_space<vmem>>, vector<32x256xf32>,
    %c241_i32_186 = arith.constant 241 : i32
    %163 = tpu.dynamic_rotate %141 by %c241_i32_186 dim 1 : vector<32x256xf32>, i32 -> vector<32x256xf32>
    %c192_187 = arith.constant 192 : index
    %c0_188 = arith.constant 0 : index
    %164 = vector.load %arg4[%c192_187, %c0_188] : memref<288x256xf32, #tpu.memory_space<vmem>>, vector<32x256xf32>
    %165 = arith.mulf %163, %164 : vector<32x256xf32>
    %c192_189 = arith.constant 192 : index
    %c1024_190 = arith.constant 1024 : index
    %166 = vector.load %arg6[%c192_189, %c1024_190] : memref<288x2048xf32, #tpu.memory_space<vmem>>, vector<32x256xf32>
    tpu.vector_store %arg6[%c192_189, %c1024_190], %165 {strides = array<i32>} : memref<288x2048xf32, #tpu.memory_space<vmem>>, vector<32x256xf32>,
    %c240_i32_191 = arith.constant 240 : i32
    %167 = tpu.dynamic_rotate %141 by %c240_i32_191 dim 1 : vector<32x256xf32>, i32 -> vector<32x256xf32>
    %c224_192 = arith.constant 224 : index
    %c0_193 = arith.constant 0 : index
    %168 = vector.load %arg4[%c224_192, %c0_193] : memref<288x256xf32, #tpu.memory_space<vmem>>, vector<32x256xf32>
    %169 = arith.mulf %167, %168 : vector<32x256xf32>
    %c224_194 = arith.constant 224 : index
    %c1024_195 = arith.constant 1024 : index
    %170 = vector.load %arg6[%c224_194, %c1024_195] : memref<288x2048xf32, #tpu.memory_space<vmem>>, vector<32x256xf32>
    tpu.vector_store %arg6[%c224_194, %c1024_195], %169 {strides = array<i32>} : memref<288x2048xf32, #tpu.memory_space<vmem>>, vector<32x256xf32>,
    %c239_i32_196 = arith.constant 239 : i32
    %171 = tpu.dynamic_rotate %141 by %c239_i32_196 dim 1 : vector<32x256xf32>, i32 -> vector<32x256xf32>
    %c256_197 = arith.constant 256 : index
    %c0_198 = arith.constant 0 : index
    %172 = vector.load %arg4[%c256_197, %c0_198] : memref<288x256xf32, #tpu.memory_space<vmem>>, vector<32x256xf32>
    %173 = arith.mulf %171, %172 : vector<32x256xf32>
    %c256_199 = arith.constant 256 : index
    %c1024_200 = arith.constant 1024 : index
    %174 = vector.load %arg6[%c256_199, %c1024_200] : memref<288x2048xf32, #tpu.memory_space<vmem>>, vector<32x256xf32>
    tpu.vector_store %arg6[%c256_199, %c1024_200], %173 {strides = array<i32>} : memref<288x2048xf32, #tpu.memory_space<vmem>>, vector<32x256xf32>,
    %c5 = arith.constant 5 : index
    %c0_201 = arith.constant 0 : index
    %c0_202 = arith.constant 0 : index
    %175 = vector.load %arg1[%c5, %c0_201, %c0_202] : memref<8x32x256xf32, #tpu.memory_space<vmem>>, vector<1x32x256xf32>
    %176 = vector.shape_cast %175 : vector<1x32x256xf32> to vector<32x256xf32>
    %c17_i32_203 = arith.constant 17 : i32
    %177 = tpu.dynamic_rotate %176 by %c17_i32_203 dim 1 : vector<32x256xf32>, i32 -> vector<32x256xf32>
    %c0_204 = arith.constant 0 : index
    %c0_205 = arith.constant 0 : index
    %178 = vector.load %arg4[%c0_204, %c0_205] : memref<288x256xf32, #tpu.memory_space<vmem>>, vector<32x256xf32>
    %179 = arith.mulf %177, %178 : vector<32x256xf32>
    %c0_206 = arith.constant 0 : index
    %c1280 = arith.constant 1280 : index
    %180 = vector.load %arg6[%c0_206, %c1280] : memref<288x2048xf32, #tpu.memory_space<vmem>>, vector<32x256xf32>
    tpu.vector_store %arg6[%c0_206, %c1280], %179 {strides = array<i32>} : memref<288x2048xf32, #tpu.memory_space<vmem>>, vector<32x256xf32>,
    %c16_i32_207 = arith.constant 16 : i32
    %181 = tpu.dynamic_rotate %176 by %c16_i32_207 dim 1 : vector<32x256xf32>, i32 -> vector<32x256xf32>
    %c32_208 = arith.constant 32 : index
    %c0_209 = arith.constant 0 : index
    %182 = vector.load %arg4[%c32_208, %c0_209] : memref<288x256xf32, #tpu.memory_space<vmem>>, vector<32x256xf32>
    %183 = arith.mulf %181, %182 : vector<32x256xf32>
    %c32_210 = arith.constant 32 : index
    %c1280_211 = arith.constant 1280 : index
    %184 = vector.load %arg6[%c32_210, %c1280_211] : memref<288x2048xf32, #tpu.memory_space<vmem>>, vector<32x256xf32>
    tpu.vector_store %arg6[%c32_210, %c1280_211], %183 {strides = array<i32>} : memref<288x2048xf32, #tpu.memory_space<vmem>>, vector<32x256xf32>,
    %c15_i32_212 = arith.constant 15 : i32
    %185 = tpu.dynamic_rotate %176 by %c15_i32_212 dim 1 : vector<32x256xf32>, i32 -> vector<32x256xf32>
    %c64_213 = arith.constant 64 : index
    %c0_214 = arith.constant 0 : index
    %186 = vector.load %arg4[%c64_213, %c0_214] : memref<288x256xf32, #tpu.memory_space<vmem>>, vector<32x256xf32>
    %187 = arith.mulf %185, %186 : vector<32x256xf32>
    %c64_215 = arith.constant 64 : index
    %c1280_216 = arith.constant 1280 : index
    %188 = vector.load %arg6[%c64_215, %c1280_216] : memref<288x2048xf32, #tpu.memory_space<vmem>>, vector<32x256xf32>
    tpu.vector_store %arg6[%c64_215, %c1280_216], %187 {strides = array<i32>} : memref<288x2048xf32, #tpu.memory_space<vmem>>, vector<32x256xf32>,
    %c1_i32_217 = arith.constant 1 : i32
    %189 = tpu.dynamic_rotate %176 by %c1_i32_217 dim 1 : vector<32x256xf32>, i32 -> vector<32x256xf32>
    %c96_218 = arith.constant 96 : index
    %c0_219 = arith.constant 0 : index
    %190 = vector.load %arg4[%c96_218, %c0_219] : memref<288x256xf32, #tpu.memory_space<vmem>>, vector<32x256xf32>
    %191 = arith.mulf %189, %190 : vector<32x256xf32>
    %c96_220 = arith.constant 96 : index
    %c1280_221 = arith.constant 1280 : index
    %192 = vector.load %arg6[%c96_220, %c1280_221] : memref<288x2048xf32, #tpu.memory_space<vmem>>, vector<32x256xf32>
    tpu.vector_store %arg6[%c96_220, %c1280_221], %191 {strides = array<i32>} : memref<288x2048xf32, #tpu.memory_space<vmem>>, vector<32x256xf32>,
    %c128_222 = arith.constant 128 : index
    %c1280_223 = arith.constant 1280 : index
    %193 = vector.load %arg6[%c128_222, %c1280_223] : memref<288x2048xf32, #tpu.memory_space<vmem>>, vector<32x256xf32>
    tpu.vector_store %arg6[%c128_222, %c1280_223], %176 {strides = array<i32>} : memref<288x2048xf32, #tpu.memory_space<vmem>>, vector<32x256xf32>,
    %c255_i32_224 = arith.constant 255 : i32
    %194 = tpu.dynamic_rotate %176 by %c255_i32_224 dim 1 : vector<32x256xf32>, i32 -> vector<32x256xf32>
    %c160_225 = arith.constant 160 : index
    %c0_226 = arith.constant 0 : index
    %195 = vector.load %arg4[%c160_225, %c0_226] : memref<288x256xf32, #tpu.memory_space<vmem>>, vector<32x256xf32>
    %196 = arith.mulf %194, %195 : vector<32x256xf32>
    %c160_227 = arith.constant 160 : index
    %c1280_228 = arith.constant 1280 : index
    %197 = vector.load %arg6[%c160_227, %c1280_228] : memref<288x2048xf32, #tpu.memory_space<vmem>>, vector<32x256xf32>
    tpu.vector_store %arg6[%c160_227, %c1280_228], %196 {strides = array<i32>} : memref<288x2048xf32, #tpu.memory_space<vmem>>, vector<32x256xf32>,
    %c241_i32_229 = arith.constant 241 : i32
    %198 = tpu.dynamic_rotate %176 by %c241_i32_229 dim 1 : vector<32x256xf32>, i32 -> vector<32x256xf32>
    %c192_230 = arith.constant 192 : index
    %c0_231 = arith.constant 0 : index
    %199 = vector.load %arg4[%c192_230, %c0_231] : memref<288x256xf32, #tpu.memory_space<vmem>>, vector<32x256xf32>
    %200 = arith.mulf %198, %199 : vector<32x256xf32>
    %c192_232 = arith.constant 192 : index
    %c1280_233 = arith.constant 1280 : index
    %201 = vector.load %arg6[%c192_232, %c1280_233] : memref<288x2048xf32, #tpu.memory_space<vmem>>, vector<32x256xf32>
    tpu.vector_store %arg6[%c192_232, %c1280_233], %200 {strides = array<i32>} : memref<288x2048xf32, #tpu.memory_space<vmem>>, vector<32x256xf32>,
    %c240_i32_234 = arith.constant 240 : i32
    %202 = tpu.dynamic_rotate %176 by %c240_i32_234 dim 1 : vector<32x256xf32>, i32 -> vector<32x256xf32>
    %c224_235 = arith.constant 224 : index
    %c0_236 = arith.constant 0 : index
    %203 = vector.load %arg4[%c224_235, %c0_236] : memref<288x256xf32, #tpu.memory_space<vmem>>, vector<32x256xf32>
    %204 = arith.mulf %202, %203 : vector<32x256xf32>
    %c224_237 = arith.constant 224 : index
    %c1280_238 = arith.constant 1280 : index
    %205 = vector.load %arg6[%c224_237, %c1280_238] : memref<288x2048xf32, #tpu.memory_space<vmem>>, vector<32x256xf32>
    tpu.vector_store %arg6[%c224_237, %c1280_238], %204 {strides = array<i32>} : memref<288x2048xf32, #tpu.memory_space<vmem>>, vector<32x256xf32>,
    %c239_i32_239 = arith.constant 239 : i32
    %206 = tpu.dynamic_rotate %176 by %c239_i32_239 dim 1 : vector<32x256xf32>, i32 -> vector<32x256xf32>
    %c256_240 = arith.constant 256 : index
    %c0_241 = arith.constant 0 : index
    %207 = vector.load %arg4[%c256_240, %c0_241] : memref<288x256xf32, #tpu.memory_space<vmem>>, vector<32x256xf32>
    %208 = arith.mulf %206, %207 : vector<32x256xf32>
    %c256_242 = arith.constant 256 : index
    %c1280_243 = arith.constant 1280 : index
    %209 = vector.load %arg6[%c256_242, %c1280_243] : memref<288x2048xf32, #tpu.memory_space<vmem>>, vector<32x256xf32>
    tpu.vector_store %arg6[%c256_242, %c1280_243], %208 {strides = array<i32>} : memref<288x2048xf32, #tpu.memory_space<vmem>>, vector<32x256xf32>,
    %c6 = arith.constant 6 : index
    %c0_244 = arith.constant 0 : index
    %c0_245 = arith.constant 0 : index
    %210 = vector.load %arg1[%c6, %c0_244, %c0_245] : memref<8x32x256xf32, #tpu.memory_space<vmem>>, vector<1x32x256xf32>
    %211 = vector.shape_cast %210 : vector<1x32x256xf32> to vector<32x256xf32>
    %c17_i32_246 = arith.constant 17 : i32
    %212 = tpu.dynamic_rotate %211 by %c17_i32_246 dim 1 : vector<32x256xf32>, i32 -> vector<32x256xf32>
    %c0_247 = arith.constant 0 : index
    %c0_248 = arith.constant 0 : index
    %213 = vector.load %arg4[%c0_247, %c0_248] : memref<288x256xf32, #tpu.memory_space<vmem>>, vector<32x256xf32>
    %214 = arith.mulf %212, %213 : vector<32x256xf32>
    %c0_249 = arith.constant 0 : index
    %c1536 = arith.constant 1536 : index
    %215 = vector.load %arg6[%c0_249, %c1536] : memref<288x2048xf32, #tpu.memory_space<vmem>>, vector<32x256xf32>
    tpu.vector_store %arg6[%c0_249, %c1536], %214 {strides = array<i32>} : memref<288x2048xf32, #tpu.memory_space<vmem>>, vector<32x256xf32>,
    %c16_i32_250 = arith.constant 16 : i32
    %216 = tpu.dynamic_rotate %211 by %c16_i32_250 dim 1 : vector<32x256xf32>, i32 -> vector<32x256xf32>
    %c32_251 = arith.constant 32 : index
    %c0_252 = arith.constant 0 : index
    %217 = vector.load %arg4[%c32_251, %c0_252] : memref<288x256xf32, #tpu.memory_space<vmem>>, vector<32x256xf32>
    %218 = arith.mulf %216, %217 : vector<32x256xf32>
    %c32_253 = arith.constant 32 : index
    %c1536_254 = arith.constant 1536 : index
    %219 = vector.load %arg6[%c32_253, %c1536_254] : memref<288x2048xf32, #tpu.memory_space<vmem>>, vector<32x256xf32>
    tpu.vector_store %arg6[%c32_253, %c1536_254], %218 {strides = array<i32>} : memref<288x2048xf32, #tpu.memory_space<vmem>>, vector<32x256xf32>,
    %c15_i32_255 = arith.constant 15 : i32
    %220 = tpu.dynamic_rotate %211 by %c15_i32_255 dim 1 : vector<32x256xf32>, i32 -> vector<32x256xf32>
    %c64_256 = arith.constant 64 : index
    %c0_257 = arith.constant 0 : index
    %221 = vector.load %arg4[%c64_256, %c0_257] : memref<288x256xf32, #tpu.memory_space<vmem>>, vector<32x256xf32>
    %222 = arith.mulf %220, %221 : vector<32x256xf32>
    %c64_258 = arith.constant 64 : index
    %c1536_259 = arith.constant 1536 : index
    %223 = vector.load %arg6[%c64_258, %c1536_259] : memref<288x2048xf32, #tpu.memory_space<vmem>>, vector<32x256xf32>
    tpu.vector_store %arg6[%c64_258, %c1536_259], %222 {strides = array<i32>} : memref<288x2048xf32, #tpu.memory_space<vmem>>, vector<32x256xf32>,
    %c1_i32_260 = arith.constant 1 : i32
    %224 = tpu.dynamic_rotate %211 by %c1_i32_260 dim 1 : vector<32x256xf32>, i32 -> vector<32x256xf32>
    %c96_261 = arith.constant 96 : index
    %c0_262 = arith.constant 0 : index
    %225 = vector.load %arg4[%c96_261, %c0_262] : memref<288x256xf32, #tpu.memory_space<vmem>>, vector<32x256xf32>
    %226 = arith.mulf %224, %225 : vector<32x256xf32>
    %c96_263 = arith.constant 96 : index
    %c1536_264 = arith.constant 1536 : index
    %227 = vector.load %arg6[%c96_263, %c1536_264] : memref<288x2048xf32, #tpu.memory_space<vmem>>, vector<32x256xf32>
    tpu.vector_store %arg6[%c96_263, %c1536_264], %226 {strides = array<i32>} : memref<288x2048xf32, #tpu.memory_space<vmem>>, vector<32x256xf32>,
    %c128_265 = arith.constant 128 : index
    %c1536_266 = arith.constant 1536 : index
    %228 = vector.load %arg6[%c128_265, %c1536_266] : memref<288x2048xf32, #tpu.memory_space<vmem>>, vector<32x256xf32>
    tpu.vector_store %arg6[%c128_265, %c1536_266], %211 {strides = array<i32>} : memref<288x2048xf32, #tpu.memory_space<vmem>>, vector<32x256xf32>,
    %c255_i32_267 = arith.constant 255 : i32
    %229 = tpu.dynamic_rotate %211 by %c255_i32_267 dim 1 : vector<32x256xf32>, i32 -> vector<32x256xf32>
    %c160_268 = arith.constant 160 : index
    %c0_269 = arith.constant 0 : index
    %230 = vector.load %arg4[%c160_268, %c0_269] : memref<288x256xf32, #tpu.memory_space<vmem>>, vector<32x256xf32>
    %231 = arith.mulf %229, %230 : vector<32x256xf32>
    %c160_270 = arith.constant 160 : index
    %c1536_271 = arith.constant 1536 : index
    %232 = vector.load %arg6[%c160_270, %c1536_271] : memref<288x2048xf32, #tpu.memory_space<vmem>>, vector<32x256xf32>
    tpu.vector_store %arg6[%c160_270, %c1536_271], %231 {strides = array<i32>} : memref<288x2048xf32, #tpu.memory_space<vmem>>, vector<32x256xf32>,
    %c241_i32_272 = arith.constant 241 : i32
    %233 = tpu.dynamic_rotate %211 by %c241_i32_272 dim 1 : vector<32x256xf32>, i32 -> vector<32x256xf32>
    %c192_273 = arith.constant 192 : index
    %c0_274 = arith.constant 0 : index
    %234 = vector.load %arg4[%c192_273, %c0_274] : memref<288x256xf32, #tpu.memory_space<vmem>>, vector<32x256xf32>
    %235 = arith.mulf %233, %234 : vector<32x256xf32>
    %c192_275 = arith.constant 192 : index
    %c1536_276 = arith.constant 1536 : index
    %236 = vector.load %arg6[%c192_275, %c1536_276] : memref<288x2048xf32, #tpu.memory_space<vmem>>, vector<32x256xf32>
    tpu.vector_store %arg6[%c192_275, %c1536_276], %235 {strides = array<i32>} : memref<288x2048xf32, #tpu.memory_space<vmem>>, vector<32x256xf32>,
    %c240_i32_277 = arith.constant 240 : i32
    %237 = tpu.dynamic_rotate %211 by %c240_i32_277 dim 1 : vector<32x256xf32>, i32 -> vector<32x256xf32>
    %c224_278 = arith.constant 224 : index
    %c0_279 = arith.constant 0 : index
    %238 = vector.load %arg4[%c224_278, %c0_279] : memref<288x256xf32, #tpu.memory_space<vmem>>, vector<32x256xf32>
    %239 = arith.mulf %237, %238 : vector<32x256xf32>
    %c224_280 = arith.constant 224 : index
    %c1536_281 = arith.constant 1536 : index
    %240 = vector.load %arg6[%c224_280, %c1536_281] : memref<288x2048xf32, #tpu.memory_space<vmem>>, vector<32x256xf32>
    tpu.vector_store %arg6[%c224_280, %c1536_281], %239 {strides = array<i32>} : memref<288x2048xf32, #tpu.memory_space<vmem>>, vector<32x256xf32>,
    %c239_i32_282 = arith.constant 239 : i32
    %241 = tpu.dynamic_rotate %211 by %c239_i32_282 dim 1 : vector<32x256xf32>, i32 -> vector<32x256xf32>
    %c256_283 = arith.constant 256 : index
    %c0_284 = arith.constant 0 : index
    %242 = vector.load %arg4[%c256_283, %c0_284] : memref<288x256xf32, #tpu.memory_space<vmem>>, vector<32x256xf32>
    %243 = arith.mulf %241, %242 : vector<32x256xf32>
    %c256_285 = arith.constant 256 : index
    %c1536_286 = arith.constant 1536 : index
    %244 = vector.load %arg6[%c256_285, %c1536_286] : memref<288x2048xf32, #tpu.memory_space<vmem>>, vector<32x256xf32>
    tpu.vector_store %arg6[%c256_285, %c1536_286], %243 {strides = array<i32>} : memref<288x2048xf32, #tpu.memory_space<vmem>>, vector<32x256xf32>,
    %c7 = arith.constant 7 : index
    %c0_287 = arith.constant 0 : index
    %c0_288 = arith.constant 0 : index
    %245 = vector.load %arg1[%c7, %c0_287, %c0_288] : memref<8x32x256xf32, #tpu.memory_space<vmem>>, vector<1x32x256xf32>
    %246 = vector.shape_cast %245 : vector<1x32x256xf32> to vector<32x256xf32>
    %c17_i32_289 = arith.constant 17 : i32
    %247 = tpu.dynamic_rotate %246 by %c17_i32_289 dim 1 : vector<32x256xf32>, i32 -> vector<32x256xf32>
    %c0_290 = arith.constant 0 : index
    %c0_291 = arith.constant 0 : index
    %248 = vector.load %arg4[%c0_290, %c0_291] : memref<288x256xf32, #tpu.memory_space<vmem>>, vector<32x256xf32>
    %249 = arith.mulf %247, %248 : vector<32x256xf32>
    %c0_292 = arith.constant 0 : index
    %c1792 = arith.constant 1792 : index
    %250 = vector.load %arg6[%c0_292, %c1792] : memref<288x2048xf32, #tpu.memory_space<vmem>>, vector<32x256xf32>
    tpu.vector_store %arg6[%c0_292, %c1792], %249 {strides = array<i32>} : memref<288x2048xf32, #tpu.memory_space<vmem>>, vector<32x256xf32>,
    %c16_i32_293 = arith.constant 16 : i32
    %251 = tpu.dynamic_rotate %246 by %c16_i32_293 dim 1 : vector<32x256xf32>, i32 -> vector<32x256xf32>
    %c32_294 = arith.constant 32 : index
    %c0_295 = arith.constant 0 : index
    %252 = vector.load %arg4[%c32_294, %c0_295] : memref<288x256xf32, #tpu.memory_space<vmem>>, vector<32x256xf32>
    %253 = arith.mulf %251, %252 : vector<32x256xf32>
    %c32_296 = arith.constant 32 : index
    %c1792_297 = arith.constant 1792 : index
    %254 = vector.load %arg6[%c32_296, %c1792_297] : memref<288x2048xf32, #tpu.memory_space<vmem>>, vector<32x256xf32>
    tpu.vector_store %arg6[%c32_296, %c1792_297], %253 {strides = array<i32>} : memref<288x2048xf32, #tpu.memory_space<vmem>>, vector<32x256xf32>,
    %c15_i32_298 = arith.constant 15 : i32
    %255 = tpu.dynamic_rotate %246 by %c15_i32_298 dim 1 : vector<32x256xf32>, i32 -> vector<32x256xf32>
    %c64_299 = arith.constant 64 : index
    %c0_300 = arith.constant 0 : index
    %256 = vector.load %arg4[%c64_299, %c0_300] : memref<288x256xf32, #tpu.memory_space<vmem>>, vector<32x256xf32>
    %257 = arith.mulf %255, %256 : vector<32x256xf32>
    %c64_301 = arith.constant 64 : index
    %c1792_302 = arith.constant 1792 : index
    %258 = vector.load %arg6[%c64_301, %c1792_302] : memref<288x2048xf32, #tpu.memory_space<vmem>>, vector<32x256xf32>
    tpu.vector_store %arg6[%c64_301, %c1792_302], %257 {strides = array<i32>} : memref<288x2048xf32, #tpu.memory_space<vmem>>, vector<32x256xf32>,
    %c1_i32_303 = arith.constant 1 : i32
    %259 = tpu.dynamic_rotate %246 by %c1_i32_303 dim 1 : vector<32x256xf32>, i32 -> vector<32x256xf32>
    %c96_304 = arith.constant 96 : index
    %c0_305 = arith.constant 0 : index
    %260 = vector.load %arg4[%c96_304, %c0_305] : memref<288x256xf32, #tpu.memory_space<vmem>>, vector<32x256xf32>
    %261 = arith.mulf %259, %260 : vector<32x256xf32>
    %c96_306 = arith.constant 96 : index
    %c1792_307 = arith.constant 1792 : index
    %262 = vector.load %arg6[%c96_306, %c1792_307] : memref<288x2048xf32, #tpu.memory_space<vmem>>, vector<32x256xf32>
    tpu.vector_store %arg6[%c96_306, %c1792_307], %261 {strides = array<i32>} : memref<288x2048xf32, #tpu.memory_space<vmem>>, vector<32x256xf32>,
    %c128_308 = arith.constant 128 : index
    %c1792_309 = arith.constant 1792 : index
    %263 = vector.load %arg6[%c128_308, %c1792_309] : memref<288x2048xf32, #tpu.memory_space<vmem>>, vector<32x256xf32>
    tpu.vector_store %arg6[%c128_308, %c1792_309], %246 {strides = array<i32>} : memref<288x2048xf32, #tpu.memory_space<vmem>>, vector<32x256xf32>,
    %c255_i32_310 = arith.constant 255 : i32
    %264 = tpu.dynamic_rotate %246 by %c255_i32_310 dim 1 : vector<32x256xf32>, i32 -> vector<32x256xf32>
    %c160_311 = arith.constant 160 : index
    %c0_312 = arith.constant 0 : index
    %265 = vector.load %arg4[%c160_311, %c0_312] : memref<288x256xf32, #tpu.memory_space<vmem>>, vector<32x256xf32>
    %266 = arith.mulf %264, %265 : vector<32x256xf32>
    %c160_313 = arith.constant 160 : index
    %c1792_314 = arith.constant 1792 : index
    %267 = vector.load %arg6[%c160_313, %c1792_314] : memref<288x2048xf32, #tpu.memory_space<vmem>>, vector<32x256xf32>
    tpu.vector_store %arg6[%c160_313, %c1792_314], %266 {strides = array<i32>} : memref<288x2048xf32, #tpu.memory_space<vmem>>, vector<32x256xf32>,
    %c241_i32_315 = arith.constant 241 : i32
    %268 = tpu.dynamic_rotate %246 by %c241_i32_315 dim 1 : vector<32x256xf32>, i32 -> vector<32x256xf32>
    %c192_316 = arith.constant 192 : index
    %c0_317 = arith.constant 0 : index
    %269 = vector.load %arg4[%c192_316, %c0_317] : memref<288x256xf32, #tpu.memory_space<vmem>>, vector<32x256xf32>
    %270 = arith.mulf %268, %269 : vector<32x256xf32>
    %c192_318 = arith.constant 192 : index
    %c1792_319 = arith.constant 1792 : index
    %271 = vector.load %arg6[%c192_318, %c1792_319] : memref<288x2048xf32, #tpu.memory_space<vmem>>, vector<32x256xf32>
    tpu.vector_store %arg6[%c192_318, %c1792_319], %270 {strides = array<i32>} : memref<288x2048xf32, #tpu.memory_space<vmem>>, vector<32x256xf32>,
    %c240_i32_320 = arith.constant 240 : i32
    %272 = tpu.dynamic_rotate %246 by %c240_i32_320 dim 1 : vector<32x256xf32>, i32 -> vector<32x256xf32>
    %c224_321 = arith.constant 224 : index
    %c0_322 = arith.constant 0 : index
    %273 = vector.load %arg4[%c224_321, %c0_322] : memref<288x256xf32, #tpu.memory_space<vmem>>, vector<32x256xf32>
    %274 = arith.mulf %272, %273 : vector<32x256xf32>
    %c224_323 = arith.constant 224 : index
    %c1792_324 = arith.constant 1792 : index
    %275 = vector.load %arg6[%c224_323, %c1792_324] : memref<288x2048xf32, #tpu.memory_space<vmem>>, vector<32x256xf32>
    tpu.vector_store %arg6[%c224_323, %c1792_324], %274 {strides = array<i32>} : memref<288x2048xf32, #tpu.memory_space<vmem>>, vector<32x256xf32>,
    %c239_i32_325 = arith.constant 239 : i32
    %276 = tpu.dynamic_rotate %246 by %c239_i32_325 dim 1 : vector<32x256xf32>, i32 -> vector<32x256xf32>
    %c256_326 = arith.constant 256 : index
    %c0_327 = arith.constant 0 : index
    %277 = vector.load %arg4[%c256_326, %c0_327] : memref<288x256xf32, #tpu.memory_space<vmem>>, vector<32x256xf32>
    %278 = arith.mulf %276, %277 : vector<32x256xf32>
    %c256_328 = arith.constant 256 : index
    %c1792_329 = arith.constant 1792 : index
    %279 = vector.load %arg6[%c256_328, %c1792_329] : memref<288x2048xf32, #tpu.memory_space<vmem>>, vector<32x256xf32>
    tpu.vector_store %arg6[%c256_328, %c1792_329], %278 {strides = array<i32>} : memref<288x2048xf32, #tpu.memory_space<vmem>>, vector<32x256xf32>,
    %c0_330 = arith.constant 0 : index
    %c0_331 = arith.constant 0 : index
    %280 = vector.load %arg2[%c0_330, %c0_331] : memref<32x288xf32, #tpu.memory_space<vmem>>, vector<32x288xf32>
    %c0_332 = arith.constant 0 : index
    %c0_333 = arith.constant 0 : index
    %281 = vector.load %arg6[%c0_332, %c0_333] : memref<288x2048xf32, #tpu.memory_space<vmem>>, vector<288x2048xf32>
    %cst = arith.constant dense<0.000000e+00> : vector<32x2048xf32>
    %282 = tpu.matmul %280, %281, %cst {dimension_numbers = #tpu.dot_dimension_numbers<[1], [0], [0], [1], [0, 0, 1, 1], [], []>} : vector<32x288xf32>, vector<288x2048xf32>, vector<32x2048xf32> -> vector<32x2048xf32>
    %c0_334 = arith.constant 0 : index
    %c0_335 = arith.constant 0 : index
    %283 = vector.load %arg3[%c0_334, %c0_335] : memref<32x1xf32, #tpu.memory_space<vmem>>, vector<32x1xf32>
    %284 = vector.extract_strided_slice %282 {offsets = [0, 0], sizes = [32, 256], strides = [1, 1]} : vector<32x2048xf32> to vector<32x256xf32>
    %285 = vector.broadcast %283 : vector<32x1xf32> to vector<32x256xf32>
    %286 = arith.addf %284, %285 : vector<32x256xf32>
    %c0_336 = arith.constant 0 : index
    %c0_337 = arith.constant 0 : index
    %c0_338 = arith.constant 0 : index
    %287 = vector.load %arg1[%c0_336, %c0_337, %c0_338] : memref<8x32x256xf32, #tpu.memory_space<vmem>>, vector<1x32x256xf32>
    %288 = vector.shape_cast %287 : vector<1x32x256xf32> to vector<32x256xf32>
    %289 = arith.addf %286, %288 : vector<32x256xf32>
    %cst_339 = arith.constant 5.000000e-01 : f32
    %290 = vector.broadcast %cst_339 : f32 to vector<32x256xf32>
    %291 = arith.mulf %290, %289 : vector<32x256xf32>
    %cst_340 = arith.constant 0.707106769 : f32
    %292 = vector.broadcast %cst_340 : f32 to vector<32x256xf32>
    %293 = arith.mulf %289, %292 : vector<32x256xf32>
    %294 = math.erf %293 : vector<32x256xf32>
    %cst_341 = arith.constant 1.000000e+00 : f32
    %295 = vector.broadcast %cst_341 : f32 to vector<32x256xf32>
    %296 = arith.addf %295, %294 : vector<32x256xf32>
    %297 = arith.mulf %291, %296 : vector<32x256xf32>
    %c0_342 = arith.constant 0 : index
    %c0_343 = arith.constant 0 : index
    %c0_344 = arith.constant 0 : index
    %298 = vector.load %arg5[%c0_342, %c0_343, %c0_344] : memref<8x32x256xf32, #tpu.memory_space<vmem>>, vector<1x32x256xf32>
    %299 = vector.shape_cast %298 : vector<1x32x256xf32> to vector<32x256xf32>
    %300 = vector.shape_cast %297 : vector<32x256xf32> to vector<1x32x256xf32>
    tpu.vector_store %arg5[%c0_342, %c0_343, %c0_344], %300 {strides = array<i32>} : memref<8x32x256xf32, #tpu.memory_space<vmem>>, vector<1x32x256xf32>,
    %301 = vector.extract_strided_slice %282 {offsets = [0, 256], sizes = [32, 256], strides = [1, 1]} : vector<32x2048xf32> to vector<32x256xf32>
    %302 = vector.broadcast %283 : vector<32x1xf32> to vector<32x256xf32>
    %303 = arith.addf %301, %302 : vector<32x256xf32>
    %c1_345 = arith.constant 1 : index
    %c0_346 = arith.constant 0 : index
    %c0_347 = arith.constant 0 : index
    %304 = vector.load %arg1[%c1_345, %c0_346, %c0_347] : memref<8x32x256xf32, #tpu.memory_space<vmem>>, vector<1x32x256xf32>
    %305 = vector.shape_cast %304 : vector<1x32x256xf32> to vector<32x256xf32>
    %306 = arith.addf %303, %305 : vector<32x256xf32>
    %cst_348 = arith.constant 5.000000e-01 : f32
    %307 = vector.broadcast %cst_348 : f32 to vector<32x256xf32>
    %308 = arith.mulf %307, %306 : vector<32x256xf32>
    %cst_349 = arith.constant 0.707106769 : f32
    %309 = vector.broadcast %cst_349 : f32 to vector<32x256xf32>
    %310 = arith.mulf %306, %309 : vector<32x256xf32>
    %311 = math.erf %310 : vector<32x256xf32>
    %cst_350 = arith.constant 1.000000e+00 : f32
    %312 = vector.broadcast %cst_350 : f32 to vector<32x256xf32>
    %313 = arith.addf %312, %311 : vector<32x256xf32>
    %314 = arith.mulf %308, %313 : vector<32x256xf32>
    %c1_351 = arith.constant 1 : index
    %c0_352 = arith.constant 0 : index
    %c0_353 = arith.constant 0 : index
    %315 = vector.load %arg5[%c1_351, %c0_352, %c0_353] : memref<8x32x256xf32, #tpu.memory_space<vmem>>, vector<1x32x256xf32>
    %316 = vector.shape_cast %315 : vector<1x32x256xf32> to vector<32x256xf32>
    %317 = vector.shape_cast %314 : vector<32x256xf32> to vector<1x32x256xf32>
    tpu.vector_store %arg5[%c1_351, %c0_352, %c0_353], %317 {strides = array<i32>} : memref<8x32x256xf32, #tpu.memory_space<vmem>>, vector<1x32x256xf32>,
    %318 = vector.extract_strided_slice %282 {offsets = [0, 512], sizes = [32, 256], strides = [1, 1]} : vector<32x2048xf32> to vector<32x256xf32>
    %319 = vector.broadcast %283 : vector<32x1xf32> to vector<32x256xf32>
    %320 = arith.addf %318, %319 : vector<32x256xf32>
    %c2_354 = arith.constant 2 : index
    %c0_355 = arith.constant 0 : index
    %c0_356 = arith.constant 0 : index
    %321 = vector.load %arg1[%c2_354, %c0_355, %c0_356] : memref<8x32x256xf32, #tpu.memory_space<vmem>>, vector<1x32x256xf32>
    %322 = vector.shape_cast %321 : vector<1x32x256xf32> to vector<32x256xf32>
    %323 = arith.addf %320, %322 : vector<32x256xf32>
    %cst_357 = arith.constant 5.000000e-01 : f32
    %324 = vector.broadcast %cst_357 : f32 to vector<32x256xf32>
    %325 = arith.mulf %324, %323 : vector<32x256xf32>
    %cst_358 = arith.constant 0.707106769 : f32
    %326 = vector.broadcast %cst_358 : f32 to vector<32x256xf32>
    %327 = arith.mulf %323, %326 : vector<32x256xf32>
    %328 = math.erf %327 : vector<32x256xf32>
    %cst_359 = arith.constant 1.000000e+00 : f32
    %329 = vector.broadcast %cst_359 : f32 to vector<32x256xf32>
    %330 = arith.addf %329, %328 : vector<32x256xf32>
    %331 = arith.mulf %325, %330 : vector<32x256xf32>
    %c2_360 = arith.constant 2 : index
    %c0_361 = arith.constant 0 : index
    %c0_362 = arith.constant 0 : index
    %332 = vector.load %arg5[%c2_360, %c0_361, %c0_362] : memref<8x32x256xf32, #tpu.memory_space<vmem>>, vector<1x32x256xf32>
    %333 = vector.shape_cast %332 : vector<1x32x256xf32> to vector<32x256xf32>
    %334 = vector.shape_cast %331 : vector<32x256xf32> to vector<1x32x256xf32>
    tpu.vector_store %arg5[%c2_360, %c0_361, %c0_362], %334 {strides = array<i32>} : memref<8x32x256xf32, #tpu.memory_space<vmem>>, vector<1x32x256xf32>,
    %335 = vector.extract_strided_slice %282 {offsets = [0, 768], sizes = [32, 256], strides = [1, 1]} : vector<32x2048xf32> to vector<32x256xf32>
    %336 = vector.broadcast %283 : vector<32x1xf32> to vector<32x256xf32>
    %337 = arith.addf %335, %336 : vector<32x256xf32>
    %c3_363 = arith.constant 3 : index
    %c0_364 = arith.constant 0 : index
    %c0_365 = arith.constant 0 : index
    %338 = vector.load %arg1[%c3_363, %c0_364, %c0_365] : memref<8x32x256xf32, #tpu.memory_space<vmem>>, vector<1x32x256xf32>
    %339 = vector.shape_cast %338 : vector<1x32x256xf32> to vector<32x256xf32>
    %340 = arith.addf %337, %339 : vector<32x256xf32>
    %cst_366 = arith.constant 5.000000e-01 : f32
    %341 = vector.broadcast %cst_366 : f32 to vector<32x256xf32>
    %342 = arith.mulf %341, %340 : vector<32x256xf32>
    %cst_367 = arith.constant 0.707106769 : f32
    %343 = vector.broadcast %cst_367 : f32 to vector<32x256xf32>
    %344 = arith.mulf %340, %343 : vector<32x256xf32>
    %345 = math.erf %344 : vector<32x256xf32>
    %cst_368 = arith.constant 1.000000e+00 : f32
    %346 = vector.broadcast %cst_368 : f32 to vector<32x256xf32>
    %347 = arith.addf %346, %345 : vector<32x256xf32>
    %348 = arith.mulf %342, %347 : vector<32x256xf32>
    %c3_369 = arith.constant 3 : index
    %c0_370 = arith.constant 0 : index
    %c0_371 = arith.constant 0 : index
    %349 = vector.load %arg5[%c3_369, %c0_370, %c0_371] : memref<8x32x256xf32, #tpu.memory_space<vmem>>, vector<1x32x256xf32>
    %350 = vector.shape_cast %349 : vector<1x32x256xf32> to vector<32x256xf32>
    %351 = vector.shape_cast %348 : vector<32x256xf32> to vector<1x32x256xf32>
    tpu.vector_store %arg5[%c3_369, %c0_370, %c0_371], %351 {strides = array<i32>} : memref<8x32x256xf32, #tpu.memory_space<vmem>>, vector<1x32x256xf32>,
    %352 = vector.extract_strided_slice %282 {offsets = [0, 1024], sizes = [32, 256], strides = [1, 1]} : vector<32x2048xf32> to vector<32x256xf32>
    %353 = vector.broadcast %283 : vector<32x1xf32> to vector<32x256xf32>
    %354 = arith.addf %352, %353 : vector<32x256xf32>
    %c4_372 = arith.constant 4 : index
    %c0_373 = arith.constant 0 : index
    %c0_374 = arith.constant 0 : index
    %355 = vector.load %arg1[%c4_372, %c0_373, %c0_374] : memref<8x32x256xf32, #tpu.memory_space<vmem>>, vector<1x32x256xf32>
    %356 = vector.shape_cast %355 : vector<1x32x256xf32> to vector<32x256xf32>
    %357 = arith.addf %354, %356 : vector<32x256xf32>
    %cst_375 = arith.constant 5.000000e-01 : f32
    %358 = vector.broadcast %cst_375 : f32 to vector<32x256xf32>
    %359 = arith.mulf %358, %357 : vector<32x256xf32>
    %cst_376 = arith.constant 0.707106769 : f32
    %360 = vector.broadcast %cst_376 : f32 to vector<32x256xf32>
    %361 = arith.mulf %357, %360 : vector<32x256xf32>
    %362 = math.erf %361 : vector<32x256xf32>
    %cst_377 = arith.constant 1.000000e+00 : f32
    %363 = vector.broadcast %cst_377 : f32 to vector<32x256xf32>
    %364 = arith.addf %363, %362 : vector<32x256xf32>
    %365 = arith.mulf %359, %364 : vector<32x256xf32>
    %c4_378 = arith.constant 4 : index
    %c0_379 = arith.constant 0 : index
    %c0_380 = arith.constant 0 : index
    %366 = vector.load %arg5[%c4_378, %c0_379, %c0_380] : memref<8x32x256xf32, #tpu.memory_space<vmem>>, vector<1x32x256xf32>
    %367 = vector.shape_cast %366 : vector<1x32x256xf32> to vector<32x256xf32>
    %368 = vector.shape_cast %365 : vector<32x256xf32> to vector<1x32x256xf32>
    tpu.vector_store %arg5[%c4_378, %c0_379, %c0_380], %368 {strides = array<i32>} : memref<8x32x256xf32, #tpu.memory_space<vmem>>, vector<1x32x256xf32>,
    %369 = vector.extract_strided_slice %282 {offsets = [0, 1280], sizes = [32, 256], strides = [1, 1]} : vector<32x2048xf32> to vector<32x256xf32>
    %370 = vector.broadcast %283 : vector<32x1xf32> to vector<32x256xf32>
    %371 = arith.addf %369, %370 : vector<32x256xf32>
    %c5_381 = arith.constant 5 : index
    %c0_382 = arith.constant 0 : index
    %c0_383 = arith.constant 0 : index
    %372 = vector.load %arg1[%c5_381, %c0_382, %c0_383] : memref<8x32x256xf32, #tpu.memory_space<vmem>>, vector<1x32x256xf32>
    %373 = vector.shape_cast %372 : vector<1x32x256xf32> to vector<32x256xf32>
    %374 = arith.addf %371, %373 : vector<32x256xf32>
    %cst_384 = arith.constant 5.000000e-01 : f32
    %375 = vector.broadcast %cst_384 : f32 to vector<32x256xf32>
    %376 = arith.mulf %375, %374 : vector<32x256xf32>
    %cst_385 = arith.constant 0.707106769 : f32
    %377 = vector.broadcast %cst_385 : f32 to vector<32x256xf32>
    %378 = arith.mulf %374, %377 : vector<32x256xf32>
    %379 = math.erf %378 : vector<32x256xf32>
    %cst_386 = arith.constant 1.000000e+00 : f32
    %380 = vector.broadcast %cst_386 : f32 to vector<32x256xf32>
    %381 = arith.addf %380, %379 : vector<32x256xf32>
    %382 = arith.mulf %376, %381 : vector<32x256xf32>
    %c5_387 = arith.constant 5 : index
    %c0_388 = arith.constant 0 : index
    %c0_389 = arith.constant 0 : index
    %383 = vector.load %arg5[%c5_387, %c0_388, %c0_389] : memref<8x32x256xf32, #tpu.memory_space<vmem>>, vector<1x32x256xf32>
    %384 = vector.shape_cast %383 : vector<1x32x256xf32> to vector<32x256xf32>
    %385 = vector.shape_cast %382 : vector<32x256xf32> to vector<1x32x256xf32>
    tpu.vector_store %arg5[%c5_387, %c0_388, %c0_389], %385 {strides = array<i32>} : memref<8x32x256xf32, #tpu.memory_space<vmem>>, vector<1x32x256xf32>,
    %386 = vector.extract_strided_slice %282 {offsets = [0, 1536], sizes = [32, 256], strides = [1, 1]} : vector<32x2048xf32> to vector<32x256xf32>
    %387 = vector.broadcast %283 : vector<32x1xf32> to vector<32x256xf32>
    %388 = arith.addf %386, %387 : vector<32x256xf32>
    %c6_390 = arith.constant 6 : index
    %c0_391 = arith.constant 0 : index
    %c0_392 = arith.constant 0 : index
    %389 = vector.load %arg1[%c6_390, %c0_391, %c0_392] : memref<8x32x256xf32, #tpu.memory_space<vmem>>, vector<1x32x256xf32>
    %390 = vector.shape_cast %389 : vector<1x32x256xf32> to vector<32x256xf32>
    %391 = arith.addf %388, %390 : vector<32x256xf32>
    %cst_393 = arith.constant 5.000000e-01 : f32
    %392 = vector.broadcast %cst_393 : f32 to vector<32x256xf32>
    %393 = arith.mulf %392, %391 : vector<32x256xf32>
    %cst_394 = arith.constant 0.707106769 : f32
    %394 = vector.broadcast %cst_394 : f32 to vector<32x256xf32>
    %395 = arith.mulf %391, %394 : vector<32x256xf32>
    %396 = math.erf %395 : vector<32x256xf32>
    %cst_395 = arith.constant 1.000000e+00 : f32
    %397 = vector.broadcast %cst_395 : f32 to vector<32x256xf32>
    %398 = arith.addf %397, %396 : vector<32x256xf32>
    %399 = arith.mulf %393, %398 : vector<32x256xf32>
    %c6_396 = arith.constant 6 : index
    %c0_397 = arith.constant 0 : index
    %c0_398 = arith.constant 0 : index
    %400 = vector.load %arg5[%c6_396, %c0_397, %c0_398] : memref<8x32x256xf32, #tpu.memory_space<vmem>>, vector<1x32x256xf32>
    %401 = vector.shape_cast %400 : vector<1x32x256xf32> to vector<32x256xf32>
    %402 = vector.shape_cast %399 : vector<32x256xf32> to vector<1x32x256xf32>
    tpu.vector_store %arg5[%c6_396, %c0_397, %c0_398], %402 {strides = array<i32>} : memref<8x32x256xf32, #tpu.memory_space<vmem>>, vector<1x32x256xf32>,
    %403 = vector.extract_strided_slice %282 {offsets = [0, 1792], sizes = [32, 256], strides = [1, 1]} : vector<32x2048xf32> to vector<32x256xf32>
    %404 = vector.broadcast %283 : vector<32x1xf32> to vector<32x256xf32>
    %405 = arith.addf %403, %404 : vector<32x256xf32>
    %c7_399 = arith.constant 7 : index
    %c0_400 = arith.constant 0 : index
    %c0_401 = arith.constant 0 : index
    %406 = vector.load %arg1[%c7_399, %c0_400, %c0_401] : memref<8x32x256xf32, #tpu.memory_space<vmem>>, vector<1x32x256xf32>
    %407 = vector.shape_cast %406 : vector<1x32x256xf32> to vector<32x256xf32>
    %408 = arith.addf %405, %407 : vector<32x256xf32>
    %cst_402 = arith.constant 5.000000e-01 : f32
    %409 = vector.broadcast %cst_402 : f32 to vector<32x256xf32>
    %410 = arith.mulf %409, %408 : vector<32x256xf32>
    %cst_403 = arith.constant 0.707106769 : f32
    %411 = vector.broadcast %cst_403 : f32 to vector<32x256xf32>
    %412 = arith.mulf %408, %411 : vector<32x256xf32>
    %413 = math.erf %412 : vector<32x256xf32>
    %cst_404 = arith.constant 1.000000e+00 : f32
    %414 = vector.broadcast %cst_404 : f32 to vector<32x256xf32>
    %415 = arith.addf %414, %413 : vector<32x256xf32>
    %416 = arith.mulf %410, %415 : vector<32x256xf32>
    %c7_405 = arith.constant 7 : index
    %c0_406 = arith.constant 0 : index
    %c0_407 = arith.constant 0 : index
    %417 = vector.load %arg5[%c7_405, %c0_406, %c0_407] : memref<8x32x256xf32, #tpu.memory_space<vmem>>, vector<1x32x256xf32>
    %418 = vector.shape_cast %417 : vector<1x32x256xf32> to vector<32x256xf32>
    %419 = vector.shape_cast %416 : vector<32x256xf32> to vector<1x32x256xf32>
    tpu.vector_store %arg5[%c7_405, %c0_406, %c0_407], %419 {strides = array<i32>} : memref<8x32x256xf32, #tpu.memory_space<vmem>>, vector<1x32x256xf32>,
    return
  }
  func.func @transform_0(%arg0: i32) -> (i32, i32, i32) {
    %c0_i32 = arith.constant 0 : i32
    %c0_i32_0 = arith.constant 0 : i32
    %c0_i32_1 = arith.constant 0 : i32
    return %arg0, %c0_i32, %c0_i32_0 : i32, i32, i32
  }
  func.func @transform_1(%arg0: i32) -> (i32, i32) {
    %c0_i32 = arith.constant 0 : i32
    %c0_i32_0 = arith.constant 0 : i32
    %c0_i32_1 = arith.constant 0 : i32
    return %c0_i32, %c0_i32_0 : i32, i32
  }
  func.func @transform_2(%arg0: i32) -> (i32, i32) {
    %c0_i32 = arith.constant 0 : i32
    %c0_i32_0 = arith.constant 0 : i32
    %c0_i32_1 = arith.constant 0 : i32
    return %c0_i32, %c0_i32_0 : i32, i32
  }
  func.func @transform_3(%arg0: i32) -> (i32, i32) {
    %c0_i32 = arith.constant 0 : i32
    %c0_i32_0 = arith.constant 0 : i32
    %c0_i32_1 = arith.constant 0 : i32
    return %c0_i32, %c0_i32_0 : i32, i32
  }
  func.func @transform_4(%arg0: i32) -> (i32, i32, i32) {
    %c0_i32 = arith.constant 0 : i32
    %c0_i32_0 = arith.constant 0 : i32
    %c0_i32_1 = arith.constant 0 : i32
    return %arg0, %c0_i32, %c0_i32_0 : i32, i32, i32
  }
}

</mosaic_0001>

<bundles_post_ra>
// kernel: residual_forward.1
= control target key start
LH: loop header
LB: loop body
LE: loop exit
PB: predicated region body
PF: predicated region fallthrough
CT: control target
= control target key end

     0   :  { %s6616_s15 = smov 0   ;;  %s12703_s0 = inlined_call_operand.vmem [shape: f32[16,32,256], index: 0, kind: input, shape index: {}]   ;;  %s12704_s1 = inlined_call_operand.vmem [shape: f32[32,288], index: 1, kind: input, shape index: {}]   ;;  %s12705_s2 = inlined_call_operand.vmem [shape: f32[32,1], index: 2, kind: input, shape index: {}]   ;;  %s12706_s3 = inlined_call_operand.vmem [shape: f32[288,256], index: 3, kind: input, shape index: {}]   ;;  %s12707_s4 = inlined_call_operand.vmem [shape: f32[16,32,256], index: 4, kind: output, shape index: {}]  }
   0x1 LB: > { %s6113_s16 = sadd.s32 4294967295, %s6579_s15   ;;  %p6117_p0 = scmp.ge.s32.totalorder %s6579_s15, 1  ;;  %s6579_s15 = sphi %s6616_s15, %s14_s15  }
   0x2   : > { %p164_p1 = scmp.lt.s32.totalorder %s6579_s15, 3 }
   0x4   : > { %p165_p2 = pnand %p6117_p0, %p164_p1 }
   0x6   : > { %168 = sbr.rel (%p165_p2) target bundleno = 1399 (0x577), region = 36 }
   0xb   : > { %s6118_s17 = sshll.u32 %s6113_s16, 3  ;;  %s6581_s22 = smov 17   ;;  %v230_v44 = vlaneseq  ;;  %v6909_v48 = vld [vmem:[%s12706_s3 + $0xf8] sm:$0xff]  ;;  %v6914_v49 = vld [vmem:[%s12706_s3 + $0xf0] sm:$0xff]  ;;  %v6932_v57 = vld [vmem:[%s12706_s3 + $0xe8] sm:$0xff]  ;;  %vm4011_vm8 = vcmask 261120  }
   0xc   : > { %p193_p3 = scmp.lt.s32.totalorder %s6118_s17, 15  ;;  %s6582_s23 = smov 16   ;;  %v6939_v59 = vld [vmem:[%s12706_s3 + $0xe0] sm:$0xff]  ;;  %v6950_v63 = vld [vmem:[%s12706_s3 + $0xd8] sm:$0xff] }
   0xd   : > { %s6583_s24 = smov 15   ;;  %s6584_s25 = smov 1   ;;  %v6900_v47 = vand.u32 127, %v230_v44  ;;  %v6959_v44 = vld [vmem:[%s12706_s3 + $0xd0] sm:$0xff] }
   0xe   : > { %s13169_s17 = smov (!%p193_p3, %s6118_s17), 15  ;;  %s6585_s26 = smov 127  }
   0xf   : > { %s6326_s18 = sshll.u32 %s13169_s17, 6  ;;  %s6586_s27 = smov 113   ;;  %vm379_vm0 = vcmp.lt.s32.totalorder %v6900_v47, 1  ;;  %vm330_vm1 = vcmp.lt.s32.totalorder %v6900_v47, 15  ;;  %vm281_vm2 = vcmp.lt.s32.totalorder %v6900_v47, 16  ;;  %vm232_vm3 = vcmp.lt.s32.totalorder %v6900_v47, 17 }
  0x10   : > { %s6632_s21 = scalar_lea.vmem %s12703_s0, %s6326_s18  ;;  %s6587_s28 = smov 112   ;;  %vm534_vm4 = vcmp.lt.s32.totalorder %v6900_v47, 112  ;;  %vm485_vm5 = vcmp.lt.s32.totalorder %v6900_v47, 113  ;;  %vm436_vm6 = vcmp.lt.s32.totalorder %v6900_v47, 127  ;;  %vm583_vm7 = vcmp.lt.s32.totalorder %v6900_v47, 111 }
  0x11   : > { %v6635_v0 = vld [vmem:[%s6632_s21 + $0x20] sm:$0xff]  ;;  %v6645_v2 = vld [vmem:[%s6632_s21 + $0x30] sm:$0xff]  ;;  %v6655_v4 = vld [vmem:[%s6632_s21 + $0x18] sm:$0xff]  ;;  %s6588_s29 = smov 111  }
  0x12   : > { %v6638_v1 = vld [vmem:[%s6632_s21] sm:$0xff]  ;;  %218 = vrot.lane.b32.xlu1 %v6635_v0, %s6581_s22  ;;  %v6648_v3 = vld [vmem:[%s6632_s21 + $0x10] sm:$0xff]  ;;  %v6658_v5 = vld [vmem:[%s6632_s21 + $0x8] sm:$0xff] }
  0x13   : > { %214 = vrot.lane.b32.xlu0 %v6638_v1, %s6581_s22  ;;  %v6665_v6 = vld [vmem:[%s6632_s21 + $0x38] sm:$0xff]  ;;  %v6668_v7 = vld [vmem:[%s6632_s21 + $0x28] sm:$0xff]  ;;  %v6799_v14 = vld [vmem:[%s6632_s21 + $0x50] sm:$0xff] }
  0x14   : > { %v6802_v15 = vld [vmem:[%s6632_s21 + $0x40] sm:$0xff]  ;;  %v6813_v18 = vld [vmem:[%s6632_s21 + $0x70] sm:$0xff]  ;;  %v6827_v22 = vld [vmem:[%s6632_s21 + $0x58] sm:$0xff] }
  0x15   : > { %v6816_v19 = vld [vmem:[%s6632_s21 + $0x60] sm:$0xff]  ;;  %v6830_v23 = vld [vmem:[%s6632_s21 + $0x48] sm:$0xff]  ;;  %v6841_v26 = vld [vmem:[%s6632_s21 + $0x78] sm:$0xff] }
  0x16   : > { %220 = vrot.lane.b32.xlu1 %v6645_v2, %s6581_s22  ;;  %v6844_v27 = vld [vmem:[%s6632_s21 + $0x68] sm:$0xff] }
  0x17   : > { %216 = vrot.lane.b32.xlu0 %v6648_v3, %s6581_s22 }
  0x1a   : > { %224 = vrot.lane.b32.xlu1 %v6655_v4, %s6581_s22 }
  0x1b   : > { %222 = vrot.lane.b32.xlu0 %v6658_v5, %s6581_s22 }
  0x1e   : > { %228 = vrot.lane.b32.xlu1 %v6665_v6, %s6581_s22 }
  0x1f   : > { %226 = vrot.lane.b32.xlu0 %v6668_v7, %s6581_s22 }
  0x22   : > { %267 = vrot.lane.b32.xlu1 %v6648_v3, %s6582_s23 }
  0x23   : > { %265 = vrot.lane.b32.xlu0 %v6638_v1, %s6582_s23 }
  0x26   : > { %271 = vrot.lane.b32.xlu1 %v6645_v2, %s6582_s23 }
  0x27   : > { %269 = vrot.lane.b32.xlu0 %v6635_v0, %s6582_s23 }
  0x2a   : > { %275 = vrot.lane.b32.xlu1 %v6655_v4, %s6582_s23 }
  0x2b   : > { %273 = vrot.lane.b32.xlu0 %v6658_v5, %s6582_s23 }
  0x2e   : > { %279 = vrot.lane.b32.xlu1 %v6665_v6, %s6582_s23 }
  0x2f   : > { %277 = vrot.lane.b32.xlu0 %v6668_v7, %s6582_s23 }
  0x32   : > { %316 = vrot.lane.b32.xlu1 %v6648_v3, %s6583_s24 }
  0x33   : > { %314 = vrot.lane.b32.xlu0 %v6638_v1, %s6583_s24 }
  0x36   : > { %320 = vrot.lane.b32.xlu1 %v6645_v2, %s6583_s24 }
  0x37   : > { %318 = vrot.lane.b32.xlu0 %v6635_v0, %s6583_s24 }
  0x3a   : > { %324 = vrot.lane.b32.xlu1 %v6655_v4, %s6583_s24 }
  0x3b   : > { %322 = vrot.lane.b32.xlu0 %v6658_v5, %s6583_s24 }
  0x3e   : > { %328 = vrot.lane.b32.xlu1 %v6665_v6, %s6583_s24 }
  0x3f   : > { %326 = vrot.lane.b32.xlu0 %v6668_v7, %s6583_s24 }
  0x42   : > { %365 = vrot.lane.b32.xlu1 %v6648_v3, %s6584_s25 }
  0x43   : > { %363 = vrot.lane.b32.xlu0 %v6638_v1, %s6584_s25 }
  0x46   : > { %369 = vrot.lane.b32.xlu1 %v6645_v2, %s6584_s25 }
  0x47   : > { %367 = vrot.lane.b32.xlu0 %v6635_v0, %s6584_s25 }
  0x4a   : > { %373 = vrot.lane.b32.xlu1 %v6655_v4, %s6584_s25 }
  0x4b   : > { %371 = vrot.lane.b32.xlu0 %v6658_v5, %s6584_s25 }
  0x4e   : > { %377 = vrot.lane.b32.xlu1 %v6665_v6, %s6584_s25 }
  0x4f   : > { %375 = vrot.lane.b32.xlu0 %v6668_v7, %s6584_s25 }
  0x52   : > { %422 = vrot.lane.b32.xlu1 %v6648_v3, %s6585_s26 }
  0x53   : > { %420 = vrot.lane.b32.xlu0 %v6638_v1, %s6585_s26 }
  0x56   : > { %426 = vrot.lane.b32.xlu1 %v6645_v2, %s6585_s26 }
  0x57   : > { %424 = vrot.lane.b32.xlu0 %v6635_v0, %s6585_s26 }
  0x5a   : > { %430 = vrot.lane.b32.xlu1 %v6655_v4, %s6585_s26 }
  0x5b   : > { %428 = vrot.lane.b32.xlu0 %v6658_v5, %s6585_s26 }
  0x5e   : > { %434 = vrot.lane.b32.xlu1 %v6665_v6, %s6585_s26 }
  0x5f   : > { %432 = vrot.lane.b32.xlu0 %v6668_v7, %s6585_s26 }
  0x62   : > { %471 = vrot.lane.b32.xlu1 %v6648_v3, %s6586_s27 }
  0x63   : > { %469 = vrot.lane.b32.xlu0 %v6638_v1, %s6586_s27 }
  0x66   : > { %475 = vrot.lane.b32.xlu1 %v6645_v2, %s6586_s27 }
  0x67   : > { %473 = vrot.lane.b32.xlu0 %v6635_v0, %s6586_s27 }
  0x6a   : > { %479 = vrot.lane.b32.xlu1 %v6655_v4, %s6586_s27 }
  0x6b   : > { %477 = vrot.lane.b32.xlu0 %v6658_v5, %s6586_s27 }
  0x6e   : > { %483 = vrot.lane.b32.xlu1 %v6665_v6, %s6586_s27 }
  0x6f   : > { %481 = vrot.lane.b32.xlu0 %v6668_v7, %s6586_s27 }
  0x72   : > { %520 = vrot.lane.b32.xlu1 %v6648_v3, %s6587_s28 }
  0x73   : > { %518 = vrot.lane.b32.xlu0 %v6638_v1, %s6587_s28 }
  0x76   : > { %524 = vrot.lane.b32.xlu1 %v6645_v2, %s6587_s28 }
  0x77   : > { %522 = vrot.lane.b32.xlu0 %v6635_v0, %s6587_s28 }
  0x7a   : > { %528 = vrot.lane.b32.xlu1 %v6655_v4, %s6587_s28 }
  0x7b   : > { %526 = vrot.lane.b32.xlu0 %v6658_v5, %s6587_s28 }
  0x7e   : > { %532 = vrot.lane.b32.xlu1 %v6665_v6, %s6587_s28 }
  0x7f   : > { %530 = vrot.lane.b32.xlu0 %v6668_v7, %s6587_s28 }
  0x82   : > { %569 = vrot.lane.b32.xlu1 %v6648_v3, %s6588_s29 }
  0x83   : > { %567 = vrot.lane.b32.xlu0 %v6638_v1, %s6588_s29  ;;  %v12708_v1 = vmov 0.0  }
  0x84   : > { %v6774_v8 = vpop.permute.xlu1 %218  ;;  %4177 = vmatprep.mubr.f32.mxu1 %v12708_v1 }
  0x85   : > { %v6776_v9 = vpop.permute.xlu0 %214 }
  0x86   : > { %573 = vrot.lane.b32.xlu1 %v6645_v2, %s6588_s29 }
  0x87   : > { %571 = vrot.lane.b32.xlu0 %v6635_v0, %s6588_s29 }
  0x88   : > { %v6782_v10 = vpop.permute.xlu1 %220 }
  0x89   : > { %v6784_v11 = vpop.permute.xlu0 %216 }
  0x8a   : > { %577 = vrot.lane.b32.xlu1 %v6655_v4, %s6588_s29 }
  0x8b   : > { %575 = vrot.lane.b32.xlu0 %v6658_v5, %s6588_s29 }
  0x8c   : > { %v6790_v12 = vpop.permute.xlu1 %224 }
  0x8d   : > { %v6792_v13 = vpop.permute.xlu0 %222 }
  0x8e   : > { %581 = vrot.lane.b32.xlu1 %v6665_v6, %s6588_s29 }
  0x8f   : > { %579 = vrot.lane.b32.xlu0 %v6668_v7, %s6588_s29 }
  0x90   : > { %v6804_v16 = vpop.permute.xlu1 %228 }
  0x91   : > { %v6806_v17 = vpop.permute.xlu0 %226 }
  0x92   : > { %627 = vrot.lane.b32.xlu1 %v6799_v14, %s6581_s22 }
  0x93   : > { %625 = vrot.lane.b32.xlu0 %v6802_v15, %s6581_s22 }
  0x94   : > { %v6818_v20 = vpop.permute.xlu1 %267 }
  0x95   : > { %v6820_v21 = vpop.permute.xlu0 %265 }
  0x96   : > { %631 = vrot.lane.b32.xlu1 %v6813_v18, %s6581_s22 }
  0x97   : > { %629 = vrot.lane.b32.xlu0 %v6816_v19, %s6581_s22 }
  0x98   : > { %v6832_v24 = vpop.permute.xlu1 %271 }
  0x99   : > { %v6834_v25 = vpop.permute.xlu0 %269 }
  0x9a   : > { %635 = vrot.lane.b32.xlu1 %v6827_v22, %s6581_s22 }
  0x9b   : > { %633 = vrot.lane.b32.xlu0 %v6830_v23, %s6581_s22 }
  0x9c   : > { %v6846_v28 = vpop.permute.xlu1 %275 }
  0x9d   : > { %v6848_v29 = vpop.permute.xlu0 %273 }
  0x9e   : > { %639 = vrot.lane.b32.xlu1 %v6841_v26, %s6581_s22 }
  0x9f   : > { %637 = vrot.lane.b32.xlu0 %v6844_v27, %s6581_s22 }
  0xa0   : > { %v6854_v30 = vpop.permute.xlu1 %279 }
  0xa1   : > { %v6856_v31 = vpop.permute.xlu0 %277 }
  0xa2   : > { %675 = vrot.lane.b32.xlu1 %v6799_v14, %s6582_s23 }
  0xa3   : > { %673 = vrot.lane.b32.xlu0 %v6802_v15, %s6582_s23 }
  0xa4   : > { %v6862_v32 = vpop.permute.xlu1 %316 }
  0xa5   : > { %v6864_v33 = vpop.permute.xlu0 %314 }
  0xa6   : > { %679 = vrot.lane.b32.xlu1 %v6813_v18, %s6582_s23 }
  0xa7   : > { %677 = vrot.lane.b32.xlu0 %v6816_v19, %s6582_s23 }
  0xa8   : > { %v6870_v34 = vpop.permute.xlu1 %320 }
  0xa9   : > { %v6872_v35 = vpop.permute.xlu0 %318 }
  0xaa   : > { %683 = vrot.lane.b32.xlu1 %v6827_v22, %s6582_s23 }
  0xab   : > { %681 = vrot.lane.b32.xlu0 %v6830_v23, %s6582_s23 }
  0xac   : > { %v6878_v36 = vpop.permute.xlu1 %324 }
  0xad   : > { %v6880_v37 = vpop.permute.xlu0 %322 }
  0xae   : > { %687 = vrot.lane.b32.xlu1 %v6841_v26, %s6582_s23 }
  0xaf   : > { %685 = vrot.lane.b32.xlu0 %v6844_v27, %s6582_s23 }
  0xb0   : > { %v329_v38 = vpop.permute.xlu1 %328 }
  0xb1   : > { %v6886_v39 = vpop.permute.xlu0 %326 }
  0xb2   : > { %723 = vrot.lane.b32.xlu1 %v6799_v14, %s6583_s24 }
  0xb3   : > { %721 = vrot.lane.b32.xlu0 %v6802_v15, %s6583_s24 }
  0xb4   : > { %v366_v40 = vpop.permute.xlu1 %365 }
  0xb5   : > { %v364_v41 = vpop.permute.xlu0 %363 }
  0xb6   : > { %727 = vrot.lane.b32.xlu1 %v6813_v18, %s6583_s24 }
  0xb7   : > { %725 = vrot.lane.b32.xlu0 %v6816_v19, %s6583_s24 }
  0xb8   : > { %v370_v42 = vpop.permute.xlu1 %369 }
  0xb9   : > { %v368_v43 = vpop.permute.xlu0 %367 }
  0xba   : > { %731 = vrot.lane.b32.xlu1 %v6827_v22, %s6583_s24 }
  0xbb   : > { %729 = vrot.lane.b32.xlu0 %v6830_v23, %s6583_s24 }
  0xbc   : > { %v374_v45 = vpop.permute.xlu1 %373 }
  0xbd   : > { %v372_v46 = vpop.permute.xlu0 %371  ;;  %v381_v60 = vsel %vm379_vm0, %v366_v40, %v374_v45 }
  0xbe   : > { %735 = vrot.lane.b32.xlu1 %v6841_v26, %s6583_s24 }
  0xbf   : > { %733 = vrot.lane.b32.xlu0 %v6844_v27, %s6583_s24 }
  0xc0   : > { %v378_v50 = vpop.permute.xlu1 %377 }
  0xc1   : > { %v376_v51 = vpop.permute.xlu0 %375  ;;  %v383_v52 = vsel %vm379_vm0, %v370_v42, %v378_v50  ;;  %v387_v53 = vsel %vm379_vm0, %v378_v50, %v370_v42  ;;  %v385_v42 = vsel %vm379_vm0, %v374_v45, %v366_v40  ;;  %v380_v50 = vsel %vm379_vm0, %v364_v41, %v372_v46  ;;  %v6971_v40 = vld [vmem:[%s12706_s3 + $0xc8] sm:$0xff] }
  0xc2   : > { %v382_v54 = vsel %vm379_vm0, %v368_v43, %v376_v51  ;;  %771 = vrot.lane.b32.xlu1 %v6799_v14, %s6584_s25  ;;  %v403_v55 = vmul.f32 %v6909_v48, %v383_v52  ;;  %v402_v56 = vmul.f32 %v6914_v49, %v387_v53  ;;  %v386_v58 = vsel %vm379_vm0, %v376_v51, %v368_v43  ;;  %v6980_v53 = vld [vmem:[%s12706_s3 + $0xc0] sm:$0xff] }
  0xc3   : > { %769 = vrot.lane.b32.xlu0 %v6802_v15, %s6584_s25  ;;  %v401_v43 = vmul.f32 %v6932_v57, %v382_v54  ;;  %v400_v51 = vmul.f32 %v6939_v59, %v386_v58  ;;  %v384_v45 = vsel %vm379_vm0, %v372_v46, %v364_v41  ;;  %v399_v52 = vmul.f32 %v6950_v63, %v381_v60  ;;  %v6993_v41 = vld [vmem:[%s12706_s3 + $0xb8] sm:$0xff] }
  0xc4   : > { %4024 = vmatprep.subr.mxu0 %v403_v55  ;;  %v6943_v61 = vpop.permute.xlu1 %422  ;;  %v334_v54 = vsel %vm330_vm1, %v6870_v34, %v329_v38  ;;  %v398_v58 = vmul.f32 %v6959_v44, %v385_v42  ;;  %v338_v46 = vsel %vm330_vm1, %v329_v38, %v6870_v34  ;;  %v397_v60 = vmul.f32 %v6971_v40, %v380_v50  ;;  %v7014_v34 = vld [vmem:[%s12706_s3 + $0xa8] sm:$0xff] }
  0xc5   : > { %v6945_v62 = vpop.permute.xlu0 %420  ;;  %4025 = vmatpush1.msra.mxu0 %v402_v56  ;;  %v333_v42 = vsel %vm330_vm1, %v6872_v35, %v6886_v39  ;;  %v337_v38 = vsel %vm330_vm1, %v6886_v39, %v6872_v35  ;;  %v354_v50 = vmul.f32 %v6993_v41, %v334_v54  ;;  %v7040_v54 = vld [vmem:[%s12706_s3 + $0x98] sm:$0xff] }
  0xc6   : > { %775 = vrot.lane.b32.xlu1 %v6813_v18, %s6584_s25  ;;  %4026 = vmatprep.subr.mxu0 %v401_v43  ;;  %v7002_v43 = vld [vmem:[%s12706_s3 + $0xb0] sm:$0xff]  ;;  %12829 = vst [vmem:[#allocation4_spill] sm:$0xff] %v7040_v54  ;;  %v352_v1 = vmul.f32 %v7014_v34, %v333_v42 }
  0xc7   : > { %773 = vrot.lane.b32.xlu0 %v6816_v19, %s6584_s25  ;;  %4027 = vmatpush1.msra.mxu0 %v400_v51  ;;  %12828 = vst [vmem:[#allocation3_spill] sm:$0xff] %v7002_v43  ;;  %v396_v51 = vmul.f32 %v6980_v53, %v384_v45  ;;  %v7026_v45 = vld [vmem:[%s12706_s3 + $0xa0] sm:$0xff]  ;;  %v353_v39 = vmul.f32 %v7002_v43, %v338_v46 }
  0xc8   : > { %v6985_v55 = vpop.permute.xlu1 %426  ;;  %4028 = vmatprep.subr.mxu0 %v399_v52  ;;  %v332_v52 = vsel %vm330_vm1, %v6862_v32, %v6878_v36  ;;  %v331_v46 = vsel %vm330_vm1, %v6864_v33, %v6880_v37  ;;  %v351_v43 = vmul.f32 %v7026_v45, %v337_v38  ;;  %v7075_v38 = vld [vmem:[%s12706_s3 + $0x80] sm:$0xff] }
  0xc9   : > { %v6987_v56 = vpop.permute.xlu0 %424  ;;  %4029 = vmatpush1.msra.mxu0 %v398_v58  ;;  %v350_v42 = vmul.f32 %v7040_v54, %v332_v52  ;;  %v289_v52 = vsel %vm281_vm2, %v6854_v30, %v6832_v24 }
  0xca   : > { %779 = vrot.lane.b32.xlu1 %v6827_v22, %s6584_s25  ;;  %4030 = vmatprep.subr.mxu0 %v397_v60  ;;  %v336_v60 = vsel %vm330_vm1, %v6878_v36, %v6862_v32  ;;  %v7062_v32 = vld [vmem:[%s12706_s3 + $0x88] sm:$0xff]  ;;  %v335_v36 = vsel %vm330_vm1, %v6880_v37, %v6864_v33 }
  0xcb   : > { %777 = vrot.lane.b32.xlu0 %v6830_v23, %s6584_s25  ;;  %4031 = vmatpush1.msra.mxu0 %v396_v51  ;;  %v7050_v51 = vld [vmem:[%s12706_s3 + $0x90] sm:$0xff]  ;;  %v348_v54 = vmul.f32 %v7062_v32, %v331_v46 }
  0xcc   : > { %v7032_v58 = vpop.permute.xlu1 %430  ;;  %4032 = vmatprep.subr.mxu0 %v354_v50  ;;  %12830 = vst [vmem:[#allocation5_spill] sm:$0xff] %v7050_v51  ;;  %v285_v50 = vsel %vm281_vm2, %v6832_v24, %v6854_v30  ;;  %v349_v37 = vmul.f32 %v7050_v51, %v336_v60  ;;  %v284_v60 = vsel %vm281_vm2, %v6834_v25, %v6856_v31  ;;  %v7111_v24 = vld [vmem:[%s12706_s3 + $0x68] sm:$0xff] }
  0xcd   : > { %v7034_v35 = vpop.permute.xlu0 %428  ;;  %4033 = vmatpush1.msra.mxu0 %v353_v39  ;;  %v347_v51 = vmul.f32 %v7075_v38, %v335_v36  ;;  %12833 = vst [vmem:[#allocation8_spill] sm:$0xff] %v7111_v24  ;;  %v288_v30 = vsel %vm281_vm2, %v6856_v31, %v6834_v25  ;;  %v7123_v36 = vld [vmem:[%s12706_s3 + $0x60] sm:$0xff] }
  0xce   : > { %783 = vrot.lane.b32.xlu1 %v6841_v26, %s6584_s25  ;;  %4034 = vmatprep.subr.mxu0 %v352_v1  ;;  %v7089_v1 = vld [vmem:[%s12706_s3 + $0x78] sm:$0xff]  ;;  %12834 = vst [vmem:[#allocation9_spill] sm:$0xff] %v7123_v36 }
  0xcf   : > { %781 = vrot.lane.b32.xlu0 %v6844_v27, %s6584_s25  ;;  %4035 = vmatpush1.msra.mxu0 %v351_v43  ;;  %12831 = vst [vmem:[#allocation6_spill] sm:$0xff] %v7089_v1  ;;  %v7099_v43 = vld [vmem:[%s12706_s3 + $0x70] sm:$0xff]  ;;  %v305_v46 = vmul.f32 %v7089_v1, %v285_v50  ;;  %v287_v50 = vsel %vm281_vm2, %v6846_v28, %v6818_v20 }
  0xd0   : > { %v7081_v39 = vpop.permute.xlu1 %434  ;;  %4036 = vmatprep.subr.mxu0 %v350_v42  ;;  %12832 = vst [vmem:[#allocation7_spill] sm:$0xff] %v7099_v43  ;;  %v283_v42 = vsel %vm281_vm2, %v6818_v20, %v6846_v28  ;;  %v304_v31 = vmul.f32 %v7099_v43, %v289_v52  ;;  %v303_v1 = vmul.f32 %v7111_v24, %v284_v60  ;;  %v7159_v20 = vld [vmem:[%s12706_s3 + $0x48] sm:$0xff] }
  0xd1   : > { %v7083_v33 = vpop.permute.xlu0 %432  ;;  %4037 = vmatpush1.msra.mxu0 %v349_v37  ;;  %v282_v52 = vsel %vm281_vm2, %v6820_v21, %v6848_v29  ;;  %v302_v43 = vmul.f32 %v7123_v36, %v288_v30  ;;  %12837 = vst [vmem:[#allocation12_spill] sm:$0xff] %v7159_v20  ;;  %v286_v28 = vsel %vm281_vm2, %v6848_v29, %v6820_v21  ;;  %v7172_v30 = vld [vmem:[%s12706_s3 + $0x40] sm:$0xff] }
  0xd2   : > { %827 = vrot.lane.b32.xlu1 %v6799_v14, %s6585_s26  ;;  %4038 = vmatprep.subr.mxu0 %v348_v54  ;;  %v7137_v54 = vld [vmem:[%s12706_s3 + $0x58] sm:$0xff]  ;;  %12838 = vst [vmem:[#allocation13_spill] sm:$0xff] %v7172_v30 }
  0xd3   : > { %825 = vrot.lane.b32.xlu0 %v6802_v15, %s6585_s26  ;;  %4039 = vmatpush1.msra.mxu0 %v347_v51  ;;  %12835 = vst [vmem:[#allocation10_spill] sm:$0xff] %v7137_v54  ;;  %v7147_v51 = vld [vmem:[%s12706_s3 + $0x50] sm:$0xff]  ;;  %v301_v60 = vmul.f32 %v7137_v54, %v283_v42  ;;  %v240_v42 = vsel %vm232_vm3, %v6804_v16, %v6782_v10 }
  0xd4   : > { %v7129_v37 = vpop.permute.xlu1 %471  ;;  %4040 = vmatprep.subr.mxu0 %v305_v46  ;;  %12836 = vst [vmem:[#allocation11_spill] sm:$0xff] %v7147_v51  ;;  %v236_v46 = vsel %vm232_vm3, %v6782_v10, %v6804_v16  ;;  %v300_v29 = vmul.f32 %v7147_v51, %v287_v50  ;;  %v299_v54 = vmul.f32 %v7159_v20, %v282_v52  ;;  %v7208_v10 = vld [vmem:[%s12706_s3 + $0x28] sm:$0xff] }
  0xd5   : > { %v7131_v25 = vpop.permute.xlu0 %469  ;;  %4041 = vmatpush1.msra.mxu0 %v304_v31  ;;  %v235_v50 = vsel %vm232_vm3, %v6774_v8, %v6806_v17  ;;  %v298_v51 = vmul.f32 %v7172_v30, %v286_v28  ;;  %12841 = vst [vmem:[#allocation16_spill] sm:$0xff] %v7208_v10  ;;  %v239_v16 = vsel %vm232_vm3, %v6806_v17, %v6774_v8  ;;  %v7220_v28 = vld [vmem:[%s12706_s3 + $0x20] sm:$0xff] }
  0xd6   : > { %831 = vrot.lane.b32.xlu1 %v6813_v18, %s6585_s26  ;;  %4042 = vmatprep.subr.mxu0 %v303_v1  ;;  %v7186_v1 = vld [vmem:[%s12706_s3 + $0x38] sm:$0xff]  ;;  %12842 = vst [vmem:[#allocation17_spill] sm:$0xff] %v7220_v28 }
  0xd7   : > { %829 = vrot.lane.b32.xlu0 %v6816_v19, %s6585_s26  ;;  %4043 = vmatpush1.msra.mxu0 %v302_v43  ;;  %12839 = vst [vmem:[#allocation14_spill] sm:$0xff] %v7186_v1  ;;  %v7196_v43 = vld [vmem:[%s12706_s3 + $0x30] sm:$0xff]  ;;  %v256_v52 = vmul.f32 %v7186_v1, %v236_v46  ;;  %v238_v46 = vsel %vm232_vm3, %v6790_v12, %v6784_v11 }
  0xd8   : > { %v7178_v31 = vpop.permute.xlu1 %475  ;;  %4044 = vmatprep.subr.mxu0 %v301_v60  ;;  %12840 = vst [vmem:[#allocation15_spill] sm:$0xff] %v7196_v43  ;;  %v234_v60 = vsel %vm232_vm3, %v6784_v11, %v6790_v12  ;;  %v255_v17 = vmul.f32 %v7196_v43, %v240_v42  ;;  %v254_v1 = vmul.f32 %v7208_v10, %v235_v50  ;;  %v7256_v11 = vld [vmem:[%s12706_s3 + $0x8] sm:$0xff] }
  0xd9   : > { %v7180_v21 = vpop.permute.xlu0 %473  ;;  %4045 = vmatpush1.msra.mxu0 %v300_v29  ;;  %v233_v42 = vsel %vm232_vm3, %v6776_v9, %v6792_v13  ;;  %v253_v43 = vmul.f32 %v7220_v28, %v239_v16  ;;  %12845 = vst [vmem:[#allocation20_spill] sm:$0xff] %v7256_v11  ;;  %v237_v12 = vsel %vm232_vm3, %v6792_v13, %v6776_v9  ;;  %v7268_v16 = vld [vmem:[%s12706_s3] sm:$0xff] }
  0xda   : > { %835 = vrot.lane.b32.xlu1 %v6827_v22, %s6585_s26  ;;  %4046 = vmatprep.subr.mxu0 %v299_v54  ;;  %v7234_v54 = vld [vmem:[%s12706_s3 + $0x18] sm:$0xff]  ;;  %12846 = vst [vmem:[#allocation21_spill] sm:$0xff] %v7268_v16  ;;  %v250_v9 = vmul.f32 %v7256_v11, %v233_v42  ;;  %v249_v13 = vmul.f32 %v7268_v16, %v237_v12 }
  0xdb   : > { %833 = vrot.lane.b32.xlu0 %v6830_v23, %s6585_s26  ;;  %4047 = vmatpush1.msra.mxu0 %v298_v51  ;;  %12843 = vst [vmem:[#allocation18_spill] sm:$0xff] %v7234_v54  ;;  %v7244_v51 = vld [vmem:[%s12706_s3 + $0x10] sm:$0xff]  ;;  %v252_v50 = vmul.f32 %v7234_v54, %v234_v60  ;;  %v7294_v12 = vld [vmem:[%s12706_s3 + $0x1f8] sm:$0xff]  ;;  %v7311_v54 = vld [vmem:[%s12706_s3 + $0x1e8] sm:$0xff] }
  0xdc   : > { %v7226_v29 = vpop.permute.xlu1 %479  ;;  %4048 = vmatprep.subr.mxu0 %v256_v52  ;;  %12844 = vst [vmem:[#allocation19_spill] sm:$0xff] %v7244_v51  ;;  %v251_v28 = vmul.f32 %v7244_v51, %v238_v46  ;;  %12847 = vst [vmem:[#allocation22_spill] sm:$0xff] %v7294_v12 }
  0xdd   : > { %v7228_v8 = vpop.permute.xlu0 %477  ;;  %4049 = vmatpush1.msra.mxu0 %v255_v17 }
  0xde   : > { %839 = vrot.lane.b32.xlu1 %v6841_v26, %s6585_s26  ;;  %4050 = vmatprep.subr.mxu0 %v254_v1 }
  0xdf   : > { %837 = vrot.lane.b32.xlu0 %v6844_v27, %s6585_s26  ;;  %4051 = vmatpush1.msra.mxu0 %v253_v43 }
  0xe0   : > { %v484_v52 = vpop.permute.xlu1 %483  ;;  %4052 = vmatprep.subr.mxu0 %v252_v50  ;;  %v7299_v50 = vld [vmem:[%s12706_s3 + $0x1f0] sm:$0xff] }
  0xe1   : > { %v7270_v17 = vpop.permute.xlu0 %481  ;;  %4053 = vmatpush1.msra.mxu0 %v251_v28  ;;  %12848 = vst [vmem:[#allocation23_spill] sm:$0xff] %v7299_v50 }
  0xe2   : > { %875 = vrot.lane.b32.xlu1 %v6799_v14, %s6586_s27  ;;  %4054 = vmatprep.subr.mxu0 %v250_v9 }
  0xe3   : > { %873 = vrot.lane.b32.xlu0 %v6802_v15, %s6586_s27  ;;  %4055 = vmatpush1.msra.mxu0 %v249_v13 }
  0xe4   : > { %v521_v1 = vpop.permute.xlu1 %520 }
  0xe5   : > { %v519_v43 = vpop.permute.xlu0 %518 }
  0xe6   : > { %879 = vrot.lane.b32.xlu1 %v6813_v18, %s6586_s27 }
  0xe7   : > { %877 = vrot.lane.b32.xlu0 %v6816_v19, %s6586_s27 }
  0xe8   : > { %v525_v60 = vpop.permute.xlu1 %524 }
  0xe9   : > { %v523_v28 = vpop.permute.xlu0 %522 }
  0xea   : > { %883 = vrot.lane.b32.xlu1 %v6827_v22, %s6586_s27 }
  0xeb   : > { %881 = vrot.lane.b32.xlu0 %v6830_v23, %s6586_s27 }
  0xec   : > { %v529_v46 = vpop.permute.xlu1 %528 }
  0xed   : > { %v527_v42 = vpop.permute.xlu0 %526 }
  0xee   : > { %887 = vrot.lane.b32.xlu1 %v6841_v26, %s6586_s27  ;;  %v539_v36 = vsel %vm534_vm4, %v527_v42, %v519_v43 }
  0xef   : > { %885 = vrot.lane.b32.xlu0 %v6844_v27, %s6586_s27 }
  0xf0   : > { %v533_v9 = vpop.permute.xlu1 %532 }
  0xf1   : > { %v531_v13 = vpop.permute.xlu0 %530  ;;  %v538_v16 = vsel %vm534_vm4, %v525_v60, %v533_v9  ;;  %v542_v11 = vsel %vm534_vm4, %v533_v9, %v525_v60  ;;  %v7322_v60 = vld [vmem:[%s12706_s3 + $0x1e0] sm:$0xff]  ;;  %v540_v9 = vsel %vm534_vm4, %v529_v46, %v521_v1 }
  0xf2   : > { %v541_v51 = vsel %vm534_vm4, %v531_v13, %v523_v28  ;;  %v537_v10 = vsel %vm534_vm4, %v523_v28, %v531_v13  ;;  %923 = vrot.lane.b32.xlu1 %v6799_v14, %s6587_s28  ;;  %v558_v30 = vmul.f32 %v7294_v12, %v542_v11  ;;  %v557_v20 = vmul.f32 %v7299_v50, %v538_v16  ;;  %v7331_v28 = vld [vmem:[%s12706_s3 + $0x1d8] sm:$0xff]  ;;  %v7343_v50 = vld [vmem:[%s12706_s3 + $0x1d0] sm:$0xff] }
  0xf3   : > { %12849 = vst [vmem:[#allocation24_spill] sm:$0xff] %v7322_v60  ;;  %921 = vrot.lane.b32.xlu0 %v6802_v15, %s6587_s28  ;;  %12850 = vst [vmem:[#allocation25_spill] sm:$0xff] %v7331_v28  ;;  %v536_v11 = vsel %vm534_vm4, %v521_v1, %v529_v46  ;;  %v556_v12 = vmul.f32 %v7311_v54, %v541_v51  ;;  %v555_v24 = vmul.f32 %v7322_v60, %v537_v10  ;;  %v7351_v1 = vld [vmem:[%s12706_s3 + $0x1c8] sm:$0xff]  ;;  %v7373_v46 = vld [vmem:[%s12706_s3 + $0x1b8] sm:$0xff] }
  0xf4   : > { %v7335_v16 = vpop.permute.xlu1 %569  ;;  %4056 = vmatprep.subr.mxu0 %v558_v30  ;;  %12851 = vst [vmem:[#allocation26_spill] sm:$0xff] %v7343_v50  ;;  %12852 = vst [vmem:[#allocation27_spill] sm:$0xff] %v7351_v1  ;;  %v535_v30 = vsel %vm534_vm4, %v519_v43, %v527_v42  ;;  %v554_v51 = vmul.f32 %v7331_v28, %v540_v9  ;;  %v493_v10 = vsel %vm485_vm5, %v484_v52, %v7178_v31 }
  0xf5   : > { %v7337_v13 = vpop.permute.xlu0 %567  ;;  %4057 = vmatpush2.msra.mxu0 %v557_v20  ;;  %v7362_v20 = vld [vmem:[%s12706_s3 + $0x1c0] sm:$0xff]  ;;  %v553_v43 = vmul.f32 %v7343_v50, %v536_v11  ;;  %12854 = vst [vmem:[#allocation29_spill] sm:$0xff] %v7373_v46  ;;  %v489_v42 = vsel %vm485_vm5, %v7178_v31, %v484_v52  ;;  %v552_v28 = vmul.f32 %v7351_v1, %v539_v36  ;;  %v7394_v31 = vld [vmem:[%s12706_s3 + $0x1a8] sm:$0xff] }
  0xf6   : > { %927 = vrot.lane.b32.xlu1 %v6813_v18, %s6587_s28  ;;  %4058 = vmatprep.subr.mxu0 %v556_v12  ;;  %12853 = vst [vmem:[#allocation28_spill] sm:$0xff] %v7362_v20  ;;  %v492_v11 = vsel %vm485_vm5, %v7270_v17, %v7180_v21  ;;  %v551_v50 = vmul.f32 %v7362_v20, %v535_v30  ;;  %12856 = vst [vmem:[#allocation31_spill] sm:$0xff] %v7394_v31  ;;  %v7406_v30 = vld [vmem:[%s12706_s3 + $0x1a0] sm:$0xff] }
  0xf7   : > { %925 = vrot.lane.b32.xlu0 %v6816_v19, %s6587_s28  ;;  %4059 = vmatpush2.msra.mxu0 %v555_v24  ;;  %v7384_v24 = vld [vmem:[%s12706_s3 + $0x1b0] sm:$0xff]  ;;  %v488_v36 = vsel %vm485_vm5, %v7180_v21, %v7270_v17  ;;  %v509_v52 = vmul.f32 %v7373_v46, %v493_v10  ;;  %12857 = vst [vmem:[#allocation32_spill] sm:$0xff] %v7406_v30  ;;  %v7418_v17 = vld [vmem:[%s12706_s3 + $0x198] sm:$0xff] }
  0xf8   : > { %v574_v12 = vpop.permute.xlu1 %573  ;;  %4060 = vmatprep.subr.mxu0 %v554_v51  ;;  %12855 = vst [vmem:[#allocation30_spill] sm:$0xff] %v7384_v24  ;;  %v491_v51 = vsel %vm485_vm5, %v7226_v29, %v7129_v37  ;;  %v508_v21 = vmul.f32 %v7384_v24, %v489_v42  ;;  %12858 = vst [vmem:[#allocation33_spill] sm:$0xff] %v7418_v17  ;;  %v507_v46 = vmul.f32 %v7394_v31, %v492_v11  ;;  %v7494_v24 = vld [vmem:[%s12706_s3 + $0x170] sm:$0xff] }
  0xf9   : > { %v7378_v9 = vpop.permute.xlu0 %571  ;;  %4061 = vmatpush2.msra.mxu0 %v553_v43  ;;  %v490_v42 = vsel %vm485_vm5, %v7228_v8, %v7131_v25  ;;  %v444_v11 = vsel %vm436_vm6, %v7081_v39, %v6985_v55  ;;  %12865 = vst [vmem:[#allocation40_spill] sm:$0xff] %v7494_v24 }
  0xfa   : > { %931 = vrot.lane.b32.xlu1 %v6827_v22, %s6587_s28  ;;  %4062 = vmatprep.subr.mxu0 %v552_v28  ;;  %v487_v28 = vsel %vm485_vm5, %v7129_v37, %v7226_v29  ;;  %v506_v37 = vmul.f32 %v7406_v30, %v488_v36  ;;  %v7441_v29 = vld [vmem:[%s12706_s3 + $0x188] sm:$0xff]  ;;  %v505_v36 = vmul.f32 %v7418_v17, %v491_v51  ;;  %v7462_v30 = vld [vmem:[%s12706_s3 + $0x178] sm:$0xff] }
  0xfb   : > { %929 = vrot.lane.b32.xlu0 %v6830_v23, %s6587_s28  ;;  %4063 = vmatpush2.msra.mxu0 %v551_v50  ;;  %v7430_v50 = vld [vmem:[%s12706_s3 + $0x190] sm:$0xff]  ;;  %12860 = vst [vmem:[#allocation35_spill] sm:$0xff] %v7441_v29  ;;  %12862 = vst [vmem:[#allocation37_spill] sm:$0xff] %v7462_v30  ;;  %v438_v51 = vsel %vm436_vm6, %v6943_v61, %v7032_v58  ;;  %v503_v31 = vmul.f32 %v7441_v29, %v490_v42  ;;  %v7505_v42 = vld [vmem:[%s12706_s3 + $0x168] sm:$0xff] }
  0xfc   : > { %v578_v10 = vpop.permute.xlu1 %577  ;;  %4064 = vmatprep.subr.mxu0 %v509_v52  ;;  %12859 = vst [vmem:[#allocation34_spill] sm:$0xff] %v7430_v50  ;;  %v486_v52 = vsel %vm485_vm5, %v7131_v25, %v7228_v8  ;;  %v504_v25 = vmul.f32 %v7430_v50, %v487_v28  ;;  %v7471_v8 = vld [vmem:[%s12706_s3 + $0x238] sm:$0xff]  ;;  %v440_v28 = vsel %vm436_vm6, %v6985_v55, %v7081_v39  ;;  %12866 = vst [vmem:[#allocation41_spill] sm:$0xff] %v7505_v42 }
  0xfd   : > { %v7424_v43 = vpop.permute.xlu0 %575  ;;  %4065 = vmatpush2.msra.mxu0 %v508_v21  ;;  %v7457_v21 = vld [vmem:[%s12706_s3 + $0x180] sm:$0xff]  ;;  %12863 = vst [vmem:[#allocation38_spill] sm:$0xff] %v7471_v8  ;;  %v460_v39 = vmul.f32 %v7462_v30, %v444_v11 }
  0xfe   : > { %935 = vrot.lane.b32.xlu1 %v6841_v26, %s6587_s28  ;;  %4066 = vmatprep.subr.mxu0 %v507_v46  ;;  %12861 = vst [vmem:[#allocation36_spill] sm:$0xff] %v7457_v21  ;;  %v7476_v46 = vld [vmem:[%s12706_s3 + $0x230] sm:$0xff]  ;;  %v502_v20 = vmul.f32 %v7457_v21, %v486_v52 }
  0xff   : > { %933 = vrot.lane.b32.xlu0 %v6844_v27, %s6587_s28  ;;  %4067 = vmatpush2.msra.mxu0 %v506_v37  ;;  %12864 = vst [vmem:[#allocation39_spill] sm:$0xff] %v7476_v46  ;;  %v443_v37 = vsel %vm436_vm6, %v7083_v33, %v6987_v56 }
 0x100   : > { %v582_v50 = vpop.permute.xlu1 %581  ;;  %4068 = vmatprep.subr.mxu0 %v505_v36 }
 0x101   : > { %v580_v17 = vpop.permute.xlu0 %579  ;;  %4069 = vmatpush2.msra.mxu0 %v504_v25  ;;  %v591_v55 = vsel %vm583_vm7, %v582_v50, %v574_v12  ;;  %v587_v1 = vsel %vm583_vm7, %v574_v12, %v582_v50  ;;  %v7517_v12 = vld [vmem:[%s12706_s3 + $0x228] sm:$0xff]  ;;  %v439_v50 = vsel %vm436_vm6, %v6987_v56, %v7083_v33  ;;  %v442_v56 = vsel %vm436_vm6, %v7032_v58, %v6943_v61  ;;  %v7559_v61 = vld [vmem:[%s12706_s3 + $0x218] sm:$0xff] }
 0x102   : > { %v590_v36 = vsel %vm583_vm7, %v580_v17, %v7378_v9  ;;  %971 = vrot.lane.b32.xlu1 %v6799_v14, %s6588_s29  ;;  %4070 = vmatprep.subr.mxu0 %v503_v31  ;;  %v607_v52 = vmul.f32 %v7471_v8, %v591_v55  ;;  %v606_v11 = vmul.f32 %v7476_v46, %v587_v1  ;;  %v7532_v1 = vld [vmem:[%s12706_s3 + $0x160] sm:$0xff]  ;;  %v7572_v55 = vld [vmem:[%s12706_s3 + $0x150] sm:$0xff] }
 0x103   : > { %12867 = vst [vmem:[#allocation42_spill] sm:$0xff] %v7517_v12  ;;  %v586_v25 = vsel %vm583_vm7, %v7378_v9, %v580_v17  ;;  %969 = vrot.lane.b32.xlu0 %v6802_v15, %s6588_s29  ;;  %4071 = vmatpush2.msra.mxu0 %v502_v20  ;;  %v459_v14 = vmul.f32 %v7494_v24, %v440_v28  ;;  %12868 = vst [vmem:[#allocation43_spill] sm:$0xff] %v7532_v1  ;;  %v7537_v31 = vld [vmem:[%s12706_s3 + $0x220] sm:$0xff]  ;;  %v7554_v17 = vld [vmem:[%s12706_s3 + $0x158] sm:$0xff] }
 0x104   : > { %12869 = vst [vmem:[#allocation44_spill] sm:$0xff] %v7537_v31  ;;  %v589_v15 = vsel %vm583_vm7, %v578_v10, %v7335_v16  ;;  %4137 = vmatprep.subr.mxu1 %v607_v52  ;;  %v7546_v33 = vpop.permute.xlu1 %627  ;;  %4072 = vmatprep.subr.mxu0 %v460_v39  ;;  %v458_v9 = vmul.f32 %v7505_v42, %v443_v37  ;;  %12870 = vst [vmem:[#allocation45_spill] sm:$0xff] %v7554_v17  ;;  %v7577_v39 = vld [vmem:[%s12706_s3 + $0x210] sm:$0xff] }
 0x105   : > { %v7548_v20 = vpop.permute.xlu0 %625  ;;  %12871 = vst [vmem:[#allocation46_spill] sm:$0xff] %v7559_v61  ;;  %v437_v58 = vsel %vm436_vm6, %v6945_v62, %v7034_v35  ;;  %v585_v28 = vsel %vm583_vm7, %v7335_v16, %v578_v10  ;;  %4073 = vmatpush2.msra.mxu0 %v459_v14  ;;  %4138 = vmatpush1.msra.mxu1 %v606_v11  ;;  %12872 = vst [vmem:[#allocation47_spill] sm:$0xff] %v7572_v55 }
 0x106   : > { %v605_v37 = vmul.f32 %v7517_v12, %v590_v36  ;;  %12873 = vst [vmem:[#allocation48_spill] sm:$0xff] %v7577_v39  ;;  %v441_v52 = vsel %vm436_vm6, %v7034_v35, %v6945_v62  ;;  %975 = vrot.lane.b32.xlu1 %v6813_v18, %s6588_s29  ;;  %4074 = vmatprep.subr.mxu0 %v458_v9  ;;  %v7598_v18 = vld [vmem:[%s12706_s3 + $0x148] sm:$0xff]  ;;  %v7623_v9 = vld [vmem:[%s12706_s3 + $0x200] sm:$0xff] }
 0x107   : > { %v457_v16 = vmul.f32 %v7532_v1, %v439_v50  ;;  %v604_v10 = vmul.f32 %v7537_v31, %v586_v25  ;;  %v588_v36 = vsel %vm583_vm7, %v7424_v43, %v7337_v13  ;;  %973 = vrot.lane.b32.xlu0 %v6816_v19, %s6588_s29  ;;  %v456_v11 = vmul.f32 %v7554_v17, %v442_v56  ;;  %v7603_v35 = vld [vmem:[%s12706_s3 + $0x208] sm:$0xff] }
 0x108   : > { %4139 = vmatprep.subr.mxu1 %v605_v37  ;;  %v603_v62 = vmul.f32 %v7559_v61, %v589_v15  ;;  %12874 = vst [vmem:[#allocation49_spill] sm:$0xff] %v7598_v18  ;;  %12875 = vst [vmem:[#allocation50_spill] sm:$0xff] %v7603_v35  ;;  %v584_v19 = vsel %vm583_vm7, %v7337_v13, %v7424_v43  ;;  %v7609_v50 = vpop.permute.xlu1 %631  ;;  %v455_v14 = vmul.f32 %v7572_v55, %v438_v51  ;;  %v7618_v15 = vld [vmem:[%s12706_s3 + $0x140] sm:$0xff]  ;;  %v7636_v37 = vld [vmem:[%s12704_s1 + $0x10] sm:$0xff] }
 0x109   : > { %4075 = vmatpush2.msra.mxu0 %v457_v16  ;;  %4140 = vmatpush1.msra.mxu1 %v604_v10  ;;  %v7611_v25 = vpop.permute.xlu0 %629  ;;  %v602_v56 = vmul.f32 %v7577_v39, %v585_v28  ;;  %12876 = vst [vmem:[#allocation51_spill] sm:$0xff] %v7618_v15  ;;  %12877 = vst [vmem:[#allocation52_spill] sm:$0xff] %v7623_v9  ;;  %v454_v13 = vmul.f32 %v7598_v18, %v441_v52  ;;  %v7658_v10 = vld [vmem:[%s6632_s21 + $0x90] sm:$0xff]  ;;  %v7768_v1 = vld [vmem:[%s12704_s1 + $0x28] sm:$0xff] }
 0x10a   : > { %4076 = vmatprep.subr.mxu0 %v456_v11  ;;  %4141 = vmatprep.subr.mxu1 %v603_v62  ;;  %v601_v43 = vmul.f32 %v7603_v35, %v588_v36  ;;  %v453_v51 = vmul.f32 %v7618_v15, %v437_v58  ;;  %v600_v28 = vmul.f32 %v7623_v9, %v584_v19  ;;  %v7661_v36 = vld [vmem:[%s6632_s21 + $0x80] sm:$0xff] }
 0x10b   : > { %4077 = vmatpush2.msra.mxu0 %v455_v14  ;;  %4142 = vmatpush1.msra.mxu1 %v602_v56  ;;  %12878 = vst [vmem:[#allocation53_spill] sm:$0xff] %v7636_v37  ;;  %v7679_v11 = vld [vmem:[%s6632_s21 + $0xa0] sm:$0xff]  ;;  %12881 = vst [vmem:[#allocation55_spill] sm:$0xff] %v7768_v1 }
 0x10c   : > { %979 = vrot.lane.b32.xlu1 %v6827_v22, %s6588_s29  ;;  %977 = vrot.lane.b32.xlu0 %v6830_v23, %s6588_s29  ;;  %v7638_v52 = vpop.permute.xlu1 %635  ;;  %v7645_v23 = vld [vmem:[%s12704_s1 + $0x8] sm:$0xff]  ;;  %v6476_v19 = vld [vmem:[%s6632_s21] sm:$0xff] }
 0x10d   : > { %4078 = vmatprep.subr.mxu0 %v454_v13  ;;  %4143 = vmatprep.subr.mxu1 %v601_v43  ;;  %v7640_v22 = vpop.permute.xlu0 %633  ;;  %v7716_v13 = vld [vmem:[%s6632_s21 + $0xb8] sm:$0xff]  ;;  %v7719_v43 = vld [vmem:[%s6632_s21 + $0xa8] sm:$0xff] }
 0x10e   : > { %4079 = vmatpush2.msra.mxu0 %v453_v51  ;;  %4144 = vmatpush1.msra.mxu1 %v600_v28 }
 0x10f   : > { %6180 = vmatmul.mubr.msk.f32.vlgmr.msra.gmra.mxu1 %vm4011_vm8, %v7636_v37  ;;  %4080 = vmatprep.subr.mxu0 %v6665_v6  ;;  %v7676_v6 = vld [vmem:[%s6632_s21 + $0xb0] sm:$0xff] }
 0x110   : > { %983 = vrot.lane.b32.xlu1 %v6841_v26, %s6588_s29  ;;  %981 = vrot.lane.b32.xlu0 %v6844_v27, %s6588_s29  ;;  %v7653_v58 = vpop.permute.xlu1 %639 }
 0x111   : > { %v7655_v16 = vpop.permute.xlu0 %637  ;;  %4088 = vmatprep.mubr.f32.mxu0 %v7645_v23  ;;  %4081 = vmatpush2.msra.mxu0 %v6645_v2  ;;  %v12879_v2 = vmov 0.0  }
 0x112   : > { %4082 = vmatprep.subr.mxu0 %v6668_v7  ;;  %4183 = vmatprep.mubr.f32.mxu1 %v12879_v2  ;;  %v7692_v7 = vld [vmem:[%s12704_s1] sm:$0xff] }
 0x113   : > { %4083 = vmatpush2.msra.mxu0 %v6635_v0  ;;  %12880 = vst [vmem:[#allocation54_spill] sm:$0xff] %v7692_v7  ;;  %6181 = vmatmul.mubr.msk.f32.gmra.mxu1 %vm4011_vm8, %v7768_v1  ;;  %v7784_v1 = vld [vmem:[%s12704_s1 + $0x40] sm:$0xff] }
 0x114   : > { %1028 = vrot.lane.b32.xlu1 %v7658_v10, %s6581_s22  ;;  %1026 = vrot.lane.b32.xlu0 %v7661_v36, %s6581_s22  ;;  %v7671_v26 = vpop.permute.xlu1 %675 }
 0x115   : > { %v7673_v27 = vpop.permute.xlu0 %673  ;;  %4084 = vmatprep.subr.mxu0 %v6655_v4  ;;  %v7699_v4 = vld [vmem:[%s6632_s21 + $0x98] sm:$0xff]  ;;  %4189 = vmatprep.mubr.f32.mxu1 %v12879_v2 }
 0x116   : > { %4085 = vmatpush2.msra.mxu0 %v6648_v3  ;;  %v7702_v3 = vld [vmem:[%s6632_s21 + $0x88] sm:$0xff] }
 0x117   : > { %4086 = vmatprep.subr.mxu0 %v6658_v5  ;;  %6182 = vmatmul.mubr.msk.f32.gmra.mxu1 %vm4011_vm8, %v7784_v1 }
 0x118   : > { %1032 = vrot.lane.b32.xlu1 %v7676_v6, %s6581_s22  ;;  %1030 = vrot.lane.b32.xlu0 %v7679_v11, %s6581_s22  ;;  %v7694_v0 = vpop.permute.xlu1 %679 }
 0x119   : > { %v7696_v62 = vpop.permute.xlu0 %677  ;;  %4087 = vmatpush2.msra.mxu0 %v6476_v19  ;;  %4195 = vmatprep.mubr.f32.mxu1 %v12879_v2 }
 0x11a   : > { %4089 = vmatmul.mubr.f32.vlgmr.msra.gmra.mxu0 %v7692_v7 }
 0x11c   : > { %1036 = vrot.lane.b32.xlu1 %v7699_v4, %s6581_s22  ;;  %1034 = vrot.lane.b32.xlu0 %v7702_v3, %s6581_s22  ;;  %v7711_v14 = vpop.permute.xlu1 %683 }
 0x11d   : > { %v7713_v56 = vpop.permute.xlu0 %681 }
 0x120   : > { %1040 = vrot.lane.b32.xlu1 %v7716_v13, %s6581_s22  ;;  %1038 = vrot.lane.b32.xlu0 %v7719_v43, %s6581_s22  ;;  %v7725_v5 = vpop.permute.xlu1 %687 }
 0x121   : > { %v7727_v51 = vpop.permute.xlu0 %685 }
 0x124   : > { %1076 = vrot.lane.b32.xlu1 %v7658_v10, %s6582_s23  ;;  %1074 = vrot.lane.b32.xlu0 %v7661_v36, %s6582_s23  ;;  %v7733_v28 = vpop.permute.xlu1 %723 }
 0x125   : > { %v7735_v19 = vpop.permute.xlu0 %721 }
 0x128   : > { %1080 = vrot.lane.b32.xlu1 %v7676_v6, %s6582_s23  ;;  %1078 = vrot.lane.b32.xlu0 %v7679_v11, %s6582_s23  ;;  %v7741_v37 = vpop.permute.xlu1 %727 }
 0x129   : > { %v7743_v7 = vpop.permute.xlu0 %725 }
 0x12c   : > { %1084 = vrot.lane.b32.xlu1 %v7699_v4, %s6582_s23  ;;  %1082 = vrot.lane.b32.xlu0 %v7702_v3, %s6582_s23  ;;  %v7749_v9 = vpop.permute.xlu1 %731 }
 0x12d   : > { %v7751_v35 = vpop.permute.xlu0 %729 }
 0x130   : > { %1088 = vrot.lane.b32.xlu1 %v7716_v13, %s6582_s23  ;;  %1086 = vrot.lane.b32.xlu0 %v7719_v43, %s6582_s23  ;;  %v736_v15 = vpop.permute.xlu1 %735 }
 0x131   : > { %v734_v18 = vpop.permute.xlu0 %733 }
 0x134   : > { %1124 = vrot.lane.b32.xlu1 %v7658_v10, %s6583_s24  ;;  %1122 = vrot.lane.b32.xlu0 %v7661_v36, %s6583_s24  ;;  %v772_v39 = vpop.permute.xlu1 %771 }
 0x135   : > { %v770_v61 = vpop.permute.xlu0 %769 }
 0x138   : > { %1128 = vrot.lane.b32.xlu1 %v7676_v6, %s6583_s24  ;;  %1126 = vrot.lane.b32.xlu0 %v7679_v11, %s6583_s24  ;;  %v776_v17 = vpop.permute.xlu1 %775 }
 0x139   : > { %v774_v31 = vpop.permute.xlu0 %773 }
 0x13c   : > { %1132 = vrot.lane.b32.xlu1 %v7699_v4, %s6583_s24  ;;  %1130 = vrot.lane.b32.xlu0 %v7702_v3, %s6583_s24  ;;  %v780_v55 = vpop.permute.xlu1 %779 }
 0x13d   : > { %v778_v12 = vpop.permute.xlu0 %777 }
 0x140   : > { %1136 = vrot.lane.b32.xlu1 %v7716_v13, %s6583_s24  ;;  %1134 = vrot.lane.b32.xlu0 %v7719_v43, %s6583_s24  ;;  %v784_v42 = vpop.permute.xlu1 %783 }
 0x141   : > { %v788_v8 = vsel %vm379_vm0, %v776_v17, %v784_v42  ;;  %v792_v46 = vsel %vm379_vm0, %v784_v42, %v776_v17  ;;  %v782_v30 = vpop.permute.xlu0 %781  ;;  %v7806_v42 = vld [vmem:[%s12704_s1 + $0x58] sm:$0xff]  ;;  %v785_v17 = vsel %vm379_vm0, %v770_v61, %v778_v12 }
 0x142   : > { %v807_v21 = vmul.f32 %v792_v46, %v6914_v49  ;;  %v787_v24 = vsel %vm379_vm0, %v774_v31, %v782_v30  ;;  %v808_v29 = vmul.f32 %v788_v8, %v6909_v48  ;;  %v791_v60 = vsel %vm379_vm0, %v782_v30, %v774_v31  ;;  %6183 = vmatmul.mubr.msk.f32.gmra.mxu1 %vm4011_vm8, %v7806_v42 }
 0x143   : > { %v786_v49 = vsel %vm379_vm0, %v772_v39, %v780_v55  ;;  %v806_v48 = vmul.f32 %v787_v24, %v6932_v57  ;;  %v790_v30 = vsel %vm379_vm0, %v780_v55, %v772_v39  ;;  %4266 = vmatprep.mubr.f32.mxu1 %v7645_v23  ;;  %v805_v31 = vmul.f32 %v791_v60, %v6939_v59 }
 0x144   : > { %1172 = vrot.lane.b32.xlu1 %v7658_v10, %s6584_s25  ;;  %1170 = vrot.lane.b32.xlu0 %v7661_v36, %s6584_s25  ;;  %v7810_v46 = vpop.permute.xlu1 %827  ;;  %v804_v57 = vmul.f32 %v786_v49, %v6950_v63  ;;  %v803_v24 = vmul.f32 %v790_v30, %v6959_v44  ;;  %v740_v59 = vsel %vm330_vm1, %v7741_v37, %v736_v15 }
 0x145   : > { %4202 = vmatprep.subr.mxu1 %v808_v29  ;;  %v7817_v8 = vpop.permute.xlu0 %825  ;;  %v789_v29 = vsel %vm379_vm0, %v778_v12, %v770_v61  ;;  %v744_v55 = vsel %vm330_vm1, %v736_v15, %v7741_v37  ;;  %v802_v63 = vmul.f32 %v785_v17, %v6971_v40  ;;  %v739_v44 = vsel %vm330_vm1, %v7743_v7, %v734_v18  ;;  %v12882_v15 = vld [vmem:[#allocation3_spill] sm:$0xff] }
 0x146   : > { %4203 = vmatpush1.msra.mxu1 %v807_v21  ;;  %v801_v12 = vmul.f32 %v789_v29, %v6980_v53  ;;  %v743_v61 = vsel %vm330_vm1, %v734_v18, %v7743_v7  ;;  %v760_v40 = vmul.f32 %v740_v59, %v6993_v41  ;;  %v738_v53 = vsel %vm330_vm1, %v7733_v28, %v7749_v9 }
 0x147   : > { %4204 = vmatprep.subr.mxu1 %v806_v48  ;;  %v759_v37 = vmul.f32 %v744_v55, %v12882_v15  ;;  %v742_v18 = vsel %vm330_vm1, %v7749_v9, %v7733_v28  ;;  %v758_v7 = vmul.f32 %v739_v44, %v7014_v34  ;;  %v737_v41 = vsel %vm330_vm1, %v7735_v19, %v7751_v35  ;;  %v12883_v9 = vld [vmem:[#allocation4_spill] sm:$0xff]  ;;  %v12886_v55 = vld [vmem:[#allocation7_spill] sm:$0xff] }
 0x148   : > { %1176 = vrot.lane.b32.xlu1 %v7676_v6, %s6584_s25  ;;  %1174 = vrot.lane.b32.xlu0 %v7679_v11, %s6584_s25  ;;  %v7831_v21 = vpop.permute.xlu1 %831  ;;  %v757_v48 = vmul.f32 %v743_v61, %v7026_v45  ;;  %v741_v30 = vsel %vm330_vm1, %v7751_v35, %v7735_v19  ;;  %v756_v28 = vmul.f32 %v738_v53, %v12883_v9 }
 0x149   : > { %4205 = vmatpush1.msra.mxu1 %v805_v31  ;;  %v7836_v60 = vpop.permute.xlu0 %829  ;;  %v692_v45 = vsel %vm281_vm2, %v7694_v0, %v7725_v5  ;;  %v12884_v31 = vld [vmem:[#allocation5_spill] sm:$0xff]  ;;  %v696_v35 = vsel %vm281_vm2, %v7725_v5, %v7694_v0  ;;  %v754_v19 = vmul.f32 %v737_v41, %v7062_v32  ;;  %v753_v29 = vmul.f32 %v741_v30, %v7075_v38  ;;  %v12885_v0 = vld [vmem:[#allocation6_spill] sm:$0xff] }
 0x14a   : > { %4206 = vmatprep.subr.mxu1 %v804_v57  ;;  %v755_v17 = vmul.f32 %v742_v18, %v12884_v31  ;;  %v695_v59 = vsel %vm281_vm2, %v7727_v51, %v7696_v62  ;;  %v712_v5 = vmul.f32 %v692_v45, %v12885_v0  ;;  %v690_v38 = vsel %vm281_vm2, %v7671_v26, %v7711_v14 }
 0x14b   : > { %4207 = vmatpush1.msra.mxu1 %v803_v24  ;;  %v691_v24 = vsel %vm281_vm2, %v7696_v62, %v7727_v51  ;;  %v694_v62 = vsel %vm281_vm2, %v7711_v14, %v7671_v26  ;;  %v12887_v51 = vld [vmem:[#allocation8_spill] sm:$0xff]  ;;  %v689_v61 = vsel %vm281_vm2, %v7673_v27, %v7713_v56  ;;  %v693_v15 = vsel %vm281_vm2, %v7713_v56, %v7673_v27  ;;  %v12889_v14 = vld [vmem:[#allocation10_spill] sm:$0xff] }
 0x14c   : > { %1180 = vrot.lane.b32.xlu1 %v7699_v4, %s6584_s25  ;;  %1178 = vrot.lane.b32.xlu0 %v7702_v3, %s6584_s25  ;;  %v7853_v39 = vpop.permute.xlu1 %835  ;;  %v644_v18 = vsel %vm232_vm3, %v7609_v50, %v7653_v58  ;;  %v648_v27 = vsel %vm232_vm3, %v7653_v58, %v7609_v50  ;;  %v12891_v56 = vld [vmem:[#allocation12_spill] sm:$0xff]  ;;  %v643_v9 = vsel %vm232_vm3, %v7611_v25, %v7655_v16  ;;  %v12893_v58 = vld [vmem:[#allocation14_spill] sm:$0xff] }
 0x14d   : > { %4208 = vmatprep.subr.mxu1 %v802_v63  ;;  %v7861_v49 = vpop.permute.xlu0 %833  ;;  %v711_v63 = vmul.f32 %v696_v35, %v12886_v55  ;;  %v706_v30 = vmul.f32 %v689_v61, %v12891_v56  ;;  %v647_v31 = vsel %vm232_vm3, %v7655_v16, %v7611_v25  ;;  %v642_v35 = vsel %vm232_vm3, %v7546_v33, %v7638_v52  ;;  %v12895_v16 = vld [vmem:[#allocation16_spill] sm:$0xff] }
 0x14e   : > { %4209 = vmatpush1.msra.mxu1 %v801_v12  ;;  %v710_v12 = vmul.f32 %v691_v24, %v12887_v51  ;;  %v646_v25 = vsel %vm232_vm3, %v7638_v52, %v7546_v33  ;;  %v641_v0 = vsel %vm232_vm3, %v7548_v20, %v7640_v22  ;;  %v645_v55 = vsel %vm232_vm3, %v7640_v22, %v7548_v20  ;;  %v12897_v52 = vld [vmem:[#allocation18_spill] sm:$0xff]  ;;  %v12899_v61 = vld [vmem:[#allocation20_spill] sm:$0xff] }
 0x14f   : > { %4210 = vmatprep.subr.mxu1 %v760_v40  ;;  %v12888_v40 = vld [vmem:[#allocation9_spill] sm:$0xff] }
 0x150   : > { %4211 = vmatpush1.msra.mxu1 %v759_v37  ;;  %1184 = vrot.lane.b32.xlu1 %v7716_v13, %s6584_s25  ;;  %v7881_v34 = vpop.permute.xlu1 %839  ;;  %v709_v53 = vmul.f32 %v695_v59, %v12888_v40  ;;  %v708_v37 = vmul.f32 %v690_v38, %v12889_v14  ;;  %v662_v59 = vmul.f32 %v643_v9, %v12895_v16  ;;  %v12901_v9 = vld [vmem:[#allocation23_spill] sm:$0xff] }
 0x151   : > { %1182 = vrot.lane.b32.xlu0 %v7719_v43, %s6584_s25  ;;  %4212 = vmatprep.subr.mxu1 %v758_v7  ;;  %v7889_v57 = vpop.permute.xlu0 %837  ;;  %v12890_v7 = vld [vmem:[#allocation11_spill] sm:$0xff]  ;;  %v658_v40 = vmul.f32 %v641_v0, %v12899_v61 }
 0x152   : > { %4213 = vmatpush1.msra.mxu1 %v757_v48  ;;  %v707_v41 = vmul.f32 %v694_v62, %v12890_v7  ;;  %v12898_v62 = vld [vmem:[#allocation19_spill] sm:$0xff] }
 0x153   : > { %4214 = vmatprep.subr.mxu1 %v756_v28  ;;  %v12892_v28 = vld [vmem:[#allocation13_spill] sm:$0xff]  ;;  %v659_v51 = vmul.f32 %v646_v25, %v12898_v62  ;;  %v12905_v62 = vld [vmem:[#allocation26_spill] sm:$0xff] }
 0x154   : > { %4215 = vmatpush1.msra.mxu1 %v755_v17  ;;  %1228 = vrot.lane.b32.xlu1 %v7658_v10, %s6585_s26  ;;  %v7909_v32 = vpop.permute.xlu1 %875  ;;  %v705_v45 = vmul.f32 %v693_v15, %v12892_v28  ;;  %v664_v17 = vmul.f32 %v644_v18, %v12893_v58  ;;  %v12902_v58 = vld [vmem:[#allocation22_spill] sm:$0xff] }
 0x155   : > { %1226 = vrot.lane.b32.xlu0 %v7661_v36, %s6585_s26  ;;  %4216 = vmatprep.subr.mxu1 %v754_v19  ;;  %v7917_v44 = vpop.permute.xlu0 %873  ;;  %v12894_v19 = vld [vmem:[#allocation15_spill] sm:$0xff] }
 0x156   : > { %4217 = vmatpush1.msra.mxu1 %v753_v29  ;;  %v663_v24 = vmul.f32 %v648_v27, %v12894_v19 }
 0x157   : > { %4218 = vmatprep.subr.mxu1 %v712_v5  ;;  %v12896_v5 = vld [vmem:[#allocation17_spill] sm:$0xff] }
 0x158   : > { %4219 = vmatpush1.msra.mxu1 %v711_v63  ;;  %1232 = vrot.lane.b32.xlu1 %v7676_v6, %s6585_s26  ;;  %v7937_v26 = vpop.permute.xlu1 %879  ;;  %v661_v38 = vmul.f32 %v647_v31, %v12896_v5  ;;  %v660_v63 = vmul.f32 %v642_v35, %v12897_v52 }
 0x159   : > { %1230 = vrot.lane.b32.xlu0 %v7679_v11, %s6585_s26  ;;  %4220 = vmatprep.subr.mxu1 %v710_v12  ;;  %v7945_v48 = vpop.permute.xlu0 %877 }
 0x15a   : > { %4221 = vmatpush1.msra.mxu1 %v709_v53  ;;  %v12900_v53 = vld [vmem:[#allocation21_spill] sm:$0xff] }
 0x15b   : > { %4222 = vmatprep.subr.mxu1 %v708_v37  ;;  %v657_v15 = vmul.f32 %v645_v55, %v12900_v53  ;;  %v12904_v55 = vld [vmem:[#allocation25_spill] sm:$0xff] }
 0x15c   : > { %4223 = vmatpush1.msra.mxu1 %v707_v41  ;;  %1236 = vrot.lane.b32.xlu1 %v7699_v4, %s6585_s26  ;;  %v7965_v50 = vpop.permute.xlu1 %883 }
 0x15d   : > { %1234 = vrot.lane.b32.xlu0 %v7702_v3, %s6585_s26  ;;  %4224 = vmatprep.subr.mxu1 %v706_v30  ;;  %v7973_v29 = vpop.permute.xlu0 %881 }
 0x15e   : > { %4225 = vmatpush1.msra.mxu1 %v705_v45 }
 0x15f   : > { %4226 = vmatprep.subr.mxu1 %v664_v17 }
 0x160   : > { %4227 = vmatpush1.msra.mxu1 %v663_v24  ;;  %1240 = vrot.lane.b32.xlu1 %v7716_v13, %s6585_s26  ;;  %v888_v33 = vpop.permute.xlu1 %887 }
 0x161   : > { %1238 = vrot.lane.b32.xlu0 %v7719_v43, %s6585_s26  ;;  %4228 = vmatprep.subr.mxu1 %v662_v59  ;;  %v886_v12 = vpop.permute.xlu0 %885  ;;  %v12903_v59 = vld [vmem:[#allocation24_spill] sm:$0xff] }
 0x162   : > { %4229 = vmatpush1.msra.mxu1 %v661_v38 }
 0x163   : > { %4230 = vmatprep.subr.mxu1 %v660_v63  ;;  %v896_v63 = vsel %vm485_vm5, %v888_v33, %v7937_v26 }
 0x164   : > { %4231 = vmatpush1.msra.mxu1 %v659_v51  ;;  %1276 = vrot.lane.b32.xlu1 %v7658_v10, %s6586_s27  ;;  %v924_v20 = vpop.permute.xlu1 %923  ;;  %v892_v51 = vsel %vm485_vm5, %v7937_v26, %v888_v33  ;;  %v891_v26 = vsel %vm485_vm5, %v7945_v48, %v886_v12  ;;  %v12908_v33 = vld [vmem:[#allocation29_spill] sm:$0xff] }
 0x165   : > { %1274 = vrot.lane.b32.xlu0 %v7661_v36, %s6586_s27  ;;  %4232 = vmatprep.subr.mxu1 %v658_v40  ;;  %v922_v22 = vpop.permute.xlu0 %921  ;;  %v12906_v40 = vld [vmem:[#allocation27_spill] sm:$0xff] }
 0x166   : > { %4233 = vmatpush1.msra.mxu1 %v657_v15  ;;  %v895_v15 = vsel %vm485_vm5, %v886_v12, %v7945_v48  ;;  %v890_v48 = vsel %vm485_vm5, %v7909_v32, %v7965_v50  ;;  %v12910_v12 = vld [vmem:[#allocation31_spill] sm:$0xff] }
 0x168   : > { %1280 = vrot.lane.b32.xlu1 %v7676_v6, %s6586_s27  ;;  %v928_v14 = vpop.permute.xlu1 %927 }
 0x169   : > { %1278 = vrot.lane.b32.xlu0 %v7679_v11, %s6586_s27  ;;  %v926_v37 = vpop.permute.xlu0 %925 }
 0x16c   : > { %1284 = vrot.lane.b32.xlu1 %v7699_v4, %s6586_s27  ;;  %v932_v18 = vpop.permute.xlu1 %931 }
 0x16d   : > { %1282 = vrot.lane.b32.xlu0 %v7702_v3, %s6586_s27  ;;  %v930_v7 = vpop.permute.xlu0 %929  ;;  %v942_v35 = vsel %vm534_vm4, %v932_v18, %v924_v20  ;;  %v938_v19 = vsel %vm534_vm4, %v924_v20, %v932_v18  ;;  %v12907_v20 = vld [vmem:[#allocation28_spill] sm:$0xff]  ;;  %v912_v18 = vmul.f32 %v896_v63, %v12908_v33  ;;  %v12919_v33 = vld [vmem:[#allocation38_spill] sm:$0xff] }
 0x16e   : > { %v941_v16 = vsel %vm534_vm4, %v930_v7, %v922_v22  ;;  %v937_v38 = vsel %vm534_vm4, %v922_v22, %v930_v7  ;;  %v956_v52 = vmul.f32 %v942_v35, %v12904_v55  ;;  %v8071_v7 = vld [vmem:[%s12704_s1 + $0x18] sm:$0xff] }
 0x16f   : > { %v954_v53 = vmul.f32 %v941_v16, %v12906_v40  ;;  %v953_v22 = vmul.f32 %v937_v38, %v12907_v20  ;;  %v12913_v16 = vld [vmem:[#allocation34_spill] sm:$0xff]  ;;  %v12915_v38 = vld [vmem:[#allocation40_spill] sm:$0xff]  ;;  %v843_v20 = vsel %vm436_vm6, %v7836_v60, %v7889_v57 }
 0x170   : > { %1288 = vrot.lane.b32.xlu1 %v7716_v13, %s6586_s27  ;;  %v936_v41 = vpop.permute.xlu1 %935 }
 0x171   : > { %1286 = vrot.lane.b32.xlu0 %v7719_v43, %s6586_s27  ;;  %v940_v27 = vsel %vm534_vm4, %v928_v14, %v936_v41  ;;  %v944_v56 = vsel %vm534_vm4, %v936_v41, %v928_v14  ;;  %v934_v30 = vpop.permute.xlu0 %933  ;;  %v894_v41 = vsel %vm485_vm5, %v7965_v50, %v7909_v32  ;;  %v844_v32 = vsel %vm436_vm6, %v7831_v21, %v7881_v34 }
 0x172   : > { %v959_v28 = vmul.f32 %v940_v27, %v12901_v9  ;;  %v939_v45 = vsel %vm534_vm4, %v926_v37, %v934_v30  ;;  %v943_v31 = vsel %vm534_vm4, %v934_v30, %v926_v37  ;;  %v960_v17 = vmul.f32 %v944_v56, %v12902_v58  ;;  %v8061_v37 = vld [vmem:[%s12704_s1 + $0x20] sm:$0xff]  ;;  %v12909_v27 = vld [vmem:[#allocation30_spill] sm:$0xff] }
 0x173   : > { %v958_v25 = vmul.f32 %v943_v31, %v7311_v54  ;;  %v957_v0 = vmul.f32 %v939_v45, %v12903_v59  ;;  %v955_v54 = vmul.f32 %v938_v19, %v12905_v62  ;;  %4094 = vmatprep.mubr.f32.mxu0 %v8061_v37  ;;  %v911_v56 = vmul.f32 %v892_v51, %v12909_v27  ;;  %v8105_v19 = vld [vmem:[%s12704_s1 + $0x38] sm:$0xff] }
 0x174   : > { %1324 = vrot.lane.b32.xlu1 %v7658_v10, %s6587_s28  ;;  %v8031_v24 = vpop.permute.xlu1 %971  ;;  %4234 = vmatprep.subr.mxu1 %v960_v17  ;;  %v910_v30 = vmul.f32 %v895_v15, %v12910_v12  ;;  %v893_v9 = vsel %vm485_vm5, %v7973_v29, %v7917_v44  ;;  %v889_v50 = vsel %vm485_vm5, %v7917_v44, %v7973_v29  ;;  %v12912_v17 = vld [vmem:[#allocation33_spill] sm:$0xff]  ;;  %v12914_v29 = vld [vmem:[#allocation35_spill] sm:$0xff] }
 0x175   : > { %1322 = vrot.lane.b32.xlu0 %v7661_v36, %s6587_s28  ;;  %v8037_v5 = vpop.permute.xlu0 %969  ;;  %4235 = vmatpush2.msra.mxu1 %v959_v28  ;;  %v12911_v28 = vld [vmem:[#allocation32_spill] sm:$0xff]  ;;  %v908_v35 = vmul.f32 %v894_v41, %v12912_v17  ;;  %v907_v59 = vmul.f32 %v890_v48, %v12913_v16  ;;  %v842_v44 = vsel %vm436_vm6, %v7810_v46, %v7853_v39  ;;  %v12922_v48 = vld [vmem:[#allocation47_spill] sm:$0xff]  ;;  %v12926_v17 = vld [vmem:[#allocation46_spill] sm:$0xff] }
 0x176   : > { %4236 = vmatprep.subr.mxu1 %v958_v25  ;;  %v909_v45 = vmul.f32 %v891_v26, %v12911_v28  ;;  %4095 = vmatmul.mubr.f32.gmra.mxu0 %v8071_v7  ;;  %v848_v25 = vsel %vm436_vm6, %v7881_v34, %v7831_v21  ;;  %v863_v55 = vmul.f32 %v844_v32, %v12915_v38  ;;  %v12916_v34 = vld [vmem:[#allocation36_spill] sm:$0xff]  ;;  %v12923_v12 = vld [vmem:[#allocation43_spill] sm:$0xff]  ;;  %v12925_v32 = vld [vmem:[#allocation45_spill] sm:$0xff] }
 0x177   : > { %4237 = vmatpush2.msra.mxu1 %v957_v0  ;;  %v906_v0 = vmul.f32 %v893_v9, %v12914_v29  ;;  %v847_v21 = vsel %vm436_vm6, %v7889_v57, %v7836_v60  ;;  %4100 = vmatprep.mubr.f32.mxu0 %v8105_v19  ;;  %v12920_v60 = vld [vmem:[#allocation41_spill] sm:$0xff]  ;;  %v845_v9 = vsel %vm436_vm6, %v7861_v49, %v7817_v8  ;;  %v12924_v28 = vld [vmem:[#allocation44_spill] sm:$0xff] }
 0x178   : > { %1328 = vrot.lane.b32.xlu1 %v7676_v6, %s6587_s28  ;;  %v976_v61 = vpop.permute.xlu1 %975  ;;  %4238 = vmatprep.subr.mxu1 %v956_v52  ;;  %v905_v52 = vmul.f32 %v889_v50, %v12916_v34  ;;  %v862_v57 = vmul.f32 %v847_v21, %v12920_v60  ;;  %v8214_v34 = vld [vmem:[%s6632_s21 + $0xd0] sm:$0xff]  ;;  %v8263_v60 = vld [vmem:[%s6632_s21 + $0xd8] sm:$0xff] }
 0x179   : > { %1326 = vrot.lane.b32.xlu0 %v7679_v11, %s6587_s28  ;;  %v974_v14 = vpop.permute.xlu0 %973  ;;  %4239 = vmatpush2.msra.mxu1 %v955_v54 }
 0x17a   : > { %4240 = vmatprep.subr.mxu1 %v954_v53  ;;  %v12917_v53 = vld [vmem:[#allocation37_spill] sm:$0xff] }
 0x17b   : > { %4241 = vmatpush2.msra.mxu1 %v953_v22  ;;  %v864_v15 = vmul.f32 %v848_v25, %v12917_v53  ;;  %v12918_v22 = vld [vmem:[#allocation39_spill] sm:$0xff]  ;;  %v12927_v25 = vld [vmem:[#allocation48_spill] sm:$0xff] }
 0x17c   : > { %1332 = vrot.lane.b32.xlu1 %v7699_v4, %s6587_s28  ;;  %4242 = vmatprep.subr.mxu1 %v912_v18  ;;  %v8238_v53 = vld [vmem:[%s12704_s1 + $0x48] sm:$0xff] }
 0x17d   : > { %1330 = vrot.lane.b32.xlu0 %v7702_v3, %s6587_s28  ;;  %4243 = vmatpush2.msra.mxu1 %v911_v56 }
 0x17e   : > { %v980_v31 = vpop.permute.xlu1 %979  ;;  %v978_v58 = vpop.permute.xlu0 %977  ;;  %4244 = vmatprep.subr.mxu1 %v910_v30  ;;  %v861_v30 = vmul.f32 %v843_v20, %v12923_v12  ;;  %v6482_v20 = vld [vmem:[%s6632_s21 + $0x50] sm:$0xff] }
 0x17f   : > { %4245 = vmatpush2.msra.mxu1 %v909_v45  ;;  %v985_v16 = vsel %vm583_vm7, %v8037_v5, %v978_v58 }
 0x180   : > { %1336 = vrot.lane.b32.xlu1 %v7716_v13, %s6587_s28  ;;  %4246 = vmatprep.subr.mxu1 %v908_v35 }
 0x181   : > { %1334 = vrot.lane.b32.xlu0 %v7719_v43, %s6587_s28  ;;  %4247 = vmatpush2.msra.mxu1 %v907_v59 }
 0x182   : > { %v984_v63 = vpop.permute.xlu1 %983  ;;  %v982_v62 = vpop.permute.xlu0 %981  ;;  %4248 = vmatprep.subr.mxu1 %v906_v0  ;;  %v12930_v0 = vld [vmem:[#allocation50_spill] sm:$0xff] }
 0x183   : > { %v988_v54 = vsel %vm583_vm7, %v976_v61, %v984_v63  ;;  %v992_v51 = vsel %vm583_vm7, %v984_v63, %v976_v61  ;;  %v991_v40 = vsel %vm583_vm7, %v982_v62, %v974_v14  ;;  %4249 = vmatpush2.msra.mxu1 %v905_v52  ;;  %v846_v61 = vsel %vm436_vm6, %v7853_v39, %v7810_v46  ;;  %v12921_v46 = vld [vmem:[#allocation42_spill] sm:$0xff]  ;;  %v6478_v52 = vld [vmem:[%s6632_s21 + $0x70] sm:$0xff] }
 0x184   : > { %v1007_v26 = vmul.f32 %v988_v54, %v12918_v22  ;;  %1372 = vrot.lane.b32.xlu1 %v7658_v10, %s6588_s29  ;;  %v1008_v18 = vmul.f32 %v992_v51, %v12919_v33  ;;  %v987_v41 = vsel %vm583_vm7, %v974_v14, %v982_v62  ;;  %4250 = vmatprep.subr.mxu1 %v864_v15  ;;  %v8222_v54 = vld [vmem:[%s6632_s21 + $0xc0] sm:$0xff]  ;;  %v6479_v51 = vld [vmem:[%s6632_s21 + $0x68] sm:$0xff]  ;;  %v8243_v15 = vld [vmem:[%s6632_s21 + $0xf0] sm:$0xff] }
 0x185   : > { %1370 = vrot.lane.b32.xlu0 %v7661_v36, %s6588_s29  ;;  %v990_v10 = vsel %vm583_vm7, %v980_v31, %v8031_v24  ;;  %4251 = vmatpush2.msra.mxu1 %v863_v55  ;;  %v1006_v39 = vmul.f32 %v991_v40, %v12921_v46  ;;  %v859_v14 = vmul.f32 %v842_v44, %v12922_v48  ;;  %v12929_v44 = vld [vmem:[#allocation51_spill] sm:$0xff]  ;;  %v6481_v40 = vld [vmem:[%s6632_s21 + $0x58] sm:$0xff]  ;;  %v8271_v46 = vld [vmem:[%s6632_s21 + $0xc8] sm:$0xff] }
 0x186   : > { %v8155_v27 = vpop.permute.xlu1 %1028  ;;  %4315 = vmatprep.subr.mxu0 %v1008_v18  ;;  %v8157_v56 = vpop.permute.xlu0 %1026  ;;  %v986_v36 = vsel %vm583_vm7, %v8031_v24, %v980_v31  ;;  %4252 = vmatprep.subr.mxu1 %v862_v57  ;;  %v1005_v45 = vmul.f32 %v987_v41, %v12924_v28  ;;  %v860_v50 = vmul.f32 %v846_v61, %v12925_v32  ;;  %v8251_v33 = vld [vmem:[%s6632_s21 + $0xe0] sm:$0xff]  ;;  %v6483_v18 = vld [vmem:[%s6632_s21 + $0x48] sm:$0xff]  ;;  %v12932_v41 = vld [vmem:[#allocation54_spill] sm:$0xff] }
 0x187   : > { %4316 = vmatpush1.msra.mxu0 %v1007_v26  ;;  %v841_v24 = vsel %vm436_vm6, %v7817_v8, %v7861_v49  ;;  %v989_v31 = vsel %vm583_vm7, %v978_v58, %v8037_v5  ;;  %4253 = vmatpush2.msra.mxu1 %v861_v30  ;;  %v1004_v35 = vmul.f32 %v990_v10, %v12926_v17  ;;  %v12928_v49 = vld [vmem:[#allocation49_spill] sm:$0xff]  ;;  %v12931_v58 = vld [vmem:[#allocation52_spill] sm:$0xff]  ;;  %v6484_v61 = vld [vmem:[%s6632_s21 + $0x40] sm:$0xff] }
 0x188   : > { %1376 = vrot.lane.b32.xlu1 %v7676_v6, %s6588_s29  ;;  %4317 = vmatprep.subr.mxu0 %v1006_v39  ;;  %v1003_v6 = vmul.f32 %v986_v36, %v12927_v25  ;;  %v857_v29 = vmul.f32 %v841_v24, %v12929_v44  ;;  %v1002_v5 = vmul.f32 %v989_v31, %v12930_v0  ;;  %v12933_v39 = vld [vmem:[#allocation53_spill] sm:$0xff]  ;;  %v8282_v48 = vld [vmem:[%s6632_s21 + $0xf8] sm:$0xff]  ;;  %v12934_v30 = vld [vmem:[#allocation55_spill] sm:$0xff] }
 0x189   : > { %1374 = vrot.lane.b32.xlu0 %v7679_v11, %s6588_s29  ;;  %4318 = vmatpush1.msra.mxu0 %v1005_v45  ;;  %v858_v11 = vmul.f32 %v845_v9, %v12928_v49  ;;  %v1001_v38 = vmul.f32 %v985_v16, %v12931_v58  ;;  %v8366_v16 = vld [vmem:[%s12706_s3 + $0xf8] sm:$0xff]  ;;  %v8375_v0 = vld [vmem:[%s12706_s3 + $0xe8] sm:$0xff]  ;;  %v8381_v58 = vld [vmem:[%s12706_s3 + $0xe0] sm:$0xff] }
 0x18a   : > { %v8187_v59 = vpop.permute.xlu1 %1032  ;;  %4254 = vmatprep.subr.mxu1 %v860_v50  ;;  %v8189_v8 = vpop.permute.xlu0 %1030  ;;  %4319 = vmatprep.subr.mxu0 %v1004_v35 }
 0x18b   : > { %4255 = vmatpush2.msra.mxu1 %v859_v14  ;;  %4320 = vmatpush1.msra.mxu0 %v1003_v6  ;;  %v8361_v6 = vld [vmem:[%s12706_s3 + $0xf0] sm:$0xff] }
 0x18c   : > { %1380 = vrot.lane.b32.xlu1 %v7699_v4, %s6588_s29  ;;  %4256 = vmatprep.subr.mxu1 %v858_v11  ;;  %v8206_v4 = vld [vmem:[%s12704_s1 + $0x30] sm:$0xff] }
 0x18d   : > { %1378 = vrot.lane.b32.xlu0 %v7702_v3, %s6588_s29  ;;  %4321 = vmatprep.subr.mxu0 %v1002_v5  ;;  %v6477_v3 = vld [vmem:[%s6632_s21 + $0x78] sm:$0xff] }
 0x18e   : > { %4257 = vmatpush2.msra.mxu1 %v857_v29  ;;  %v8199_v55 = vpop.permute.xlu1 %1036  ;;  %v8201_v21 = vpop.permute.xlu0 %1034  ;;  %4322 = vmatpush1.msra.mxu0 %v1001_v38 }
 0x18f   : > { %4258 = vmatprep.subr.mxu1 %v6477_v3  ;;  %4101 = vmatmul.mubr.f32.gmra.mxu0 %v8206_v4 }
 0x190   : > { %1384 = vrot.lane.b32.xlu1 %v7716_v13, %s6588_s29  ;;  %4259 = vmatpush2.msra.mxu1 %v6478_v52  ;;  %v6480_v13 = vld [vmem:[%s6632_s21 + $0x60] sm:$0xff] }
 0x191   : > { %1382 = vrot.lane.b32.xlu0 %v7719_v43, %s6588_s29  ;;  %4260 = vmatprep.subr.mxu1 %v6479_v51  ;;  %v8230_v43 = vld [vmem:[%s12704_s1 + $0x50] sm:$0xff] }
 0x192   : > { %v8217_v63 = vpop.permute.xlu1 %1040  ;;  %v8219_v62 = vpop.permute.xlu0 %1038  ;;  %4261 = vmatpush2.msra.mxu1 %v6480_v13  ;;  %4106 = vmatprep.mubr.f32.mxu0 %v8230_v43  ;;  %v8397_v13 = vld [vmem:[%s12706_s3 + $0xd8] sm:$0xff] }
 0x193   : > { %4262 = vmatprep.subr.mxu1 %v6481_v40  ;;  %4107 = vmatmul.mubr.f32.gmra.mxu0 %v8238_v53  ;;  %v8402_v40 = vld [vmem:[%s12706_s3 + $0xd0] sm:$0xff] }
 0x194   : > { %1429 = vrot.lane.b32.xlu1 %v8214_v34, %s6581_s22  ;;  %4263 = vmatpush2.msra.mxu1 %v6482_v20 }
 0x195   : > { %1427 = vrot.lane.b32.xlu0 %v8222_v54, %s6581_s22  ;;  %4264 = vmatprep.subr.mxu1 %v6483_v18 }
 0x196   : > { %v8246_v22 = vpop.permute.xlu1 %1076  ;;  %v8248_v26 = vpop.permute.xlu0 %1074  ;;  %4265 = vmatpush2.msra.mxu1 %v6484_v61  ;;  %4355 = vmatprep.mubr.f32.mxu0 %v12879_v2 }
 0x197   : > { %4267 = vmatmul.mubr.f32.vlgmr.msra.gmra.mxu1 %v12932_v41  ;;  %6184 = vmatmul.mubr.msk.f32.vlgmr.msra.gmra.mxu0 %vm4011_vm8, %v12933_v39 }
 0x198   : > { %1433 = vrot.lane.b32.xlu1 %v8243_v15, %s6581_s22  ;;  %4272 = vmatprep.mubr.f32.mxu1 %v8061_v37  ;;  %v8290_v37 = vld [vmem:[%s6632_s21 + $0xe8] sm:$0xff] }
 0x199   : > { %1431 = vrot.lane.b32.xlu0 %v8251_v33, %s6581_s22  ;;  %4361 = vmatprep.mubr.f32.mxu0 %v12879_v2 }
 0x19a   : > { %v8266_v57 = vpop.permute.xlu1 %1080  ;;  %v8268_v10 = vpop.permute.xlu0 %1078 }
 0x19b   : > { %4273 = vmatmul.mubr.f32.gmra.mxu1 %v8071_v7  ;;  %6185 = vmatmul.mubr.msk.f32.gmra.mxu0 %vm4011_vm8, %v12934_v30 }
 0x19c   : > { %1437 = vrot.lane.b32.xlu1 %v8263_v60, %s6581_s22  ;;  %4278 = vmatprep.mubr.f32.mxu1 %v8105_v19 }
 0x19d   : > { %1435 = vrot.lane.b32.xlu0 %v8271_v46, %s6581_s22  ;;  %4367 = vmatprep.mubr.f32.mxu0 %v12879_v2 }
 0x19e   : > { %v8285_v14 = vpop.permute.xlu1 %1084  ;;  %v8287_v12 = vpop.permute.xlu0 %1082 }
 0x19f   : > { %4279 = vmatmul.mubr.f32.gmra.mxu1 %v8206_v4  ;;  %6186 = vmatmul.mubr.msk.f32.gmra.mxu0 %vm4011_vm8, %v7784_v1 }
 0x1a0   : > { %1441 = vrot.lane.b32.xlu1 %v8282_v48, %s6581_s22  ;;  %4373 = vmatprep.mubr.f32.mxu0 %v12879_v2 }
 0x1a1   : > { %1439 = vrot.lane.b32.xlu0 %v8290_v37, %s6581_s22  ;;  %4284 = vmatprep.mubr.f32.mxu1 %v8230_v43 }
 0x1a2   : > { %v8300_v7 = vpop.permute.xlu1 %1088  ;;  %v8302_v36 = vpop.permute.xlu0 %1086 }
 0x1a3   : > { %6187 = vmatmul.mubr.msk.f32.gmra.mxu0 %vm4011_vm8, %v7806_v42  ;;  %4285 = vmatmul.mubr.f32.gmra.mxu1 %v8238_v53 }
 0x1a4   : > { %1477 = vrot.lane.b32.xlu1 %v8214_v34, %s6582_s23  ;;  %4533 = vmatprep.mubr.f32.mxu0 %v12879_v2 }
 0x1a5   : > { %1475 = vrot.lane.b32.xlu0 %v8222_v54, %s6582_s23  ;;  %4444 = vmatprep.mubr.f32.mxu1 %v7645_v23 }
 0x1a6   : > { %v8312_v19 = vpop.permute.xlu1 %1124  ;;  %v8314_v9 = vpop.permute.xlu0 %1122 }
 0x1a8   : > { %1481 = vrot.lane.b32.xlu1 %v8243_v15, %s6582_s23 }
 0x1a9   : > { %1479 = vrot.lane.b32.xlu0 %v8251_v33, %s6582_s23 }
 0x1aa   : > { %v1129_v1 = vpop.permute.xlu1 %1128  ;;  %v8326_v28 = vpop.permute.xlu0 %1126 }
 0x1ac   : > { %1485 = vrot.lane.b32.xlu1 %v8263_v60, %s6582_s23 }
 0x1ad   : > { %1483 = vrot.lane.b32.xlu0 %v8271_v46, %s6582_s23 }
 0x1ae   : > { %v8332_v42 = vpop.permute.xlu1 %1132  ;;  %v8334_v45 = vpop.permute.xlu0 %1130 }
 0x1b0   : > { %1489 = vrot.lane.b32.xlu1 %v8282_v48, %s6582_s23 }
 0x1b1   : > { %1487 = vrot.lane.b32.xlu0 %v8290_v37, %s6582_s23 }
 0x1b2   : > { %v1137_v23 = vpop.permute.xlu1 %1136  ;;  %v8340_v32 = vpop.permute.xlu0 %1134 }
 0x1b4   : > { %1525 = vrot.lane.b32.xlu1 %v8214_v34, %s6583_s24 }
 0x1b5   : > { %1523 = vrot.lane.b32.xlu0 %v8222_v54, %s6583_s24 }
 0x1b6   : > { %v1173_v50 = vpop.permute.xlu1 %1172  ;;  %v1171_v24 = vpop.permute.xlu0 %1170 }
 0x1b8   : > { %1529 = vrot.lane.b32.xlu1 %v8243_v15, %s6583_s24 }
 0x1b9   : > { %1527 = vrot.lane.b32.xlu0 %v8251_v33, %s6583_s24 }
 0x1ba   : > { %v1177_v31 = vpop.permute.xlu1 %1176  ;;  %v1175_v17 = vpop.permute.xlu0 %1174 }
 0x1bc   : > { %1533 = vrot.lane.b32.xlu1 %v8263_v60, %s6583_s24 }
 0x1bd   : > { %1531 = vrot.lane.b32.xlu0 %v8271_v46, %s6583_s24 }
 0x1be   : > { %v1181_v35 = vpop.permute.xlu1 %1180  ;;  %v1179_v25 = vpop.permute.xlu0 %1178 }
 0x1bf   : > { %v1187_v51 = vsel %vm379_vm0, %v1173_v50, %v1181_v35  ;;  %v1191_v20 = vsel %vm379_vm0, %v1181_v35, %v1173_v50  ;;  %v1186_v41 = vsel %vm379_vm0, %v1171_v24, %v1179_v25  ;;  %v8422_v50 = vld [vmem:[%s12706_s3 + $0xc0] sm:$0xff] }
 0x1c0   : > { %1537 = vrot.lane.b32.xlu1 %v8282_v48, %s6583_s24  ;;  %v1205_v35 = vmul.f32 %v8397_v13, %v1187_v51  ;;  %v8459_v51 = vld [vmem:[%s12706_s3 + $0xa8] sm:$0xff] }
 0x1c1   : > { %1535 = vrot.lane.b32.xlu0 %v8290_v37, %s6583_s24 }
 0x1c2   : > { %v1185_v49 = vpop.permute.xlu1 %1184 }
 0x1c3   : > { %v1189_v11 = vsel %vm379_vm0, %v1177_v31, %v1185_v49  ;;  %v1193_v44 = vsel %vm379_vm0, %v1185_v49, %v1177_v31  ;;  %v1183_v29 = vpop.permute.xlu0 %1182  ;;  %v8417_v31 = vld [vmem:[%s12706_s3 + $0xc8] sm:$0xff]  ;;  %v1141_v49 = vsel %vm330_vm1, %v1129_v1, %v1137_v23 }
 0x1c4   : > { %v1208_v5 = vmul.f32 %v8361_v6, %v1193_v44  ;;  %v1188_v38 = vsel %vm379_vm0, %v1175_v17, %v1183_v29  ;;  %v1192_v3 = vsel %vm379_vm0, %v1183_v29, %v1175_v17  ;;  %1573 = vrot.lane.b32.xlu1 %v8214_v34, %s6584_s25  ;;  %v1209_v52 = vmul.f32 %v8366_v16, %v1189_v11  ;;  %v8437_v44 = vld [vmem:[%s12706_s3 + $0xb8] sm:$0xff] }
 0x1c5   : > { %1571 = vrot.lane.b32.xlu0 %v8222_v54, %s6584_s25  ;;  %v1207_v61 = vmul.f32 %v8375_v0, %v1188_v38  ;;  %v1206_v39 = vmul.f32 %v8381_v58, %v1192_v3  ;;  %v1190_v17 = vsel %vm379_vm0, %v1179_v25, %v1171_v24  ;;  %v1204_v11 = vmul.f32 %v8402_v40, %v1191_v20  ;;  %v8442_v24 = vld [vmem:[%s12706_s3 + $0xb0] sm:$0xff] }
 0x1c6   : > { %v8406_v18 = vpop.permute.xlu1 %1228  ;;  %4380 = vmatprep.subr.mxu1 %v1209_v52  ;;  %v1145_v25 = vsel %vm330_vm1, %v1137_v23, %v1129_v1  ;;  %v1140_v38 = vsel %vm330_vm1, %v8326_v28, %v8340_v32  ;;  %v1202_v3 = vmul.f32 %v8422_v50, %v1190_v17  ;;  %v8464_v1 = vld [vmem:[%s12706_s3 + $0xa0] sm:$0xff]  ;;  %v1144_v23 = vsel %vm330_vm1, %v8340_v32, %v8326_v28  ;;  %v8483_v28 = vld [vmem:[%s12706_s3 + $0x98] sm:$0xff]  ;;  %v8488_v32 = vld [vmem:[%s12706_s3 + $0x90] sm:$0xff] }
 0x1c7   : > { %v8412_v30 = vpop.permute.xlu0 %1226  ;;  %4381 = vmatpush1.msra.mxu1 %v1208_v5  ;;  %v1203_v5 = vmul.f32 %v8417_v31, %v1186_v41  ;;  %v1161_v20 = vmul.f32 %v8437_v44, %v1141_v49  ;;  %v1160_v41 = vmul.f32 %v8442_v24, %v1145_v25  ;;  %12935 = vst [vmem:[#allocation3_spill] sm:$0xff] %v8488_v32 }
 0x1c8   : > { %1577 = vrot.lane.b32.xlu1 %v8243_v15, %s6584_s25  ;;  %4382 = vmatprep.subr.mxu1 %v1207_v61  ;;  %v1139_v61 = vsel %vm330_vm1, %v8312_v19, %v8332_v42  ;;  %v1138_v49 = vsel %vm330_vm1, %v8314_v9, %v8334_v45 }
 0x1c9   : > { %1575 = vrot.lane.b32.xlu0 %v8251_v33, %s6584_s25  ;;  %4383 = vmatpush1.msra.mxu1 %v1206_v39  ;;  %v1143_v39 = vsel %vm330_vm1, %v8332_v42, %v8312_v19  ;;  %v8512_v19 = vld [vmem:[%s12706_s3 + $0x80] sm:$0xff]  ;;  %v1142_v42 = vsel %vm330_vm1, %v8334_v45, %v8314_v9  ;;  %v8531_v9 = vld [vmem:[%s12706_s3 + $0x78] sm:$0xff]  ;;  %v8536_v45 = vld [vmem:[%s12706_s3 + $0x70] sm:$0xff] }
 0x1ca   : > { %v8446_v29 = vpop.permute.xlu1 %1232  ;;  %4384 = vmatprep.subr.mxu1 %v1205_v35  ;;  %v1159_v35 = vmul.f32 %v8459_v51, %v1140_v38  ;;  %v1157_v38 = vmul.f32 %v8483_v28, %v1139_v61  ;;  %12936 = vst [vmem:[#allocation4_spill] sm:$0xff] %v8531_v9  ;;  %12937 = vst [vmem:[#allocation5_spill] sm:$0xff] %v8536_v45 }
 0x1cb   : > { %v8454_v52 = vpop.permute.xlu0 %1230  ;;  %4385 = vmatpush1.msra.mxu1 %v1204_v11  ;;  %v1158_v11 = vmul.f32 %v8464_v1, %v1144_v23  ;;  %v1156_v23 = vmul.f32 %v8488_v32, %v1143_v39  ;;  %v1092_v39 = vsel %vm281_vm2, %v8268_v10, %v8302_v36  ;;  %v8555_v32 = vld [vmem:[%s12706_s3 + $0x68] sm:$0xff] }
 0x1cc   : > { %1581 = vrot.lane.b32.xlu1 %v8263_v60, %s6584_s25  ;;  %4386 = vmatprep.subr.mxu1 %v1203_v5  ;;  %v8507_v5 = vld [vmem:[%s12706_s3 + $0x88] sm:$0xff]  ;;  %12938 = vst [vmem:[#allocation6_spill] sm:$0xff] %v8555_v32 }
 0x1cd   : > { %1579 = vrot.lane.b32.xlu0 %v8271_v46, %s6584_s25  ;;  %4387 = vmatpush1.msra.mxu1 %v1202_v3  ;;  %v1093_v3 = vsel %vm281_vm2, %v8266_v57, %v8300_v7 }
 0x1ce   : > { %v8494_v17 = vpop.permute.xlu1 %1236  ;;  %4388 = vmatprep.subr.mxu1 %v1161_v20  ;;  %v1097_v20 = vsel %vm281_vm2, %v8300_v7, %v8266_v57  ;;  %v8560_v57 = vld [vmem:[%s12706_s3 + $0x60] sm:$0xff]  ;;  %v1096_v7 = vsel %vm281_vm2, %v8302_v36, %v8268_v10  ;;  %v8579_v10 = vld [vmem:[%s12706_s3 + $0x58] sm:$0xff]  ;;  %v8584_v36 = vld [vmem:[%s12706_s3 + $0x50] sm:$0xff] }
 0x1cf   : > { %v8502_v25 = vpop.permute.xlu0 %1234  ;;  %4389 = vmatpush1.msra.mxu1 %v1160_v41  ;;  %v1155_v41 = vmul.f32 %v8507_v5, %v1138_v49  ;;  %12939 = vst [vmem:[#allocation7_spill] sm:$0xff] %v8560_v57  ;;  %v1113_v49 = vmul.f32 %v8531_v9, %v1093_v3  ;;  %12940 = vst [vmem:[#allocation8_spill] sm:$0xff] %v8579_v10  ;;  %v1095_v3 = vsel %vm281_vm2, %v8285_v14, %v8246_v22  ;;  %v8603_v9 = vld [vmem:[%s12706_s3 + $0x48] sm:$0xff] }
 0x1d0   : > { %1585 = vrot.lane.b32.xlu1 %v8282_v48, %s6584_s25  ;;  %4390 = vmatprep.subr.mxu1 %v1159_v35  ;;  %v1154_v35 = vmul.f32 %v8512_v19, %v1142_v42  ;;  %v1091_v42 = vsel %vm281_vm2, %v8246_v22, %v8285_v14  ;;  %12941 = vst [vmem:[#allocation9_spill] sm:$0xff] %v8584_v36  ;;  %12942 = vst [vmem:[#allocation10_spill] sm:$0xff] %v8603_v9  ;;  %v8608_v22 = vld [vmem:[%s12706_s3 + $0x40] sm:$0xff] }
 0x1d1   : > { %1583 = vrot.lane.b32.xlu0 %v8290_v37, %s6584_s25  ;;  %4391 = vmatpush1.msra.mxu1 %v1158_v11  ;;  %12943 = vst [vmem:[#allocation11_spill] sm:$0xff] %v8608_v22  ;;  %v1094_v14 = vsel %vm281_vm2, %v8287_v12, %v8248_v26 }
 0x1d2   : > { %v8542_v61 = vpop.permute.xlu1 %1240  ;;  %4392 = vmatprep.subr.mxu1 %v1157_v38  ;;  %v1112_v38 = vmul.f32 %v8536_v45, %v1097_v20  ;;  %v1111_v20 = vmul.f32 %v8555_v32, %v1092_v39  ;;  %v1109_v39 = vmul.f32 %v8579_v10, %v1091_v42  ;;  %v1049_v42 = vsel %vm232_vm3, %v8217_v63, %v8187_v59  ;;  %v8651_v10 = vld [vmem:[%s12706_s3 + $0x28] sm:$0xff] }
 0x1d3   : > { %v8550_v11 = vpop.permute.xlu0 %1238  ;;  %4393 = vmatpush1.msra.mxu1 %v1156_v23  ;;  %12946 = vst [vmem:[#allocation14_spill] sm:$0xff] %v8651_v10  ;;  %v8795_v32 = vld [vmem:[%s12706_s3 + $0x1c8] sm:$0xff] }
 0x1d4   : > { %1629 = vrot.lane.b32.xlu1 %v8214_v34, %s6585_s26  ;;  %4394 = vmatprep.subr.mxu1 %v1155_v41  ;;  %v1090_v41 = vsel %vm281_vm2, %v8248_v26, %v8287_v12  ;;  %v8627_v26 = vld [vmem:[%s12706_s3 + $0x38] sm:$0xff]  ;;  %v8632_v12 = vld [vmem:[%s12706_s3 + $0x30] sm:$0xff]  ;;  %12957 = vst [vmem:[#allocation25_spill] sm:$0xff] %v8795_v32 }
 0x1d5   : > { %1627 = vrot.lane.b32.xlu0 %v8222_v54, %s6585_s26  ;;  %4395 = vmatpush1.msra.mxu1 %v1154_v35  ;;  %v1110_v35 = vmul.f32 %v8560_v57, %v1096_v7  ;;  %v1045_v7 = vsel %vm232_vm3, %v8187_v59, %v8217_v63  ;;  %12944 = vst [vmem:[#allocation12_spill] sm:$0xff] %v8627_v26  ;;  %12945 = vst [vmem:[#allocation13_spill] sm:$0xff] %v8632_v12  ;;  %v8656_v59 = vld [vmem:[%s12706_s3 + $0x20] sm:$0xff] }
 0x1d6   : > { %v8590_v23 = vpop.permute.xlu1 %1276  ;;  %4396 = vmatprep.subr.mxu1 %v1113_v49  ;;  %v1108_v49 = vmul.f32 %v8584_v36, %v1095_v3  ;;  %v1107_v3 = vmul.f32 %v8603_v9, %v1090_v41  ;;  %12947 = vst [vmem:[#allocation15_spill] sm:$0xff] %v8656_v59  ;;  %v1048_v63 = vsel %vm232_vm3, %v8219_v62, %v8189_v8 }
 0x1d7   : > { %v8598_v45 = vpop.permute.xlu0 %1274  ;;  %4397 = vmatpush1.msra.mxu1 %v1112_v38  ;;  %v1065_v41 = vmul.f32 %v8627_v26, %v1045_v7  ;;  %v1047_v7 = vsel %vm232_vm3, %v8199_v55, %v8155_v27  ;;  %v8699_v26 = vld [vmem:[%s12706_s3 + $0x8] sm:$0xff] }
 0x1d8   : > { %1633 = vrot.lane.b32.xlu1 %v8243_v15, %s6585_s26  ;;  %4398 = vmatprep.subr.mxu1 %v1111_v20  ;;  %v1044_v20 = vsel %vm232_vm3, %v8189_v8, %v8219_v62  ;;  %v8675_v8 = vld [vmem:[%s12706_s3 + $0x18] sm:$0xff]  ;;  %v8680_v62 = vld [vmem:[%s12706_s3 + $0x10] sm:$0xff]  ;;  %12950 = vst [vmem:[#allocation18_spill] sm:$0xff] %v8699_v26 }
 0x1d9   : > { %1631 = vrot.lane.b32.xlu0 %v8251_v33, %s6585_s26  ;;  %4399 = vmatpush1.msra.mxu1 %v1110_v35  ;;  %v1106_v35 = vmul.f32 %v8608_v22, %v1094_v14  ;;  %v1043_v14 = vsel %vm232_vm3, %v8155_v27, %v8199_v55  ;;  %12948 = vst [vmem:[#allocation16_spill] sm:$0xff] %v8675_v8  ;;  %12949 = vst [vmem:[#allocation17_spill] sm:$0xff] %v8680_v62  ;;  %v8704_v27 = vld [vmem:[%s12706_s3] sm:$0xff] }
 0x1da   : > { %v8638_v38 = vpop.permute.xlu1 %1280  ;;  %4400 = vmatprep.subr.mxu1 %v1109_v39  ;;  %v1064_v39 = vmul.f32 %v8632_v12, %v1049_v42  ;;  %v1063_v42 = vmul.f32 %v8651_v10, %v1044_v20  ;;  %12951 = vst [vmem:[#allocation19_spill] sm:$0xff] %v8704_v27  ;;  %v1046_v55 = vsel %vm232_vm3, %v8201_v21, %v8157_v56 }
 0x1db   : > { %v8646_v36 = vpop.permute.xlu0 %1278  ;;  %4401 = vmatpush1.msra.mxu1 %v1108_v49  ;;  %v1061_v20 = vmul.f32 %v8675_v8, %v1043_v14 }
 0x1dc   : > { %1637 = vrot.lane.b32.xlu1 %v8263_v60, %s6585_s26  ;;  %4402 = vmatprep.subr.mxu1 %v1107_v3  ;;  %v1042_v3 = vsel %vm232_vm3, %v8157_v56, %v8201_v21 }
 0x1dd   : > { %1635 = vrot.lane.b32.xlu0 %v8271_v46, %s6585_s26  ;;  %4403 = vmatpush1.msra.mxu1 %v1106_v35  ;;  %v1062_v35 = vmul.f32 %v8656_v59, %v1048_v63  ;;  %v1060_v63 = vmul.f32 %v8680_v62, %v1047_v7  ;;  %v1058_v59 = vmul.f32 %v8704_v27, %v1046_v55  ;;  %v8753_v27 = vld [vmem:[%s12706_s3 + $0x1e8] sm:$0xff]  ;;  %v8759_v62 = vld [vmem:[%s12706_s3 + $0x1e0] sm:$0xff] }
 0x1de   : > { %v8686_v49 = vpop.permute.xlu1 %1284  ;;  %4404 = vmatprep.subr.mxu1 %v1065_v41  ;;  %12954 = vst [vmem:[#allocation23_spill] sm:$0xff] %v8759_v62 }
 0x1df   : > { %v8694_v12 = vpop.permute.xlu0 %1282  ;;  %4405 = vmatpush1.msra.mxu1 %v1064_v39  ;;  %v1059_v39 = vmul.f32 %v8699_v26, %v1042_v3 }
 0x1e0   : > { %1641 = vrot.lane.b32.xlu1 %v8282_v48, %s6585_s26  ;;  %4406 = vmatprep.subr.mxu1 %v1063_v42 }
 0x1e1   : > { %1639 = vrot.lane.b32.xlu0 %v8290_v37, %s6585_s26  ;;  %4407 = vmatpush1.msra.mxu1 %v1062_v35  ;;  %v8744_v35 = vld [vmem:[%s12706_s3 + $0x1f8] sm:$0xff] }
 0x1e2   : > { %v1289_v41 = vpop.permute.xlu1 %1288  ;;  %4408 = vmatprep.subr.mxu1 %v1061_v20  ;;  %12953 = vst [vmem:[#allocation21_spill] sm:$0xff] %v8744_v35 }
 0x1e3   : > { %v8718_v10 = vpop.permute.xlu0 %1286  ;;  %4409 = vmatpush1.msra.mxu1 %v1060_v63 }
 0x1e4   : > { %1677 = vrot.lane.b32.xlu1 %v8214_v34, %s6586_s27  ;;  %4410 = vmatprep.subr.mxu1 %v1059_v39 }
 0x1e5   : > { %1675 = vrot.lane.b32.xlu0 %v8222_v54, %s6586_s27  ;;  %4411 = vmatpush1.msra.mxu1 %v1058_v59  ;;  %v8739_v59 = vld [vmem:[%s12706_s3 + $0x1f0] sm:$0xff] }
 0x1e6   : > { %v1325_v56 = vpop.permute.xlu1 %1324  ;;  %12952 = vst [vmem:[#allocation20_spill] sm:$0xff] %v8739_v59 }
 0x1e7   : > { %v1323_v21 = vpop.permute.xlu0 %1322 }
 0x1e8   : > { %1681 = vrot.lane.b32.xlu1 %v8243_v15, %s6586_s27 }
 0x1e9   : > { %1679 = vrot.lane.b32.xlu0 %v8251_v33, %s6586_s27 }
 0x1ea   : > { %v1329_v14 = vpop.permute.xlu1 %1328 }
 0x1eb   : > { %v1327_v7 = vpop.permute.xlu0 %1326 }
 0x1ec   : > { %1685 = vrot.lane.b32.xlu1 %v8263_v60, %s6586_s27 }
 0x1ed   : > { %1683 = vrot.lane.b32.xlu0 %v8271_v46, %s6586_s27 }
 0x1ee   : > { %v1333_v42 = vpop.permute.xlu1 %1332 }
 0x1ef   : > { %v1331_v3 = vpop.permute.xlu0 %1330 }
 0x1f0   : > { %1689 = vrot.lane.b32.xlu1 %v8282_v48, %s6586_s27 }
 0x1f1   : > { %1687 = vrot.lane.b32.xlu0 %v8290_v37, %s6586_s27 }
 0x1f2   : > { %v1337_v55 = vpop.permute.xlu1 %1336 }
 0x1f3   : > { %v1341_v20 = vsel %vm534_vm4, %v1329_v14, %v1337_v55  ;;  %v1345_v63 = vsel %vm534_vm4, %v1337_v55, %v1329_v14  ;;  %v1335_v39 = vpop.permute.xlu0 %1334  ;;  %v1343_v55 = vsel %vm534_vm4, %v1333_v42, %v1325_v56 }
 0x1f4   : > { %v1360_v26 = vmul.f32 %v8739_v59, %v1341_v20  ;;  %v1340_v8 = vsel %vm534_vm4, %v1327_v7, %v1335_v39  ;;  %v1344_v22 = vsel %vm534_vm4, %v1335_v39, %v1327_v7  ;;  %1725 = vrot.lane.b32.xlu1 %v8214_v34, %s6587_s28  ;;  %v1361_v14 = vmul.f32 %v8744_v35, %v1345_v63  ;;  %v8775_v20 = vld [vmem:[%s12706_s3 + $0x1d8] sm:$0xff]  ;;  %v8780_v7 = vld [vmem:[%s12706_s3 + $0x1d0] sm:$0xff] }
 0x1f5   : > { %1723 = vrot.lane.b32.xlu0 %v8222_v54, %s6587_s28  ;;  %12955 = vst [vmem:[#allocation22_spill] sm:$0xff] %v8775_v20  ;;  %12956 = vst [vmem:[#allocation24_spill] sm:$0xff] %v8780_v7  ;;  %v1339_v39 = vsel %vm534_vm4, %v1325_v56, %v1333_v42  ;;  %v1359_v35 = vmul.f32 %v8753_v27, %v1344_v22  ;;  %v1342_v59 = vsel %vm534_vm4, %v1331_v3, %v1323_v21  ;;  %v8800_v56 = vld [vmem:[%s12706_s3 + $0x1c0] sm:$0xff] }
 0x1f6   : > { %v8784_v63 = vpop.permute.xlu1 %1372  ;;  %4412 = vmatprep.subr.mxu1 %v1361_v14  ;;  %v1358_v9 = vmul.f32 %v8759_v62, %v1340_v8  ;;  %12958 = vst [vmem:[#allocation26_spill] sm:$0xff] %v8800_v56  ;;  %v1338_v22 = vsel %vm534_vm4, %v1323_v21, %v1331_v3  ;;  %v1357_v8 = vmul.f32 %v8775_v20, %v1343_v55  ;;  %v8816_v21 = vld [vmem:[%s12706_s3 + $0x1b8] sm:$0xff]  ;;  %v8821_v3 = vld [vmem:[%s12706_s3 + $0x1b0] sm:$0xff]  ;;  %v8837_v20 = vld [vmem:[%s12706_s3 + $0x1a8] sm:$0xff] }
 0x1f7   : > { %v8790_v57 = vpop.permute.xlu0 %1370  ;;  %4413 = vmatpush2.msra.mxu1 %v1360_v26  ;;  %v1297_v26 = vsel %vm485_vm5, %v1289_v41, %v8638_v38  ;;  %v1356_v42 = vmul.f32 %v8780_v7, %v1339_v39  ;;  %12959 = vst [vmem:[#allocation27_spill] sm:$0xff] %v8816_v21  ;;  %12960 = vst [vmem:[#allocation28_spill] sm:$0xff] %v8821_v3  ;;  %v1355_v55 = vmul.f32 %v8795_v32, %v1342_v59 }
 0x1f8   : > { %1729 = vrot.lane.b32.xlu1 %v8243_v15, %s6587_s28  ;;  %4414 = vmatprep.subr.mxu1 %v1359_v35  ;;  %v1293_v35 = vsel %vm485_vm5, %v8638_v38, %v1289_v41  ;;  %v1354_v39 = vmul.f32 %v8800_v56, %v1338_v22  ;;  %12961 = vst [vmem:[#allocation29_spill] sm:$0xff] %v8837_v20  ;;  %v8842_v38 = vld [vmem:[%s12706_s3 + $0x1a0] sm:$0xff] }
 0x1f9   : > { %1727 = vrot.lane.b32.xlu0 %v8251_v33, %s6587_s28  ;;  %4415 = vmatpush2.msra.mxu1 %v1358_v9  ;;  %v1296_v9 = vsel %vm485_vm5, %v8718_v10, %v8646_v36  ;;  %12962 = vst [vmem:[#allocation30_spill] sm:$0xff] %v8842_v38  ;;  %v1292_v41 = vsel %vm485_vm5, %v8646_v36, %v8718_v10  ;;  %v8861_v10 = vld [vmem:[%s12706_s3 + $0x198] sm:$0xff]  ;;  %v8866_v36 = vld [vmem:[%s12706_s3 + $0x190] sm:$0xff] }
 0x1fa   : > { %v1377_v14 = vpop.permute.xlu1 %1376  ;;  %4416 = vmatprep.subr.mxu1 %v1357_v8  ;;  %v1313_v59 = vmul.f32 %v8816_v21, %v1297_v26  ;;  %v1295_v22 = vsel %vm485_vm5, %v8686_v49, %v8590_v23  ;;  %v1312_v8 = vmul.f32 %v8821_v3, %v1293_v35  ;;  %12963 = vst [vmem:[#allocation31_spill] sm:$0xff] %v8861_v10  ;;  %12964 = vst [vmem:[#allocation32_spill] sm:$0xff] %v8866_v36  ;;  %v8883_v21 = vld [vmem:[%s12706_s3 + $0x188] sm:$0xff] }
 0x1fb   : > { %v8832_v7 = vpop.permute.xlu0 %1374  ;;  %4417 = vmatpush2.msra.mxu1 %v1356_v42  ;;  %v1291_v26 = vsel %vm485_vm5, %v8590_v23, %v8686_v49  ;;  %v1311_v35 = vmul.f32 %v8837_v20, %v1296_v9  ;;  %12965 = vst [vmem:[#allocation33_spill] sm:$0xff] %v8883_v21  ;;  %v8888_v23 = vld [vmem:[%s12706_s3 + $0x170] sm:$0xff]  ;;  %v1245_v49 = vsel %vm436_vm6, %v8446_v29, %v8542_v61  ;;  %v8897_v9 = vld [vmem:[%s12706_s3 + $0x180] sm:$0xff] }
 0x1fc   : > { %1733 = vrot.lane.b32.xlu1 %v8263_v60, %s6587_s28  ;;  %4418 = vmatprep.subr.mxu1 %v1355_v55  ;;  %v1294_v55 = vsel %vm485_vm5, %v8694_v12, %v8598_v45  ;;  %12966 = vst [vmem:[#allocation34_spill] sm:$0xff] %v8888_v23  ;;  %12967 = vst [vmem:[#allocation35_spill] sm:$0xff] %v8897_v9 }
 0x1fd   : > { %1731 = vrot.lane.b32.xlu0 %v8271_v46, %s6587_s28  ;;  %4419 = vmatpush2.msra.mxu1 %v1354_v39  ;;  %v1310_v39 = vmul.f32 %v8842_v38, %v1292_v41  ;;  %v1290_v41 = vsel %vm485_vm5, %v8598_v45, %v8694_v12  ;;  %v1308_v38 = vmul.f32 %v8866_v36, %v1291_v26  ;;  %v8916_v45 = vld [vmem:[%s12706_s3 + $0x230] sm:$0xff]  ;;  %v8921_v12 = vld [vmem:[%s12706_s3 + $0x178] sm:$0xff] }
 0x1fe   : > { %v1381_v42 = vpop.permute.xlu1 %1380  ;;  %4420 = vmatprep.subr.mxu1 %v1313_v59  ;;  %v1309_v59 = vmul.f32 %v8861_v10, %v1295_v22  ;;  %12968 = vst [vmem:[#allocation40_spill] sm:$0xff] %v8916_v45  ;;  %12969 = vst [vmem:[#allocation36_spill] sm:$0xff] %v8921_v12  ;;  %v1307_v22 = vmul.f32 %v8883_v21, %v1294_v55  ;;  %v8931_v26 = vld [vmem:[%s12706_s3 + $0x238] sm:$0xff]  ;;  %v8942_v55 = vld [vmem:[%s12706_s3 + $0x150] sm:$0xff] }
 0x1ff   : > { %v8878_v3 = vpop.permute.xlu0 %1378  ;;  %4421 = vmatpush2.msra.mxu1 %v1312_v8  ;;  %v1249_v8 = vsel %vm436_vm6, %v8542_v61, %v8446_v29  ;;  %v1243_v29 = vsel %vm436_vm6, %v8406_v18, %v8494_v17  ;;  %12970 = vst [vmem:[#allocation37_spill] sm:$0xff] %v8931_v26  ;;  %12971 = vst [vmem:[#allocation39_spill] sm:$0xff] %v8942_v55 }
 0x200   : > { %1737 = vrot.lane.b32.xlu1 %v8282_v48, %s6587_s28  ;;  %4422 = vmatprep.subr.mxu1 %v1311_v35  ;;  %v1264_v35 = vmul.f32 %v8888_v23, %v1245_v49  ;;  %v1248_v49 = vsel %vm436_vm6, %v8550_v11, %v8454_v52 }
 0x201   : > { %1735 = vrot.lane.b32.xlu0 %v8290_v37, %s6587_s28  ;;  %4423 = vmatpush2.msra.mxu1 %v1310_v39  ;;  %v1306_v39 = vmul.f32 %v8897_v9, %v1290_v41 }
 0x202   : > { %v1385_v61 = vpop.permute.xlu1 %1384  ;;  %4424 = vmatprep.subr.mxu1 %v1309_v59  ;;  %v8960_v59 = vld [vmem:[%s12706_s3 + $0x160] sm:$0xff] }
 0x203   : > { %v1389_v36 = vsel %vm583_vm7, %v1377_v14, %v1385_v61  ;;  %v1393_v10 = vsel %vm583_vm7, %v1385_v61, %v1377_v14  ;;  %v1383_v20 = vpop.permute.xlu0 %1382  ;;  %4425 = vmatpush2.msra.mxu1 %v1308_v38  ;;  %v1265_v14 = vmul.f32 %v8921_v12, %v1249_v8  ;;  %v8955_v38 = vld [vmem:[%s12706_s3 + $0x168] sm:$0xff]  ;;  %12973 = vst [vmem:[#allocation41_spill] sm:$0xff] %v8960_v59 }
 0x204   : > { %v1408_v41 = vmul.f32 %v8916_v45, %v1389_v36  ;;  %1773 = vrot.lane.b32.xlu1 %v8214_v34, %s6588_s29  ;;  %4426 = vmatprep.subr.mxu1 %v1307_v22  ;;  %12972 = vst [vmem:[#allocation38_spill] sm:$0xff] %v8955_v38  ;;  %v1244_v36 = vsel %vm436_vm6, %v8454_v52, %v8550_v11  ;;  %v8975_v61 = vld [vmem:[%s12706_s3 + $0x228] sm:$0xff]  ;;  %v8984_v11 = vld [vmem:[%s12706_s3 + $0x220] sm:$0xff]  ;;  %v8994_v22 = vld [vmem:[%s12706_s3 + $0x158] sm:$0xff] }
 0x205   : > { %v1392_v34 = vsel %vm583_vm7, %v1383_v20, %v8832_v7  ;;  %1771 = vrot.lane.b32.xlu0 %v8222_v54, %s6588_s29  ;;  %4427 = vmatpush2.msra.mxu1 %v1306_v39  ;;  %v1409_v8 = vmul.f32 %v8931_v26, %v1393_v10  ;;  %12974 = vst [vmem:[#allocation42_spill] sm:$0xff] %v8975_v61  ;;  %12975 = vst [vmem:[#allocation47_spill] sm:$0xff] %v8984_v11 }
 0x206   : > { %v1247_v52 = vsel %vm436_vm6, %v8494_v17, %v8406_v18  ;;  %v1388_v54 = vsel %vm583_vm7, %v8832_v7, %v1383_v20  ;;  %v8989_v10 = vpop.permute.xlu1 %1429  ;;  %4428 = vmatprep.subr.mxu1 %v1265_v14  ;;  %12976 = vst [vmem:[#allocation43_spill] sm:$0xff] %v8994_v22  ;;  %v1260_v39 = vmul.f32 %v8942_v55, %v1243_v29  ;;  %v9006_v7 = vld [vmem:[%s12706_s3 + $0x218] sm:$0xff]  ;;  %v9012_v29 = vld [vmem:[%s12706_s3 + $0x210] sm:$0xff] }
 0x207   : > { %v1391_v18 = vsel %vm583_vm7, %v1381_v42, %v8784_v63  ;;  %4493 = vmatprep.subr.mxu0 %v1409_v8  ;;  %v9000_v17 = vpop.permute.xlu0 %1427  ;;  %4429 = vmatpush2.msra.mxu1 %v1264_v35  ;;  %v1263_v20 = vmul.f32 %v8955_v38, %v1248_v49  ;;  %12977 = vst [vmem:[#allocation44_spill] sm:$0xff] %v9006_v7  ;;  %12978 = vst [vmem:[#allocation45_spill] sm:$0xff] %v9012_v29 }
 0x208   : > { %v1262_v14 = vmul.f32 %v8960_v59, %v1244_v36  ;;  %v1387_v8 = vsel %vm583_vm7, %v8784_v63, %v1381_v42  ;;  %4494 = vmatpush1.msra.mxu0 %v1408_v41  ;;  %1777 = vrot.lane.b32.xlu1 %v8243_v15, %s6588_s29  ;;  %v1407_v35 = vmul.f32 %v8975_v61, %v1392_v34  ;;  %v9031_v63 = vld [vmem:[%s12706_s3 + $0x148] sm:$0xff]  ;;  %v9036_v15 = vld [vmem:[%s12706_s3 + $0x140] sm:$0xff] }
 0x209   : > { %v1246_v49 = vsel %vm436_vm6, %v8502_v25, %v8412_v30  ;;  %v1406_v36 = vmul.f32 %v8984_v11, %v1388_v54  ;;  %1775 = vrot.lane.b32.xlu0 %v8251_v33, %s6588_s29  ;;  %4430 = vmatprep.subr.mxu1 %v1263_v20  ;;  %v1261_v59 = vmul.f32 %v8994_v22, %v1247_v52  ;;  %v9052_v52 = vld [vmem:[%s12706_s3 + $0x208] sm:$0xff] }
 0x20a   : > { %12979 = vst [vmem:[#allocation46_spill] sm:$0xff] %v9031_v63  ;;  %12980 = vst [vmem:[#allocation48_spill] sm:$0xff] %v9036_v15  ;;  %v1242_v42 = vsel %vm436_vm6, %v8412_v30, %v8502_v25  ;;  %v1390_v33 = vsel %vm583_vm7, %v8878_v3, %v8790_v57  ;;  %4495 = vmatprep.subr.mxu0 %v1407_v35  ;;  %4431 = vmatpush2.msra.mxu1 %v1262_v14  ;;  %v9046_v41 = vpop.permute.xlu1 %1433  ;;  %v9058_v30 = vld [vmem:[%s12706_s3 + $0x200] sm:$0xff]  ;;  %v6486_v35 = vld [vmem:[%s6632_s21 + $0xb8] sm:$0xff] }
 0x20b   : > { %v1405_v34 = vmul.f32 %v9006_v7, %v1391_v18  ;;  %12981 = vst [vmem:[#allocation49_spill] sm:$0xff] %v9052_v52  ;;  %v1404_v54 = vmul.f32 %v9012_v29, %v1387_v8  ;;  %12982 = vst [vmem:[#allocation51_spill] sm:$0xff] %v9058_v30  ;;  %v1386_v25 = vsel %vm583_vm7, %v8790_v57, %v8878_v3  ;;  %4496 = vmatpush1.msra.mxu0 %v1406_v36  ;;  %v9064_v18 = vpop.permute.xlu0 %1431  ;;  %v6487_v36 = vld [vmem:[%s6632_s21 + $0xb0] sm:$0xff] }
 0x20c   : > { %4432 = vmatprep.subr.mxu1 %v1261_v59  ;;  %v1259_v20 = vmul.f32 %v9031_v63, %v1246_v49  ;;  %v1258_v14 = vmul.f32 %v9036_v15, %v1242_v42  ;;  %1781 = vrot.lane.b32.xlu1 %v8263_v60, %s6588_s29  ;;  %v1403_v8 = vmul.f32 %v9052_v52, %v1390_v33  ;;  %v9083_v60 = vld [vmem:[%s12704_s1 + $0x10] sm:$0xff]  ;;  %v9098_v49 = vld [vmem:[%s6632_s21 + $0x100] sm:$0xff]  ;;  %v6488_v42 = vld [vmem:[%s6632_s21 + $0xa8] sm:$0xff] }
 0x20d   : > { %4497 = vmatprep.subr.mxu0 %v1405_v34  ;;  %4433 = vmatpush2.msra.mxu1 %v1260_v39  ;;  %v1402_v57 = vmul.f32 %v9058_v30, %v1386_v25  ;;  %12983 = vst [vmem:[#allocation50_spill] sm:$0xff] %v9083_v60  ;;  %v9092_v39 = vld [vmem:[%s6632_s21 + $0x110] sm:$0xff]  ;;  %v9187_v30 = vld [vmem:[%s12704_s1 + $0x38] sm:$0xff] }
 0x20e   : > { %4498 = vmatpush1.msra.mxu0 %v1404_v54  ;;  %1779 = vrot.lane.b32.xlu0 %v8271_v46, %s6588_s29  ;;  %v9074_v3 = vpop.permute.xlu1 %1437  ;;  %v9111_v34 = vld [vmem:[%s6632_s21 + $0x130] sm:$0xff]  ;;  %v6490_v54 = vld [vmem:[%s6632_s21 + $0x98] sm:$0xff]  ;;  %12989 = vst [vmem:[#allocation57_spill] sm:$0xff] %v9187_v30 }
 0x20f   : > { %4434 = vmatprep.subr.mxu1 %v1259_v20  ;;  %4499 = vmatprep.subr.mxu0 %v1403_v8  ;;  %v9076_v59 = vpop.permute.xlu0 %1435  ;;  %v9117_v20 = vld [vmem:[%s6632_s21 + $0x120] sm:$0xff]  ;;  %v9123_v8 = vld [vmem:[%s12704_s1 + $0x28] sm:$0xff]  ;;  %v9193_v15 = vld [vmem:[%s12704_s1 + $0x58] sm:$0xff] }
 0x210   : > { %4435 = vmatpush2.msra.mxu1 %v1258_v14  ;;  %4500 = vmatpush1.msra.mxu0 %v1402_v57  ;;  %v6491_v14 = vld [vmem:[%s6632_s21 + $0x90] sm:$0xff]  ;;  %12984 = vst [vmem:[#allocation52_spill] sm:$0xff] %v9123_v8  ;;  %v6493_v57 = vld [vmem:[%s6632_s21 + $0x88] sm:$0xff]  ;;  %12990 = vst [vmem:[#allocation58_spill] sm:$0xff] %v9193_v15 }
 0x211   : > { %1785 = vrot.lane.b32.xlu1 %v8282_v48, %s6588_s29  ;;  %6188 = vmatmul.mubr.msk.f32.vlgmr.msra.gmra.mxu0 %vm4011_vm8, %v9083_v60  ;;  %v9182_v60 = vld [vmem:[%s6632_s21 + $0x128] sm:$0xff] }
 0x212   : > { %1783 = vrot.lane.b32.xlu0 %v8290_v37, %s6588_s29  ;;  %v9089_v46 = vpop.permute.xlu1 %1441  ;;  %4436 = vmatprep.subr.mxu1 %v6486_v35  ;;  %v6489_v37 = vld [vmem:[%s6632_s21 + $0xa0] sm:$0xff] }
 0x213   : > { %v9095_v48 = vpop.permute.xlu0 %1439  ;;  %4437 = vmatpush2.msra.mxu1 %v6487_v36  ;;  %4539 = vmatprep.mubr.f32.mxu0 %v12879_v2  ;;  %v6494_v35 = vld [vmem:[%s6632_s21 + $0x80] sm:$0xff] }
 0x214   : > { %4438 = vmatprep.subr.mxu1 %v6488_v42  ;;  %v9137_v42 = vld [vmem:[%s6632_s21 + $0x118] sm:$0xff] }
 0x215   : > { %1830 = vrot.lane.b32.xlu1 %v9092_v39, %s6581_s22  ;;  %4439 = vmatpush2.msra.mxu1 %v6489_v37  ;;  %v9142_v37 = vld [vmem:[%s12704_s1] sm:$0xff] }
 0x216   : > { %1828 = vrot.lane.b32.xlu0 %v9098_v49, %s6581_s22  ;;  %v9108_v33 = vpop.permute.xlu1 %1477  ;;  %4440 = vmatprep.subr.mxu1 %v6490_v54  ;;  %12985 = vst [vmem:[#allocation54_spill] sm:$0xff] %v9142_v37 }
 0x217   : > { %v9114_v25 = vpop.permute.xlu0 %1475  ;;  %4441 = vmatpush2.msra.mxu1 %v6491_v14  ;;  %6189 = vmatmul.mubr.msk.f32.gmra.mxu0 %vm4011_vm8, %v9123_v8  ;;  %v9148_v14 = vld [vmem:[%s6632_s21 + $0x108] sm:$0xff]  ;;  %v9171_v8 = vld [vmem:[%s6632_s21 + $0x138] sm:$0xff] }
 0x218   : > { %4442 = vmatprep.subr.mxu1 %v6493_v57  ;;  %4545 = vmatprep.mubr.f32.mxu0 %v12879_v2  ;;  %v9153_v57 = vld [vmem:[%s12704_s1 + $0x20] sm:$0xff] }
 0x219   : > { %1834 = vrot.lane.b32.xlu1 %v9111_v34, %s6581_s22  ;;  %4443 = vmatpush2.msra.mxu1 %v6494_v35  ;;  %12986 = vst [vmem:[#allocation53_spill] sm:$0xff] %v9153_v57  ;;  %v9159_v35 = vld [vmem:[%s12704_s1 + $0x40] sm:$0xff] }
 0x21a   : > { %1832 = vrot.lane.b32.xlu0 %v9117_v20, %s6581_s22  ;;  %v9134_v36 = vpop.permute.xlu1 %1481  ;;  %4445 = vmatmul.mubr.f32.vlgmr.msra.gmra.mxu1 %v9142_v37  ;;  %12987 = vst [vmem:[#allocation55_spill] sm:$0xff] %v9159_v35 }
 0x21b   : > { %v9145_v54 = vpop.permute.xlu0 %1479  ;;  %4450 = vmatprep.mubr.f32.mxu1 %v9153_v57  ;;  %6190 = vmatmul.mubr.msk.f32.gmra.mxu0 %vm4011_vm8, %v9159_v35  ;;  %v9176_v57 = vld [vmem:[%s12704_s1 + $0x18] sm:$0xff] }
 0x21c   : > { %4551 = vmatprep.mubr.f32.mxu0 %v12879_v2  ;;  %12988 = vst [vmem:[#allocation56_spill] sm:$0xff] %v9176_v57 }
 0x21d   : > { %1838 = vrot.lane.b32.xlu1 %v9137_v42, %s6581_s22 }
 0x21e   : > { %1836 = vrot.lane.b32.xlu0 %v9148_v14, %s6581_s22  ;;  %v9168_v37 = vpop.permute.xlu1 %1485  ;;  %4451 = vmatmul.mubr.f32.gmra.mxu1 %v9176_v57  ;;  %v9200_v57 = vld [vmem:[%s12704_s1 + $0x8] sm:$0xff] }
 0x21f   : > { %v9179_v35 = vpop.permute.xlu0 %1483  ;;  %4456 = vmatprep.mubr.f32.mxu1 %v9187_v30  ;;  %6191 = vmatmul.mubr.msk.f32.gmra.mxu0 %vm4011_vm8, %v9193_v15  ;;  %12991 = vst [vmem:[#allocation59_spill] sm:$0xff] %v9200_v57 }
 0x220   : > { %4622 = vmatprep.mubr.f32.mxu0 %v9200_v57 }
 0x221   : > { %1842 = vrot.lane.b32.xlu1 %v9171_v8, %s6581_s22 }
 0x222   : > { %1840 = vrot.lane.b32.xlu0 %v9182_v60, %s6581_s22  ;;  %v9207_v30 = vpop.permute.xlu1 %1489  ;;  %4457 = vmatmul.mubr.f32.gmra.mxu1 %v8206_v4 }
 0x223   : > { %v9210_v52 = vpop.permute.xlu0 %1487  ;;  %4462 = vmatprep.mubr.f32.mxu1 %v8230_v43 }
 0x225   : > { %1878 = vrot.lane.b32.xlu1 %v9092_v39, %s6582_s23 }
 0x226   : > { %1876 = vrot.lane.b32.xlu0 %v9098_v49, %s6582_s23  ;;  %v9217_v57 = vpop.permute.xlu1 %1525  ;;  %4463 = vmatmul.mubr.f32.gmra.mxu1 %v8238_v53 }
 0x227   : > { %v9220_v15 = vpop.permute.xlu0 %1523  ;;  %4711 = vmatprep.mubr.f32.mxu1 %v12879_v2 }
 0x229   : > { %1882 = vrot.lane.b32.xlu1 %v9111_v34, %s6582_s23 }
 0x22a   : > { %1880 = vrot.lane.b32.xlu0 %v9117_v20, %s6582_s23  ;;  %v1530_v4 = vpop.permute.xlu1 %1529 }
 0x22b   : > { %v1528_v43 = vpop.permute.xlu0 %1527 }
 0x22d   : > { %1886 = vrot.lane.b32.xlu1 %v9137_v42, %s6582_s23 }
 0x22e   : > { %1884 = vrot.lane.b32.xlu0 %v9148_v14, %s6582_s23  ;;  %v9231_v63 = vpop.permute.xlu1 %1533 }
 0x22f   : > { %v9233_v53 = vpop.permute.xlu0 %1531 }
 0x231   : > { %1890 = vrot.lane.b32.xlu1 %v9171_v8, %s6582_s23 }
 0x232   : > { %1888 = vrot.lane.b32.xlu0 %v9182_v60, %s6582_s23  ;;  %v1538_v2 = vpop.permute.xlu1 %1537 }
 0x233   : > { %v1536_v29 = vpop.permute.xlu0 %1535 }
 0x235   : > { %1926 = vrot.lane.b32.xlu1 %v9092_v39, %s6583_s24 }
 0x236   : > { %1924 = vrot.lane.b32.xlu0 %v9098_v49, %s6583_s24  ;;  %v1574_v7 = vpop.permute.xlu1 %1573 }
 0x237   : > { %v1572_v22 = vpop.permute.xlu0 %1571 }
 0x239   : > { %1930 = vrot.lane.b32.xlu1 %v9111_v34, %s6583_s24 }
 0x23a   : > { %1928 = vrot.lane.b32.xlu0 %v9117_v20, %s6583_s24  ;;  %v1578_v11 = vpop.permute.xlu1 %1577 }
 0x23b   : > { %v1576_v61 = vpop.permute.xlu0 %1575 }
 0x23d   : > { %1934 = vrot.lane.b32.xlu1 %v9137_v42, %s6583_s24 }
 0x23e   : > { %1932 = vrot.lane.b32.xlu0 %v9148_v14, %s6583_s24  ;;  %v1582_v55 = vpop.permute.xlu1 %1581 }
 0x23f   : > { %v1580_v38 = vpop.permute.xlu0 %1579  ;;  %v1588_v62 = vsel %vm379_vm0, %v1574_v7, %v1582_v55 }
 0x241   : > { %1938 = vrot.lane.b32.xlu1 %v9171_v8, %s6583_s24 }
 0x242   : > { %1936 = vrot.lane.b32.xlu0 %v9182_v60, %s6583_s24  ;;  %v1586_v26 = vpop.permute.xlu1 %1585 }
 0x243   : > { %v1590_v45 = vsel %vm379_vm0, %v1578_v11, %v1586_v26  ;;  %v1594_v12 = vsel %vm379_vm0, %v1586_v26, %v1578_v11  ;;  %v1584_v23 = vpop.permute.xlu0 %1583  ;;  %v1592_v26 = vsel %vm379_vm0, %v1582_v55, %v1574_v7  ;;  %v1606_v55 = vmul.f32 %v1588_v62, %v8397_v13 }
 0x244   : > { %v1609_v9 = vmul.f32 %v1594_v12, %v8361_v6  ;;  %v1589_v21 = vsel %vm379_vm0, %v1576_v61, %v1584_v23  ;;  %v1593_v56 = vsel %vm379_vm0, %v1584_v23, %v1576_v61  ;;  %v1610_v32 = vmul.f32 %v1590_v45, %v8366_v16 }
 0x245   : > { %1974 = vrot.lane.b32.xlu1 %v9092_v39, %s6584_s25  ;;  %v1608_v12 = vmul.f32 %v1589_v21, %v8375_v0  ;;  %v1587_v16 = vsel %vm379_vm0, %v1572_v22, %v1580_v38  ;;  %v1607_v23 = vmul.f32 %v1593_v56, %v8381_v58  ;;  %v1591_v61 = vsel %vm379_vm0, %v1580_v38, %v1572_v22 }
 0x246   : > { %1972 = vrot.lane.b32.xlu0 %v9098_v49, %s6584_s25  ;;  %v9273_v6 = vpop.permute.xlu1 %1629  ;;  %4558 = vmatprep.subr.mxu0 %v1610_v32  ;;  %v1542_v11 = vsel %vm330_vm1, %v1530_v4, %v1538_v2  ;;  %v1605_v32 = vmul.f32 %v1592_v26, %v8402_v40  ;;  %v1546_v0 = vsel %vm330_vm1, %v1538_v2, %v1530_v4 }
 0x247   : > { %v9279_v45 = vpop.permute.xlu0 %1627  ;;  %4559 = vmatpush1.msra.mxu0 %v1609_v9  ;;  %v1604_v13 = vmul.f32 %v1587_v16, %v8417_v31  ;;  %v1541_v62 = vsel %vm330_vm1, %v1528_v43, %v1536_v29  ;;  %v1603_v40 = vmul.f32 %v1591_v61, %v8422_v50  ;;  %v1545_v21 = vsel %vm330_vm1, %v1536_v29, %v1528_v43  ;;  %v12994_v16 = vld [vmem:[#allocation5_spill] sm:$0xff] }
 0x248   : > { %4560 = vmatprep.subr.mxu0 %v1608_v12  ;;  %v1562_v2 = vmul.f32 %v1542_v11, %v8437_v44  ;;  %v1540_v9 = vsel %vm330_vm1, %v9217_v57, %v9231_v63  ;;  %v1561_v31 = vmul.f32 %v1546_v0, %v8442_v24  ;;  %v1544_v50 = vsel %vm330_vm1, %v9231_v63, %v9217_v57  ;;  %v12992_v57 = vld [vmem:[#allocation3_spill] sm:$0xff] }
 0x249   : > { %1978 = vrot.lane.b32.xlu1 %v9111_v34, %s6584_s25  ;;  %4561 = vmatpush1.msra.mxu0 %v1607_v23  ;;  %v1560_v38 = vmul.f32 %v1541_v62, %v8459_v51  ;;  %v1539_v24 = vsel %vm330_vm1, %v9220_v15, %v9233_v53  ;;  %v1559_v22 = vmul.f32 %v1545_v21, %v8464_v1  ;;  %v12996_v11 = vld [vmem:[#allocation7_spill] sm:$0xff] }
 0x24a   : > { %1976 = vrot.lane.b32.xlu0 %v9117_v20, %s6584_s25  ;;  %v9293_v58 = vpop.permute.xlu1 %1633  ;;  %4562 = vmatprep.subr.mxu0 %v1606_v55  ;;  %v1543_v29 = vsel %vm330_vm1, %v9233_v53, %v9220_v15  ;;  %v1558_v63 = vmul.f32 %v1540_v9, %v8483_v28  ;;  %v1494_v51 = vsel %vm281_vm2, %v9134_v36, %v9207_v30 }
 0x24b   : > { %v9299_v56 = vpop.permute.xlu0 %1631  ;;  %4563 = vmatpush1.msra.mxu0 %v1605_v32  ;;  %v1557_v4 = vmul.f32 %v1544_v50, %v12992_v57  ;;  %v1498_v1 = vsel %vm281_vm2, %v9207_v30, %v9134_v36  ;;  %v1556_v15 = vmul.f32 %v1539_v24, %v8507_v5  ;;  %v1493_v43 = vsel %vm281_vm2, %v9145_v54, %v9210_v52  ;;  %v12993_v36 = vld [vmem:[#allocation4_spill] sm:$0xff]  ;;  %v13000_v50 = vld [vmem:[#allocation11_spill] sm:$0xff] }
 0x24c   : > { %4564 = vmatprep.subr.mxu0 %v1604_v13  ;;  %v1555_v53 = vmul.f32 %v1543_v29, %v8512_v19  ;;  %v1497_v30 = vsel %vm281_vm2, %v9210_v52, %v9145_v54  ;;  %v1514_v12 = vmul.f32 %v1494_v51, %v12993_v36  ;;  %v1492_v5 = vsel %vm281_vm2, %v9108_v33, %v9168_v37  ;;  %v12995_v54 = vld [vmem:[#allocation6_spill] sm:$0xff]  ;;  %v13006_v36 = vld [vmem:[#allocation17_spill] sm:$0xff] }
 0x24d   : > { %1982 = vrot.lane.b32.xlu1 %v9137_v42, %s6584_s25  ;;  %4565 = vmatpush1.msra.mxu0 %v1603_v40  ;;  %v1513_v23 = vmul.f32 %v1498_v1, %v12994_v16  ;;  %v1496_v19 = vsel %vm281_vm2, %v9168_v37, %v9108_v33  ;;  %v1512_v61 = vmul.f32 %v1493_v43, %v12995_v54  ;;  %v12997_v37 = vld [vmem:[#allocation8_spill] sm:$0xff]  ;;  %v12998_v40 = vld [vmem:[#allocation9_spill] sm:$0xff]  ;;  %v13007_v16 = vld [vmem:[#allocation18_spill] sm:$0xff] }
 0x24e   : > { %1980 = vrot.lane.b32.xlu0 %v9148_v14, %s6584_s25  ;;  %v9317_v44 = vpop.permute.xlu1 %1637  ;;  %4566 = vmatprep.subr.mxu0 %v1562_v2  ;;  %v1491_v55 = vsel %vm281_vm2, %v9114_v25, %v9179_v35  ;;  %v1511_v32 = vmul.f32 %v1497_v30, %v12996_v11  ;;  %v1495_v33 = vsel %vm281_vm2, %v9179_v35, %v9114_v25  ;;  %v12999_v35 = vld [vmem:[#allocation10_spill] sm:$0xff] }
 0x24f   : > { %v9325_v7 = vpop.permute.xlu0 %1635  ;;  %4567 = vmatpush1.msra.mxu0 %v1561_v31  ;;  %v1510_v13 = vmul.f32 %v1492_v5, %v12997_v37  ;;  %v1446_v62 = vsel %vm232_vm3, %v9046_v41, %v9089_v46  ;;  %v1509_v21 = vmul.f32 %v1496_v19, %v12998_v40  ;;  %v1450_v2 = vsel %vm232_vm3, %v9089_v46, %v9046_v41  ;;  %v13001_v46 = vld [vmem:[#allocation12_spill] sm:$0xff]  ;;  %v13008_v19 = vld [vmem:[#allocation19_spill] sm:$0xff] }
 0x250   : > { %4568 = vmatprep.subr.mxu0 %v1560_v38  ;;  %v1508_v9 = vmul.f32 %v1491_v55, %v12999_v35  ;;  %v1445_v31 = vsel %vm232_vm3, %v9064_v18, %v9095_v48  ;;  %v1507_v38 = vmul.f32 %v1495_v33, %v13000_v50  ;;  %v1449_v41 = vsel %vm232_vm3, %v9095_v48, %v9064_v18  ;;  %v13003_v48 = vld [vmem:[#allocation14_spill] sm:$0xff] }
 0x251   : > { %1986 = vrot.lane.b32.xlu1 %v9171_v8, %s6584_s25  ;;  %4569 = vmatpush1.msra.mxu0 %v1559_v22  ;;  %v1466_v22 = vmul.f32 %v1446_v62, %v13001_v46  ;;  %v1444_v29 = vsel %vm232_vm3, %v8989_v10, %v9074_v3  ;;  %v1448_v57 = vsel %vm232_vm3, %v9074_v3, %v8989_v10  ;;  %v13005_v3 = vld [vmem:[#allocation16_spill] sm:$0xff] }
 0x252   : > { %1984 = vrot.lane.b32.xlu0 %v9182_v60, %s6584_s25  ;;  %v9345_v28 = vpop.permute.xlu1 %1641  ;;  %4570 = vmatprep.subr.mxu0 %v1558_v63  ;;  %v13002_v63 = vld [vmem:[#allocation13_spill] sm:$0xff]  ;;  %v1443_v1 = vsel %vm232_vm3, %v9000_v17, %v9076_v59  ;;  %v1447_v10 = vsel %vm232_vm3, %v9076_v59, %v9000_v17  ;;  %v1462_v30 = vmul.f32 %v1444_v29, %v13005_v3 }
 0x253   : > { %v9353_v26 = vpop.permute.xlu0 %1639  ;;  %4571 = vmatpush1.msra.mxu0 %v1557_v4  ;;  %v1465_v51 = vmul.f32 %v1450_v2, %v13002_v63  ;;  %v1464_v4 = vmul.f32 %v1445_v31, %v13003_v48  ;;  %v1459_v54 = vmul.f32 %v1447_v10, %v13008_v19  ;;  %v13010_v31 = vld [vmem:[#allocation21_spill] sm:$0xff]  ;;  %v13013_v10 = vld [vmem:[#allocation24_spill] sm:$0xff] }
 0x254   : > { %4572 = vmatprep.subr.mxu0 %v1556_v15  ;;  %v13004_v15 = vld [vmem:[#allocation15_spill] sm:$0xff] }
 0x255   : > { %2030 = vrot.lane.b32.xlu1 %v9092_v39, %s6585_s26  ;;  %4573 = vmatpush1.msra.mxu0 %v1555_v53  ;;  %v1463_v43 = vmul.f32 %v1449_v41, %v13004_v15  ;;  %v13012_v15 = vld [vmem:[#allocation22_spill] sm:$0xff] }
 0x256   : > { %2028 = vrot.lane.b32.xlu0 %v9098_v49, %s6585_s26  ;;  %v9373_v52 = vpop.permute.xlu1 %1677  ;;  %4574 = vmatprep.subr.mxu0 %v1514_v12  ;;  %v1461_v12 = vmul.f32 %v1448_v57, %v13006_v36 }
 0x257   : > { %v9381_v0 = vpop.permute.xlu0 %1675  ;;  %4575 = vmatpush1.msra.mxu0 %v1513_v23  ;;  %v1460_v23 = vmul.f32 %v1443_v1, %v13007_v16  ;;  %v13014_v16 = vld [vmem:[#allocation25_spill] sm:$0xff] }
 0x258   : > { %4576 = vmatprep.subr.mxu0 %v1512_v61 }
 0x259   : > { %2034 = vrot.lane.b32.xlu1 %v9111_v34, %s6585_s26  ;;  %4577 = vmatpush1.msra.mxu0 %v1511_v32 }
 0x25a   : > { %2032 = vrot.lane.b32.xlu0 %v9117_v20, %s6585_s26  ;;  %v9401_v25 = vpop.permute.xlu1 %1681  ;;  %4578 = vmatprep.subr.mxu0 %v1510_v13 }
 0x25b   : > { %v9409_v24 = vpop.permute.xlu0 %1679  ;;  %4579 = vmatpush1.msra.mxu0 %v1509_v21  ;;  %v13009_v21 = vld [vmem:[#allocation20_spill] sm:$0xff] }
 0x25c   : > { %4580 = vmatprep.subr.mxu0 %v1508_v9 }
 0x25d   : > { %2038 = vrot.lane.b32.xlu1 %v9137_v42, %s6585_s26  ;;  %4581 = vmatpush1.msra.mxu0 %v1507_v38 }
 0x25e   : > { %2036 = vrot.lane.b32.xlu0 %v9148_v14, %s6585_s26  ;;  %v9429_v18 = vpop.permute.xlu1 %1685  ;;  %4582 = vmatprep.subr.mxu0 %v1466_v22  ;;  %v9488_v22 = vld [vmem:[%s6632_s21 + $0x178] sm:$0xff] }
 0x25f   : > { %v9437_v53 = vpop.permute.xlu0 %1683  ;;  %4583 = vmatpush1.msra.mxu0 %v1465_v51  ;;  %v13011_v51 = vld [vmem:[#allocation23_spill] sm:$0xff] }
 0x260   : > { %4584 = vmatprep.subr.mxu0 %v1464_v4  ;;  %v9497_v4 = vld [vmem:[%s6632_s21 + $0x170] sm:$0xff] }
 0x261   : > { %2042 = vrot.lane.b32.xlu1 %v9171_v8, %s6585_s26  ;;  %4585 = vmatpush1.msra.mxu0 %v1463_v43 }
 0x262   : > { %2040 = vrot.lane.b32.xlu0 %v9182_v60, %s6585_s26  ;;  %v1690_v5 = vpop.permute.xlu1 %1689  ;;  %4586 = vmatprep.subr.mxu0 %v1462_v30 }
 0x263   : > { %v1688_v61 = vpop.permute.xlu0 %1687  ;;  %4587 = vmatpush1.msra.mxu0 %v1461_v12  ;;  %v1694_v30 = vsel %vm485_vm5, %v9401_v25, %v1690_v5  ;;  %v9514_v12 = vld [vmem:[%s6632_s21 + $0x168] sm:$0xff] }
 0x264   : > { %4588 = vmatprep.subr.mxu0 %v1460_v23  ;;  %v1697_v19 = vsel %vm485_vm5, %v1688_v61, %v9409_v24 }
 0x265   : > { %2078 = vrot.lane.b32.xlu1 %v9092_v39, %s6586_s27  ;;  %4589 = vmatpush1.msra.mxu0 %v1459_v54  ;;  %v13015_v54 = vld [vmem:[#allocation26_spill] sm:$0xff] }
 0x266   : > { %2076 = vrot.lane.b32.xlu0 %v9098_v49, %s6586_s27  ;;  %v1726_v17 = vpop.permute.xlu1 %1725 }
 0x267   : > { %v1724_v59 = vpop.permute.xlu0 %1723 }
 0x269   : > { %2186 = vrot.lane.b32.xlu1 %v9171_v8, %s6588_s29 }
 0x26a   : > { %2178 = vrot.lane.b32.xlu0 %v9111_v34, %s6588_s29  ;;  %v1730_v55 = vpop.permute.xlu1 %1729 }
 0x26b   : > { %v1728_v11 = vpop.permute.xlu0 %1727 }
 0x26d   : > { %2184 = vrot.lane.b32.xlu1 %v9182_v60, %s6588_s29 }
 0x26e   : > { %2176 = vrot.lane.b32.xlu0 %v9117_v20, %s6588_s29  ;;  %v1734_v32 = vpop.permute.xlu1 %1733 }
 0x26f   : > { %v1732_v33 = vpop.permute.xlu0 %1731  ;;  %v1744_v38 = vsel %vm534_vm4, %v1734_v32, %v1726_v17  ;;  %v1740_v41 = vsel %vm534_vm4, %v1726_v17, %v1734_v32  ;;  %v1696_v32 = vsel %vm485_vm5, %v9429_v18, %v9373_v52 }
 0x270   : > { %v1743_v63 = vsel %vm534_vm4, %v1732_v33, %v1724_v59  ;;  %v1739_v1 = vsel %vm534_vm4, %v1724_v59, %v1732_v33  ;;  %v1758_v43 = vmul.f32 %v1744_v38, %v13012_v15  ;;  %v1757_v3 = vmul.f32 %v1740_v41, %v13013_v10  ;;  %v13017_v33 = vld [vmem:[#allocation28_spill] sm:$0xff] }
 0x271   : > { %2182 = vrot.lane.b32.xlu1 %v9137_v42, %s6588_s29  ;;  %v1756_v23 = vmul.f32 %v1743_v63, %v13014_v16  ;;  %v1755_v17 = vmul.f32 %v1739_v1, %v13015_v54  ;;  %v1646_v38 = vsel %vm436_vm6, %v9293_v58, %v9345_v28  ;;  %v1650_v41 = vsel %vm436_vm6, %v9345_v28, %v9293_v58  ;;  %v13023_v28 = vld [vmem:[#allocation35_spill] sm:$0xff] }
 0x272   : > { %2174 = vrot.lane.b32.xlu0 %v9092_v39, %s6588_s29  ;;  %v1738_v37 = vpop.permute.xlu1 %1737  ;;  %v1649_v58 = vsel %vm436_vm6, %v9353_v26, %v9299_v56  ;;  %v1645_v54 = vsel %vm436_vm6, %v9299_v56, %v9353_v26  ;;  %v1648_v26 = vsel %vm436_vm6, %v9317_v44, %v9273_v6 }
 0x273   : > { %v1742_v13 = vsel %vm534_vm4, %v1730_v55, %v1738_v37  ;;  %v1746_v62 = vsel %vm534_vm4, %v1738_v37, %v1730_v55  ;;  %v1736_v40 = vpop.permute.xlu0 %1735  ;;  %v9522_v55 = vld [vmem:[%s6632_s21 + $0x160] sm:$0xff]  ;;  %v1713_v37 = vmul.f32 %v1694_v30, %v13017_v33  ;;  %v13028_v33 = vld [vmem:[#allocation38_spill] sm:$0xff] }
 0x274   : > { %v1761_v2 = vmul.f32 %v1742_v13, %v13009_v21  ;;  %v1741_v35 = vsel %vm534_vm4, %v1728_v11, %v1736_v40  ;;  %v1745_v9 = vsel %vm534_vm4, %v1736_v40, %v1728_v11  ;;  %v1762_v50 = vmul.f32 %v1746_v62, %v13010_v31  ;;  %v13018_v13 = vld [vmem:[#allocation29_spill] sm:$0xff]  ;;  %v13019_v21 = vld [vmem:[#allocation30_spill] sm:$0xff]  ;;  %v13020_v31 = vld [vmem:[#allocation31_spill] sm:$0xff] }
 0x275   : > { %2180 = vrot.lane.b32.xlu1 %v9148_v14, %s6588_s29  ;;  %v1760_v29 = vmul.f32 %v1745_v9, %v8753_v27  ;;  %v1759_v57 = vmul.f32 %v1741_v35, %v13011_v51  ;;  %v1698_v27 = vsel %vm485_vm5, %v1690_v5, %v9401_v25  ;;  %v1693_v25 = vsel %vm485_vm5, %v9409_v24, %v1688_v61  ;;  %v13016_v5 = vld [vmem:[#allocation27_spill] sm:$0xff]  ;;  %v9542_v61 = vld [vmem:[%s6632_s21 + $0x158] sm:$0xff]  ;;  %v9551_v9 = vld [vmem:[%s6632_s21 + $0x150] sm:$0xff] }
 0x276   : > { %2172 = vrot.lane.b32.xlu0 %v9098_v49, %s6588_s29  ;;  %v9485_v46 = vpop.permute.xlu1 %1773  ;;  %4590 = vmatprep.subr.mxu0 %v1762_v50  ;;  %v1714_v11 = vmul.f32 %v1698_v27, %v13016_v5  ;;  %v1692_v24 = vsel %vm485_vm5, %v9373_v52, %v9429_v18  ;;  %v1712_v62 = vmul.f32 %v1697_v19, %v13018_v13  ;;  %v13024_v27 = vld [vmem:[#allocation34_spill] sm:$0xff] }
 0x277   : > { %v9494_v48 = vpop.permute.xlu0 %1771  ;;  %4591 = vmatpush2.msra.mxu0 %v1761_v2  ;;  %v1695_v40 = vsel %vm485_vm5, %v9437_v53, %v9381_v0  ;;  %v1711_v2 = vmul.f32 %v1693_v25, %v13019_v21  ;;  %v1691_v52 = vsel %vm485_vm5, %v9381_v0, %v9437_v53  ;;  %v1710_v50 = vmul.f32 %v1696_v32, %v13020_v31  ;;  %v9572_v0 = vld [vmem:[%s6632_s21 + $0x148] sm:$0xff]  ;;  %v13022_v53 = vld [vmem:[#allocation33_spill] sm:$0xff]  ;;  %v13030_v21 = vld [vmem:[#allocation42_spill] sm:$0xff] }
 0x278   : > { %4592 = vmatprep.subr.mxu0 %v1760_v29  ;;  %v13021_v29 = vld [vmem:[#allocation32_spill] sm:$0xff]  ;;  %v1708_v51 = vmul.f32 %v1695_v40, %v13022_v53  ;;  %v1707_v1 = vmul.f32 %v1691_v52, %v13023_v28  ;;  %v1665_v10 = vmul.f32 %v1646_v38, %v13024_v27  ;;  %v1664_v56 = vmul.f32 %v1649_v58, %v13028_v33  ;;  %v13032_v31 = vld [vmem:[#allocation47_spill] sm:$0xff]  ;;  %v13035_v53 = vld [vmem:[#allocation45_spill] sm:$0xff] }
 0x279   : > { %2387 = vrot.lane.b32.xlu1 %v9488_v22, %s6584_s25  ;;  %4593 = vmatpush2.msra.mxu0 %v1759_v57  ;;  %v1709_v63 = vmul.f32 %v1692_v24, %v13021_v29  ;;  %v1644_v57 = vsel %vm436_vm6, %v9273_v6, %v9317_v44  ;;  %v1647_v6 = vsel %vm436_vm6, %v9325_v7, %v9279_v45  ;;  %v13031_v44 = vld [vmem:[#allocation41_spill] sm:$0xff]  ;;  %v13038_v27 = vld [vmem:[#allocation48_spill] sm:$0xff] }
 0x27a   : > { %2379 = vrot.lane.b32.xlu0 %v9497_v4, %s6584_s25  ;;  %v1778_v36 = vpop.permute.xlu1 %1777  ;;  %4594 = vmatprep.subr.mxu0 %v1758_v43  ;;  %v9585_v43 = vld [vmem:[%s6632_s21 + $0x140] sm:$0xff]  ;;  %v1663_v52 = vmul.f32 %v1645_v54, %v13031_v44  ;;  %v6503_v54 = vld [vmem:[%s6632_s21 + $0xf0] sm:$0xff]  ;;  %v13042_v33 = vld [vmem:[#allocation52_spill] sm:$0xff] }
 0x27b   : > { %v1776_v59 = vpop.permute.xlu0 %1775  ;;  %4595 = vmatpush2.msra.mxu0 %v1757_v3 }
 0x27c   : > { %4596 = vmatprep.subr.mxu0 %v1756_v23  ;;  %v13025_v23 = vld [vmem:[#allocation36_spill] sm:$0xff] }
 0x27d   : > { %2385 = vrot.lane.b32.xlu1 %v9514_v12, %s6584_s25  ;;  %4597 = vmatpush2.msra.mxu0 %v1755_v17  ;;  %v1666_v19 = vmul.f32 %v1650_v41, %v13025_v23  ;;  %v13026_v17 = vld [vmem:[#allocation40_spill] sm:$0xff]  ;;  %v6502_v23 = vld [vmem:[%s6632_s21 + $0xf8] sm:$0xff] }
 0x27e   : > { %2377 = vrot.lane.b32.xlu0 %v9522_v55, %s6584_s25  ;;  %4598 = vmatprep.subr.mxu0 %v1714_v11  ;;  %v1782_v35 = vpop.permute.xlu1 %1781  ;;  %v13027_v11 = vld [vmem:[#allocation37_spill] sm:$0xff]  ;;  %v13034_v41 = vld [vmem:[#allocation44_spill] sm:$0xff] }
 0x27f   : > { %4599 = vmatpush2.msra.mxu0 %v1713_v37  ;;  %v1792_v37 = vsel %vm583_vm7, %v1782_v35, %v9485_v46 }
 0x280   : > { %v1780_v18 = vpop.permute.xlu0 %1779  ;;  %4600 = vmatprep.subr.mxu0 %v1712_v62  ;;  %v1788_v62 = vsel %vm583_vm7, %v9485_v46, %v1782_v35  ;;  %v13033_v35 = vld [vmem:[#allocation43_spill] sm:$0xff]  ;;  %v1806_v29 = vmul.f32 %v1792_v37, %v13034_v41  ;;  %v6508_v37 = vld [vmem:[%s6632_s21 + $0xc8] sm:$0xff] }
 0x281   : > { %2383 = vrot.lane.b32.xlu1 %v9542_v61, %s6584_s25  ;;  %4601 = vmatpush2.msra.mxu0 %v1711_v2  ;;  %v1791_v46 = vsel %vm583_vm7, %v1780_v18, %v9494_v48  ;;  %v1662_v38 = vmul.f32 %v1648_v26, %v13033_v35  ;;  %v6507_v26 = vld [vmem:[%s6632_s21 + $0xd0] sm:$0xff] }
 0x282   : > { %2375 = vrot.lane.b32.xlu0 %v9551_v9, %s6584_s25  ;;  %4602 = vmatprep.subr.mxu0 %v1710_v50  ;;  %v13049_v35 = vld [vmem:[#allocation57_spill] sm:$0xff] }
 0x283   : > { %v1786_v15 = vpop.permute.xlu1 %1785  ;;  %4603 = vmatpush2.msra.mxu0 %v1709_v63  ;;  %v1643_v63 = vsel %vm436_vm6, %v9279_v45, %v9325_v7  ;;  %v13037_v45 = vld [vmem:[#allocation49_spill] sm:$0xff] }
 0x284   : > { %v1790_v3 = vsel %vm583_vm7, %v1778_v36, %v1786_v15  ;;  %v1794_v30 = vsel %vm583_vm7, %v1786_v15, %v1778_v36  ;;  %v1784_v16 = vpop.permute.xlu0 %1783  ;;  %4604 = vmatprep.subr.mxu0 %v1708_v51  ;;  %v1805_v51 = vmul.f32 %v1788_v62, %v13035_v53  ;;  %v1804_v7 = vmul.f32 %v1791_v46, %v13037_v45  ;;  %v13043_v62 = vld [vmem:[#allocation55_spill] sm:$0xff] }
 0x285   : > { %v1809_v25 = vmul.f32 %v1790_v3, %v13026_v17  ;;  %v1793_v5 = vsel %vm583_vm7, %v1784_v16, %v1776_v59  ;;  %2381 = vrot.lane.b32.xlu1 %v9572_v0, %s6584_s25  ;;  %4605 = vmatpush2.msra.mxu0 %v1707_v1  ;;  %v1789_v36 = vsel %vm583_vm7, %v1776_v59, %v1784_v16  ;;  %v13029_v59 = vld [vmem:[#allocation39_spill] sm:$0xff]  ;;  %v13036_v1 = vld [vmem:[#allocation46_spill] sm:$0xff]  ;;  %v13041_v17 = vmov 0.0  }
 0x286   : > { %2373 = vrot.lane.b32.xlu0 %v9585_v43, %s6584_s25  ;;  %4606 = vmatprep.subr.mxu0 %v1666_v19  ;;  %v1810_v32 = vmul.f32 %v1794_v30, %v13027_v11  ;;  %v1661_v13 = vmul.f32 %v1644_v57, %v13029_v59  ;;  %v1808_v2 = vmul.f32 %v1793_v5, %v13030_v21  ;;  %v13039_v3 = vld [vmem:[#allocation51_spill] sm:$0xff]  ;;  %v13040_v16 = vld [vmem:[#allocation50_spill] sm:$0xff]  ;;  %v6504_v5 = vld [vmem:[%s6632_s21 + $0xe8] sm:$0xff] }
 0x287   : > { %v9615_v24 = vpop.permute.xlu1 %1830  ;;  %4607 = vmatpush2.msra.mxu0 %v1665_v10  ;;  %v1807_v50 = vmul.f32 %v1789_v36, %v13032_v31  ;;  %v1787_v57 = vsel %vm583_vm7, %v9494_v48, %v1780_v18  ;;  %v1660_v15 = vmul.f32 %v1647_v6, %v13036_v1  ;;  %v1659_v10 = vmul.f32 %v1643_v63, %v13038_v27  ;;  %v6505_v36 = vld [vmem:[%s6632_s21 + $0xe0] sm:$0xff]  ;;  %v13045_v6 = vld [vmem:[#allocation53_spill] sm:$0xff] }
 0x288   : > { %4671 = vmatprep.subr.mxu1 %v1810_v32  ;;  %v9621_v40 = vpop.permute.xlu0 %1828  ;;  %4608 = vmatprep.subr.mxu0 %v1664_v56  ;;  %v1803_v48 = vmul.f32 %v1787_v57, %v13039_v3  ;;  %v6506_v32 = vld [vmem:[%s6632_s21 + $0xd8] sm:$0xff]  ;;  %v13048_v46 = vld [vmem:[#allocation59_spill] sm:$0xff]  ;;  %v6511_v63 = vld [vmem:[%s12704_s1 + $0x50] sm:$0xff] }
 0x289   : > { %4672 = vmatpush1.msra.mxu1 %v1809_v25  ;;  %2339 = vrot.lane.b32.xlu1 %v9488_v22, %s6583_s24  ;;  %v6512_v57 = vld [vmem:[%s12704_s1 + $0x48] sm:$0xff] }
 0x28a   : > { %2331 = vrot.lane.b32.xlu0 %v9497_v4, %s6583_s24  ;;  %4673 = vmatprep.subr.mxu1 %v1808_v2  ;;  %v13044_v2 = vld [vmem:[#allocation54_spill] sm:$0xff] }
 0x28b   : > { %4609 = vmatpush2.msra.mxu0 %v1663_v52  ;;  %4674 = vmatpush1.msra.mxu1 %v1807_v50  ;;  %v9647_v58 = vpop.permute.xlu1 %1834  ;;  %v13046_v52 = vld [vmem:[#allocation58_spill] sm:$0xff]  ;;  %v13047_v50 = vld [vmem:[#allocation56_spill] sm:$0xff] }
 0x28c   : > { %4610 = vmatprep.subr.mxu0 %v1662_v38  ;;  %4675 = vmatprep.subr.mxu1 %v1806_v29  ;;  %v9649_v28 = vpop.permute.xlu0 %1832  ;;  %v6510_v29 = vld [vmem:[%s12704_s1 + $0x30] sm:$0xff] }
 0x28d   : > { %4611 = vmatpush2.msra.mxu0 %v1661_v13  ;;  %4676 = vmatpush1.msra.mxu1 %v1805_v51  ;;  %v6509_v13 = vld [vmem:[%s6632_s21 + $0xc0] sm:$0xff] }
 0x28e   : > { %2337 = vrot.lane.b32.xlu1 %v9514_v12, %s6583_s24  ;;  %2329 = vrot.lane.b32.xlu0 %v9522_v55, %s6583_s24 }
 0x28f   : > { %4612 = vmatprep.subr.mxu0 %v1660_v15  ;;  %4677 = vmatprep.subr.mxu1 %v1804_v7  ;;  %v9659_v18 = vpop.permute.xlu1 %1838 }
 0x290   : > { %4613 = vmatpush2.msra.mxu0 %v1659_v10  ;;  %4678 = vmatpush1.msra.mxu1 %v1803_v48  ;;  %v9661_v30 = vpop.permute.xlu0 %1836 }
 0x291   : > { %6192 = vmatmul.mubr.msk.f32.vlgmr.msra.gmra.mxu1 %vm4011_vm8, %v13040_v16  ;;  %4614 = vmatprep.subr.mxu0 %v6502_v23 }
 0x292   : > { %2335 = vrot.lane.b32.xlu1 %v9542_v61, %s6583_s24  ;;  %2327 = vrot.lane.b32.xlu0 %v9551_v9, %s6583_s24 }
 0x293   : > { %v9670_v19 = vpop.permute.xlu1 %1842  ;;  %4615 = vmatpush2.msra.mxu0 %v6503_v54  ;;  %4717 = vmatprep.mubr.f32.mxu1 %v13041_v17 }
 0x294   : > { %v9674_v25 = vpop.permute.xlu0 %1840  ;;  %4616 = vmatprep.subr.mxu0 %v6504_v5 }
 0x295   : > { %4617 = vmatpush2.msra.mxu0 %v6505_v36  ;;  %6193 = vmatmul.mubr.msk.f32.gmra.mxu1 %vm4011_vm8, %v13042_v33 }
 0x296   : > { %2333 = vrot.lane.b32.xlu1 %v9572_v0, %s6583_s24  ;;  %2325 = vrot.lane.b32.xlu0 %v9585_v43, %s6583_s24 }
 0x297   : > { %v9682_v11 = vpop.permute.xlu1 %1878  ;;  %4618 = vmatprep.subr.mxu0 %v6506_v32  ;;  %4723 = vmatprep.mubr.f32.mxu1 %v13041_v17 }
 0x298   : > { %v9687_v56 = vpop.permute.xlu0 %1876  ;;  %4619 = vmatpush2.msra.mxu0 %v6507_v26 }
 0x299   : > { %4620 = vmatprep.subr.mxu0 %v6508_v37  ;;  %6194 = vmatmul.mubr.msk.f32.gmra.mxu1 %vm4011_vm8, %v13043_v62  ;;  %v9809_v37 = vld [vmem:[%s12706_s3 + $0xe0] sm:$0xff] }
 0x29a   : > { %2138 = vrot.lane.b32.xlu1 %v9171_v8, %s6587_s28  ;;  %2130 = vrot.lane.b32.xlu0 %v9111_v34, %s6587_s28 }
 0x29b   : > { %v9696_v59 = vpop.permute.xlu1 %1882  ;;  %4621 = vmatpush2.msra.mxu0 %v6509_v13  ;;  %4729 = vmatprep.mubr.f32.mxu1 %v13041_v17 }
 0x29c   : > { %v9701_v21 = vpop.permute.xlu0 %1880  ;;  %4623 = vmatmul.mubr.f32.vlgmr.msra.gmra.mxu0 %v13044_v2 }
 0x29d   : > { %4628 = vmatprep.mubr.f32.mxu0 %v13045_v6  ;;  %6195 = vmatmul.mubr.msk.f32.gmra.mxu1 %vm4011_vm8, %v13046_v52  ;;  %v9825_v52 = vld [vmem:[%s12706_s3 + $0xd8] sm:$0xff] }
 0x29e   : > { %2291 = vrot.lane.b32.xlu1 %v9488_v22, %s6582_s23  ;;  %2283 = vrot.lane.b32.xlu0 %v9497_v4, %s6582_s23 }
 0x29f   : > { %v9710_v44 = vpop.permute.xlu1 %1886  ;;  %4800 = vmatprep.mubr.f32.mxu1 %v13048_v46 }
 0x2a0   : > { %v9714_v31 = vpop.permute.xlu0 %1884  ;;  %4629 = vmatmul.mubr.f32.gmra.mxu0 %v13047_v50  ;;  %v9830_v50 = vld [vmem:[%s12706_s3 + $0xd0] sm:$0xff] }
 0x2a1   : > { %4634 = vmatprep.mubr.f32.mxu0 %v13049_v35 }
 0x2a2   : > { %2136 = vrot.lane.b32.xlu1 %v9182_v60, %s6587_s28  ;;  %2128 = vrot.lane.b32.xlu0 %v9117_v20, %s6587_s28 }
 0x2a3   : > { %v9723_v38 = vpop.permute.xlu1 %1890 }
 0x2a4   : > { %v9725_v41 = vpop.permute.xlu0 %1888  ;;  %4635 = vmatmul.mubr.f32.gmra.mxu0 %v6510_v29 }
 0x2a5   : > { %4640 = vmatprep.mubr.f32.mxu0 %v6511_v63 }
 0x2a6   : > { %2289 = vrot.lane.b32.xlu1 %v9514_v12, %s6582_s23  ;;  %2281 = vrot.lane.b32.xlu0 %v9522_v55, %s6582_s23 }
 0x2a7   : > { %v9737_v53 = vpop.permute.xlu1 %1926 }
 0x2a8   : > { %v9739_v51 = vpop.permute.xlu0 %1924  ;;  %4641 = vmatmul.mubr.f32.gmra.mxu0 %v6512_v57 }
 0x2a9   : > { %4889 = vmatprep.mubr.f32.mxu0 %v13041_v17 }
 0x2aa   : > { %2134 = vrot.lane.b32.xlu1 %v9137_v42, %s6587_s28  ;;  %2126 = vrot.lane.b32.xlu0 %v9092_v39, %s6587_s28 }
 0x2ab   : > { %v9749_v1 = vpop.permute.xlu1 %1930 }
 0x2ac   : > { %v9751_v15 = vpop.permute.xlu0 %1928 }
 0x2ae   : > { %2287 = vrot.lane.b32.xlu1 %v9542_v61, %s6582_s23  ;;  %2279 = vrot.lane.b32.xlu0 %v9551_v9, %s6582_s23 }
 0x2af   : > { %v9757_v45 = vpop.permute.xlu1 %1934 }
 0x2b0   : > { %v9759_v7 = vpop.permute.xlu0 %1932 }
 0x2b2   : > { %2132 = vrot.lane.b32.xlu1 %v9148_v14, %s6587_s28  ;;  %2124 = vrot.lane.b32.xlu0 %v9098_v49, %s6587_s28 }
 0x2b3   : > { %v1939_v39 = vpop.permute.xlu1 %1938 }
 0x2b4   : > { %v9765_v27 = vpop.permute.xlu0 %1936 }
 0x2b6   : > { %2285 = vrot.lane.b32.xlu1 %v9572_v0, %s6582_s23  ;;  %2277 = vrot.lane.b32.xlu0 %v9585_v43, %s6582_s23 }
 0x2b7   : > { %v1975_v10 = vpop.permute.xlu1 %1974 }
 0x2b8   : > { %v1973_v3 = vpop.permute.xlu0 %1972 }
 0x2ba   : > { %2090 = vrot.lane.b32.xlu1 %v9171_v8, %s6586_s27  ;;  %2082 = vrot.lane.b32.xlu0 %v9111_v34, %s6586_s27  ;;  %v9786_v34 = vld [vmem:[%s12706_s3 + $0xf0] sm:$0xff]  ;;  %v9791_v8 = vld [vmem:[%s12706_s3 + $0xf8] sm:$0xff] }
 0x2bb   : > { %v1979_v48 = vpop.permute.xlu1 %1978 }
 0x2bc   : > { %v1977_v16 = vpop.permute.xlu0 %1976 }
 0x2be   : > { %2243 = vrot.lane.b32.xlu1 %v9488_v22, %s6581_s22  ;;  %2235 = vrot.lane.b32.xlu0 %v9497_v4, %s6581_s22 }
 0x2bf   : > { %v1983_v49 = vpop.permute.xlu1 %1982 }
 0x2c0   : > { %v1981_v23 = vpop.permute.xlu0 %1980  ;;  %v1989_v62 = vsel %vm379_vm0, %v1975_v10, %v1983_v49  ;;  %v1993_v46 = vsel %vm379_vm0, %v1983_v49, %v1975_v10  ;;  %v9847_v10 = vld [vmem:[%s12706_s3 + $0xc8] sm:$0xff] }
 0x2c1   : > { %v1988_v63 = vsel %vm379_vm0, %v1973_v3, %v1981_v23  ;;  %v2007_v57 = vmul.f32 %v9825_v52, %v1989_v62  ;;  %v1992_v49 = vsel %vm379_vm0, %v1981_v23, %v1973_v3  ;;  %v1947_v3 = vsel %vm330_vm1, %v1939_v39, %v9749_v1 }
 0x2c2   : > { %2088 = vrot.lane.b32.xlu1 %v9182_v60, %s6586_s27  ;;  %2080 = vrot.lane.b32.xlu0 %v9117_v20, %s6586_s27  ;;  %v9800_v20 = vld [vmem:[%s12706_s3 + $0xe8] sm:$0xff]  ;;  %v2005_v23 = vmul.f32 %v9847_v10, %v1988_v63  ;;  %v1941_v62 = vsel %vm330_vm1, %v9737_v53, %v9757_v45 }
 0x2c3   : > { %v1987_v54 = vpop.permute.xlu1 %1986 }
 0x2c4   : > { %v1991_v5 = vsel %vm379_vm0, %v1979_v48, %v1987_v54  ;;  %v1995_v60 = vsel %vm379_vm0, %v1987_v54, %v1979_v48  ;;  %v1985_v36 = vpop.permute.xlu0 %1984  ;;  %v2006_v48 = vmul.f32 %v9830_v50, %v1993_v46 }
 0x2c5   : > { %v2010_v32 = vmul.f32 %v9786_v34, %v1995_v60  ;;  %v1990_v33 = vsel %vm379_vm0, %v1977_v16, %v1985_v36  ;;  %v2011_v26 = vmul.f32 %v9791_v8, %v1991_v5  ;;  %v1994_v13 = vsel %vm379_vm0, %v1985_v36, %v1977_v16  ;;  %v9853_v16 = vld [vmem:[%s12706_s3 + $0xc0] sm:$0xff]  ;;  %v9867_v60 = vld [vmem:[%s12706_s3 + $0xb8] sm:$0xff]  ;;  %v9872_v36 = vld [vmem:[%s12706_s3 + $0xb0] sm:$0xff] }
 0x2c6   : > { %2241 = vrot.lane.b32.xlu1 %v9514_v12, %s6581_s22  ;;  %2233 = vrot.lane.b32.xlu0 %v9522_v55, %s6581_s22  ;;  %v2009_v6 = vmul.f32 %v9800_v20, %v1990_v33  ;;  %v2008_v29 = vmul.f32 %v9809_v37, %v1994_v13  ;;  %v2004_v33 = vmul.f32 %v9853_v16, %v1992_v49  ;;  %v9936_v49 = vld [vmem:[%s12706_s3 + $0x88] sm:$0xff] }
 0x2c7   : > { %v9819_v2 = vpop.permute.xlu1 %2030  ;;  %4736 = vmatprep.subr.mxu1 %v2011_v26  ;;  %v1946_v26 = vsel %vm330_vm1, %v9765_v27, %v9751_v15 }
 0x2c8   : > { %13050 = vst [vmem:[#allocation3_spill] sm:$0xff] %v9819_v2  ;;  %v9834_v35 = vpop.permute.xlu0 %2028  ;;  %4737 = vmatpush1.msra.mxu1 %v2010_v32  ;;  %v1942_v32 = vsel %vm330_vm1, %v9751_v15, %v9765_v27  ;;  %v9919_v15 = vld [vmem:[%s12706_s3 + $0x90] sm:$0xff]  ;;  %v1945_v27 = vsel %vm330_vm1, %v9757_v45, %v9737_v53  ;;  %v9941_v53 = vld [vmem:[%s12706_s3 + $0x80] sm:$0xff]  ;;  %v1944_v45 = vsel %vm330_vm1, %v9759_v7, %v9739_v51 }
 0x2c9   : > { %13051 = vst [vmem:[#allocation4_spill] sm:$0xff] %v9834_v35  ;;  %4738 = vmatprep.subr.mxu1 %v2009_v6  ;;  %v1962_v6 = vmul.f32 %v9872_v36, %v1947_v3  ;;  %v10069_v35 = vld [vmem:[%s12706_s3 + $0x30] sm:$0xff]  ;;  %v1846_v2 = vsel %vm232_vm3, %v9649_v28, %v9674_v25 }
 0x2ca   : > { %2231 = vrot.lane.b32.xlu1 %v9551_v9, %s6581_s22  ;;  %2086 = vrot.lane.b32.xlu0 %v9137_v42, %s6586_s27  ;;  %v1943_v42 = vsel %vm330_vm1, %v9749_v1, %v1939_v39  ;;  %v9890_v1 = vld [vmem:[%s12706_s3 + $0xa8] sm:$0xff]  ;;  %v9895_v39 = vld [vmem:[%s12706_s3 + $0xa0] sm:$0xff] }
 0x2cb   : > { %4739 = vmatpush1.msra.mxu1 %v2008_v29  ;;  %v9857_v54 = vpop.permute.xlu1 %2034  ;;  %v1963_v13 = vmul.f32 %v9867_v60, %v1943_v42  ;;  %v9914_v29 = vld [vmem:[%s12706_s3 + $0x98] sm:$0xff]  ;;  %v1961_v63 = vmul.f32 %v9890_v1, %v1942_v32  ;;  %v1958_v32 = vmul.f32 %v9919_v15, %v1945_v27  ;;  %v9984_v27 = vld [vmem:[%s12706_s3 + $0x68] sm:$0xff] }
 0x2cc   : > { %4740 = vmatprep.subr.mxu1 %v2007_v57  ;;  %v9862_v5 = vpop.permute.xlu0 %2032  ;;  %v1940_v57 = vsel %vm330_vm1, %v9739_v51, %v9759_v7  ;;  %v1959_v3 = vmul.f32 %v9914_v29, %v1941_v62  ;;  %v9962_v51 = vld [vmem:[%s12706_s3 + $0x78] sm:$0xff]  ;;  %v9967_v7 = vld [vmem:[%s12706_s3 + $0x70] sm:$0xff]  ;;  %v1894_v62 = vsel %vm281_vm2, %v9701_v21, %v9725_v41 }
 0x2cd   : > { %13052 = vst [vmem:[#allocation5_spill] sm:$0xff] %v9862_v5  ;;  %4741 = vmatpush1.msra.mxu1 %v2006_v48  ;;  %v1960_v48 = vmul.f32 %v9895_v39, %v1946_v26  ;;  %v1899_v26 = vsel %vm281_vm2, %v9723_v38, %v9696_v59 }
 0x2ce   : > { %2084 = vrot.lane.b32.xlu1 %v9148_v14, %s6586_s27  ;;  %2239 = vrot.lane.b32.xlu0 %v9542_v61, %s6581_s22 }
 0x2cf   : > { %4742 = vmatprep.subr.mxu1 %v2005_v23  ;;  %v9901_v14 = vpop.permute.xlu1 %2038  ;;  %v1895_v23 = vsel %vm281_vm2, %v9696_v59, %v9723_v38  ;;  %v9989_v59 = vld [vmem:[%s12706_s3 + $0x60] sm:$0xff]  ;;  %v1898_v38 = vsel %vm281_vm2, %v9725_v41, %v9701_v21  ;;  %v10010_v21 = vld [vmem:[%s12706_s3 + $0x58] sm:$0xff]  ;;  %v10015_v41 = vld [vmem:[%s12706_s3 + $0x50] sm:$0xff] }
 0x2d0   : > { %13053 = vst [vmem:[#allocation6_spill] sm:$0xff] %v9901_v14  ;;  %4743 = vmatpush1.msra.mxu1 %v2004_v33  ;;  %v9909_v46 = vpop.permute.xlu0 %2036 }
 0x2d1   : > { %13054 = vst [vmem:[#allocation7_spill] sm:$0xff] %v9909_v46  ;;  %4744 = vmatprep.subr.mxu1 %v1963_v13  ;;  %v1957_v13 = vmul.f32 %v9936_v49, %v1940_v57  ;;  %v1915_v57 = vmul.f32 %v9962_v51, %v1895_v23  ;;  %v1897_v23 = vsel %vm281_vm2, %v9710_v44, %v9682_v11  ;;  %v10064_v46 = vld [vmem:[%s12706_s3 + $0x38] sm:$0xff] }
 0x2d2   : > { %4745 = vmatpush1.msra.mxu1 %v1962_v6  ;;  %2237 = vrot.lane.b32.xlu1 %v9572_v0, %s6581_s22  ;;  %v1956_v6 = vmul.f32 %v9941_v53, %v1944_v45  ;;  %v1914_v45 = vmul.f32 %v9967_v7, %v1899_v26  ;;  %v1892_v26 = vsel %vm281_vm2, %v9687_v56, %v9714_v31 }
 0x2d3   : > { %2229 = vrot.lane.b32.xlu0 %v9585_v43, %s6581_s22  ;;  %4746 = vmatprep.subr.mxu1 %v1961_v63  ;;  %v9949_v42 = vpop.permute.xlu1 %2042 }
 0x2d4   : > { %4747 = vmatpush1.msra.mxu1 %v1960_v48  ;;  %v9957_v33 = vpop.permute.xlu0 %2040  ;;  %v1893_v48 = vsel %vm281_vm2, %v9682_v11, %v9710_v44  ;;  %v10037_v11 = vld [vmem:[%s12706_s3 + $0x40] sm:$0xff]  ;;  %v1896_v44 = vsel %vm281_vm2, %v9714_v31, %v9687_v56  ;;  %v1847_v56 = vsel %vm232_vm3, %v9647_v58, %v9670_v19  ;;  %v1851_v31 = vsel %vm232_vm3, %v9670_v19, %v9647_v58 }
 0x2d5   : > { %13055 = vst [vmem:[#allocation8_spill] sm:$0xff] %v9957_v33  ;;  %4748 = vmatprep.subr.mxu1 %v1959_v3 }
 0x2d6   : > { %4749 = vmatpush1.msra.mxu1 %v1958_v32  ;;  %2539 = vrot.lane.b32.xlu1 %v9488_v22, %s6587_s28  ;;  %v1913_v32 = vmul.f32 %v9984_v27, %v1894_v62 }
 0x2d7   : > { %2531 = vrot.lane.b32.xlu0 %v9497_v4, %s6587_s28  ;;  %4750 = vmatprep.subr.mxu1 %v1957_v13  ;;  %v9997_v63 = vpop.permute.xlu1 %2078  ;;  %v1912_v13 = vmul.f32 %v9989_v59, %v1898_v38  ;;  %v1911_v38 = vmul.f32 %v10010_v21, %v1893_v48  ;;  %v1910_v48 = vmul.f32 %v10015_v41, %v1897_v23 }
 0x2d8   : > { %4751 = vmatpush1.msra.mxu1 %v1956_v6  ;;  %v10005_v3 = vpop.permute.xlu0 %2076  ;;  %v10032_v6 = vld [vmem:[%s12706_s3 + $0x48] sm:$0xff] }
 0x2d9   : > { %13056 = vst [vmem:[#allocation9_spill] sm:$0xff] %v10005_v3  ;;  %4752 = vmatprep.subr.mxu1 %v1915_v57  ;;  %v2202_v57 = vld [vmem:[%s12706_s3 + $0x230] sm:$0xff]  ;;  %v1909_v23 = vmul.f32 %v10032_v6, %v1892_v26  ;;  %v1856_v26 = vld [vmem:[%s12706_s3 + $0x20] sm:$0xff] }
 0x2da   : > { %4753 = vmatpush1.msra.mxu1 %v1914_v45  ;;  %2537 = vrot.lane.b32.xlu1 %v9514_v12, %s6587_s28  ;;  %v2203_v45 = vld [vmem:[%s12706_s3 + $0x238] sm:$0xff]  ;;  %v1852_v3 = vld [vmem:[%s12706_s3] sm:$0xff] }
 0x2db   : > { %2529 = vrot.lane.b32.xlu0 %v9522_v55, %s6587_s28  ;;  %4754 = vmatprep.subr.mxu1 %v1913_v32  ;;  %v2187_v62 = vpop.permute.xlu1 %2186 }
 0x2dc   : > { %4755 = vmatpush1.msra.mxu1 %v1912_v13  ;;  %v2179_v32 = vpop.permute.xlu0 %2178  ;;  %v1908_v13 = vmul.f32 %v10037_v11, %v1896_v44  ;;  %v1850_v44 = vsel %vm232_vm3, %v9674_v25, %v9649_v28  ;;  %v1849_v28 = vsel %vm232_vm3, %v9659_v18, %v9615_v24  ;;  %v1844_v25 = vsel %vm232_vm3, %v9621_v40, %v9661_v30 }
 0x2dd   : > { %4756 = vmatprep.subr.mxu1 %v1911_v38  ;;  %v2191_v58 = vsel %vm583_vm7, %v2179_v32, %v2187_v62  ;;  %v2195_v19 = vsel %vm583_vm7, %v2187_v62, %v2179_v32  ;;  %v10086_v38 = vld [vmem:[%s12706_s3 + $0x28] sm:$0xff]  ;;  %v1845_v62 = vsel %vm232_vm3, %v9615_v24, %v9659_v18 }
 0x2de   : > { %v2210_v14 = vmul.f32 %v2202_v57, %v2191_v58  ;;  %4757 = vmatpush1.msra.mxu1 %v1910_v48  ;;  %2535 = vrot.lane.b32.xlu1 %v9542_v61, %s6587_s28  ;;  %v2211_v33 = vmul.f32 %v2203_v45, %v2195_v19  ;;  %v1867_v45 = vmul.f32 %v10064_v46, %v1847_v56  ;;  %v2200_v48 = vld [vmem:[%s12706_s3 + $0x220] sm:$0xff]  ;;  %v2201_v32 = vld [vmem:[%s12706_s3 + $0x228] sm:$0xff]  ;;  %v10120_v19 = vld [vmem:[%s12706_s3 + $0x18] sm:$0xff] }
 0x2df   : > { %2527 = vrot.lane.b32.xlu0 %v9551_v9, %s6587_s28  ;;  %4758 = vmatprep.subr.mxu1 %v1909_v23  ;;  %v2185_v57 = vpop.permute.xlu1 %2184  ;;  %v1866_v56 = vmul.f32 %v10069_v35, %v1851_v31  ;;  %v1854_v23 = vld [vmem:[%s12706_s3 + $0x10] sm:$0xff]  ;;  %v1864_v31 = vmul.f32 %v1856_v26, %v1850_v44  ;;  %v1863_v26 = vmul.f32 %v10120_v19, %v1845_v62 }
 0x2e0   : > { %4759 = vmatpush1.msra.mxu1 %v1908_v13  ;;  %4849 = vmatprep.subr.mxu0 %v2211_v33  ;;  %v2177_v58 = vpop.permute.xlu0 %2176  ;;  %v1865_v33 = vmul.f32 %v10086_v38, %v1846_v2  ;;  %v1848_v2 = vsel %vm232_vm3, %v9661_v30, %v9621_v40  ;;  %v2198_v44 = vld [vmem:[%s12706_s3 + $0x210] sm:$0xff] }
 0x2e1   : > { %4760 = vmatprep.subr.mxu1 %v1867_v45  ;;  %v2190_v24 = vsel %vm583_vm7, %v2177_v58, %v2185_v57  ;;  %v2194_v18 = vsel %vm583_vm7, %v2185_v57, %v2177_v58  ;;  %4850 = vmatpush1.msra.mxu0 %v2210_v14  ;;  %v10135_v45 = vld [vmem:[%s12706_s3 + $0x8] sm:$0xff]  ;;  %v2199_v57 = vld [vmem:[%s12706_s3 + $0x218] sm:$0xff] }
 0x2e2   : > { %v2208_v13 = vmul.f32 %v2200_v48, %v2190_v24  ;;  %4761 = vmatpush1.msra.mxu1 %v1866_v56  ;;  %2533 = vrot.lane.b32.xlu1 %v9572_v0, %s6587_s28  ;;  %v2209_v5 = vmul.f32 %v2201_v32, %v2194_v18  ;;  %v1862_v48 = vmul.f32 %v1854_v23, %v1849_v28  ;;  %v2196_v23 = vld [vmem:[%s12706_s3 + $0x200] sm:$0xff] }
 0x2e3   : > { %2525 = vrot.lane.b32.xlu0 %v9585_v43, %s6587_s28  ;;  %4762 = vmatprep.subr.mxu1 %v1865_v33  ;;  %v2183_v14 = vpop.permute.xlu1 %2182  ;;  %v1861_v62 = vmul.f32 %v10135_v45, %v1844_v25  ;;  %v1860_v56 = vmul.f32 %v1852_v3, %v1848_v2  ;;  %v2197_v25 = vld [vmem:[%s12706_s3 + $0x208] sm:$0xff] }
 0x2e4   : > { %4763 = vmatpush1.msra.mxu1 %v1864_v31  ;;  %4851 = vmatprep.subr.mxu0 %v2209_v5  ;;  %v2175_v32 = vpop.permute.xlu0 %2174 }
 0x2e5   : > { %4764 = vmatprep.subr.mxu1 %v1863_v26  ;;  %v2189_v40 = vsel %vm583_vm7, %v2175_v32, %v2183_v14  ;;  %v2193_v30 = vsel %vm583_vm7, %v2183_v14, %v2175_v32  ;;  %4852 = vmatpush1.msra.mxu0 %v2208_v13 }
 0x2e6   : > { %v2206_v58 = vmul.f32 %v2198_v44, %v2189_v40  ;;  %4765 = vmatpush1.msra.mxu1 %v1862_v48  ;;  %2491 = vrot.lane.b32.xlu1 %v9488_v22, %s6586_s27  ;;  %v2207_v28 = vmul.f32 %v2199_v57, %v2193_v30  ;;  %v6513_v48 = vld [vmem:[%s12704_s1 + $0x10] sm:$0xff] }
 0x2e7   : > { %2483 = vrot.lane.b32.xlu0 %v9497_v4, %s6586_s27  ;;  %4766 = vmatprep.subr.mxu1 %v1861_v62  ;;  %v2181_v5 = vpop.permute.xlu1 %2180 }
 0x2e8   : > { %4767 = vmatpush1.msra.mxu1 %v1860_v56  ;;  %4853 = vmatprep.subr.mxu0 %v2207_v28  ;;  %v2173_v3 = vpop.permute.xlu0 %2172  ;;  %v6514_v56 = vld [vmem:[%s12704_s1 + $0x28] sm:$0xff] }
 0x2e9   : > { %v2188_v24 = vsel %vm583_vm7, %v2173_v3, %v2181_v5  ;;  %v2192_v18 = vsel %vm583_vm7, %v2181_v5, %v2173_v3  ;;  %4854 = vmatpush1.msra.mxu0 %v2206_v58 }
 0x2ea   : > { %v2204_v33 = vmul.f32 %v2196_v23, %v2188_v24  ;;  %2489 = vrot.lane.b32.xlu1 %v9514_v12, %s6586_s27  ;;  %v2205_v31 = vmul.f32 %v2197_v25, %v2192_v18  ;;  %v6515_v25 = vld [vmem:[%s12704_s1 + $0x40] sm:$0xff] }
 0x2eb   : > { %2481 = vrot.lane.b32.xlu0 %v9522_v55, %s6586_s27  ;;  %v2388_v13 = vpop.permute.xlu1 %2387 }
 0x2ec   : > { %4855 = vmatprep.subr.mxu0 %v2205_v31  ;;  %v2380_v2 = vpop.permute.xlu0 %2379  ;;  %v6516_v31 = vld [vmem:[%s12704_s1 + $0x58] sm:$0xff] }
 0x2ed   : > { %v2392_v14 = vsel %vm379_vm0, %v2380_v2, %v2388_v13  ;;  %v2396_v26 = vsel %vm379_vm0, %v2388_v13, %v2380_v2  ;;  %4856 = vmatpush1.msra.mxu0 %v2204_v33  ;;  %v6517_v2 = vld [vmem:[%s12704_s1 + $0x8] sm:$0xff] }
 0x2ee   : > { %v2411_v44 = vmul.f32 %v2396_v26, %v9786_v34  ;;  %2487 = vrot.lane.b32.xlu1 %v9542_v61, %s6586_s27  ;;  %v2412_v57 = vmul.f32 %v2392_v14, %v9791_v8  ;;  %6196 = vmatmul.mubr.msk.f32.vlgmr.msra.gmra.mxu0 %vm4011_vm8, %v6513_v48 }
 0x2ef   : > { %2479 = vrot.lane.b32.xlu0 %v9551_v9, %s6586_s27  ;;  %v2386_v32 = vpop.permute.xlu1 %2385  ;;  %4895 = vmatprep.mubr.f32.mxu0 %v13041_v17 }
 0x2f0   : > { %4914 = vmatprep.subr.mxu0 %v2412_v57  ;;  %v2378_v40 = vpop.permute.xlu0 %2377 }
 0x2f1   : > { %v2391_v34 = vsel %vm379_vm0, %v2378_v40, %v2386_v32  ;;  %v2395_v8 = vsel %vm379_vm0, %v2386_v32, %v2378_v40  ;;  %4915 = vmatpush1.msra.mxu0 %v2411_v44 }
 0x2f2   : > { %v2409_v30 = vmul.f32 %v2395_v8, %v9809_v37  ;;  %2485 = vrot.lane.b32.xlu1 %v9572_v0, %s6586_s27  ;;  %v2410_v62 = vmul.f32 %v2391_v34, %v9800_v20  ;;  %6197 = vmatmul.mubr.msk.f32.gmra.mxu0 %vm4011_vm8, %v6514_v56 }
 0x2f3   : > { %2477 = vrot.lane.b32.xlu0 %v9585_v43, %s6586_s27  ;;  %v2384_v58 = vpop.permute.xlu1 %2383  ;;  %4901 = vmatprep.mubr.f32.mxu0 %v13041_v17 }
 0x2f4   : > { %4916 = vmatprep.subr.mxu0 %v2410_v62  ;;  %v2376_v28 = vpop.permute.xlu0 %2375 }
 0x2f5   : > { %v2390_v37 = vsel %vm379_vm0, %v2376_v28, %v2384_v58  ;;  %v2394_v20 = vsel %vm379_vm0, %v2384_v58, %v2376_v28  ;;  %4917 = vmatpush1.msra.mxu0 %v2409_v30 }
 0x2f6   : > { %v2407_v5 = vmul.f32 %v2394_v20, %v9830_v50  ;;  %2443 = vrot.lane.b32.xlu1 %v9488_v22, %s6585_s26  ;;  %v2408_v23 = vmul.f32 %v2390_v37, %v9825_v52  ;;  %6198 = vmatmul.mubr.msk.f32.gmra.mxu0 %vm4011_vm8, %v6515_v25 }
 0x2f7   : > { %2435 = vrot.lane.b32.xlu0 %v9497_v4, %s6585_s26  ;;  %v2382_v3 = vpop.permute.xlu1 %2381  ;;  %4907 = vmatprep.mubr.f32.mxu0 %v13041_v17 }
 0x2f8   : > { %4918 = vmatprep.subr.mxu0 %v2408_v23  ;;  %v2374_v24 = vpop.permute.xlu0 %2373 }
 0x2f9   : > { %v2389_v50 = vsel %vm379_vm0, %v2374_v24, %v2382_v3  ;;  %v2393_v52 = vsel %vm379_vm0, %v2382_v3, %v2374_v24  ;;  %4919 = vmatpush1.msra.mxu0 %v2407_v5 }
 0x2fa   : > { %v2405_v18 = vmul.f32 %v2393_v52, %v9853_v16  ;;  %2441 = vrot.lane.b32.xlu1 %v9514_v12, %s6585_s26  ;;  %v2406_v33 = vmul.f32 %v2389_v50, %v9847_v10  ;;  %6199 = vmatmul.mubr.msk.f32.gmra.mxu0 %vm4011_vm8, %v6516_v31  ;;  %v10314_v52 = vld [vmem:[%s6632_s21 + $0x1b8] sm:$0xff] }
 0x2fb   : > { %2433 = vrot.lane.b32.xlu0 %v9522_v55, %s6585_s26  ;;  %v2340_v13 = vpop.permute.xlu1 %2339  ;;  %4978 = vmatprep.mubr.f32.mxu0 %v6517_v2  ;;  %v10335_v2 = vld [vmem:[%s6632_s21 + $0x1a8] sm:$0xff] }
 0x2fc   : > { %4920 = vmatprep.subr.mxu0 %v2406_v33  ;;  %v2332_v16 = vpop.permute.xlu0 %2331 }
 0x2fd   : > { %v2344_v10 = vsel %vm330_vm1, %v2332_v16, %v2340_v13  ;;  %v2348_v14 = vsel %vm330_vm1, %v2340_v13, %v2332_v16  ;;  %4921 = vmatpush1.msra.mxu0 %v2405_v18  ;;  %v10322_v18 = vld [vmem:[%s6632_s21 + $0x1b0] sm:$0xff] }
 0x2fe   : > { %v2363_v26 = vmul.f32 %v2348_v14, %v9872_v36  ;;  %2439 = vrot.lane.b32.xlu1 %v9542_v61, %s6585_s26  ;;  %v2364_v44 = vmul.f32 %v2344_v10, %v9867_v60  ;;  %v10338_v14 = vld [vmem:[%s6632_s21 + $0x1a0] sm:$0xff] }
 0x2ff   : > { %2431 = vrot.lane.b32.xlu0 %v9551_v9, %s6585_s26 }
 0x300   : > { %v2338_v57 = vpop.permute.xlu1 %2337  ;;  %4922 = vmatprep.subr.mxu0 %v2364_v44  ;;  %v2330_v48 = vpop.permute.xlu0 %2329 }
 0x301   : > { %v2343_v32 = vsel %vm330_vm1, %v2330_v48, %v2338_v57  ;;  %v2347_v40 = vsel %vm330_vm1, %v2338_v57, %v2330_v48  ;;  %4923 = vmatpush1.msra.mxu0 %v2363_v26 }
 0x302   : > { %v2361_v36 = vmul.f32 %v2347_v40, %v9895_v39  ;;  %2437 = vrot.lane.b32.xlu1 %v9572_v0, %s6585_s26  ;;  %v2362_v60 = vmul.f32 %v2343_v32, %v9890_v1  ;;  %v10353_v32 = vld [vmem:[%s12706_s3 + $0x1d0] sm:$0xff]  ;;  %v10356_v40 = vld [vmem:[%s6632_s21 + $0x198] sm:$0xff] }
 0x303   : > { %2429 = vrot.lane.b32.xlu0 %v9585_v43, %s6585_s26 }
 0x304   : > { %v2336_v34 = vpop.permute.xlu1 %2335  ;;  %4924 = vmatprep.subr.mxu0 %v2362_v60  ;;  %v2328_v8 = vpop.permute.xlu0 %2327  ;;  %v10364_v60 = vld [vmem:[%s6632_s21 + $0x190] sm:$0xff] }
 0x305   : > { %v2342_v30 = vsel %vm330_vm1, %v2328_v8, %v2336_v34  ;;  %v2346_v62 = vsel %vm330_vm1, %v2336_v34, %v2328_v8  ;;  %4925 = vmatpush1.msra.mxu0 %v2361_v36 }
 0x306   : > { %v2359_v39 = vmul.f32 %v2346_v62, %v9919_v15  ;;  %2587 = vrot.lane.b32.xlu1 %v9488_v22, %s6588_s29  ;;  %v2360_v1 = vmul.f32 %v2342_v30, %v9914_v29  ;;  %v10286_v29 = vld [vmem:[%s12706_s3 + $0x1f8] sm:$0xff] }
 0x307   : > { %2579 = vrot.lane.b32.xlu0 %v9497_v4, %s6588_s29  ;;  %v10281_v4 = vld [vmem:[%s12706_s3 + $0x1f0] sm:$0xff] }
 0x308   : > { %v2334_v56 = vpop.permute.xlu1 %2333  ;;  %4926 = vmatprep.subr.mxu0 %v2360_v1  ;;  %v2326_v58 = vpop.permute.xlu0 %2325 }
 0x309   : > { %v2341_v28 = vsel %vm330_vm1, %v2326_v58, %v2334_v56  ;;  %v2345_v37 = vsel %vm330_vm1, %v2334_v56, %v2326_v58  ;;  %4927 = vmatpush1.msra.mxu0 %v2359_v39  ;;  %v10377_v39 = vld [vmem:[%s6632_s21 + $0x188] sm:$0xff]  ;;  %v10380_v58 = vld [vmem:[%s6632_s21 + $0x180] sm:$0xff] }
 0x30a   : > { %v2357_v15 = vmul.f32 %v2345_v37, %v9941_v53  ;;  %2585 = vrot.lane.b32.xlu1 %v9514_v12, %s6588_s29  ;;  %v2358_v22 = vmul.f32 %v2341_v28, %v9936_v49 }
 0x30b   : > { %2577 = vrot.lane.b32.xlu0 %v9522_v55, %s6588_s29 }
 0x30c   : > { %v2139_v20 = vpop.permute.xlu1 %2138  ;;  %4928 = vmatprep.subr.mxu0 %v2358_v22  ;;  %v2131_v53 = vpop.permute.xlu0 %2130 }
 0x30d   : > { %v2143_v12 = vsel %vm534_vm4, %v2131_v53, %v2139_v20  ;;  %v2147_v49 = vsel %vm534_vm4, %v2139_v20, %v2131_v53  ;;  %4929 = vmatpush1.msra.mxu0 %v2357_v15  ;;  %v10395_v20 = vld [vmem:[%s12706_s3 + $0x1c0] sm:$0xff]  ;;  %v10400_v53 = vld [vmem:[%s12706_s3 + $0x1c8] sm:$0xff] }
 0x30e   : > { %v2162_v55 = vmul.f32 %v10281_v4, %v2143_v12  ;;  %2583 = vrot.lane.b32.xlu1 %v9542_v61, %s6588_s29  ;;  %v2163_v5 = vmul.f32 %v10286_v29, %v2147_v49 }
 0x30f   : > { %2575 = vrot.lane.b32.xlu0 %v9551_v9, %s6588_s29  ;;  %v10311_v9 = vld [vmem:[%s12706_s3 + $0x1e0] sm:$0xff] }
 0x310   : > { %v2292_v23 = vpop.permute.xlu1 %2291  ;;  %4768 = vmatprep.subr.mxu1 %v2163_v5  ;;  %v2284_v25 = vpop.permute.xlu0 %2283 }
 0x311   : > { %v2296_v3 = vsel %vm281_vm2, %v2284_v25, %v2292_v23  ;;  %v2300_v24 = vsel %vm281_vm2, %v2292_v23, %v2284_v25  ;;  %4769 = vmatpush2.msra.mxu1 %v2162_v55 }
 0x312   : > { %v2315_v50 = vmul.f32 %v2300_v24, %v9967_v7  ;;  %2581 = vrot.lane.b32.xlu1 %v9572_v0, %s6588_s29  ;;  %v2316_v61 = vmul.f32 %v2296_v3, %v9962_v51  ;;  %v10319_v7 = vld [vmem:[%s12706_s3 + $0x1e8] sm:$0xff] }
 0x313   : > { %2573 = vrot.lane.b32.xlu0 %v9585_v43, %s6588_s29 }
 0x314   : > { %v2137_v0 = vpop.permute.xlu1 %2136  ;;  %4930 = vmatprep.subr.mxu0 %v2316_v61  ;;  %v2129_v51 = vpop.permute.xlu0 %2128 }
 0x315   : > { %v2142_v43 = vsel %vm534_vm4, %v2129_v51, %v2137_v0  ;;  %v2146_v33 = vsel %vm534_vm4, %v2137_v0, %v2129_v51  ;;  %4931 = vmatpush1.msra.mxu0 %v2315_v50  ;;  %v10425_v0 = vld [vmem:[%s12706_s3 + $0x1b0] sm:$0xff]  ;;  %v10430_v51 = vld [vmem:[%s12706_s3 + $0x1b8] sm:$0xff] }
 0x316   : > { %v2160_v31 = vmul.f32 %v10311_v9, %v2142_v43  ;;  %2788 = vrot.lane.b32.xlu1 %v10314_v52, %s6584_s25  ;;  %v2161_v13 = vmul.f32 %v10319_v7, %v2146_v33 }
 0x317   : > { %2780 = vrot.lane.b32.xlu0 %v10322_v18, %s6584_s25 }
 0x318   : > { %v2290_v16 = vpop.permute.xlu1 %2289  ;;  %4770 = vmatprep.subr.mxu1 %v2161_v13  ;;  %v2282_v10 = vpop.permute.xlu0 %2281 }
 0x319   : > { %v2295_v26 = vsel %vm281_vm2, %v2282_v10, %v2290_v16  ;;  %v2299_v44 = vsel %vm281_vm2, %v2290_v16, %v2282_v10  ;;  %4771 = vmatpush2.msra.mxu1 %v2160_v31 }
 0x31a   : > { %v2313_v57 = vmul.f32 %v2299_v44, %v9989_v59  ;;  %2786 = vrot.lane.b32.xlu1 %v10335_v2, %s6584_s25  ;;  %v2314_v48 = vmul.f32 %v2295_v26, %v9984_v27  ;;  %v10361_v59 = vld [vmem:[%s12706_s3 + $0x1d8] sm:$0xff] }
 0x31b   : > { %2778 = vrot.lane.b32.xlu0 %v10338_v14, %s6584_s25 }
 0x31c   : > { %v2135_v36 = vpop.permute.xlu1 %2134  ;;  %4932 = vmatprep.subr.mxu0 %v2314_v48  ;;  %v2127_v27 = vpop.permute.xlu0 %2126 }
 0x31d   : > { %v2141_v34 = vsel %vm534_vm4, %v2127_v27, %v2135_v36  ;;  %v2145_v8 = vsel %vm534_vm4, %v2135_v36, %v2127_v27  ;;  %4933 = vmatpush1.msra.mxu0 %v2313_v57  ;;  %v10455_v36 = vld [vmem:[%s12706_s3 + $0x1a0] sm:$0xff]  ;;  %v10460_v27 = vld [vmem:[%s12706_s3 + $0x1a8] sm:$0xff] }
 0x31e   : > { %v2158_v30 = vmul.f32 %v10353_v32, %v2141_v34  ;;  %2784 = vrot.lane.b32.xlu1 %v10356_v40, %s6584_s25  ;;  %v2159_v62 = vmul.f32 %v10361_v59, %v2145_v8 }
 0x31f   : > { %2776 = vrot.lane.b32.xlu0 %v10364_v60, %s6584_s25 }
 0x320   : > { %v2288_v1 = vpop.permute.xlu1 %2287  ;;  %4772 = vmatprep.subr.mxu1 %v2159_v62  ;;  %v2280_v56 = vpop.permute.xlu0 %2279 }
 0x321   : > { %v2294_v28 = vsel %vm281_vm2, %v2280_v56, %v2288_v1  ;;  %v2298_v37 = vsel %vm281_vm2, %v2288_v1, %v2280_v56  ;;  %4773 = vmatpush2.msra.mxu1 %v2158_v30  ;;  %v2257_v1 = vld [vmem:[%s12706_s3 + $0x20] sm:$0xff] }
 0x322   : > { %v2311_v15 = vmul.f32 %v2298_v37, %v10015_v41  ;;  %2782 = vrot.lane.b32.xlu1 %v10377_v39, %s6584_s25  ;;  %v2312_v22 = vmul.f32 %v2294_v28, %v10010_v21 }
 0x323   : > { %2774 = vrot.lane.b32.xlu0 %v10380_v58, %s6584_s25 }
 0x324   : > { %v2133_v12 = vpop.permute.xlu1 %2132  ;;  %4934 = vmatprep.subr.mxu0 %v2312_v22  ;;  %v2125_v41 = vpop.permute.xlu0 %2124 }
 0x325   : > { %v2140_v49 = vsel %vm534_vm4, %v2125_v41, %v2133_v12  ;;  %v2144_v21 = vsel %vm534_vm4, %v2133_v12, %v2125_v41  ;;  %4935 = vmatpush1.msra.mxu0 %v2311_v15  ;;  %v10487_v41 = vld [vmem:[%s12706_s3 + $0x190] sm:$0xff] }
 0x326   : > { %v2156_v55 = vmul.f32 %v10395_v20, %v2140_v49  ;;  %2740 = vrot.lane.b32.xlu1 %v10314_v52, %s6583_s24  ;;  %v2157_v5 = vmul.f32 %v10400_v53, %v2144_v21  ;;  %v10492_v49 = vld [vmem:[%s12706_s3 + $0x198] sm:$0xff] }
 0x327   : > { %2732 = vrot.lane.b32.xlu0 %v10322_v18, %s6583_s24 }
 0x328   : > { %v2286_v23 = vpop.permute.xlu1 %2285  ;;  %4774 = vmatprep.subr.mxu1 %v2157_v5  ;;  %v2278_v25 = vpop.permute.xlu0 %2277 }
 0x329   : > { %v2293_v3 = vsel %vm281_vm2, %v2278_v25, %v2286_v23  ;;  %v2297_v24 = vsel %vm281_vm2, %v2286_v23, %v2278_v25  ;;  %4775 = vmatpush2.msra.mxu1 %v2156_v55 }
 0x32a   : > { %v2309_v50 = vmul.f32 %v2297_v24, %v10037_v11  ;;  %2988 = vrot.lane.b32.xlu1 %v10314_v52, %s6588_s29  ;;  %v2310_v61 = vmul.f32 %v2293_v3, %v10032_v6  ;;  %v10509_v3 = vld [vmem:[%s12706_s3 + $0x180] sm:$0xff]  ;;  %v10517_v24 = vld [vmem:[%s12706_s3 + $0x188] sm:$0xff] }
 0x32b   : > { %2980 = vrot.lane.b32.xlu0 %v10322_v18, %s6588_s29 }
 0x32c   : > { %v2091_v43 = vpop.permute.xlu1 %2090  ;;  %4936 = vmatprep.subr.mxu0 %v2310_v61  ;;  %v2083_v11 = vpop.permute.xlu0 %2082  ;;  %v2051_v61 = vsel %vm436_vm6, %v9949_v42, %v9857_v54 }
 0x32d   : > { %v2095_v33 = vsel %vm485_vm5, %v2083_v11, %v2091_v43  ;;  %v2099_v6 = vsel %vm485_vm5, %v2091_v43, %v2083_v11  ;;  %4937 = vmatpush1.msra.mxu0 %v2309_v50  ;;  %v2047_v50 = vsel %vm436_vm6, %v9857_v54, %v9949_v42  ;;  %v10540_v54 = vld [vmem:[%s12706_s3 + $0x178] sm:$0xff]  ;;  %v2058_v42 = vld [vmem:[%s12706_s3 + $0x170] sm:$0xff] }
 0x32e   : > { %v2114_v31 = vmul.f32 %v10425_v0, %v2095_v33  ;;  %2738 = vrot.lane.b32.xlu1 %v10335_v2, %s6583_s24  ;;  %v2115_v13 = vmul.f32 %v10430_v51, %v2099_v6  ;;  %v13057_v33 = vld [vmem:[#allocation9_spill] sm:$0xff] }
 0x32f   : > { %2730 = vrot.lane.b32.xlu0 %v10338_v14, %s6583_s24 }
 0x330   : > { %v2244_v16 = vpop.permute.xlu1 %2243  ;;  %4776 = vmatprep.subr.mxu1 %v2115_v13  ;;  %v2236_v10 = vpop.permute.xlu0 %2235 }
 0x331   : > { %v2248_v26 = vsel %vm232_vm3, %v2236_v10, %v2244_v16  ;;  %v2252_v44 = vsel %vm232_vm3, %v2244_v16, %v2236_v10  ;;  %4777 = vmatpush2.msra.mxu1 %v2114_v31 }
 0x332   : > { %v2267_v57 = vmul.f32 %v2252_v44, %v10069_v35  ;;  %2986 = vrot.lane.b32.xlu1 %v10335_v2, %s6588_s29  ;;  %v2268_v48 = vmul.f32 %v2248_v26, %v10064_v46 }
 0x333   : > { %2978 = vrot.lane.b32.xlu0 %v10338_v14, %s6588_s29 }
 0x334   : > { %v2089_v34 = vpop.permute.xlu1 %2088  ;;  %4938 = vmatprep.subr.mxu0 %v2268_v48  ;;  %v2081_v35 = vpop.permute.xlu0 %2080  ;;  %v13058_v48 = vld [vmem:[#allocation5_spill] sm:$0xff] }
 0x335   : > { %v2094_v8 = vsel %vm485_vm5, %v2081_v35, %v2089_v34  ;;  %v2098_v46 = vsel %vm485_vm5, %v2089_v34, %v2081_v35  ;;  %4939 = vmatpush1.msra.mxu0 %v2267_v57  ;;  %v13059_v34 = vld [vmem:[#allocation8_spill] sm:$0xff] }
 0x336   : > { %v2112_v30 = vmul.f32 %v10455_v36, %v2094_v8  ;;  %2736 = vrot.lane.b32.xlu1 %v10356_v40, %s6583_s24  ;;  %v2113_v62 = vmul.f32 %v10460_v27, %v2098_v46  ;;  %v2050_v35 = vsel %vm436_vm6, %v13059_v34, %v13058_v48  ;;  %v10559_v8 = vld [vmem:[%s12706_s3 + $0x168] sm:$0xff]  ;;  %v2056_v46 = vld [vmem:[%s12706_s3 + $0x160] sm:$0xff] }
 0x337   : > { %2728 = vrot.lane.b32.xlu0 %v10364_v60, %s6583_s24 }
 0x338   : > { %v2242_v56 = vpop.permute.xlu1 %2241  ;;  %4778 = vmatprep.subr.mxu1 %v2113_v62  ;;  %v2234_v28 = vpop.permute.xlu0 %2233  ;;  %v2253_v62 = vld [vmem:[%s12706_s3] sm:$0xff] }
 0x339   : > { %v2247_v37 = vsel %vm232_vm3, %v2234_v28, %v2242_v56  ;;  %v2251_v15 = vsel %vm232_vm3, %v2242_v56, %v2234_v28  ;;  %4779 = vmatpush2.msra.mxu1 %v2112_v30  ;;  %v13060_v56 = vld [vmem:[#allocation6_spill] sm:$0xff]  ;;  %v13061_v28 = vld [vmem:[#allocation3_spill] sm:$0xff] }
 0x33a   : > { %v2265_v22 = vmul.f32 %v2257_v1, %v2251_v15  ;;  %2984 = vrot.lane.b32.xlu1 %v10356_v40, %s6588_s29  ;;  %v2266_v12 = vmul.f32 %v2247_v37, %v10086_v38  ;;  %v2067_v1 = vmul.f32 %v10540_v54, %v2051_v61  ;;  %v2045_v37 = vsel %vm436_vm6, %v13061_v28, %v13060_v56  ;;  %v10599_v61 = vld [vmem:[%s6632_s21 + $0x1f8] sm:$0xff] }
 0x33b   : > { %2976 = vrot.lane.b32.xlu0 %v10364_v60, %s6588_s29  ;;  %v2049_v15 = vsel %vm436_vm6, %v13060_v56, %v13061_v28  ;;  %v10643_v28 = vld [vmem:[%s6632_s21 + $0x1e8] sm:$0xff] }
 0x33c   : > { %v2232_v21 = vpop.permute.xlu1 %2231  ;;  %4940 = vmatprep.subr.mxu0 %v2266_v12  ;;  %v2087_v55 = vpop.permute.xlu0 %2086 }
 0x33d   : > { %v2093_v38 = vsel %vm485_vm5, %v9997_v63, %v2087_v55  ;;  %v2097_v5 = vsel %vm485_vm5, %v2087_v55, %v9997_v63  ;;  %4941 = vmatpush1.msra.mxu0 %v2265_v22  ;;  %v2255_v63 = vld [vmem:[%s12706_s3 + $0x10] sm:$0xff]  ;;  %v2066_v22 = vmul.f32 %v2058_v42, %v2047_v50 }
 0x33e   : > { %v2110_v23 = vmul.f32 %v10487_v41, %v2093_v38  ;;  %2734 = vrot.lane.b32.xlu1 %v10377_v39, %s6583_s24  ;;  %v2111_v25 = vmul.f32 %v10492_v49, %v2097_v5  ;;  %v2065_v38 = vmul.f32 %v10559_v8, %v2050_v35  ;;  %v10590_v5 = vld [vmem:[%s12706_s3 + $0x158] sm:$0xff] }
 0x33f   : > { %2726 = vrot.lane.b32.xlu0 %v10380_v58, %s6583_s24 }
 0x340   : > { %v2085_v43 = vpop.permute.xlu1 %2084  ;;  %4780 = vmatprep.subr.mxu1 %v2111_v25  ;;  %v2240_v11 = vpop.permute.xlu0 %2239 }
 0x341   : > { %v2092_v6 = vsel %vm485_vm5, %v13057_v33, %v2085_v43  ;;  %v2096_v31 = vsel %vm485_vm5, %v2085_v43, %v13057_v33  ;;  %v2246_v13 = vsel %vm232_vm3, %v2232_v21, %v2240_v11  ;;  %v2250_v16 = vsel %vm232_vm3, %v2240_v11, %v2232_v21  ;;  %4781 = vmatpush2.msra.mxu1 %v2110_v23  ;;  %v2054_v23 = vld [vmem:[%s12706_s3 + $0x150] sm:$0xff]  ;;  %v13062_v43 = vld [vmem:[#allocation4_spill] sm:$0xff]  ;;  %v13063_v11 = vld [vmem:[#allocation7_spill] sm:$0xff] }
 0x342   : > { %v2108_v10 = vmul.f32 %v10509_v3, %v2092_v6  ;;  %v2263_v26 = vmul.f32 %v2255_v63, %v2250_v16  ;;  %2982 = vrot.lane.b32.xlu1 %v10377_v39, %s6588_s29  ;;  %v2109_v44 = vmul.f32 %v10517_v24, %v2096_v31  ;;  %v2264_v57 = vmul.f32 %v2246_v13, %v10120_v19  ;;  %v10606_v31 = vld [vmem:[%s6632_s21 + $0x1f0] sm:$0xff]  ;;  %v10611_v13 = vld [vmem:[%s12706_s3 + $0x148] sm:$0xff] }
 0x343   : > { %2974 = vrot.lane.b32.xlu0 %v10380_v58, %s6588_s29  ;;  %v2046_v19 = vsel %vm436_vm6, %v13058_v48, %v13059_v34  ;;  %v2048_v33 = vsel %vm436_vm6, %v13063_v11, %v13062_v43  ;;  %v2044_v16 = vsel %vm436_vm6, %v13062_v43, %v13063_v11  ;;  %v6523_v11 = vld [vmem:[%s6632_s21 + $0x110] sm:$0xff] }
 0x344   : > { %v2238_v30 = vpop.permute.xlu1 %2237  ;;  %4782 = vmatprep.subr.mxu1 %v2109_v44  ;;  %4942 = vmatprep.subr.mxu0 %v2264_v57  ;;  %v2064_v25 = vmul.f32 %v2056_v46, %v2046_v19  ;;  %v2061_v34 = vmul.f32 %v10611_v13, %v2048_v33 }
 0x345   : > { %v2230_v12 = vpop.permute.xlu0 %2229  ;;  %4783 = vmatpush2.msra.mxu1 %v2108_v10  ;;  %4943 = vmatpush1.msra.mxu0 %v2263_v26  ;;  %v2063_v10 = vmul.f32 %v10590_v5, %v2049_v15  ;;  %v2062_v26 = vmul.f32 %v2054_v23, %v2045_v37  ;;  %v10646_v37 = vld [vmem:[%s6632_s21 + $0x1e0] sm:$0xff]  ;;  %v6518_v15 = vld [vmem:[%s6632_s21 + $0x138] sm:$0xff] }
 0x346   : > { %v2245_v21 = vsel %vm232_vm3, %v2230_v12, %v2238_v30  ;;  %v2249_v55 = vsel %vm232_vm3, %v2238_v30, %v2230_v12  ;;  %2692 = vrot.lane.b32.xlu1 %v10314_v52, %s6582_s23  ;;  %4784 = vmatprep.subr.mxu1 %v2067_v1 }
 0x347   : > { %v2261_v63 = vmul.f32 %v2253_v62, %v2249_v55  ;;  %2684 = vrot.lane.b32.xlu0 %v10322_v18, %s6582_s23  ;;  %4785 = vmatpush2.msra.mxu1 %v2066_v22  ;;  %v2262_v50 = vmul.f32 %v2245_v21, %v10135_v45  ;;  %v2052_v45 = vld [vmem:[%s12706_s3 + $0x140] sm:$0xff] }
 0x348   : > { %v2540_v6 = vpop.permute.xlu1 %2539  ;;  %4786 = vmatprep.subr.mxu1 %v2065_v38  ;;  %v2060_v46 = vmul.f32 %v2052_v45, %v2044_v16  ;;  %v10675_v45 = vld [vmem:[%s6632_s21 + $0x1d8] sm:$0xff]  ;;  %v10678_v16 = vld [vmem:[%s6632_s21 + $0x1d0] sm:$0xff] }
 0x349   : > { %4944 = vmatprep.subr.mxu0 %v2262_v50  ;;  %v2532_v42 = vpop.permute.xlu0 %2531  ;;  %4787 = vmatpush2.msra.mxu1 %v2064_v25  ;;  %v6521_v25 = vld [vmem:[%s6632_s21 + $0x120] sm:$0xff]  ;;  %v6522_v50 = vld [vmem:[%s6632_s21 + $0x118] sm:$0xff] }
 0x34a   : > { %v2544_v44 = vsel %vm534_vm4, %v2532_v42, %v2540_v6  ;;  %v2548_v57 = vsel %vm534_vm4, %v2540_v6, %v2532_v42  ;;  %4945 = vmatpush1.msra.mxu0 %v2261_v63  ;;  %3189 = vrot.lane.b32.xlu1 %v10599_v61, %s6584_s25  ;;  %v6524_v42 = vld [vmem:[%s6632_s21 + $0x108] sm:$0xff] }
 0x34b   : > { %v2563_v48 = vmul.f32 %v2544_v44, %v10281_v4  ;;  %3181 = vrot.lane.b32.xlu0 %v10606_v31, %s6584_s25  ;;  %4788 = vmatprep.subr.mxu1 %v2063_v10  ;;  %v2564_v35 = vmul.f32 %v2548_v57, %v10286_v29 }
 0x34c   : > { %4789 = vmatpush2.msra.mxu1 %v2062_v26  ;;  %v2538_v19 = vpop.permute.xlu1 %2537  ;;  %v6525_v26 = vld [vmem:[%s6632_s21 + $0x100] sm:$0xff] }
 0x34d   : > { %4790 = vmatprep.subr.mxu1 %v2061_v34  ;;  %4946 = vmatprep.subr.mxu0 %v2564_v35  ;;  %v2530_v30 = vpop.permute.xlu0 %2529  ;;  %v10701_v35 = vld [vmem:[%s12704_s1 + $0x20] sm:$0xff] }
 0x34e   : > { %v2543_v4 = vsel %vm534_vm4, %v2530_v30, %v2538_v19  ;;  %v2547_v62 = vsel %vm534_vm4, %v2538_v19, %v2530_v30  ;;  %4791 = vmatpush2.msra.mxu1 %v2060_v46  ;;  %4947 = vmatpush2.msra.mxu0 %v2563_v48 }
 0x34f   : > { %v2561_v29 = vmul.f32 %v2543_v4, %v10311_v9  ;;  %2690 = vrot.lane.b32.xlu1 %v10335_v2, %s6582_s23  ;;  %2682 = vrot.lane.b32.xlu0 %v10338_v14, %s6582_s23  ;;  %v2562_v1 = vmul.f32 %v2547_v62, %v10319_v7  ;;  %v6519_v9 = vld [vmem:[%s6632_s21 + $0x130] sm:$0xff]  ;;  %v6520_v7 = vld [vmem:[%s6632_s21 + $0x128] sm:$0xff] }
 0x350   : > { %v2536_v56 = vpop.permute.xlu1 %2535  ;;  %4792 = vmatprep.subr.mxu1 %v6518_v15 }
 0x351   : > { %4948 = vmatprep.subr.mxu0 %v2562_v1  ;;  %v2528_v22 = vpop.permute.xlu0 %2527  ;;  %4793 = vmatpush2.msra.mxu1 %v6519_v9  ;;  %v10724_v1 = vld [vmem:[%s6632_s21 + $0x1c0] sm:$0xff] }
 0x352   : > { %v2542_v12 = vsel %vm534_vm4, %v2528_v22, %v2536_v56  ;;  %v2546_v21 = vsel %vm534_vm4, %v2536_v56, %v2528_v22  ;;  %4949 = vmatpush2.msra.mxu0 %v2561_v29  ;;  %4794 = vmatprep.subr.mxu1 %v6520_v7  ;;  %v10721_v29 = vld [vmem:[%s6632_s21 + $0x1c8] sm:$0xff]  ;;  %v10729_v56 = vld [vmem:[%s12704_s1 + $0x38] sm:$0xff]  ;;  %v10739_v22 = vld [vmem:[%s12704_s1 + $0x30] sm:$0xff] }
 0x353   : > { %v2559_v55 = vmul.f32 %v2542_v12, %v10353_v32  ;;  %3187 = vrot.lane.b32.xlu1 %v10643_v28, %s6584_s25  ;;  %3179 = vrot.lane.b32.xlu0 %v10646_v37, %s6584_s25  ;;  %v2560_v38 = vmul.f32 %v2546_v21, %v10361_v59  ;;  %v10751_v7 = vld [vmem:[%s12704_s1 + $0x50] sm:$0xff] }
 0x354   : > { %v2534_v23 = vpop.permute.xlu1 %2533  ;;  %4795 = vmatpush2.msra.mxu1 %v6521_v25 }
 0x355   : > { %4950 = vmatprep.subr.mxu0 %v2560_v38  ;;  %v2526_v63 = vpop.permute.xlu0 %2525  ;;  %4796 = vmatprep.subr.mxu1 %v6522_v50  ;;  %v2459_v50 = vld [vmem:[%s12706_s3 + $0x170] sm:$0xff] }
 0x356   : > { %v2541_v32 = vsel %vm534_vm4, %v2526_v63, %v2534_v23  ;;  %v2545_v43 = vsel %vm534_vm4, %v2534_v23, %v2526_v63  ;;  %4951 = vmatpush2.msra.mxu0 %v2559_v55  ;;  %4797 = vmatpush2.msra.mxu1 %v6523_v11 }
 0x357   : > { %v2557_v59 = vmul.f32 %v2541_v32, %v10395_v20  ;;  %2688 = vrot.lane.b32.xlu1 %v10356_v40, %s6582_s23  ;;  %2680 = vrot.lane.b32.xlu0 %v10364_v60, %s6582_s23  ;;  %v2558_v33 = vmul.f32 %v2545_v43, %v10400_v53  ;;  %v10689_v53 = vld [vmem:[%s12704_s1] sm:$0xff] }
 0x358   : > { %v2492_v6 = vpop.permute.xlu1 %2491  ;;  %4798 = vmatprep.subr.mxu1 %v6524_v42 }
 0x359   : > { %4952 = vmatprep.subr.mxu0 %v2558_v33  ;;  %v2484_v10 = vpop.permute.xlu0 %2483  ;;  %4799 = vmatpush2.msra.mxu1 %v6525_v26  ;;  %v2457_v33 = vld [vmem:[%s12706_s3 + $0x160] sm:$0xff] }
 0x35a   : > { %v2496_v20 = vsel %vm485_vm5, %v2484_v10, %v2492_v6  ;;  %v2500_v44 = vsel %vm485_vm5, %v2492_v6, %v2484_v10  ;;  %4953 = vmatpush2.msra.mxu0 %v2557_v59  ;;  %4801 = vmatmul.mubr.f32.vlgmr.msra.gmra.mxu1 %v10689_v53 }
 0x35b   : > { %v2515_v57 = vmul.f32 %v2496_v20, %v10425_v0  ;;  %3185 = vrot.lane.b32.xlu1 %v10675_v45, %s6584_s25  ;;  %3177 = vrot.lane.b32.xlu0 %v10678_v16, %s6584_s25  ;;  %v2516_v48 = vmul.f32 %v2500_v44, %v10430_v51  ;;  %v10711_v51 = vld [vmem:[%s12704_s1 + $0x18] sm:$0xff]  ;;  %v2455_v44 = vld [vmem:[%s12706_s3 + $0x150] sm:$0xff] }
 0x35c   : > { %v2490_v34 = vpop.permute.xlu1 %2489  ;;  %4806 = vmatprep.mubr.f32.mxu1 %v10701_v35 }
 0x35d   : > { %4954 = vmatprep.subr.mxu0 %v2516_v48  ;;  %v2482_v0 = vpop.permute.xlu0 %2481 }
 0x35e   : > { %v2495_v46 = vsel %vm485_vm5, %v2482_v0, %v2490_v34  ;;  %v2499_v19 = vsel %vm485_vm5, %v2490_v34, %v2482_v0  ;;  %4955 = vmatpush2.msra.mxu0 %v2515_v57  ;;  %4807 = vmatmul.mubr.f32.gmra.mxu1 %v10711_v51 }
 0x35f   : > { %v2513_v30 = vmul.f32 %v2495_v46, %v10455_v36  ;;  %2686 = vrot.lane.b32.xlu1 %v10377_v39, %s6582_s23  ;;  %2678 = vrot.lane.b32.xlu0 %v10380_v58, %s6582_s23  ;;  %v2514_v4 = vmul.f32 %v2499_v19, %v10460_v27  ;;  %v2453_v19 = vld [vmem:[%s12706_s3 + $0x140] sm:$0xff] }
 0x360   : > { %v2488_v62 = vpop.permute.xlu1 %2487  ;;  %4812 = vmatprep.mubr.f32.mxu1 %v10729_v56 }
 0x361   : > { %4956 = vmatprep.subr.mxu0 %v2514_v4  ;;  %v2480_v36 = vpop.permute.xlu0 %2479 }
 0x362   : > { %v2494_v15 = vsel %vm485_vm5, %v2480_v36, %v2488_v62  ;;  %v2498_v27 = vsel %vm485_vm5, %v2488_v62, %v2480_v36  ;;  %4957 = vmatpush2.msra.mxu0 %v2513_v30  ;;  %4813 = vmatmul.mubr.f32.gmra.mxu1 %v10739_v22 }
 0x363   : > { %v2511_v9 = vmul.f32 %v2494_v15, %v10487_v41  ;;  %3183 = vrot.lane.b32.xlu1 %v10721_v29, %s6584_s25  ;;  %3175 = vrot.lane.b32.xlu0 %v10724_v1, %s6584_s25  ;;  %v2512_v12 = vmul.f32 %v2498_v27, %v10492_v49  ;;  %v10761_v49 = vld [vmem:[%s12704_s1 + $0x48] sm:$0xff]  ;;  %v10822_v27 = vld [vmem:[%s12706_s3 + $0x230] sm:$0xff] }
 0x364   : > { %v2486_v21 = vpop.permute.xlu1 %2485  ;;  %4818 = vmatprep.mubr.f32.mxu1 %v10751_v7 }
 0x365   : > { %4958 = vmatprep.subr.mxu0 %v2512_v12  ;;  %v2478_v55 = vpop.permute.xlu0 %2477 }
 0x366   : > { %v2493_v41 = vsel %vm485_vm5, %v2478_v55, %v2486_v21  ;;  %v2497_v38 = vsel %vm485_vm5, %v2486_v21, %v2478_v55  ;;  %4959 = vmatpush2.msra.mxu0 %v2511_v9  ;;  %4819 = vmatmul.mubr.f32.gmra.mxu1 %v10761_v49  ;;  %v10827_v9 = vld [vmem:[%s12706_s3 + $0x238] sm:$0xff] }
 0x367   : > { %v2509_v23 = vmul.f32 %v2493_v41, %v10509_v3  ;;  %2644 = vrot.lane.b32.xlu1 %v10314_v52, %s6581_s22  ;;  %2636 = vrot.lane.b32.xlu0 %v10322_v18, %s6581_s22  ;;  %v2510_v25 = vmul.f32 %v2497_v38, %v10517_v24 }
 0x368   : > { %v2444_v63 = vpop.permute.xlu1 %2443  ;;  %5067 = vmatprep.mubr.f32.mxu1 %v13041_v17 }
 0x369   : > { %4960 = vmatprep.subr.mxu0 %v2510_v25  ;;  %v2436_v32 = vpop.permute.xlu0 %2435  ;;  %v10847_v25 = vld [vmem:[%s12706_s3 + $0x228] sm:$0xff] }
 0x36a   : > { %v2448_v3 = vsel %vm436_vm6, %v2436_v32, %v2444_v63  ;;  %v2452_v43 = vsel %vm436_vm6, %v2444_v63, %v2436_v32  ;;  %4961 = vmatpush2.msra.mxu0 %v2509_v23  ;;  %v10842_v23 = vld [vmem:[%s12706_s3 + $0x220] sm:$0xff]  ;;  %v6533_v63 = vld [vmem:[%s6632_s21 + $0x178] sm:$0xff]  ;;  %v6534_v32 = vld [vmem:[%s6632_s21 + $0x170] sm:$0xff] }
 0x36b   : > { %v2467_v11 = vmul.f32 %v2459_v50, %v2448_v3  ;;  %3141 = vrot.lane.b32.xlu1 %v10599_v61, %s6583_s24  ;;  %3133 = vrot.lane.b32.xlu0 %v10606_v31, %s6583_s24  ;;  %v2468_v24 = vmul.f32 %v2452_v43, %v10540_v54 }
 0x36c   : > { %v2442_v59 = vpop.permute.xlu1 %2441 }
 0x36d   : > { %4962 = vmatprep.subr.mxu0 %v2468_v24  ;;  %v2434_v6 = vpop.permute.xlu0 %2433 }
 0x36e   : > { %v2447_v42 = vsel %vm436_vm6, %v2434_v6, %v2442_v59  ;;  %v2451_v10 = vsel %vm436_vm6, %v2442_v59, %v2434_v6  ;;  %4963 = vmatpush2.msra.mxu0 %v2467_v11  ;;  %v6535_v11 = vld [vmem:[%s6632_s21 + $0x168] sm:$0xff]  ;;  %v10865_v6 = vld [vmem:[%s12706_s3 + $0x210] sm:$0xff] }
 0x36f   : > { %v2465_v26 = vmul.f32 %v2457_v33, %v2447_v42  ;;  %2642 = vrot.lane.b32.xlu1 %v10335_v2, %s6581_s22  ;;  %2634 = vrot.lane.b32.xlu0 %v10338_v14, %s6581_s22  ;;  %v2466_v54 = vmul.f32 %v2451_v10, %v10559_v8  ;;  %v10870_v42 = vld [vmem:[%s12706_s3 + $0x218] sm:$0xff]  ;;  %v6536_v10 = vld [vmem:[%s6632_s21 + $0x160] sm:$0xff] }
 0x370   : > { %v2440_v20 = vpop.permute.xlu1 %2439 }
 0x371   : > { %4964 = vmatprep.subr.mxu0 %v2466_v54  ;;  %v2432_v57 = vpop.permute.xlu0 %2431  ;;  %v6537_v54 = vld [vmem:[%s6632_s21 + $0x158] sm:$0xff] }
 0x372   : > { %v2446_v48 = vsel %vm436_vm6, %v2432_v57, %v2440_v20  ;;  %v2450_v34 = vsel %vm436_vm6, %v2440_v20, %v2432_v57  ;;  %4965 = vmatpush2.msra.mxu0 %v2465_v26  ;;  %v6538_v57 = vld [vmem:[%s6632_s21 + $0x150] sm:$0xff] }
 0x373   : > { %v2463_v0 = vmul.f32 %v2455_v44, %v2446_v48  ;;  %3139 = vrot.lane.b32.xlu1 %v10643_v28, %s6583_s24  ;;  %3131 = vrot.lane.b32.xlu0 %v10646_v37, %s6583_s24  ;;  %v2464_v8 = vmul.f32 %v2450_v34, %v10590_v5 }
 0x374   : > { %v2438_v46 = vpop.permute.xlu1 %2437 }
 0x375   : > { %4966 = vmatprep.subr.mxu0 %v2464_v8  ;;  %v2430_v30 = vpop.permute.xlu0 %2429  ;;  %v10888_v8 = vld [vmem:[%s12706_s3 + $0x200] sm:$0xff] }
 0x376   : > { %v2445_v4 = vsel %vm436_vm6, %v2430_v30, %v2438_v46  ;;  %v2449_v62 = vsel %vm436_vm6, %v2438_v46, %v2430_v30  ;;  %4967 = vmatpush2.msra.mxu0 %v2463_v0  ;;  %v10893_v46 = vld [vmem:[%s12706_s3 + $0x208] sm:$0xff] }
 0x377   : > { %v2461_v36 = vmul.f32 %v2453_v19, %v2445_v4  ;;  %2640 = vrot.lane.b32.xlu1 %v10356_v40, %s6581_s22  ;;  %2632 = vrot.lane.b32.xlu0 %v10364_v60, %s6581_s22  ;;  %v2462_v5 = vmul.f32 %v2449_v62, %v10611_v13  ;;  %v6539_v19 = vld [vmem:[%s6632_s21 + $0x148] sm:$0xff]  ;;  %v6540_v4 = vld [vmem:[%s6632_s21 + $0x140] sm:$0xff] }
 0x378   : > { %v2588_v15 = vpop.permute.xlu1 %2587 }
 0x379   : > { %4968 = vmatprep.subr.mxu0 %v2462_v5  ;;  %v2580_v12 = vpop.permute.xlu0 %2579 }
 0x37a   : > { %v2592_v21 = vsel %vm583_vm7, %v2580_v12, %v2588_v15  ;;  %v2596_v13 = vsel %vm583_vm7, %v2588_v15, %v2580_v12  ;;  %4969 = vmatpush2.msra.mxu0 %v2461_v36 }
 0x37b   : > { %v2611_v55 = vmul.f32 %v10822_v27, %v2592_v21  ;;  %3137 = vrot.lane.b32.xlu1 %v10675_v45, %s6583_s24  ;;  %3129 = vrot.lane.b32.xlu0 %v10678_v16, %s6583_s24  ;;  %v2612_v41 = vmul.f32 %v10827_v9, %v2596_v13  ;;  %v10911_v21 = vld [vmem:[%s12706_s3 + $0xf0] sm:$0xff] }
 0x37c   : > { %v2586_v38 = vpop.permute.xlu1 %2585  ;;  %4970 = vmatprep.subr.mxu0 %v6533_v63 }
 0x37d   : > { %5027 = vmatprep.subr.mxu1 %v2612_v41  ;;  %v2578_v50 = vpop.permute.xlu0 %2577  ;;  %4971 = vmatpush2.msra.mxu0 %v6534_v32  ;;  %v10945_v32 = vld [vmem:[%s12706_s3 + $0xe8] sm:$0xff] }
 0x37e   : > { %v2591_v3 = vsel %vm583_vm7, %v2578_v50, %v2586_v38  ;;  %v2595_v43 = vsel %vm583_vm7, %v2586_v38, %v2578_v50  ;;  %5028 = vmatpush1.msra.mxu1 %v2611_v55  ;;  %4972 = vmatprep.subr.mxu0 %v6535_v11  ;;  %v10933_v50 = vld [vmem:[%s12706_s3 + $0xe0] sm:$0xff] }
 0x37f   : > { %v2609_v24 = vmul.f32 %v10842_v23, %v2591_v3  ;;  %2638 = vrot.lane.b32.xlu1 %v10377_v39, %s6581_s22  ;;  %2630 = vrot.lane.b32.xlu0 %v10380_v58, %s6581_s22  ;;  %v2610_v59 = vmul.f32 %v10847_v25, %v2595_v43 }
 0x380   : > { %v2584_v33 = vpop.permute.xlu1 %2583  ;;  %4973 = vmatpush2.msra.mxu0 %v6536_v10 }
 0x381   : > { %5029 = vmatprep.subr.mxu1 %v2610_v59  ;;  %v2576_v26 = vpop.permute.xlu0 %2575  ;;  %4974 = vmatprep.subr.mxu0 %v6537_v54 }
 0x382   : > { %v2590_v20 = vsel %vm583_vm7, %v2576_v26, %v2584_v33  ;;  %v2594_v44 = vsel %vm583_vm7, %v2584_v33, %v2576_v26  ;;  %5030 = vmatpush1.msra.mxu1 %v2609_v24  ;;  %4975 = vmatpush2.msra.mxu0 %v6538_v57  ;;  %v10963_v33 = vld [vmem:[%s12706_s3 + $0xd0] sm:$0xff]  ;;  %v10993_v57 = vld [vmem:[%s12706_s3 + $0xc0] sm:$0xff] }
 0x383   : > { %v2607_v48 = vmul.f32 %v10865_v6, %v2590_v20  ;;  %3135 = vrot.lane.b32.xlu1 %v10721_v29, %s6583_s24  ;;  %3127 = vrot.lane.b32.xlu0 %v10724_v1, %s6583_s24  ;;  %v2608_v34 = vmul.f32 %v10870_v42, %v2594_v44 }
 0x384   : > { %v2582_v0 = vpop.permute.xlu1 %2581  ;;  %4976 = vmatprep.subr.mxu0 %v6539_v19 }
 0x385   : > { %5031 = vmatprep.subr.mxu1 %v2608_v34  ;;  %v2574_v30 = vpop.permute.xlu0 %2573  ;;  %4977 = vmatpush2.msra.mxu0 %v6540_v4 }
 0x386   : > { %v2589_v62 = vsel %vm583_vm7, %v2574_v30, %v2582_v0  ;;  %v2593_v36 = vsel %vm583_vm7, %v2582_v0, %v2574_v30  ;;  %5032 = vmatpush1.msra.mxu1 %v2607_v48  ;;  %4979 = vmatmul.mubr.f32.vlgmr.msra.gmra.mxu0 %v10689_v53  ;;  %v10916_v53 = vld [vmem:[%s12706_s3 + $0xf8] sm:$0xff]  ;;  %v11004_v48 = vld [vmem:[%s12704_s1 + $0x40] sm:$0xff]  ;;  %v6590_v30 = vmov 0  }
 0x387   : > { %v2605_v5 = vmul.f32 %v10888_v8, %v2589_v62  ;;  %2940 = vrot.lane.b32.xlu1 %v10314_v52, %s6587_s28  ;;  %2932 = vrot.lane.b32.xlu0 %v10322_v18, %s6587_s28  ;;  %v2606_v15 = vmul.f32 %v10893_v46, %v2593_v36 }
 0x388   : > { %v2789_v12 = vpop.permute.xlu1 %2788  ;;  %4984 = vmatprep.mubr.f32.mxu0 %v10701_v35  ;;  %6347 = vset.pattern.permute.xlu1 %v6590_v30 }
 0x389   : > { %5033 = vmatprep.subr.mxu1 %v2606_v15  ;;  %v2781_v13 = vpop.permute.xlu0 %2780  ;;  %v11027_v15 = vld [vmem:[%s12706_s3 + $0xb8] sm:$0xff]  ;;  %6346 = vset.pattern.permute.xlu0 %v6590_v30  ;;  %v11095_v30 = vld [vmem:[%s12706_s3 + $0x90] sm:$0xff] }
 0x38a   : > { %v2793_v55 = vsel %vm379_vm0, %v2781_v13, %v2789_v12  ;;  %v2797_v41 = vsel %vm379_vm0, %v2789_v12, %v2781_v13  ;;  %5034 = vmatpush1.msra.mxu1 %v2605_v5  ;;  %4985 = vmatmul.mubr.f32.gmra.mxu0 %v10711_v51  ;;  %v10938_v51 = vld [vmem:[%s12704_s1 + $0x10] sm:$0xff]  ;;  %v11039_v12 = vld [vmem:[%s12704_s1 + $0x8] sm:$0xff] }
 0x38b   : > { %v2812_v38 = vmul.f32 %v10911_v21, %v2797_v41  ;;  %3093 = vrot.lane.b32.xlu1 %v10599_v61, %s6582_s23  ;;  %3085 = vrot.lane.b32.xlu0 %v10606_v31, %s6582_s23  ;;  %v2813_v35 = vmul.f32 %v10916_v53, %v2793_v55  ;;  %v11022_v5 = vld [vmem:[%s12706_s3 + $0xb0] sm:$0xff] }
 0x38c   : > { %v2787_v63 = vpop.permute.xlu1 %2786  ;;  %6200 = vmatmul.mubr.msk.f32.vlgmr.msra.gmra.mxu1 %vm4011_vm8, %v10938_v51  ;;  %4990 = vmatprep.mubr.f32.mxu0 %v10729_v56 }
 0x38d   : > { %5092 = vmatprep.subr.mxu1 %v2813_v35  ;;  %v2779_v3 = vpop.permute.xlu0 %2778  ;;  %5073 = vmatprep.mubr.f32.mxu1 %v13041_v17 }
 0x38e   : > { %v2792_v43 = vsel %vm379_vm0, %v2779_v3, %v2787_v63  ;;  %v2796_v11 = vsel %vm379_vm0, %v2787_v63, %v2779_v3  ;;  %5093 = vmatpush1.msra.mxu1 %v2812_v38  ;;  %4991 = vmatmul.mubr.f32.gmra.mxu0 %v10739_v22  ;;  %v10968_v22 = vld [vmem:[%s12706_s3 + $0xd8] sm:$0xff] }
 0x38f   : > { %v2810_v24 = vmul.f32 %v10933_v50, %v2796_v11  ;;  %2938 = vrot.lane.b32.xlu1 %v10335_v2, %s6587_s28  ;;  %2930 = vrot.lane.b32.xlu0 %v10338_v14, %s6587_s28  ;;  %v2811_v56 = vmul.f32 %v10945_v32, %v2792_v43  ;;  %v10974_v2 = vld [vmem:[%s12704_s1 + $0x28] sm:$0xff] }
 0x390   : > { %v2785_v59 = vpop.permute.xlu1 %2784  ;;  %4996 = vmatprep.mubr.f32.mxu0 %v10751_v7  ;;  %6201 = vmatmul.mubr.msk.f32.gmra.mxu1 %vm4011_vm8, %v10974_v2 }
 0x391   : > { %5094 = vmatprep.subr.mxu1 %v2811_v56  ;;  %v2777_v10 = vpop.permute.xlu0 %2776  ;;  %5079 = vmatprep.mubr.f32.mxu1 %v13041_v17 }
 0x392   : > { %v2791_v26 = vsel %vm379_vm0, %v2777_v10, %v2785_v59  ;;  %v2795_v54 = vsel %vm379_vm0, %v2785_v59, %v2777_v10  ;;  %5095 = vmatpush1.msra.mxu1 %v2810_v24  ;;  %4997 = vmatmul.mubr.f32.gmra.mxu0 %v10761_v49  ;;  %v10998_v49 = vld [vmem:[%s12706_s3 + $0xc8] sm:$0xff]  ;;  %v11065_v59 = vld [vmem:[%s12706_s3 + $0xa0] sm:$0xff] }
 0x393   : > { %v2808_v7 = vmul.f32 %v10963_v33, %v2795_v54  ;;  %3091 = vrot.lane.b32.xlu1 %v10643_v28, %s6582_s23  ;;  %3083 = vrot.lane.b32.xlu0 %v10646_v37, %s6582_s23  ;;  %v2809_v20 = vmul.f32 %v10968_v22, %v2791_v26  ;;  %v11070_v10 = vld [vmem:[%s12706_s3 + $0xa8] sm:$0xff] }
 0x394   : > { %v2783_v44 = vpop.permute.xlu1 %2782  ;;  %5245 = vmatprep.mubr.f32.mxu0 %v13041_v17  ;;  %6202 = vmatmul.mubr.msk.f32.gmra.mxu1 %vm4011_vm8, %v11004_v48 }
 0x395   : > { %5096 = vmatprep.subr.mxu1 %v2809_v20  ;;  %v2775_v34 = vpop.permute.xlu0 %2774  ;;  %5085 = vmatprep.mubr.f32.mxu1 %v13041_v17 }
 0x396   : > { %v2790_v0 = vsel %vm379_vm0, %v2775_v34, %v2783_v44  ;;  %v2794_v19 = vsel %vm379_vm0, %v2783_v44, %v2775_v34  ;;  %5097 = vmatpush1.msra.mxu1 %v2808_v7 }
 0x397   : > { %v2806_v4 = vmul.f32 %v10993_v57, %v2794_v19  ;;  %2936 = vrot.lane.b32.xlu1 %v10356_v40, %s6587_s28  ;;  %2928 = vrot.lane.b32.xlu0 %v10364_v60, %s6587_s28  ;;  %v2807_v62 = vmul.f32 %v10998_v49, %v2790_v0  ;;  %v11032_v40 = vld [vmem:[%s12704_s1 + $0x58] sm:$0xff] }
 0x398   : > { %v2741_v36 = vpop.permute.xlu1 %2740  ;;  %6203 = vmatmul.mubr.msk.f32.gmra.mxu1 %vm4011_vm8, %v11032_v40 }
 0x399   : > { %5098 = vmatprep.subr.mxu1 %v2807_v62  ;;  %v2733_v60 = vpop.permute.xlu0 %2732  ;;  %5156 = vmatprep.mubr.f32.mxu1 %v11039_v12 }
 0x39a   : > { %v2745_v13 = vsel %vm330_vm1, %v2733_v60, %v2741_v36  ;;  %v2749_v55 = vsel %vm330_vm1, %v2741_v36, %v2733_v60  ;;  %5099 = vmatpush1.msra.mxu1 %v2806_v4  ;;  %v11100_v4 = vld [vmem:[%s12706_s3 + $0x98] sm:$0xff] }
 0x39b   : > { %v2764_v41 = vmul.f32 %v11022_v5, %v2749_v55  ;;  %3089 = vrot.lane.b32.xlu1 %v10675_v45, %s6582_s23  ;;  %3081 = vrot.lane.b32.xlu0 %v10678_v16, %s6582_s23  ;;  %v2765_v38 = vmul.f32 %v11027_v15, %v2745_v13 }
 0x39c   : > { %v2989_v35 = vpop.permute.xlu1 %2988 }
 0x39d   : > { %5100 = vmatprep.subr.mxu1 %v2765_v38  ;;  %v2981_v63 = vpop.permute.xlu0 %2980  ;;  %v11118_v38 = vld [vmem:[%s6632_s21 + $0x1a8] sm:$0xff] }
 0x39e   : > { %v2993_v3 = vsel %vm583_vm7, %v2981_v63, %v2989_v35  ;;  %v2997_v43 = vsel %vm583_vm7, %v2989_v35, %v2981_v63  ;;  %5101 = vmatpush1.msra.mxu1 %v2764_v41 }
 0x39f   : > { %v3012_v11 = vmul.f32 %v2993_v3, %v10822_v27  ;;  %2934 = vrot.lane.b32.xlu1 %v10377_v39, %s6587_s28  ;;  %2926 = vrot.lane.b32.xlu0 %v10380_v58, %s6587_s28  ;;  %v3013_v24 = vmul.f32 %v2997_v43, %v10827_v9  ;;  %v11128_v3 = vld [vmem:[%s12706_s3 + $0x80] sm:$0xff] }
 0x3a0   : > { %v2739_v56 = vpop.permute.xlu1 %2738 }
 0x3a1   : > { %5205 = vmatprep.subr.mxu0 %v3013_v24  ;;  %v2731_v27 = vpop.permute.xlu0 %2730 }
 0x3a2   : > { %v2744_v39 = vsel %vm330_vm1, %v2731_v27, %v2739_v56  ;;  %v2748_v58 = vsel %vm330_vm1, %v2739_v56, %v2731_v27  ;;  %5206 = vmatpush1.msra.mxu0 %v3012_v11 }
 0x3a3   : > { %v2762_v9 = vmul.f32 %v11065_v59, %v2748_v58  ;;  %3087 = vrot.lane.b32.xlu1 %v10721_v29, %s6582_s23  ;;  %3079 = vrot.lane.b32.xlu0 %v10724_v1, %s6582_s23  ;;  %v2763_v26 = vmul.f32 %v11070_v10, %v2744_v39 }
 0x3a4   : > { %v2987_v54 = vpop.permute.xlu1 %2986 }
 0x3a5   : > { %5102 = vmatprep.subr.mxu1 %v2763_v26  ;;  %v2979_v7 = vpop.permute.xlu0 %2978  ;;  %v11151_v26 = vld [vmem:[%s6632_s21 + $0x198] sm:$0xff] }
 0x3a6   : > { %v2992_v20 = vsel %vm583_vm7, %v2979_v7, %v2987_v54  ;;  %v2996_v44 = vsel %vm583_vm7, %v2987_v54, %v2979_v7  ;;  %5103 = vmatpush1.msra.mxu1 %v2762_v9  ;;  %v11156_v54 = vld [vmem:[%s6632_s21 + $0x190] sm:$0xff] }
 0x3a7   : > { %v3010_v34 = vmul.f32 %v2992_v20, %v10842_v23  ;;  %2892 = vrot.lane.b32.xlu1 %v10314_v52, %s6586_s27  ;;  %2884 = vrot.lane.b32.xlu0 %v10322_v18, %s6586_s27  ;;  %v3011_v0 = vmul.f32 %v2996_v44, %v10847_v25  ;;  %v11164_v44 = vld [vmem:[%s12706_s3 + $0x70] sm:$0xff] }
 0x3a8   : > { %v2737_v19 = vpop.permute.xlu1 %2736 }
 0x3a9   : > { %5207 = vmatprep.subr.mxu0 %v3011_v0  ;;  %v2729_v23 = vpop.permute.xlu0 %2728 }
 0x3aa   : > { %v2743_v52 = vsel %vm330_vm1, %v2729_v23, %v2737_v19  ;;  %v2747_v18 = vsel %vm330_vm1, %v2737_v19, %v2729_v23  ;;  %5208 = vmatpush1.msra.mxu0 %v3010_v34 }
 0x3ab   : > { %v2760_v25 = vmul.f32 %v11095_v30, %v2747_v18  ;;  %3045 = vrot.lane.b32.xlu1 %v10599_v61, %s6581_s22  ;;  %3037 = vrot.lane.b32.xlu0 %v10606_v31, %s6581_s22  ;;  %v2761_v62 = vmul.f32 %v11100_v4, %v2743_v52 }
 0x3ac   : > { %v2985_v36 = vpop.permute.xlu1 %2984 }
 0x3ad   : > { %5104 = vmatprep.subr.mxu1 %v2761_v62  ;;  %v2977_v60 = vpop.permute.xlu0 %2976 }
 0x3ae   : > { %v2991_v13 = vsel %vm583_vm7, %v2977_v60, %v2985_v36  ;;  %v2995_v55 = vsel %vm583_vm7, %v2985_v36, %v2977_v60  ;;  %5105 = vmatpush1.msra.mxu1 %v2760_v25  ;;  %v11190_v60 = vld [vmem:[%s6632_s21 + $0x188] sm:$0xff] }
 0x3af   : > { %v3008_v41 = vmul.f32 %v2991_v13, %v10865_v6  ;;  %2890 = vrot.lane.b32.xlu1 %v11118_v38, %s6586_s27  ;;  %2882 = vrot.lane.b32.xlu0 %v10338_v14, %s6586_s27  ;;  %v3009_v35 = vmul.f32 %v2995_v55, %v10870_v42  ;;  %v11133_v6 = vld [vmem:[%s12706_s3 + $0x88] sm:$0xff]  ;;  %v11195_v13 = vld [vmem:[%s6632_s21 + $0x180] sm:$0xff] }
 0x3b0   : > { %v2735_v63 = vpop.permute.xlu1 %2734  ;;  %v11203_v55 = vld [vmem:[%s12706_s3 + $0x60] sm:$0xff] }
 0x3b1   : > { %5209 = vmatprep.subr.mxu0 %v3009_v35  ;;  %v2727_v43 = vpop.permute.xlu0 %2726 }
 0x3b2   : > { %v2742_v11 = vsel %vm330_vm1, %v2727_v43, %v2735_v63  ;;  %v2746_v14 = vsel %vm330_vm1, %v2735_v63, %v2727_v43  ;;  %5210 = vmatpush1.msra.mxu0 %v3008_v41 }
 0x3b3   : > { %v2758_v42 = vmul.f32 %v11128_v3, %v2746_v14  ;;  %3043 = vrot.lane.b32.xlu1 %v10643_v28, %s6581_s22  ;;  %3035 = vrot.lane.b32.xlu0 %v10646_v37, %s6581_s22  ;;  %v2759_v24 = vmul.f32 %v11133_v6, %v2742_v11 }
 0x3b4   : > { %v2983_v56 = vpop.permute.xlu1 %2982 }
 0x3b5   : > { %5106 = vmatprep.subr.mxu1 %v2759_v24  ;;  %v2975_v27 = vpop.permute.xlu0 %2974 }
 0x3b6   : > { %v2990_v39 = vsel %vm583_vm7, %v2975_v27, %v2983_v56  ;;  %v2994_v58 = vsel %vm583_vm7, %v2983_v56, %v2975_v27  ;;  %5107 = vmatpush1.msra.mxu1 %v2758_v42  ;;  %v11232_v27 = vld [vmem:[%s6632_s21 + $0x1b8] sm:$0xff] }
 0x3b7   : > { %v3006_v9 = vmul.f32 %v2990_v39, %v10888_v8  ;;  %2888 = vrot.lane.b32.xlu1 %v11151_v26, %s6586_s27  ;;  %2880 = vrot.lane.b32.xlu0 %v11156_v54, %s6586_s27  ;;  %v3007_v7 = vmul.f32 %v2994_v58, %v10893_v46  ;;  %v11169_v8 = vld [vmem:[%s12706_s3 + $0x78] sm:$0xff]  ;;  %v11245_v58 = vld [vmem:[%s12706_s3 + $0x50] sm:$0xff] }
 0x3b8   : > { %v2693_v20 = vpop.permute.xlu1 %2692 }
 0x3b9   : > { %5211 = vmatprep.subr.mxu0 %v3007_v7  ;;  %v2685_v34 = vpop.permute.xlu0 %2684 }
 0x3ba   : > { %v2697_v0 = vsel %vm281_vm2, %v2685_v34, %v2693_v20  ;;  %v2701_v46 = vsel %vm281_vm2, %v2693_v20, %v2685_v34  ;;  %5212 = vmatpush1.msra.mxu0 %v3006_v9 }
 0x3bb   : > { %v2716_v19 = vmul.f32 %v11164_v44, %v2701_v46  ;;  %3041 = vrot.lane.b32.xlu1 %v10675_v45, %s6581_s22  ;;  %3033 = vrot.lane.b32.xlu0 %v10678_v16, %s6581_s22  ;;  %v2717_v23 = vmul.f32 %v11169_v8, %v2697_v0 }
 0x3bc   : > { %v3190_v52 = vpop.permute.xlu1 %3189  ;;  %6204 = vmatmul.mubr.msk.f32.vlgmr.msra.gmra.mxu0 %vm4011_vm8, %v10938_v51 }
 0x3bd   : > { %5108 = vmatprep.subr.mxu1 %v2717_v23  ;;  %v3182_v18 = vpop.permute.xlu0 %3181  ;;  %5251 = vmatprep.mubr.f32.mxu0 %v13041_v17 }
 0x3be   : > { %v3194_v25 = vsel %vm379_vm0, %v3182_v18, %v3190_v52  ;;  %v3198_v62 = vsel %vm379_vm0, %v3190_v52, %v3182_v18  ;;  %5109 = vmatpush1.msra.mxu1 %v2716_v19  ;;  %v11281_v18 = vld [vmem:[%s12706_s3 + $0x40] sm:$0xff] }
 0x3bf   : > { %v3213_v36 = vmul.f32 %v3198_v62, %v10911_v21  ;;  %2886 = vrot.lane.b32.xlu1 %v11190_v60, %s6586_s27  ;;  %2878 = vrot.lane.b32.xlu0 %v11195_v13, %s6586_s27  ;;  %v3214_v51 = vmul.f32 %v3194_v25, %v10916_v53  ;;  %v11208_v21 = vld [vmem:[%s12706_s3 + $0x68] sm:$0xff] }
 0x3c0   : > { %6205 = vmatmul.mubr.msk.f32.gmra.mxu0 %vm4011_vm8, %v10974_v2  ;;  %v11286_v25 = vld [vmem:[%s12706_s3 + $0x48] sm:$0xff] }
 0x3c1   : > { %v2691_v41 = vpop.permute.xlu1 %2690  ;;  %5270 = vmatprep.subr.mxu0 %v3214_v51  ;;  %v2683_v35 = vpop.permute.xlu0 %2682  ;;  %5257 = vmatprep.mubr.f32.mxu0 %v13041_v17 }
 0x3c2   : > { %v2696_v53 = vsel %vm281_vm2, %v2683_v35, %v2691_v41  ;;  %v2700_v63 = vsel %vm281_vm2, %v2691_v41, %v2683_v35  ;;  %5271 = vmatpush1.msra.mxu0 %v3213_v36 }
 0x3c3   : > { %v2714_v43 = vmul.f32 %v11203_v55, %v2700_v63  ;;  %3039 = vrot.lane.b32.xlu1 %v10721_v29, %s6581_s22  ;;  %3031 = vrot.lane.b32.xlu0 %v10724_v1, %s6581_s22  ;;  %v2715_v2 = vmul.f32 %v11208_v21, %v2696_v53 }
 0x3c4   : > { %6206 = vmatmul.mubr.msk.f32.gmra.mxu0 %vm4011_vm8, %v11004_v48  ;;  %v11237_v48 = vld [vmem:[%s6632_s21 + $0x1b0] sm:$0xff] }
 0x3c5   : > { %v3188_v11 = vpop.permute.xlu1 %3187  ;;  %5110 = vmatprep.subr.mxu1 %v2715_v2  ;;  %v3180_v14 = vpop.permute.xlu0 %3179  ;;  %5263 = vmatprep.mubr.f32.mxu0 %v13041_v17 }
 0x3c6   : > { %v3193_v42 = vsel %vm379_vm0, %v3180_v14, %v3188_v11  ;;  %v3197_v24 = vsel %vm379_vm0, %v3188_v11, %v3180_v14  ;;  %5111 = vmatpush1.msra.mxu1 %v2714_v43  ;;  %v11311_v14 = vld [vmem:[%s12706_s3 + $0x30] sm:$0xff] }
 0x3c7   : > { %v3211_v56 = vmul.f32 %v3197_v24, %v10933_v50  ;;  %2844 = vrot.lane.b32.xlu1 %v11232_v27, %s6585_s26  ;;  %2836 = vrot.lane.b32.xlu0 %v11237_v48, %s6585_s26  ;;  %v3212_v39 = vmul.f32 %v3193_v42, %v10945_v32  ;;  %v11250_v50 = vld [vmem:[%s12706_s3 + $0x58] sm:$0xff] }
 0x3c8   : > { %6207 = vmatmul.mubr.msk.f32.gmra.mxu0 %vm4011_vm8, %v11032_v40  ;;  %v11316_v42 = vld [vmem:[%s12706_s3 + $0x38] sm:$0xff] }
 0x3c9   : > { %v2689_v9 = vpop.permute.xlu1 %2688  ;;  %5272 = vmatprep.subr.mxu0 %v3212_v39  ;;  %v2681_v7 = vpop.permute.xlu0 %2680  ;;  %5334 = vmatprep.mubr.f32.mxu0 %v11039_v12 }
 0x3ca   : > { %v2695_v32 = vsel %vm281_vm2, %v2681_v7, %v2689_v9  ;;  %v2699_v20 = vsel %vm281_vm2, %v2689_v9, %v2681_v7  ;;  %5273 = vmatpush1.msra.mxu0 %v3211_v56 }
 0x3cb   : > { %v2712_v34 = vmul.f32 %v11245_v58, %v2699_v20  ;;  %3341 = vrot.lane.b32.xlu1 %v10599_v61, %s6587_s28  ;;  %3333 = vrot.lane.b32.xlu0 %v10606_v31, %s6587_s28  ;;  %v2713_v40 = vmul.f32 %v11250_v50, %v2695_v32  ;;  %v11274_v61 = vld [vmem:[%s6632_s21 + $0x1a0] sm:$0xff] }
 0x3cd   : > { %v3186_v0 = vpop.permute.xlu1 %3185  ;;  %5112 = vmatprep.subr.mxu1 %v2713_v40  ;;  %v3178_v12 = vpop.permute.xlu0 %3177 }
 0x3ce   : > { %v3192_v46 = vsel %vm379_vm0, %v3178_v12, %v3186_v0  ;;  %v3196_v19 = vsel %vm379_vm0, %v3186_v0, %v3178_v12  ;;  %5113 = vmatpush1.msra.mxu1 %v2712_v34  ;;  %v11341_v12 = vld [vmem:[%s12706_s3 + $0x20] sm:$0xff] }
 0x3cf   : > { %v3209_v23 = vmul.f32 %v3196_v19, %v10963_v33  ;;  %v3210_v52 = vmul.f32 %v3192_v46, %v10968_v22  ;;  %2842 = vrot.lane.b32.xlu1 %v11118_v38, %s6585_s26  ;;  %2834 = vrot.lane.b32.xlu0 %v11274_v61, %s6585_s26  ;;  %v11346_v46 = vld [vmem:[%s12706_s3 + $0x28] sm:$0xff] }
 0x3d1   : > { %v2687_v33 = vpop.permute.xlu1 %2686  ;;  %5274 = vmatprep.subr.mxu0 %v3210_v52  ;;  %v2679_v22 = vpop.permute.xlu0 %2678 }
 0x3d2   : > { %v2694_v62 = vsel %vm281_vm2, %v2679_v22, %v2687_v33  ;;  %v2698_v36 = vsel %vm281_vm2, %v2687_v33, %v2679_v22  ;;  %5275 = vmatpush1.msra.mxu0 %v3209_v23 }
 0x3d3   : > { %v2710_v51 = vmul.f32 %v11281_v18, %v2698_v36  ;;  %v2711_v41 = vmul.f32 %v11286_v25, %v2694_v62  ;;  %3339 = vrot.lane.b32.xlu1 %v10643_v28, %s6587_s28  ;;  %3331 = vrot.lane.b32.xlu0 %v10646_v37, %s6587_s28 }
 0x3d5   : > { %v3184_v35 = vpop.permute.xlu1 %3183  ;;  %5114 = vmatprep.subr.mxu1 %v2711_v41  ;;  %v3176_v53 = vpop.permute.xlu0 %3175 }
 0x3d6   : > { %v3191_v63 = vsel %vm379_vm0, %v3176_v53, %v3184_v35  ;;  %v3195_v43 = vsel %vm379_vm0, %v3184_v35, %v3176_v53  ;;  %5115 = vmatpush1.msra.mxu1 %v2710_v51  ;;  %v11362_v41 = vpop.f32.mrf.mxu0  ;;  %v11364_v35 = vpop.f32.mrf.mxu1 }
 0x3d7   : > { %v3207_v2 = vmul.f32 %v3195_v43, %v10993_v57  ;;  %v3208_v11 = vmul.f32 %v3191_v63, %v10998_v49  ;;  %2840 = vrot.lane.b32.xlu1 %v11151_v26, %s6585_s26  ;;  %2832 = vrot.lane.b32.xlu0 %v11156_v54, %s6585_s26  ;;  %v11369_v43 = vld [vmem:[%s6632_s21 + $0x1f8] sm:$0xff] }
 0x3d9   : > { %v2645_v24 = vpop.permute.xlu1 %2644  ;;  %5276 = vmatprep.subr.mxu0 %v3208_v11  ;;  %v2637_v57 = vpop.permute.xlu0 %2636  ;;  %v11383_v11 = vld [vmem:[%s12706_s3 + $0x18] sm:$0xff] }
 0x3da   : > { %v2649_v49 = vsel %vm232_vm3, %v2637_v57, %v2645_v24  ;;  %v2653_v56 = vsel %vm232_vm3, %v2645_v24, %v2637_v57  ;;  %5277 = vmatpush1.msra.mxu0 %v3207_v2  ;;  %v11378_v2 = vld [vmem:[%s12706_s3 + $0x10] sm:$0xff] }
 0x3db   : > { %v2668_v39 = vmul.f32 %v11311_v14, %v2653_v56  ;;  %v2669_v9 = vmul.f32 %v11316_v42, %v2649_v49  ;;  %3337 = vrot.lane.b32.xlu1 %v10675_v45, %s6587_s28  ;;  %3329 = vrot.lane.b32.xlu0 %v10678_v16, %s6587_s28  ;;  %v11391_v49 = vpop.f32.mrf.mxu1 }
 0x3dd   : > { %v3142_v7 = vpop.permute.xlu1 %3141  ;;  %5116 = vmatprep.subr.mxu1 %v2669_v9  ;;  %v3134_v32 = vpop.permute.xlu0 %3133 }
 0x3de   : > { %v3146_v20 = vsel %vm330_vm1, %v3134_v32, %v3142_v7  ;;  %v3150_v34 = vsel %vm330_vm1, %v3142_v7, %v3134_v32  ;;  %5117 = vmatpush1.msra.mxu1 %v2668_v39  ;;  %v11401_v7 = vpop.f32.mrf.mxu1 }
 0x3df   : > { %v3165_v40 = vmul.f32 %v3150_v34, %v11022_v5  ;;  %v3166_v0 = vmul.f32 %v3146_v20, %v11027_v15  ;;  %2838 = vrot.lane.b32.xlu1 %v11190_v60, %s6585_s26  ;;  %2830 = vrot.lane.b32.xlu0 %v11195_v13, %s6585_s26 }
 0x3e1   : > { %v2643_v19 = vpop.permute.xlu1 %2642  ;;  %5278 = vmatprep.subr.mxu0 %v3166_v0  ;;  %v2635_v5 = vpop.permute.xlu0 %2634 }
 0x3e2   : > { %v2648_v15 = vsel %vm232_vm3, %v2635_v5, %v2643_v19  ;;  %v2652_v23 = vsel %vm232_vm3, %v2643_v19, %v2635_v5  ;;  %5279 = vmatpush1.msra.mxu0 %v3165_v40  ;;  %v11421_v19 = vld [vmem:[%s12706_s3 + $0x8] sm:$0xff] }
 0x3e3   : > { %v2666_v52 = vmul.f32 %v11341_v12, %v2652_v23  ;;  %v2667_v33 = vmul.f32 %v11346_v46, %v2648_v15  ;;  %3335 = vrot.lane.b32.xlu1 %v10721_v29, %s6587_s28  ;;  %3327 = vrot.lane.b32.xlu0 %v10724_v1, %s6587_s28 }
 0x3e5   : > { %v3140_v22 = vpop.permute.xlu1 %3139  ;;  %5118 = vmatprep.subr.mxu1 %v2667_v33  ;;  %v3132_v62 = vpop.permute.xlu0 %3131 }
 0x3e6   : > { %v3145_v36 = vsel %vm330_vm1, %v3132_v62, %v3140_v22  ;;  %v3149_v51 = vsel %vm330_vm1, %v3140_v22, %v3132_v62  ;;  %5119 = vmatpush1.msra.mxu1 %v2666_v52 }
 0x3e7   : > { %v3163_v53 = vmul.f32 %v3149_v51, %v11065_v59  ;;  %v3164_v63 = vmul.f32 %v3145_v36, %v11070_v10  ;;  %3293 = vrot.lane.b32.xlu1 %v11369_v43, %s6586_s27  ;;  %3285 = vrot.lane.b32.xlu0 %v10606_v31, %s6586_s27  ;;  %v11389_v31 = vpop.f32.mrf.mxu0 }
 0x3e9   : > { %v2641_v59 = vpop.permute.xlu1 %2640  ;;  %5280 = vmatprep.subr.mxu0 %v3164_v63  ;;  %v2633_v10 = vpop.permute.xlu0 %2632 }
 0x3ea   : > { %v2647_v24 = vsel %vm232_vm3, %v2633_v10, %v2641_v59  ;;  %v2651_v57 = vsel %vm232_vm3, %v2641_v59, %v2633_v10  ;;  %5281 = vmatpush1.msra.mxu0 %v3163_v53  ;;  %v11399_v9 = vpop.f32.mrf.mxu0  ;;  %v11457_v59 = vld [vmem:[%s12706_s3 + $0x1f0] sm:$0xff] }
 0x3eb   : > { %v2664_v56 = vmul.f32 %v11378_v2, %v2651_v57  ;;  %v2665_v39 = vmul.f32 %v11383_v11, %v2647_v24  ;;  %3291 = vrot.lane.b32.xlu1 %v10643_v28, %s6586_s27  ;;  %3283 = vrot.lane.b32.xlu0 %v10646_v37, %s6586_s27  ;;  %v11416_v37 = vld [vmem:[%s12706_s3] sm:$0xff] }
 0x3ec   : > { %v11423_v5 = vpop.f32.mrf.mxu0 }
 0x3ed   : > { %v3138_v32 = vpop.permute.xlu1 %3137  ;;  %5120 = vmatprep.subr.mxu1 %v2665_v39  ;;  %v3130_v20 = vpop.permute.xlu0 %3129 }
 0x3ee   : > { %v3144_v34 = vsel %vm330_vm1, %v3130_v20, %v3138_v32  ;;  %v3148_v40 = vsel %vm330_vm1, %v3138_v32, %v3130_v20  ;;  %5121 = vmatpush1.msra.mxu1 %v2664_v56  ;;  %v11437_v33 = vpop.f32.mrf.mxu0 }
 0x3ef   : > { %v3161_v0 = vmul.f32 %v3148_v40, %v11095_v30  ;;  %v3162_v28 = vmul.f32 %v3144_v34, %v11100_v4  ;;  %3289 = vrot.lane.b32.xlu1 %v10675_v45, %s6586_s27  ;;  %3281 = vrot.lane.b32.xlu0 %v10678_v16, %s6586_s27  ;;  %v11425_v30 = vpop.f32.mrf.mxu1  ;;  %v11475_v34 = vld [vmem:[%s6632_s21 + $0x1e8] sm:$0xff]  ;;  %v11480_v40 = vld [vmem:[%s6632_s21 + $0x1e0] sm:$0xff] }
 0x3f0   : > { %v4188_v47 = vadd.f32 %v11425_v30, %v11423_v5 }
 0x3f1   : > { %v2639_v4 = vpop.permute.xlu1 %2638  ;;  %5282 = vmatprep.subr.mxu0 %v3162_v28  ;;  %v2631_v45 = vpop.permute.xlu0 %2630 }
 0x3f2   : > { %v2646_v16 = vsel %vm232_vm3, %v2631_v45, %v2639_v4  ;;  %v2650_v15 = vsel %vm232_vm3, %v2639_v4, %v2631_v45  ;;  %5283 = vmatpush1.msra.mxu0 %v3161_v0  ;;  %v11439_v22 = vpop.f32.mrf.mxu1 }
 0x3f3   : > { %v2662_v23 = vmul.f32 %v11416_v37, %v2650_v15  ;;  %v2663_v52 = vmul.f32 %v11421_v19, %v2646_v16  ;;  %3287 = vrot.lane.b32.xlu1 %v10721_v29, %s6586_s27  ;;  %3279 = vrot.lane.b32.xlu0 %v10724_v1, %s6586_s27  ;;  %v11450_v1 = vld [vmem:[%s6632_s21 + $0x1f0] sm:$0xff] }
 0x3f4   : > { %v11466_v10 = vpop.f32.mrf.mxu1 }
 0x3f5   : > { %v3136_v62 = vpop.permute.xlu1 %3135  ;;  %5122 = vmatprep.subr.mxu1 %v2663_v52  ;;  %v3128_v36 = vpop.permute.xlu0 %3127 }
 0x3f6   : > { %v3143_v51 = vsel %vm330_vm1, %v3128_v36, %v3136_v62  ;;  %v3147_v53 = vsel %vm330_vm1, %v3136_v62, %v3128_v36  ;;  %5123 = vmatpush1.msra.mxu1 %v2662_v23  ;;  %v11486_v28 = vpop.f32.mrf.mxu1  ;;  %v11495_v62 = vld [vmem:[%s6632_s21 + $0x1d8] sm:$0xff]  ;;  %v11500_v36 = vld [vmem:[%s6632_s21 + $0x1d0] sm:$0xff] }
 0x3f7   : > { %v3159_v63 = vmul.f32 %v3147_v53, %v11128_v3  ;;  %v3160_v29 = vmul.f32 %v3143_v51, %v11133_v6  ;;  %3245 = vrot.lane.b32.xlu1 %v11369_v43, %s6585_s26  ;;  %3237 = vrot.lane.b32.xlu0 %v11450_v1, %s6585_s26  ;;  %v11462_v3 = vld [vmem:[%s12706_s3 + $0x1f8] sm:$0xff]  ;;  %v11464_v6 = vpop.f32.mrf.mxu0  ;;  %v11507_v51 = vld [vmem:[%s12706_s3 + $0x1e0] sm:$0xff] }
 0x3f8   : > { %v11516_v53 = vpop.f32.mrf.mxu1 }
 0x3f9   : > { %v2941_v24 = vpop.permute.xlu1 %2940  ;;  %5284 = vmatprep.subr.mxu0 %v3160_v29  ;;  %v2933_v57 = vpop.permute.xlu0 %2932  ;;  %13065 = vst [vmem:[#allocation11_spill] sm:$0xff] %v11516_v53 }
 0x3fa   : > { %v2945_v56 = vsel %vm534_vm4, %v2933_v57, %v2941_v24  ;;  %v2949_v39 = vsel %vm534_vm4, %v2941_v24, %v2933_v57  ;;  %5285 = vmatpush1.msra.mxu0 %v3159_v63  ;;  %v11484_v0 = vpop.f32.mrf.mxu0 }
 0x3fb   : > { %v2964_v32 = vmul.f32 %v11457_v59, %v2945_v56  ;;  %v2965_v20 = vmul.f32 %v11462_v3, %v2949_v39  ;;  %3243 = vrot.lane.b32.xlu1 %v11475_v34, %s6585_s26  ;;  %3235 = vrot.lane.b32.xlu0 %v11480_v40, %s6585_s26 }
 0x3fd   : > { %v3094_v4 = vpop.permute.xlu1 %3093  ;;  %5124 = vmatprep.subr.mxu1 %v2965_v20  ;;  %v3086_v45 = vpop.permute.xlu0 %3085  ;;  %v11530_v20 = vld [vmem:[%s6632_s21 + $0x1c0] sm:$0xff] }
 0x3fe   : > { %v3098_v16 = vsel %vm281_vm2, %v3086_v45, %v3094_v4  ;;  %v3102_v15 = vsel %vm281_vm2, %v3094_v4, %v3086_v45  ;;  %5125 = vmatpush2.msra.mxu1 %v2964_v32  ;;  %v11525_v32 = vld [vmem:[%s6632_s21 + $0x1c8] sm:$0xff]  ;;  %v11534_v4 = vpop.f32.mrf.mxu1 }
 0x3ff   : > { %v3117_v23 = vmul.f32 %v3102_v15, %v11164_v44  ;;  %v3118_v52 = vmul.f32 %v3098_v16, %v11169_v8  ;;  %3241 = vrot.lane.b32.xlu1 %v11495_v62, %s6585_s26  ;;  %3233 = vrot.lane.b32.xlu0 %v11500_v36, %s6585_s26  ;;  %v11512_v44 = vld [vmem:[%s12706_s3 + $0x1e8] sm:$0xff]  ;;  %v11514_v8 = vpop.f32.mrf.mxu0  ;;  %13066 = vst [vmem:[#allocation12_spill] sm:$0xff] %v11534_v4 }
 0x400   : > { %13064 = vst [vmem:[#allocation10_spill] sm:$0xff] %v11514_v8 }
 0x401   : > { %v2939_v63 = vpop.permute.xlu1 %2938  ;;  %5286 = vmatprep.subr.mxu0 %v3118_v52  ;;  %v2931_v29 = vpop.permute.xlu0 %2930 }
 0x402   : > { %v2944_v24 = vsel %vm534_vm4, %v2931_v29, %v2939_v63  ;;  %v2948_v57 = vsel %vm534_vm4, %v2939_v63, %v2931_v29  ;;  %5287 = vmatpush1.msra.mxu0 %v3117_v23  ;;  %v11536_v45 = vpop.f32.mrf.mxu0 }
 0x403   : > { %v2962_v56 = vmul.f32 %v11507_v51, %v2944_v24  ;;  %v2963_v39 = vmul.f32 %v11512_v44, %v2948_v57  ;;  %3239 = vrot.lane.b32.xlu1 %v11525_v32, %s6585_s26  ;;  %3231 = vrot.lane.b32.xlu0 %v11530_v20, %s6585_s26  ;;  %13067 = vst [vmem:[#allocation13_spill] sm:$0xff] %v11536_v45  ;;  %v11551_v24 = vld [vmem:[%s12706_s3 + $0x1d0] sm:$0xff]  ;;  %v11556_v57 = vld [vmem:[%s12706_s3 + $0x1d8] sm:$0xff]  ;;  %s12377_s26 = scalar_lea.vmem %s12707_s4, %s6326_s18 }
 0x405   : > { %v3092_v16 = vpop.permute.xlu1 %3091  ;;  %5126 = vmatprep.subr.mxu1 %v2963_v39  ;;  %v3084_v15 = vpop.permute.xlu0 %3083 }
 0x406   : > { %v3097_v23 = vsel %vm281_vm2, %v3084_v15, %v3092_v16  ;;  %v3101_v52 = vsel %vm281_vm2, %v3092_v16, %v3084_v15  ;;  %5127 = vmatpush2.msra.mxu1 %v2962_v56  ;;  %v11558_v56 = vpop.f32.mrf.mxu1  ;;  %v13110_v30 = vld [vmem:[#allocation12_spill] sm:$0xff] }
 0x407   : > { %v3115_v63 = vmul.f32 %v3101_v52, %v11203_v55  ;;  %v3116_v29 = vmul.f32 %v3097_v23, %v11208_v21  ;;  %3389 = vrot.lane.b32.xlu1 %v11369_v43, %s6588_s29  ;;  %3381 = vrot.lane.b32.xlu0 %v11450_v1, %s6588_s29  ;;  %13068 = vst [vmem:[#allocation14_spill] sm:$0xff] %v11558_v56  ;;  %v11560_v55 = vpop.f32.mrf.mxu0 }
 0x408   : > { %13069 = vst [vmem:[#allocation15_spill] sm:$0xff] %v11560_v55  ;;  %v11572_v55 = vpop.f32.mrf.mxu1 }
 0x409   : > { %v2937_v21 = vpop.permute.xlu1 %2936  ;;  %5288 = vmatprep.subr.mxu0 %v3116_v29  ;;  %v2929_v39 = vpop.permute.xlu0 %2928  ;;  %13070 = vst [vmem:[#allocation16_spill] sm:$0xff] %v11572_v55 }
 0x40a   : > { %v2943_v16 = vsel %vm534_vm4, %v2929_v39, %v2937_v21  ;;  %v2947_v15 = vsel %vm534_vm4, %v2937_v21, %v2929_v39  ;;  %5289 = vmatpush1.msra.mxu0 %v3115_v63  ;;  %v11574_v29 = vpop.f32.mrf.mxu0 }
 0x40b   : > { %v2960_v23 = vmul.f32 %v11551_v24, %v2943_v16  ;;  %v2961_v52 = vmul.f32 %v11556_v57, %v2947_v15  ;;  %3387 = vrot.lane.b32.xlu1 %v11475_v34, %s6588_s29  ;;  %3379 = vrot.lane.b32.xlu0 %v11480_v40, %s6588_s29  ;;  %13071 = vst [vmem:[#allocation17_spill] sm:$0xff] %v11574_v29  ;;  %v11589_v15 = vld [vmem:[%s12706_s3 + $0x1c0] sm:$0xff] }
 0x40d   : > { %v3090_v56 = vpop.permute.xlu1 %3089  ;;  %5128 = vmatprep.subr.mxu1 %v2961_v52  ;;  %v3082_v45 = vpop.permute.xlu0 %3081 }
 0x40e   : > { %v3096_v63 = vsel %vm281_vm2, %v3082_v45, %v3090_v56  ;;  %v3100_v21 = vsel %vm281_vm2, %v3090_v56, %v3082_v45  ;;  %5129 = vmatpush2.msra.mxu1 %v2960_v23  ;;  %v11594_v45 = vld [vmem:[%s12706_s3 + $0x1c8] sm:$0xff]  ;;  %v11596_v56 = vpop.f32.mrf.mxu1 }
 0x40f   : > { %v3113_v39 = vmul.f32 %v3100_v21, %v11245_v58  ;;  %v3114_v16 = vmul.f32 %v3096_v63, %v11250_v50  ;;  %3385 = vrot.lane.b32.xlu1 %v11495_v62, %s6588_s29  ;;  %3377 = vrot.lane.b32.xlu0 %v11500_v36, %s6588_s29  ;;  %13072 = vst [vmem:[#allocation18_spill] sm:$0xff] %v11596_v56  ;;  %v11598_v58 = vpop.f32.mrf.mxu0 }
 0x410   : > { %13073 = vst [vmem:[#allocation19_spill] sm:$0xff] %v11598_v58  ;;  %v5448_v58 = vld [vmem:[%s12705_s2] sm:$0xff] }
 0x411   : > { %v2935_v50 = vpop.permute.xlu1 %2934  ;;  %5290 = vmatprep.subr.mxu0 %v3114_v16  ;;  %v2927_v23 = vpop.permute.xlu0 %2926  ;;  %v5449_v16 = vld [vmem:[%s12705_s2 + $0x8] sm:$0xff] }
 0x412   : > { %v2942_v52 = vsel %vm534_vm4, %v2927_v23, %v2935_v50  ;;  %v2946_v63 = vsel %vm534_vm4, %v2935_v50, %v2927_v23  ;;  %5291 = vmatpush1.msra.mxu0 %v3113_v39  ;;  %v11616_v50 = vpop.f32.mrf.mxu1  ;;  %v11618_v39 = vpop.f32.mrf.mxu0 }
 0x413   : > { %v2958_v21 = vmul.f32 %v11589_v15, %v2942_v52  ;;  %v2959_v29 = vmul.f32 %v11594_v45, %v2946_v63  ;;  %3383 = vrot.lane.b32.xlu1 %v11525_v32, %s6588_s29  ;;  %3375 = vrot.lane.b32.xlu0 %v11530_v20, %s6588_s29  ;;  %13074 = vst [vmem:[#allocation20_spill] sm:$0xff] %v11616_v50  ;;  %13075 = vst [vmem:[#allocation21_spill] sm:$0xff] %v11618_v39  ;;  %v11629_v39 = vld [vmem:[%s12706_s3 + $0x1b0] sm:$0xff] }
 0x415   : > { %v3088_v23 = vpop.permute.xlu1 %3087  ;;  %5130 = vmatprep.subr.mxu1 %v2959_v29  ;;  %v3080_v52 = vpop.permute.xlu0 %3079  ;;  %v11634_v29 = vld [vmem:[%s12706_s3 + $0x1b8] sm:$0xff] }
 0x416   : > { %v3095_v63 = vsel %vm281_vm2, %v3080_v52, %v3088_v23  ;;  %v3099_v56 = vsel %vm281_vm2, %v3088_v23, %v3080_v52  ;;  %5131 = vmatpush2.msra.mxu1 %v2958_v21  ;;  %v5450_v21 = vld [vmem:[%s12705_s2 + $0x10] sm:$0xff] }
 0x417   : > { %v3111_v55 = vmul.f32 %v3099_v56, %v11281_v18  ;;  %v3112_v4 = vmul.f32 %v3095_v63, %v11286_v25  ;;  %5459 = vperm.xlu1 %6347, %v5449_v16   ;;  %5454 = vperm.xlu0 %6346, %v5448_v58   ;;  %v5451_v18 = vld [vmem:[%s12705_s2 + $0x18] sm:$0xff]  ;;  %v11642_v25 = vpop.f32.mrf.mxu1  ;;  %v11644_v56 = vpop.f32.mrf.mxu0 }
 0x418   : > { %13076 = vst [vmem:[#allocation23_spill] sm:$0xff] %v11642_v25  ;;  %13077 = vst [vmem:[#allocation22_spill] sm:$0xff] %v11644_v56 }
 0x419   : > { %v2893_v58 = vpop.permute.xlu1 %2892  ;;  %5292 = vmatprep.subr.mxu0 %v3112_v4  ;;  %v2885_v16 = vpop.permute.xlu0 %2884 }
 0x41a   : > { %v2897_v23 = vsel %vm485_vm5, %v2885_v16, %v2893_v58  ;;  %v2901_v52 = vsel %vm485_vm5, %v2893_v58, %v2885_v16  ;;  %5293 = vmatpush1.msra.mxu0 %v3111_v55  ;;  %v11652_v53 = vpop.f32.mrf.mxu1  ;;  %v11654_v25 = vpop.f32.mrf.mxu0 }
 0x41b   : > { %v2916_v63 = vmul.f32 %v11629_v39, %v2897_v23  ;;  %v2917_v50 = vmul.f32 %v11634_v29, %v2901_v52  ;;  %5464 = vperm.xlu1 %6347, %v5450_v21   ;;  %5469 = vperm.xlu0 %6346, %v5451_v18   ;;  %13078 = vst [vmem:[#allocation24_spill] sm:$0xff] %v11654_v25  ;;  %v11665_v21 = vld [vmem:[%s12706_s3 + $0x1a0] sm:$0xff] }
 0x41c   : > { %v11672_v18 = vpop.f32.mrf.mxu1  ;;  %v11674_v23 = vpop.f32.mrf.mxu0 }
 0x41d   : > { %v3046_v56 = vpop.permute.xlu1 %3045  ;;  %5132 = vmatprep.subr.mxu1 %v2917_v50  ;;  %v3038_v4 = vpop.permute.xlu0 %3037  ;;  %v11670_v50 = vld [vmem:[%s12706_s3 + $0x1a8] sm:$0xff]  ;;  %13079 = vst [vmem:[#allocation25_spill] sm:$0xff] %v11672_v18  ;;  %13080 = vst [vmem:[#allocation26_spill] sm:$0xff] %v11674_v23 }
 0x41e   : > { %v3050_v8 = vsel %vm232_vm3, %v3038_v4, %v3046_v56  ;;  %v3054_v58 = vsel %vm232_vm3, %v3046_v56, %v3038_v4  ;;  %5133 = vmatpush2.msra.mxu1 %v2916_v63  ;;  %v11682_v4 = vpop.f32.mrf.mxu1 }
 0x41f   : > { %v3069_v55 = vmul.f32 %v3054_v58, %v11311_v14  ;;  %v3070_v16 = vmul.f32 %v3050_v8, %v11316_v42  ;;  %13081 = vst [vmem:[#allocation27_spill] sm:$0xff] %v11682_v4  ;;  %v11684_v58 = vpop.f32.mrf.mxu0 }
 0x420   : > { %13082 = vst [vmem:[#allocation28_spill] sm:$0xff] %v11684_v58 }
 0x421   : > { %v2891_v56 = vpop.permute.xlu1 %2890  ;;  %5294 = vmatprep.subr.mxu0 %v3070_v16  ;;  %v2883_v52 = vpop.permute.xlu0 %2882 }
 0x422   : > { %v2896_v14 = vsel %vm485_vm5, %v2883_v52, %v2891_v56  ;;  %v2900_v42 = vsel %vm485_vm5, %v2891_v56, %v2883_v52  ;;  %5295 = vmatpush1.msra.mxu0 %v3069_v55  ;;  %v11695_v52 = vld [vmem:[%s12706_s3 + $0x190] sm:$0xff] }
 0x423   : > { %v2914_v8 = vmul.f32 %v11665_v21, %v2896_v14  ;;  %v2915_v63 = vmul.f32 %v11670_v50, %v2900_v42  ;;  %v11700_v14 = vld [vmem:[%s12706_s3 + $0x198] sm:$0xff]  ;;  %v11702_v42 = vpop.f32.mrf.mxu1 }
 0x424   : > { %13083 = vst [vmem:[#allocation29_spill] sm:$0xff] %v11702_v42 }
 0x425   : > { %v3044_v18 = vpop.permute.xlu1 %3043  ;;  %5134 = vmatprep.subr.mxu1 %v2915_v63  ;;  %v3036_v23 = vpop.permute.xlu0 %3035 }
 0x426   : > { %v3049_v16 = vsel %vm232_vm3, %v3036_v23, %v3044_v18  ;;  %v3053_v25 = vsel %vm232_vm3, %v3044_v18, %v3036_v23  ;;  %5135 = vmatpush2.msra.mxu1 %v2914_v8  ;;  %v11704_v63 = vpop.f32.mrf.mxu0 }
 0x427   : > { %v3067_v55 = vmul.f32 %v3053_v25, %v11341_v12  ;;  %v3068_v56 = vmul.f32 %v3049_v16, %v11346_v46  ;;  %13084 = vst [vmem:[#allocation30_spill] sm:$0xff] %v11704_v63  ;;  %v11710_v25 = vpop.f32.mrf.mxu1 }
 0x428   : > { %13085 = vst [vmem:[#allocation31_spill] sm:$0xff] %v11710_v25  ;;  %v11712_v8 = vpop.f32.mrf.mxu0 }
 0x429   : > { %v2889_v18 = vpop.permute.xlu1 %2888  ;;  %5296 = vmatprep.subr.mxu0 %v3068_v56  ;;  %v2881_v23 = vpop.permute.xlu0 %2880  ;;  %13086 = vst [vmem:[#allocation32_spill] sm:$0xff] %v11712_v8 }
 0x42a   : > { %v2895_v12 = vsel %vm485_vm5, %v2881_v23, %v2889_v18  ;;  %v2899_v46 = vsel %vm485_vm5, %v2889_v18, %v2881_v23  ;;  %5297 = vmatpush1.msra.mxu0 %v3067_v55  ;;  %v11720_v18 = vpop.f32.mrf.mxu1  ;;  %v11722_v55 = vpop.f32.mrf.mxu0 }
 0x42b   : > { %v2912_v16 = vmul.f32 %v11695_v52, %v2895_v12  ;;  %v2913_v42 = vmul.f32 %v11700_v14, %v2899_v46  ;;  %13087 = vst [vmem:[#allocation33_spill] sm:$0xff] %v11720_v18  ;;  %13088 = vst [vmem:[#allocation35_spill] sm:$0xff] %v11722_v55  ;;  %v11734_v46 = vld [vmem:[%s12706_s3 + $0x188] sm:$0xff] }
 0x42d   : > { %v3042_v58 = vpop.permute.xlu1 %3041  ;;  %5136 = vmatprep.subr.mxu1 %v2913_v42  ;;  %v3034_v63 = vpop.permute.xlu0 %3033  ;;  %v11729_v42 = vld [vmem:[%s12706_s3 + $0x180] sm:$0xff] }
 0x42e   : > { %v3048_v56 = vsel %vm232_vm3, %v3034_v63, %v3042_v58  ;;  %v3052_v4 = vsel %vm232_vm3, %v3042_v58, %v3034_v63  ;;  %5137 = vmatpush2.msra.mxu1 %v2912_v16 }
 0x42f   : > { %v3065_v23 = vmul.f32 %v3052_v4, %v11378_v2  ;;  %v3066_v12 = vmul.f32 %v3048_v56, %v11383_v11  ;;  %v11740_v11 = vpop.f32.mrf.mxu1  ;;  %v11742_v4 = vpop.f32.mrf.mxu0 }
 0x430   : > { %13089 = vst [vmem:[#allocation34_spill] sm:$0xff] %v11740_v11  ;;  %13090 = vst [vmem:[#allocation36_spill] sm:$0xff] %v11742_v4 }
 0x431   : > { %v2887_v58 = vpop.permute.xlu1 %2886  ;;  %5298 = vmatprep.subr.mxu0 %v3066_v12  ;;  %v2879_v63 = vpop.permute.xlu0 %2878 }
 0x432   : > { %v2894_v16 = vsel %vm485_vm5, %v2879_v63, %v2887_v58  ;;  %v2898_v2 = vsel %vm485_vm5, %v2887_v58, %v2879_v63  ;;  %5299 = vmatpush1.msra.mxu0 %v3065_v23  ;;  %v11750_v58 = vpop.f32.mrf.mxu1  ;;  %v11752_v23 = vpop.f32.mrf.mxu0 }
 0x433   : > { %v2910_v56 = vmul.f32 %v11729_v42, %v2894_v16  ;;  %v2911_v55 = vmul.f32 %v11734_v46, %v2898_v2  ;;  %13091 = vst [vmem:[#allocation40_spill] sm:$0xff] %v11750_v58  ;;  %13092 = vst [vmem:[#allocation37_spill] sm:$0xff] %v11752_v23  ;;  %v11764_v2 = vld [vmem:[%s12706_s3 + $0x178] sm:$0xff] }
 0x435   : > { %v3040_v18 = vpop.permute.xlu1 %3039  ;;  %5138 = vmatprep.subr.mxu1 %v2911_v55  ;;  %v3032_v8 = vpop.permute.xlu0 %3031  ;;  %v11759_v55 = vld [vmem:[%s12706_s3 + $0x170] sm:$0xff] }
 0x436   : > { %v3047_v12 = vsel %vm232_vm3, %v3032_v8, %v3040_v18  ;;  %v3051_v25 = vsel %vm232_vm3, %v3040_v18, %v3032_v8  ;;  %5139 = vmatpush2.msra.mxu1 %v2910_v56 }
 0x437   : > { %v3063_v63 = vmul.f32 %v3051_v25, %v11416_v37  ;;  %v3064_v16 = vmul.f32 %v3047_v12, %v11421_v19  ;;  %v11770_v19 = vpop.f32.mrf.mxu1  ;;  %v11772_v25 = vpop.f32.mrf.mxu0 }
 0x438   : > { %13093 = vst [vmem:[#allocation38_spill] sm:$0xff] %v11770_v19  ;;  %13094 = vst [vmem:[#allocation39_spill] sm:$0xff] %v11772_v25 }
 0x439   : > { %v2845_v8 = vpop.permute.xlu1 %2844  ;;  %5300 = vmatprep.subr.mxu0 %v3064_v16  ;;  %v2837_v18 = vpop.permute.xlu0 %2836 }
 0x43a   : > { %v2849_v56 = vsel %vm436_vm6, %v2837_v18, %v2845_v8  ;;  %v2853_v37 = vsel %vm436_vm6, %v2845_v8, %v2837_v18  ;;  %5301 = vmatpush1.msra.mxu0 %v3063_v63  ;;  %v11780_v8 = vpop.f32.mrf.mxu1  ;;  %v11782_v63 = vpop.f32.mrf.mxu0 }
 0x43b   : > { %v2868_v12 = vmul.f32 %v11759_v55, %v2849_v56  ;;  %v2869_v23 = vmul.f32 %v11764_v2, %v2853_v37  ;;  %13095 = vst [vmem:[#allocation42_spill] sm:$0xff] %v11780_v8  ;;  %13096 = vst [vmem:[#allocation41_spill] sm:$0xff] %v11782_v63  ;;  %v11794_v37 = vld [vmem:[%s12706_s3 + $0x168] sm:$0xff] }
 0x43d   : > { %v3342_v58 = vpop.permute.xlu1 %3341  ;;  %5140 = vmatprep.subr.mxu1 %v2869_v23  ;;  %v3334_v4 = vpop.permute.xlu0 %3333  ;;  %v11789_v23 = vld [vmem:[%s12706_s3 + $0x160] sm:$0xff] }
 0x43e   : > { %v3346_v16 = vsel %vm534_vm4, %v3334_v4, %v3342_v58  ;;  %v3350_v11 = vsel %vm534_vm4, %v3342_v58, %v3334_v4  ;;  %5141 = vmatpush2.msra.mxu1 %v2868_v12 }
 0x43f   : > { %v3365_v18 = vmul.f32 %v3346_v16, %v11457_v59  ;;  %v3366_v56 = vmul.f32 %v3350_v11, %v11462_v3  ;;  %v11800_v3 = vpop.f32.mrf.mxu0  ;;  %v11802_v11 = vpop.f32.mrf.mxu1 }
 0x440   : > { %13097 = vst [vmem:[#allocation47_spill] sm:$0xff] %v11800_v3  ;;  %13098 = vst [vmem:[#allocation43_spill] sm:$0xff] %v11802_v11 }
 0x441   : > { %v2843_v4 = vpop.permute.xlu1 %2842  ;;  %5302 = vmatprep.subr.mxu0 %v3366_v56  ;;  %v2835_v58 = vpop.permute.xlu0 %2834 }
 0x442   : > { %v2848_v12 = vsel %vm436_vm6, %v2835_v58, %v2843_v4  ;;  %v2852_v59 = vsel %vm436_vm6, %v2843_v4, %v2835_v58  ;;  %5303 = vmatpush2.msra.mxu0 %v3365_v18  ;;  %v11810_v4 = vpop.f32.mrf.mxu0  ;;  %v11812_v18 = vpop.f32.mrf.mxu1 }
 0x443   : > { %v2866_v16 = vmul.f32 %v11789_v23, %v2848_v12  ;;  %v2867_v63 = vmul.f32 %v11794_v37, %v2852_v59  ;;  %13099 = vst [vmem:[#allocation44_spill] sm:$0xff] %v11810_v4  ;;  %13100 = vst [vmem:[#allocation45_spill] sm:$0xff] %v11812_v18  ;;  %v11824_v59 = vld [vmem:[%s12706_s3 + $0x158] sm:$0xff] }
 0x445   : > { %v3340_v8 = vpop.permute.xlu1 %3339  ;;  %5142 = vmatprep.subr.mxu1 %v2867_v63  ;;  %v3332_v25 = vpop.permute.xlu0 %3331  ;;  %v11819_v63 = vld [vmem:[%s12706_s3 + $0x150] sm:$0xff] }
 0x446   : > { %v3345_v56 = vsel %vm534_vm4, %v3332_v25, %v3340_v8  ;;  %v3349_v19 = vsel %vm534_vm4, %v3340_v8, %v3332_v25  ;;  %5143 = vmatpush2.msra.mxu1 %v2866_v16 }
 0x447   : > { %v3363_v58 = vmul.f32 %v3345_v56, %v11507_v51  ;;  %v3364_v12 = vmul.f32 %v3349_v19, %v11512_v44  ;;  %v11830_v44 = vpop.f32.mrf.mxu0  ;;  %v11832_v19 = vpop.f32.mrf.mxu1 }
 0x448   : > { %13101 = vst [vmem:[#allocation46_spill] sm:$0xff] %v11830_v44  ;;  %13102 = vst [vmem:[#allocation49_spill] sm:$0xff] %v11832_v19 }
 0x449   : > { %v2841_v25 = vpop.permute.xlu1 %2840  ;;  %5304 = vmatprep.subr.mxu0 %v3364_v12  ;;  %v2833_v8 = vpop.permute.xlu0 %2832 }
 0x44a   : > { %v2847_v16 = vsel %vm436_vm6, %v2833_v8, %v2841_v25  ;;  %v2851_v51 = vsel %vm436_vm6, %v2841_v25, %v2833_v8  ;;  %5305 = vmatpush2.msra.mxu0 %v3363_v58  ;;  %v11840_v25 = vpop.f32.mrf.mxu0  ;;  %v11842_v58 = vpop.f32.mrf.mxu1 }
 0x44b   : > { %v2864_v56 = vmul.f32 %v11819_v63, %v2847_v16  ;;  %v2865_v18 = vmul.f32 %v11824_v59, %v2851_v51  ;;  %13103 = vst [vmem:[#allocation48_spill] sm:$0xff] %v11840_v25  ;;  %13104 = vst [vmem:[#allocation51_spill] sm:$0xff] %v11842_v58  ;;  %v11854_v51 = vld [vmem:[%s12706_s3 + $0x148] sm:$0xff] }
 0x44d   : > { %v3338_v4 = vpop.permute.xlu1 %3337  ;;  %5144 = vmatprep.subr.mxu1 %v2865_v18  ;;  %v3330_v11 = vpop.permute.xlu0 %3329  ;;  %v11849_v18 = vld [vmem:[%s12706_s3 + $0x140] sm:$0xff] }
 0x44e   : > { %v3344_v12 = vsel %vm534_vm4, %v3330_v11, %v3338_v4  ;;  %v3348_v3 = vsel %vm534_vm4, %v3338_v4, %v3330_v11  ;;  %5145 = vmatpush2.msra.mxu1 %v2864_v56 }
 0x44f   : > { %v3361_v8 = vmul.f32 %v3344_v12, %v11551_v24  ;;  %v3362_v16 = vmul.f32 %v3348_v3, %v11556_v57  ;;  %v11860_v57 = vpop.f32.mrf.mxu0  ;;  %v11862_v3 = vpop.f32.mrf.mxu1 }
 0x451   : > { %v2839_v11 = vpop.permute.xlu1 %2838  ;;  %5306 = vmatprep.subr.mxu0 %v3362_v16  ;;  %v2831_v4 = vpop.permute.xlu0 %2830 }
 0x452   : > { %v2846_v56 = vsel %vm436_vm6, %v2831_v4, %v2839_v11  ;;  %v2850_v24 = vsel %vm436_vm6, %v2839_v11, %v2831_v4  ;;  %5307 = vmatpush2.msra.mxu0 %v3361_v8  ;;  %v11870_v11 = vpop.f32.mrf.mxu0  ;;  %v11872_v8 = vpop.f32.mrf.mxu1 }
 0x453   : > { %v2862_v12 = vmul.f32 %v11849_v18, %v2846_v56  ;;  %v2863_v58 = vmul.f32 %v11854_v51, %v2850_v24 }
 0x455   : > { %v3336_v25 = vpop.permute.xlu1 %3335  ;;  %5146 = vmatprep.subr.mxu1 %v2863_v58  ;;  %v3328_v19 = vpop.permute.xlu0 %3327 }
 0x456   : > { %v3343_v16 = vsel %vm534_vm4, %v3328_v19, %v3336_v25  ;;  %v3347_v44 = vsel %vm534_vm4, %v3336_v25, %v3328_v19  ;;  %5147 = vmatpush2.msra.mxu1 %v2862_v12 }
 0x457   : > { %v3359_v4 = vmul.f32 %v3343_v16, %v11589_v15  ;;  %v3360_v56 = vmul.f32 %v3347_v44, %v11594_v45  ;;  %5148 = vmatprep.subr.mxu1 %v11232_v27  ;;  %v11884_v15 = vpop.f32.mrf.mxu0  ;;  %v11886_v45 = vpop.f32.mrf.mxu1 }
 0x458   : > { %5149 = vmatpush2.msra.mxu1 %v11237_v48 }
 0x459   : > { %v3294_v58 = vpop.permute.xlu1 %3293  ;;  %5150 = vmatprep.subr.mxu1 %v11118_v38  ;;  %5308 = vmatprep.subr.mxu0 %v3360_v56  ;;  %v3286_v24 = vpop.permute.xlu0 %3285 }
 0x45a   : > { %v3298_v19 = vsel %vm485_vm5, %v3286_v24, %v3294_v58  ;;  %v3302_v25 = vsel %vm485_vm5, %v3294_v58, %v3286_v24  ;;  %5151 = vmatpush2.msra.mxu1 %v11274_v61  ;;  %5309 = vmatpush2.msra.mxu0 %v3359_v4 }
 0x45b   : > { %v3317_v27 = vmul.f32 %v3298_v19, %v11629_v39  ;;  %v3318_v48 = vmul.f32 %v3302_v25, %v11634_v29  ;;  %5152 = vmatprep.subr.mxu1 %v11151_v26  ;;  %v11898_v39 = vpop.f32.mrf.mxu0  ;;  %v11900_v29 = vpop.f32.mrf.mxu1  ;;  %v11929_v25 = vld [vmem:[%s12704_s1 + $0x18] sm:$0xff] }
 0x45c   : > { %5153 = vmatpush2.msra.mxu1 %v11156_v54 }
 0x45d   : > { %v3292_v38 = vpop.permute.xlu1 %3291  ;;  %5154 = vmatprep.subr.mxu1 %v11190_v60  ;;  %5310 = vmatprep.subr.mxu0 %v3318_v48  ;;  %v3284_v44 = vpop.permute.xlu0 %3283  ;;  %v11907_v60 = vld [vmem:[%s12704_s1] sm:$0xff] }
 0x45e   : > { %v3297_v61 = vsel %vm485_vm5, %v3284_v44, %v3292_v38  ;;  %v3301_v12 = vsel %vm485_vm5, %v3292_v38, %v3284_v44  ;;  %5155 = vmatpush2.msra.mxu1 %v11195_v13  ;;  %5311 = vmatpush2.msra.mxu0 %v3317_v27  ;;  %v11913_v13 = vld [vmem:[%s12704_s1 + $0x20] sm:$0xff]  ;;  %v11920_v56 = vpop.f32.mrf.mxu1  ;;  %v11922_v58 = vpop.f32.mrf.mxu0  ;;  %v11935_v27 = vld [vmem:[%s12704_s1 + $0x38] sm:$0xff] }
 0x45f   : > { %v3315_v26 = vmul.f32 %v3297_v61, %v11665_v21  ;;  %v3316_v54 = vmul.f32 %v3301_v12, %v11670_v50  ;;  %5157 = vmatmul.mubr.f32.vlgmr.msra.gmra.mxu1 %v11907_v60 }
 0x460   : > { %5162 = vmatprep.mubr.f32.mxu1 %v11913_v13  ;;  %v11942_v44 = vpop.f32.mrf.mxu1  ;;  %v11944_v61 = vpop.f32.mrf.mxu0 }
 0x461   : > { %v3290_v16 = vpop.permute.xlu1 %3289  ;;  %5312 = vmatprep.subr.mxu0 %v3316_v54  ;;  %v3282_v4 = vpop.permute.xlu0 %3281  ;;  %v11951_v54 = vld [vmem:[%s12704_s1 + $0x30] sm:$0xff] }
 0x462   : > { %v3296_v21 = vsel %vm485_vm5, %v3282_v4, %v3290_v16  ;;  %v3300_v50 = vsel %vm485_vm5, %v3290_v16, %v3282_v4  ;;  %5313 = vmatpush2.msra.mxu0 %v3315_v26  ;;  %v11957_v16 = vld [vmem:[%s12704_s1 + $0x50] sm:$0xff]  ;;  %v11960_v4 = vpop.f32.mrf.mxu1 }
 0x463   : > { %v3313_v24 = vmul.f32 %v3296_v21, %v11695_v52  ;;  %v3314_v19 = vmul.f32 %v3300_v50, %v11700_v14  ;;  %5163 = vmatmul.mubr.f32.gmra.mxu1 %v11929_v25  ;;  %v11962_v21 = vpop.f32.mrf.mxu0 }
 0x464   : > { %5168 = vmatprep.mubr.f32.mxu1 %v11935_v27  ;;  %13105 = vst [vmem:[#allocation50_spill] sm:$0xff] %v11962_v21 }
 0x465   : > { %v3288_v48 = vpop.permute.xlu1 %3287  ;;  %5314 = vmatprep.subr.mxu0 %v3314_v19  ;;  %v3280_v38 = vpop.permute.xlu0 %3279 }
 0x466   : > { %v3295_v52 = vsel %vm485_vm5, %v3280_v38, %v3288_v48  ;;  %v3299_v14 = vsel %vm485_vm5, %v3288_v48, %v3280_v38  ;;  %5315 = vmatpush2.msra.mxu0 %v3313_v24  ;;  %v11973_v38 = vld [vmem:[%s12704_s1 + $0x48] sm:$0xff] }
 0x467   : > { %v3311_v12 = vmul.f32 %v3295_v52, %v11729_v42  ;;  %v3312_v26 = vmul.f32 %v3299_v14, %v11734_v46  ;;  %5169 = vmatmul.mubr.f32.gmra.mxu1 %v11951_v54  ;;  %v11977_v52 = vpop.f32.mrf.mxu1  ;;  %v11979_v14 = vpop.f32.mrf.mxu0 }
 0x468   : > { %5174 = vmatprep.mubr.f32.mxu1 %v11957_v16  ;;  %13106 = vst [vmem:[#allocation52_spill] sm:$0xff] %v11977_v52  ;;  %13107 = vst [vmem:[#allocation55_spill] sm:$0xff] %v11979_v14 }
 0x469   : > { %v3246_v42 = vpop.permute.xlu1 %3245  ;;  %5316 = vmatprep.subr.mxu0 %v3312_v26  ;;  %v3238_v46 = vpop.permute.xlu0 %3237 }
 0x46a   : > { %v3250_v50 = vsel %vm436_vm6, %v3238_v46, %v3246_v42  ;;  %v3254_v24 = vsel %vm436_vm6, %v3246_v42, %v3238_v46  ;;  %5317 = vmatpush2.msra.mxu0 %v3311_v12 }
 0x46b   : > { %v3269_v19 = vmul.f32 %v3250_v50, %v11759_v55  ;;  %v3270_v48 = vmul.f32 %v3254_v24, %v11764_v2  ;;  %5175 = vmatmul.mubr.f32.gmra.mxu1 %v11973_v38  ;;  %v11987_v50 = vpop.f32.mrf.mxu1  ;;  %v11989_v24 = vpop.f32.mrf.mxu0 }
 0x46c   : > { %5423 = vmatprep.mubr.f32.mxu1 %v13041_v17 }
 0x46d   : > { %v3244_v26 = vpop.permute.xlu1 %3243  ;;  %5318 = vmatprep.subr.mxu0 %v3270_v48  ;;  %v3236_v12 = vpop.permute.xlu0 %3235 }
 0x46e   : > { %v3249_v55 = vsel %vm436_vm6, %v3236_v12, %v3244_v26  ;;  %v3253_v2 = vsel %vm436_vm6, %v3244_v26, %v3236_v12  ;;  %5319 = vmatpush2.msra.mxu0 %v3269_v19  ;;  %v11997_v26 = vpop.f32.mrf.mxu1 }
 0x46f   : > { %v3267_v42 = vmul.f32 %v3249_v55, %v11789_v23  ;;  %v3268_v46 = vmul.f32 %v3253_v2, %v11794_v37  ;;  %v11999_v37 = vpop.f32.mrf.mxu0 }
 0x471   : > { %v3242_v52 = vpop.permute.xlu1 %3241  ;;  %5320 = vmatprep.subr.mxu0 %v3268_v46  ;;  %v3234_v14 = vpop.permute.xlu0 %3233 }
 0x472   : > { %v3248_v48 = vsel %vm436_vm6, %v3234_v14, %v3242_v52  ;;  %v3252_v21 = vsel %vm436_vm6, %v3242_v52, %v3234_v14  ;;  %5321 = vmatpush2.msra.mxu0 %v3267_v42  ;;  %v12013_v14 = vpop.f32.mrf.mxu1  ;;  %v12015_v42 = vpop.f32.mrf.mxu0 }
 0x473   : > { %v3265_v19 = vmul.f32 %v3248_v48, %v11819_v63  ;;  %v3266_v23 = vmul.f32 %v3252_v21, %v11824_v59  ;;  %v3405_v59 = vld [vmem:[%s12706_s3 + $0x230] sm:$0xff]  ;;  %v3406_v21 = vld [vmem:[%s12706_s3 + $0x238] sm:$0xff] }
 0x475   : > { %v3240_v12 = vpop.permute.xlu1 %3239  ;;  %5322 = vmatprep.subr.mxu0 %v3266_v23  ;;  %v3232_v55 = vpop.permute.xlu0 %3231 }
 0x476   : > { %v3247_v2 = vsel %vm436_vm6, %v3232_v55, %v3240_v12  ;;  %v3251_v46 = vsel %vm436_vm6, %v3240_v12, %v3232_v55  ;;  %5323 = vmatpush2.msra.mxu0 %v3265_v19  ;;  %v3403_v55 = vld [vmem:[%s12706_s3 + $0x220] sm:$0xff] }
 0x477   : > { %v3263_v52 = vmul.f32 %v3247_v2, %v11849_v18  ;;  %v3264_v63 = vmul.f32 %v3251_v46, %v11854_v51  ;;  %v3404_v2 = vld [vmem:[%s12706_s3 + $0x228] sm:$0xff]  ;;  %v12029_v46 = vpop.f32.mrf.mxu1 }
 0x479   : > { %v3390_v48 = vpop.permute.xlu1 %3389  ;;  %5324 = vmatprep.subr.mxu0 %v3264_v63  ;;  %v3382_v23 = vpop.permute.xlu0 %3381 }
 0x47a   : > { %v3394_v18 = vsel %vm583_vm7, %v3382_v23, %v3390_v48  ;;  %v3398_v51 = vsel %vm583_vm7, %v3390_v48, %v3382_v23  ;;  %5325 = vmatpush2.msra.mxu0 %v3263_v52  ;;  %v12031_v63 = vpop.f32.mrf.mxu0  ;;  %v3401_v23 = vld [vmem:[%s12706_s3 + $0x210] sm:$0xff] }
 0x47b   : > { %v3413_v19 = vmul.f32 %v3405_v59, %v3394_v18  ;;  %v3414_v12 = vmul.f32 %v3406_v21, %v3398_v51  ;;  %5326 = vmatprep.subr.mxu0 %v11369_v43  ;;  %v12049_v51 = vpop.f32.mrf.mxu1 }
 0x47c   : > { %5327 = vmatpush2.msra.mxu0 %v11450_v1  ;;  %v12047_v18 = vpop.f32.mrf.mxu0 }
 0x47d   : > { %v3388_v48 = vpop.permute.xlu1 %3387  ;;  %5383 = vmatprep.subr.mxu1 %v3414_v12  ;;  %v3380_v52 = vpop.permute.xlu0 %3379  ;;  %5328 = vmatprep.subr.mxu0 %v11475_v34  ;;  %v3402_v34 = vld [vmem:[%s12706_s3 + $0x218] sm:$0xff] }
 0x47e   : > { %v3393_v43 = vsel %vm583_vm7, %v3380_v52, %v3388_v48  ;;  %v3397_v59 = vsel %vm583_vm7, %v3388_v48, %v3380_v52  ;;  %5384 = vmatpush1.msra.mxu1 %v3413_v19  ;;  %5329 = vmatpush2.msra.mxu0 %v11480_v40  ;;  %v12065_v48 = vpop.f32.mrf.mxu0  ;;  %v12067_v52 = vpop.f32.mrf.mxu1 }
 0x47f   : > { %v3411_v21 = vmul.f32 %v3403_v55, %v3393_v43  ;;  %v3412_v1 = vmul.f32 %v3404_v2, %v3397_v59  ;;  %5330 = vmatprep.subr.mxu0 %v11495_v62  ;;  %v3399_v2 = vld [vmem:[%s12706_s3 + $0x200] sm:$0xff] }
 0x480   : > { %5331 = vmatpush2.msra.mxu0 %v11500_v36 }
 0x481   : > { %v3386_v19 = vpop.permute.xlu1 %3385  ;;  %5385 = vmatprep.subr.mxu1 %v3412_v1  ;;  %v3378_v40 = vpop.permute.xlu0 %3377  ;;  %5332 = vmatprep.subr.mxu0 %v11525_v32  ;;  %v3400_v32 = vld [vmem:[%s12706_s3 + $0x208] sm:$0xff] }
 0x482   : > { %v3392_v62 = vsel %vm583_vm7, %v3378_v40, %v3386_v19  ;;  %v3396_v12 = vsel %vm583_vm7, %v3386_v19, %v3378_v40  ;;  %5386 = vmatpush1.msra.mxu1 %v3411_v21  ;;  %5333 = vmatpush2.msra.mxu0 %v11530_v20  ;;  %v13114_v19 = vld [vmem:[#allocation16_spill] sm:$0xff]  ;;  %v13116_v40 = vld [vmem:[#allocation18_spill] sm:$0xff] }
 0x483   : > { %v3409_v55 = vmul.f32 %v3401_v23, %v3392_v62  ;;  %v3410_v36 = vmul.f32 %v3402_v34, %v3396_v12  ;;  %5335 = vmatmul.mubr.f32.vlgmr.msra.gmra.mxu0 %v11907_v60  ;;  %v12080_v23 = vadd.f32 %v11391_v49, %v11389_v31  ;;  %v12084_v34 = vadd.f32 %v11401_v7, %v11399_v9  ;;  %v12101_v31 = vpop.f32.mrf.mxu0  ;;  %v12103_v49 = vpop.f32.mrf.mxu1  ;;  %v13108_v9 = vld [vmem:[#allocation10_spill] sm:$0xff]  ;;  %v13109_v7 = vld [vmem:[#allocation11_spill] sm:$0xff] }
 0x484   : > { %5340 = vmatprep.mubr.f32.mxu0 %v11913_v13  ;;  %v12076_v13 = vadd.f32 %v11364_v35, %v11362_v41  ;;  %v12095_v41 = vadd.f32 %v11466_v10, %v11464_v6  ;;  %v12099_v35 = vadd.f32 %v11486_v28, %v11484_v0  ;;  %v12107_v5 = vadd.f32 %v13109_v7, %v13108_v9  ;;  %v13113_v6 = vld [vmem:[#allocation15_spill] sm:$0xff]  ;;  %v13115_v0 = vld [vmem:[#allocation17_spill] sm:$0xff]  ;;  %v13124_v9 = vld [vmem:[#allocation26_spill] sm:$0xff] }
 0x485   : > { %v3384_v43 = vpop.permute.xlu1 %3383  ;;  %5387 = vmatprep.subr.mxu1 %v3410_v36  ;;  %v3376_v20 = vpop.permute.xlu0 %3375  ;;  %v4364_v28 = vadd.f32 %v13115_v0, %v13114_v19  ;;  %v13117_v62 = vld [vmem:[#allocation19_spill] sm:$0xff]  ;;  %v13119_v36 = vld [vmem:[#allocation21_spill] sm:$0xff]  ;;  %v13129_v19 = vld [vmem:[#allocation30_spill] sm:$0xff] }
 0x486   : > { %v3391_v60 = vsel %vm583_vm7, %v3376_v20, %v3384_v43  ;;  %v3395_v59 = vsel %vm583_vm7, %v3384_v43, %v3376_v20  ;;  %5388 = vmatpush1.msra.mxu1 %v3409_v55  ;;  %v4366_v12 = vadd.f32 %v13117_v62, %v13116_v40  ;;  %v13118_v55 = vld [vmem:[#allocation20_spill] sm:$0xff]  ;;  %v13121_v43 = vld [vmem:[#allocation22_spill] sm:$0xff]  ;;  %v13132_v62 = vld [vmem:[#allocation33_spill] sm:$0xff] }
 0x487   : > { %v3407_v21 = vmul.f32 %v3399_v2, %v3391_v60  ;;  %v3408_v1 = vmul.f32 %v3400_v32, %v3395_v59  ;;  %5341 = vmatmul.mubr.f32.gmra.mxu0 %v11929_v25  ;;  %v12091_v25 = vadd.f32 %v11439_v22, %v11437_v33  ;;  %v13111_v33 = vld [vmem:[#allocation13_spill] sm:$0xff]  ;;  %v12123_v2 = vadd.f32 %v13119_v36, %v13118_v55  ;;  %v13120_v32 = vld [vmem:[#allocation23_spill] sm:$0xff]  ;;  %v13122_v59 = vld [vmem:[#allocation24_spill] sm:$0xff] }
 0x488   : > { %5346 = vmatprep.mubr.f32.mxu0 %v11935_v27  ;;  %v12111_v22 = vadd.f32 %v13111_v33, %v13110_v30  ;;  %v13112_v27 = vld [vmem:[#allocation14_spill] sm:$0xff]  ;;  %v12127_v20 = vadd.f32 %v13121_v43, %v13120_v32  ;;  %v6569_v60 = vld [vmem:[%s12704_s1 + $0x10] sm:$0xff]  ;;  %v13126_v30 = vld [vmem:[#allocation27_spill] sm:$0xff] }
 0x489   : > { %5389 = vmatprep.subr.mxu1 %v3408_v1  ;;  %v12115_v10 = vadd.f32 %v13113_v6, %v13112_v27  ;;  %v13123_v1 = vld [vmem:[#allocation25_spill] sm:$0xff]  ;;  %v13127_v33 = vld [vmem:[#allocation28_spill] sm:$0xff]  ;;  %v13133_v55 = vld [vmem:[#allocation35_spill] sm:$0xff] }
 0x48a   : > { %5390 = vmatpush1.msra.mxu1 %v3407_v21  ;;  %v12136_v21 = vadd.f32 %v13122_v59, %v11652_v53  ;;  %v12140_v7 = vadd.f32 %v13124_v9, %v13123_v1  ;;  %v12144_v27 = vadd.f32 %v13127_v33, %v13126_v30  ;;  %v13128_v6 = vld [vmem:[#allocation29_spill] sm:$0xff]  ;;  %v13131_v40 = vld [vmem:[#allocation32_spill] sm:$0xff]  ;;  %v12156_v36 = vadd.f32 %v13133_v55, %v13132_v62  ;;  %v13134_v32 = vld [vmem:[#allocation34_spill] sm:$0xff]  ;;  %v12162_v59 = vpop.f32.mrf.mxu0  ;;  %v12164_v1 = vpop.f32.mrf.mxu1 }
 0x48b   : > { %6208 = vmatmul.mubr.msk.f32.vlgmr.msra.gmra.mxu1 %vm4011_vm8, %v6569_v60  ;;  %5347 = vmatmul.mubr.f32.gmra.mxu0 %v11951_v54  ;;  %v12150_v0 = vadd.f32 %v13129_v19, %v13128_v6  ;;  %v13130_v54 = vld [vmem:[#allocation31_spill] sm:$0xff]  ;;  %v13135_v43 = vld [vmem:[#allocation36_spill] sm:$0xff]  ;;  %v13137_v9 = vld [vmem:[#allocation37_spill] sm:$0xff] }
 0x48c   : > { %13125 = vst [vmem:[#allocation54_spill] sm:$0xff] %v12140_v7  ;;  %5429 = vmatprep.mubr.f32.mxu1 %v13041_v17  ;;  %5352 = vmatprep.mubr.f32.mxu0 %v11957_v16  ;;  %v4542_v53 = vadd.f32 %v13131_v40, %v13130_v54  ;;  %v12160_v60 = vadd.f32 %v13135_v43, %v13134_v32  ;;  %v13136_v16 = vld [vmem:[#allocation40_spill] sm:$0xff]  ;;  %v13138_v33 = vld [vmem:[#allocation38_spill] sm:$0xff]  ;;  %v13139_v6 = vld [vmem:[#allocation39_spill] sm:$0xff] }
 0x48d   : > { %v12168_v30 = vadd.f32 %v13137_v9, %v13136_v16  ;;  %v12172_v19 = vadd.f32 %v13139_v6, %v13138_v33  ;;  %v13140_v54 = vld [vmem:[#allocation42_spill] sm:$0xff]  ;;  %v13141_v40 = vld [vmem:[#allocation41_spill] sm:$0xff]  ;;  %v13142_v55 = vld [vmem:[#allocation47_spill] sm:$0xff] }
 0x48e   : > { %v12176_v62 = vadd.f32 %v13141_v40, %v13140_v54  ;;  %v13143_v32 = vld [vmem:[#allocation43_spill] sm:$0xff]  ;;  %v6570_v7 = vld [vmem:[%s12704_s1 + $0x28] sm:$0xff]  ;;  %v13146_v9 = vld [vmem:[#allocation45_spill] sm:$0xff] }
 0x48f   : > { %v12180_v43 = vadd.f32 %v13143_v32, %v13142_v55  ;;  %6209 = vmatmul.mubr.msk.f32.gmra.mxu1 %vm4011_vm8, %v6570_v7  ;;  %5353 = vmatmul.mubr.f32.gmra.mxu0 %v11973_v38  ;;  %v13145_v16 = vld [vmem:[#allocation44_spill] sm:$0xff]  ;;  %v13147_v6 = vld [vmem:[#allocation46_spill] sm:$0xff]  ;;  %v13148_v54 = vld [vmem:[#allocation49_spill] sm:$0xff]  ;;  %v12202_v38 = vadd.f32 %v11862_v3, %v11860_v57  ;;  %v12206_v7 = vadd.f32 %v11872_v8, %v11870_v11 }
 0x490   : > { %v12189_v33 = vadd.f32 %v13146_v9, %v13145_v16  ;;  %v12193_v40 = vadd.f32 %v13148_v54, %v13147_v6  ;;  %v13149_v55 = vld [vmem:[#allocation48_spill] sm:$0xff]  ;;  %v13150_v32 = vld [vmem:[#allocation51_spill] sm:$0xff]  ;;  %5435 = vmatprep.mubr.f32.mxu1 %v13041_v17  ;;  %v12210_v16 = vadd.f32 %v11886_v45, %v11884_v15  ;;  %v12214_v9 = vadd.f32 %v11900_v29, %v11898_v39  ;;  %v5482_v6 = vld [vmem:[%s6632_s21 + $0x10] sm:$0xff]  ;;  %v4992_v39 = vpop.f32.mrf.mxu0  ;;  %v5081_v29 = vpop.f32.mrf.mxu1 }
 0x491   : > { %13144 = vst [vmem:[#allocation53_spill] sm:$0xff] %v12180_v43  ;;  %v12197_v43 = vadd.f32 %v13150_v32, %v13149_v55  ;;  %v12219_v54 = vadd.f32 %v11922_v58, %v11920_v56  ;;  %v12223_v57 = vadd.f32 %v11944_v61, %v11942_v44  ;;  %v13152_v3 = vld [vmem:[#allocation50_spill] sm:$0xff]  ;;  %v13153_v8 = vld [vmem:[#allocation52_spill] sm:$0xff]  ;;  %v13154_v15 = vld [vmem:[#allocation55_spill] sm:$0xff]  ;;  %v12242_v44 = vadd.f32 %v11989_v24, %v11987_v50 }
 0x492   : > { %v12227_v11 = vadd.f32 %v13152_v3, %v11960_v4  ;;  %v12231_v45 = vadd.f32 %v13154_v15, %v13153_v8  ;;  %v5483_v55 = vld [vmem:[%s6632_s21 + $0x18] sm:$0xff]  ;;  %v6214_v32 = vld [vmem:[%s6632_s21 + $0x50] sm:$0xff]  ;;  %v12236_v58 = vpop.permute.xlu1 %5459  ;;  %v12246_v61 = vadd.f32 %v11999_v37, %v11997_v26  ;;  %v12250_v4 = vadd.f32 %v12015_v42, %v12013_v14  ;;  %v5480_v26 = vld [vmem:[%s6632_s21] sm:$0xff] }
 0x493   : > { %13151 = vst [vmem:[#allocation58_spill] sm:$0xff] %v12219_v54  ;;  %v6215_v56 = vld [vmem:[%s6632_s21 + $0x58] sm:$0xff]  ;;  %v12238_v54 = vpop.permute.xlu0 %5454  ;;  %13156 = vst [vmem:[#allocation59_spill] sm:$0xff] %v12242_v44  ;;  %v12254_v3 = vadd.f32 %v12031_v63, %v12029_v46  ;;  %v6230_v8 = vld [vmem:[%s6632_s21 + $0x90] sm:$0xff]  ;;  %v5474_v15 = vadd.f32 %v12236_v58, %v12084_v34  ;;  %v5546_v50 = vadd.f32 %v12236_v58, %v4364_v28 }
 0x494   : > { %13155 = vst [vmem:[#allocation56_spill] sm:$0xff] %v12231_v45  ;;  %13157 = vst [vmem:[#allocation57_spill] sm:$0xff] %v12246_v61  ;;  %v5475_v45 = vadd.f32 %v12236_v58, %v4188_v47  ;;  %v5547_v24 = vadd.f32 %v12236_v58, %v4366_v12  ;;  %v5481_v37 = vld [vmem:[%s6632_s21 + $0x8] sm:$0xff]  ;;  %v6571_v14 = vld [vmem:[%s12704_s1 + $0x40] sm:$0xff]  ;;  %v5619_v42 = vadd.f32 %v12236_v58, %v4542_v53  ;;  %v5083_v61 = vpop.f32.mrf.mxu1 }
 0x495   : > { %13158 = vst [vmem:[#allocation9_spill] sm:$0xff] %v12250_v4  ;;  %13159 = vst [vmem:[#allocation5_spill] sm:$0xff] %v12254_v3  ;;  %6210 = vmatmul.mubr.msk.f32.gmra.mxu1 %vm4011_vm8, %v6571_v14  ;;  %v5472_v46 = vadd.f32 %v12238_v54, %v12076_v13  ;;  %v5473_v63 = vadd.f32 %v12238_v54, %v12080_v23  ;;  %v12276_v34 = vadd.f32 %v12049_v51, %v12047_v18  ;;  %v4994_v23 = vpop.f32.mrf.mxu0 }
 0x496   : > { %5441 = vmatprep.mubr.f32.mxu1 %v13041_v17  ;;  %v5490_v47 = vadd.f32 %v5482_v6, %v5474_v15  ;;  %v5491_v28 = vadd.f32 %v5483_v55, %v5475_v45  ;;  %v5562_v12 = vadd.f32 %v6214_v32, %v5546_v50  ;;  %v5563_v3 = vadd.f32 %v6215_v56, %v5547_v24  ;;  %v6572_v6 = vld [vmem:[%s12704_s1 + $0x58] sm:$0xff]  ;;  %v6213_v55 = vld [vmem:[%s6632_s21 + $0x48] sm:$0xff]  ;;  %v12300_v56 = vpop.permute.xlu1 %5464 }
 0x497   : > { %v5635_v14 = vadd.f32 %v6230_v8, %v5619_v42  ;;  %v5488_v53 = vadd.f32 %v5480_v26, %v5472_v46  ;;  %v5489_v4 = vadd.f32 %v5481_v37, %v5473_v63  ;;  %v12280_v13 = vadd.f32 %v12067_v52, %v12065_v48  ;;  %v6212_v52 = vld [vmem:[%s6632_s21 + $0x40] sm:$0xff]  ;;  %v6229_v26 = vld [vmem:[%s6632_s21 + $0x88] sm:$0xff] }
 0x498   : > { %v5506_v17 = vmul.f32 0.70710677, %v5490_v47  ;;  %v5507_v44 = vmul.f32 0.70710677, %v5491_v28  ;;  %v5544_v18 = vadd.f32 %v12238_v54, %v12111_v22  ;;  %v5545_v51 = vadd.f32 %v12238_v54, %v12115_v10 }
 0x499   : > { %6211 = vmatmul.mubr.msk.f32.gmra.mxu1 %vm4011_vm8, %v6572_v6  ;;  %v5578_v45 = vmul.f32 0.70710677, %v5562_v12  ;;  %v5579_v48 = vmul.f32 0.70710677, %v5563_v3  ;;  %v12294_v32 = vadd.f32 %v12103_v49, %v12101_v31  ;;  %v12298_v22 = vadd.f32 %v12164_v1, %v12162_v59  ;;  %v6228_v49 = vld [vmem:[%s6632_s21 + $0x80] sm:$0xff] }
 0x49a   : > { %6348 = verf.f32 %v5506_v17  ;;  %v5651_v10 = vmul.f32 0.70710677, %v5635_v14  ;;  %v12302_v8 = vadd.f32 %v5081_v29, %v4992_v39  ;;  %v12304_v15 = vadd.f32 %v5083_v61, %v4994_v23  ;;  %v6231_v61 = vld [vmem:[%s6632_s21 + $0x98] sm:$0xff] }
 0x49b   : > { %v12306_v50 = vmul.f32 0.5, %v5490_v47  ;;  %6350 = verf.f32 %v5507_v44  ;;  %v5504_v24 = vmul.f32 0.70710677, %v5488_v53  ;;  %v5505_v31 = vmul.f32 0.70710677, %v5489_v4  ;;  %v5484_v44 = vld [vmem:[%s6632_s21 + $0x20] sm:$0xff] }
 0x49c   : > { %6352 = verf.f32 %v5578_v45  ;;  %v5560_v59 = vadd.f32 %v6212_v52, %v5544_v18  ;;  %v5561_v1 = vadd.f32 %v6213_v55, %v5545_v51  ;;  %v5617_v37 = vadd.f32 %v12238_v54, %v12144_v27  ;;  %v12333_v52 = vpop.permute.xlu0 %5469 }
 0x49d   : > { %6354 = verf.f32 %v5579_v48  ;;  %v5618_v39 = vadd.f32 %v12238_v54, %v12150_v0  ;;  %v5620_v29 = vadd.f32 %v12236_v58, %v12156_v36  ;;  %v5476_v42 = vadd.f32 %v12300_v56, %v12091_v25  ;;  %v5485_v36 = vld [vmem:[%s6632_s21 + $0x28] sm:$0xff] }
 0x49e   : > { %v12320_v46 = vmul.f32 0.5, %v5491_v28  ;;  %v12322_v63 = vmul.f32 0.5, %v5562_v12  ;;  %6356 = verf.f32 %v5651_v10  ;;  %v5576_v47 = vmul.f32 0.70710677, %v5560_v59  ;;  %v6216_v10 = vld [vmem:[%s6632_s21 + $0x60] sm:$0xff] }
 0x49f   : > { %6358 = verf.f32 %v5504_v24  ;;  %v5577_v27 = vmul.f32 0.70710677, %v5561_v1  ;;  %v5633_v23 = vadd.f32 %v6228_v49, %v5617_v37  ;;  %v5634_v17 = vadd.f32 %v6229_v26, %v5618_v39  ;;  %v6232_v24 = vld [vmem:[%s6632_s21 + $0xa0] sm:$0xff]  ;;  %v5486_v37 = vld [vmem:[%s6632_s21 + $0x30] sm:$0xff] }
 0x4a0   : > { %6360 = verf.f32 %v5505_v31  ;;  %v5636_v0 = vadd.f32 %v6231_v61, %v5620_v29  ;;  %v5477_v18 = vadd.f32 %v12300_v56, %v12095_v41  ;;  %v5492_v25 = vadd.f32 %v5484_v44, %v5476_v42  ;;  %v6217_v41 = vld [vmem:[%s6632_s21 + $0x68] sm:$0xff] }
 0x4a1   : > { %v12327_v28 = vmul.f32 0.5, %v5563_v3  ;;  %v12329_v12 = vmul.f32 0.5, %v5635_v14  ;;  %6362 = verf.f32 %v5576_v47  ;;  %v5649_v51 = vmul.f32 0.70710677, %v5633_v23 }
 0x4a2   : > { %v12331_v6 = vmul.f32 0.5, %v5488_v53  ;;  %6364 = verf.f32 %v5577_v27  ;;  %v5650_v45 = vmul.f32 0.70710677, %v5634_v17  ;;  %v5652_v48 = vmul.f32 0.70710677, %v5636_v0 }
 0x4a3   : > { %v12335_v55 = vmul.f32 0.5, %v5489_v4  ;;  %6366 = verf.f32 %v5649_v51  ;;  %v12340_v3 = vadd.f32 %v5485_v36, %v5477_v18  ;;  %v5508_v14 = vmul.f32 0.70710677, %v5492_v25 }
 0x4a4   : > { %6368 = verf.f32 %v5650_v45  ;;  %v5548_v53 = vadd.f32 %v12300_v56, %v12123_v2  ;;  %v5549_v31 = vadd.f32 %v12300_v56, %v12127_v20  ;;  %v5621_v49 = vadd.f32 %v12300_v56, %v12160_v60 }
 0x4a5   : > { %v12348_v4 = vmul.f32 0.5, %v5560_v59  ;;  %6370 = verf.f32 %v5652_v48  ;;  %v5509_v26 = vmul.f32 0.70710677, %v12340_v3  ;;  %v5478_v39 = vadd.f32 %v12333_v52, %v12099_v35  ;;  %v5487_v59 = vld [vmem:[%s6632_s21 + $0x38] sm:$0xff] }
 0x4a6   : > { %6372 = verf.f32 %v5508_v14  ;;  %v12354_v29 = vadd.f32 %v6216_v10, %v5548_v53  ;;  %v12356_v2 = vadd.f32 %v6217_v41, %v5549_v31  ;;  %v12358_v61 = vadd.f32 %v6232_v24, %v5621_v49  ;;  %v6218_v49 = vld [vmem:[%s6632_s21 + $0x70] sm:$0xff] }
 0x4a7   : > { %v6349_v20 = vpop.eup %6348  ;;  %v12360_v44 = vmul.f32 0.5, %v5561_v1  ;;  %v12362_v60 = vmul.f32 0.5, %v5633_v23  ;;  %6374 = verf.f32 %v5509_v26  ;;  %v5479_v42 = vadd.f32 %v12333_v52, %v12107_v5 }
 0x4a8   : > { %v6351_v47 = vpop.eup %6350  ;;  %v5522_v35 = vadd.f32 1.0, %v6349_v20  ;;  %v12367_v27 = vmul.f32 0.5, %v5634_v17  ;;  %v5580_v36 = vmul.f32 0.70710677, %v12354_v29  ;;  %v12370_v18 = vadd.f32 %v5486_v37, %v5478_v39 }
 0x4a9   : > { %v6353_v51 = vpop.eup %6352  ;;  %v5523_v1 = vadd.f32 1.0, %v6351_v47  ;;  %v5581_v5 = vmul.f32 0.70710677, %v12356_v2  ;;  %v5653_v23 = vmul.f32 0.70710677, %v12358_v61  ;;  %v5550_v17 = vadd.f32 %v12333_v52, %v12136_v21 }
 0x4aa   : > { %v6355_v45 = vpop.eup %6354  ;;  %v5530_v48 = vmul.f32 %v5522_v35, %v12306_v50  ;;  %v5594_v10 = vadd.f32 1.0, %v6353_v51  ;;  %6376 = verf.f32 %v5580_v36  ;;  %v12384_v41 = vadd.f32 %v5487_v59, %v5479_v42 }
 0x4ab   : > { %v6357_v24 = vpop.eup %6356  ;;  %v5531_v14 = vmul.f32 %v5523_v1, %v12320_v46  ;;  %v5595_v53 = vadd.f32 1.0, %v6355_v45  ;;  %v12387_v31 = vmul.f32 0.5, %v5636_v0  ;;  %6378 = verf.f32 %v5581_v5  ;;  %v6219_v46 = vld [vmem:[%s6632_s21 + $0x78] sm:$0xff] }
 0x4ac   : > { %v6359_v26 = vpop.eup %6358  ;;  %5538 = vst [vmem:[%s12377_s26 + $0x10] sm:$0xff] %v5530_v48  ;;  %v5602_v21 = vmul.f32 %v5594_v10, %v12322_v63  ;;  %v5667_v50 = vadd.f32 1.0, %v6357_v24  ;;  %v5500_v37 = vmul.f32 0.5, %v5492_v25  ;;  %6380 = verf.f32 %v5653_v23  ;;  %v13160_v25 = vld [vmem:[#allocation54_spill] sm:$0xff] }
 0x4ad   : > { %v6361_v39 = vpop.eup %6360  ;;  %5539 = vst [vmem:[%s12377_s26 + $0x18] sm:$0xff] %v5531_v14  ;;  %v5603_v20 = vmul.f32 %v5595_v53, %v12327_v28  ;;  %v5520_v59 = vadd.f32 1.0, %v6359_v26  ;;  %v5510_v0 = vmul.f32 0.70710677, %v12370_v18  ;;  %v5511_v42 = vmul.f32 0.70710677, %v12384_v41 }
 0x4ae   : > { %v6363_v47 = vpop.eup %6362  ;;  %6222 = vst [vmem:[%s12377_s26 + $0x50] sm:$0xff] %v5602_v21  ;;  %v5675_v35 = vmul.f32 %v5667_v50, %v12329_v12  ;;  %v5521_v63 = vadd.f32 1.0, %v6361_v39  ;;  %v5551_v36 = vadd.f32 %v12333_v52, %v13160_v25  ;;  %v12401_v51 = vadd.f32 %v6218_v49, %v5550_v17  ;;  %v6233_v17 = vld [vmem:[%s6632_s21 + $0xa8] sm:$0xff] }
 0x4af   : > { %v6365_v28 = vpop.eup %6364  ;;  %6223 = vst [vmem:[%s12377_s26 + $0x58] sm:$0xff] %v5603_v20  ;;  %v5528_v1 = vmul.f32 %v5520_v59, %v12331_v6  ;;  %v5592_v5 = vadd.f32 1.0, %v6363_v47  ;;  %6382 = verf.f32 %v5510_v0  ;;  %v5622_v23 = vadd.f32 %v12300_v56, %v12168_v30  ;;  %v6234_v59 = vld [vmem:[%s6632_s21 + $0xb0] sm:$0xff] }
 0x4b0   : > { %v6367_v45 = vpop.eup %6366  ;;  %6238 = vst [vmem:[%s12377_s26 + $0x90] sm:$0xff] %v5675_v35  ;;  %v5529_v12 = vmul.f32 %v5521_v63, %v12335_v55  ;;  %v5593_v48 = vadd.f32 1.0, %v6365_v28  ;;  %6384 = verf.f32 %v5511_v42  ;;  %v12409_v10 = vadd.f32 %v6219_v46, %v5551_v36  ;;  %v5087_v42 = vpop.f32.mrf.mxu1 }
 0x4b1   : > { %v6369_v24 = vpop.eup %6368  ;;  %5536 = vst [vmem:[%s12377_s26] sm:$0xff] %v5528_v1  ;;  %v5600_v6 = vmul.f32 %v5592_v5, %v12348_v4  ;;  %v5665_v14 = vadd.f32 1.0, %v6367_v45  ;;  %v5501_v53 = vmul.f32 0.5, %v12340_v3  ;;  %v5582_v30 = vmul.f32 0.70710677, %v12401_v51  ;;  %v13161_v1 = vld [vmem:[#allocation53_spill] sm:$0xff]  ;;  %v6245_v45 = vld [vmem:[%s6632_s21 + $0xc8] sm:$0xff] }
 0x4b2   : > { %v6371_v49 = vpop.eup %6370  ;;  %5537 = vst [vmem:[%s12377_s26 + $0x8] sm:$0xff] %v5529_v12  ;;  %v5601_v55 = vmul.f32 %v5593_v48, %v12360_v44  ;;  %v5666_v26 = vadd.f32 1.0, %v6369_v24  ;;  %v5572_v21 = vmul.f32 0.5, %v12354_v29  ;;  %v5583_v50 = vmul.f32 0.70710677, %v12409_v10 }
 0x4b3   : > { %v6373_v39 = vpop.eup %6372  ;;  %6220 = vst [vmem:[%s12377_s26 + $0x40] sm:$0xff] %v5600_v6  ;;  %v5673_v4 = vmul.f32 %v5665_v14, %v12362_v60  ;;  %v5668_v20 = vadd.f32 1.0, %v6371_v49  ;;  %6386 = verf.f32 %v5582_v30  ;;  %v12422_v3 = vadd.f32 %v6233_v17, %v5622_v23  ;;  %v4998_v60 = vpop.f32.mrf.mxu0  ;;  %v6244_v23 = vld [vmem:[%s6632_s21 + $0xc0] sm:$0xff] }
 0x4b4   : > { %v6375_v46 = vpop.eup %6374  ;;  %6221 = vst [vmem:[%s12377_s26 + $0x48] sm:$0xff] %v5601_v55  ;;  %v5674_v44 = vmul.f32 %v5666_v26, %v12367_v27  ;;  %v5524_v0 = vadd.f32 1.0, %v6373_v39  ;;  %6388 = verf.f32 %v5583_v50  ;;  %v5623_v29 = vadd.f32 %v12333_v52, %v12172_v19  ;;  %v6235_v27 = vld [vmem:[%s6632_s21 + $0xb8] sm:$0xff]  ;;  %v5089_v49 = vpop.f32.mrf.mxu1 }
 0x4b5   : > { %6236 = vst [vmem:[%s12377_s26 + $0x80] sm:$0xff] %v5673_v4  ;;  %v5676_v47 = vmul.f32 %v5668_v20, %v12387_v31  ;;  %v5525_v35 = vadd.f32 1.0, %v6375_v46  ;;  %v5573_v63 = vmul.f32 0.5, %v12356_v2  ;;  %v5654_v25 = vmul.f32 0.70710677, %v12422_v3  ;;  %v6246_v31 = vld [vmem:[%s6632_s21 + $0xd0] sm:$0xff]  ;;  %v5000_v30 = vpop.f32.mrf.mxu0 }
 0x4b6   : > { %6237 = vst [vmem:[%s12377_s26 + $0x88] sm:$0xff] %v5674_v44  ;;  %v5532_v36 = vmul.f32 %v5524_v0, %v5500_v37  ;;  %v12435_v28 = vadd.f32 %v6234_v59, %v5623_v29  ;;  %v5624_v19 = vadd.f32 %v12333_v52, %v12176_v62  ;;  %v5690_v5 = vadd.f32 %v12238_v54, %v13161_v1  ;;  %v6250_v1 = vld [vmem:[%s6632_s21 + $0xf0] sm:$0xff] }
 0x4b7   : > { %v6377_v12 = vpop.eup %6376  ;;  %6239 = vst [vmem:[%s12377_s26 + $0x98] sm:$0xff] %v5676_v47  ;;  %v5533_v2 = vmul.f32 %v5525_v35, %v5501_v53  ;;  %6390 = verf.f32 %v5654_v25  ;;  %v5691_v48 = vadd.f32 %v12238_v54, %v12189_v33  ;;  %v5692_v37 = vadd.f32 %v12236_v58, %v12193_v40 }
 0x4b8   : > { %v6379_v17 = vpop.eup %6378  ;;  %5540 = vst [vmem:[%s12377_s26 + $0x20] sm:$0xff] %v5532_v36  ;;  %v5596_v62 = vadd.f32 1.0, %v6377_v12  ;;  %v5645_v24 = vmul.f32 0.5, %v12358_v61  ;;  %v5655_v6 = vmul.f32 0.70710677, %v12435_v28  ;;  %v12452_v14 = vadd.f32 %v6235_v27, %v5624_v19  ;;  %v6248_v27 = vld [vmem:[%s6632_s21 + $0xe0] sm:$0xff] }
 0x4b9   : > { %v6381_v53 = vpop.eup %6380  ;;  %5541 = vst [vmem:[%s12377_s26 + $0x28] sm:$0xff] %v5533_v2  ;;  %v5597_v55 = vadd.f32 1.0, %v6379_v17  ;;  %v12455_v26 = vadd.f32 %v6244_v23, %v5690_v5  ;;  %v12457_v33 = vadd.f32 %v6245_v45, %v5691_v48  ;;  %v12459_v40 = vadd.f32 %v6246_v31, %v5692_v37  ;;  %v6249_v36 = vld [vmem:[%s6632_s21 + $0xe8] sm:$0xff] }
 0x4ba   : > { %v5604_v50 = vmul.f32 %v5596_v62, %v5572_v21  ;;  %v5669_v61 = vadd.f32 1.0, %v6381_v53  ;;  %6392 = verf.f32 %v5655_v6  ;;  %v12461_v39 = vadd.f32 %v5087_v42, %v4998_v60  ;;  %v6247_v42 = vld [vmem:[%s6632_s21 + $0xd8] sm:$0xff] }
 0x4bb   : > { %v5605_v4 = vmul.f32 %v5597_v55, %v5573_v63  ;;  %v5656_v20 = vmul.f32 0.70710677, %v12452_v14  ;;  %v5722_v59 = vmul.f32 0.70710677, %v12455_v26  ;;  %v12465_v46 = vadd.f32 %v5089_v49, %v5000_v30  ;;  %v6251_v53 = vld [vmem:[%s6632_s21 + $0xf8] sm:$0xff] }
 0x4bc   : > { %v6383_v44 = vpop.eup %6382  ;;  %6224 = vst [vmem:[%s12377_s26 + $0x60] sm:$0xff] %v5604_v50  ;;  %v5677_v0 = vmul.f32 %v5669_v61, %v5645_v24  ;;  %v5502_v21 = vmul.f32 0.5, %v12370_v18  ;;  %v5503_v29 = vmul.f32 0.5, %v12384_v41  ;;  %v5723_v60 = vmul.f32 0.70710677, %v12457_v33 }
 0x4bd   : > { %v6385_v47 = vpop.eup %6384  ;;  %6225 = vst [vmem:[%s12377_s26 + $0x68] sm:$0xff] %v5605_v4  ;;  %v5526_v35 = vadd.f32 1.0, %v6383_v44  ;;  %6394 = verf.f32 %v5656_v20  ;;  %v5724_v63 = vmul.f32 0.70710677, %v12459_v40  ;;  %v5693_v25 = vadd.f32 %v12236_v58, %v12197_v43  ;;  %v6261_v4 = vld [vmem:[%s6632_s21 + $0x108] sm:$0xff] }
 0x4be   : > { %6240 = vst [vmem:[%s12377_s26 + $0xa0] sm:$0xff] %v5677_v0  ;;  %v5527_v18 = vadd.f32 1.0, %v6385_v47  ;;  %6396 = verf.f32 %v5722_v59  ;;  %v5694_v41 = vadd.f32 %v12300_v56, %v12202_v38  ;;  %v5695_v19 = vadd.f32 %v12300_v56, %v12206_v7  ;;  %v6262_v0 = vld [vmem:[%s6632_s21 + $0x110] sm:$0xff] }
 0x4bf   : > { %v5534_v5 = vmul.f32 %v5526_v35, %v5502_v21  ;;  %6398 = verf.f32 %v5723_v60  ;;  %v12484_v23 = vadd.f32 %v6247_v42, %v5693_v25  ;;  %v5696_v43 = vadd.f32 %v12333_v52, %v12210_v16 }
 0x4c0   : > { %v6387_v45 = vpop.eup %6386  ;;  %v5535_v31 = vmul.f32 %v5527_v18, %v5503_v29  ;;  %6400 = verf.f32 %v5724_v63  ;;  %v12488_v12 = vadd.f32 %v6248_v27, %v5694_v41  ;;  %v12490_v2 = vadd.f32 %v6249_v36, %v5695_v19  ;;  %v13163_v29 = vld [vmem:[#allocation56_spill] sm:$0xff]  ;;  %v6264_v19 = vld [vmem:[%s6632_s21 + $0x120] sm:$0xff] }
 0x4c1   : > { %v6389_v38 = vpop.eup %6388  ;;  %5542 = vst [vmem:[%s12377_s26 + $0x30] sm:$0xff] %v5534_v5  ;;  %v5574_v7 = vmul.f32 0.5, %v12401_v51  ;;  %v5598_v48 = vadd.f32 1.0, %v6387_v45  ;;  %v5725_v37 = vmul.f32 0.70710677, %v12484_v23  ;;  %v12495_v17 = vadd.f32 %v6250_v1, %v5696_v43 }
 0x4c2   : > { %5543 = vst [vmem:[%s12377_s26 + $0x38] sm:$0xff] %v5535_v31  ;;  %v5575_v16 = vmul.f32 0.5, %v12409_v10  ;;  %v5599_v62 = vadd.f32 1.0, %v6389_v38  ;;  %v5646_v24 = vmul.f32 0.5, %v12422_v3  ;;  %v5726_v6 = vmul.f32 0.70710677, %v12488_v12 }
 0x4c3   : > { %v5606_v30 = vmul.f32 %v5598_v48, %v5574_v7  ;;  %v5647_v49 = vmul.f32 0.5, %v12435_v28  ;;  %6402 = verf.f32 %v5725_v37  ;;  %v5727_v51 = vmul.f32 0.70710677, %v12490_v2  ;;  %v6260_v3 = vld [vmem:[%s6632_s21 + $0x100] sm:$0xff]  ;;  %v13162_v28 = vld [vmem:[#allocation58_spill] sm:$0xff] }
 0x4c4   : > { %v6391_v55 = vpop.eup %6390  ;;  %v5607_v50 = vmul.f32 %v5599_v62, %v5575_v16  ;;  %6404 = verf.f32 %v5726_v6  ;;  %v5728_v10 = vmul.f32 0.70710677, %v12495_v17  ;;  %v5697_v61 = vadd.f32 %v12333_v52, %v12214_v9 }
 0x4c5   : > { %6226 = vst [vmem:[%s12377_s26 + $0x70] sm:$0xff] %v5606_v30  ;;  %v5670_v20 = vadd.f32 1.0, %v6391_v55  ;;  %6406 = verf.f32 %v5727_v51  ;;  %v5763_v59 = vadd.f32 %v12238_v54, %v13162_v28  ;;  %v5764_v44 = vadd.f32 %v12238_v54, %v12223_v57  ;;  %v13164_v57 = vld [vmem:[#allocation59_spill] sm:$0xff]  ;;  %v6265_v30 = vld [vmem:[%s6632_s21 + $0x128] sm:$0xff]  ;;  %v6266_v51 = vld [vmem:[%s6632_s21 + $0x130] sm:$0xff] }
 0x4c6   : > { %6227 = vst [vmem:[%s12377_s26 + $0x78] sm:$0xff] %v5607_v50  ;;  %6408 = verf.f32 %v5728_v10  ;;  %v12516_v21 = vadd.f32 %v6251_v53, %v5697_v61  ;;  %v5765_v9 = vadd.f32 %v12236_v58, %v12227_v11  ;;  %v5766_v60 = vadd.f32 %v12236_v58, %v13163_v29  ;;  %v6263_v11 = vld [vmem:[%s6632_s21 + $0x118] sm:$0xff] }
 0x4c7   : > { %v6393_v42 = vpop.eup %6392  ;;  %v5678_v47 = vmul.f32 %v5670_v20, %v5646_v24  ;;  %v12522_v35 = vadd.f32 %v6260_v3, %v5763_v59  ;;  %v12524_v63 = vadd.f32 %v6261_v4, %v5764_v44  ;;  %v5767_v25 = vadd.f32 %v12300_v56, %v13164_v57  ;;  %v13165_v24 = vld [vmem:[#allocation57_spill] sm:$0xff] }
 0x4c8   : > { %v5671_v27 = vadd.f32 1.0, %v6393_v42  ;;  %v5648_v36 = vmul.f32 0.5, %v12452_v14  ;;  %v5729_v18 = vmul.f32 0.70710677, %v12516_v21  ;;  %v12530_v41 = vadd.f32 %v6262_v0, %v5765_v9  ;;  %v6267_v9 = vld [vmem:[%s6632_s21 + $0x138] sm:$0xff] }
 0x4c9   : > { %6241 = vst [vmem:[%s12377_s26 + $0xa8] sm:$0xff] %v5678_v47  ;;  %v5714_v1 = vmul.f32 0.5, %v12455_v26  ;;  %v5715_v5 = vmul.f32 0.5, %v12457_v33  ;;  %v5795_v43 = vmul.f32 0.70710677, %v12522_v35  ;;  %v5716_v14 = vmul.f32 0.5, %v12459_v40 }
 0x4ca   : > { %v5796_v45 = vmul.f32 0.70710677, %v12524_v63  ;;  %v6395_v31 = vpop.eup %6394  ;;  %v5679_v38 = vmul.f32 %v5671_v27, %v5647_v49  ;;  %6410 = verf.f32 %v5729_v18  ;;  %v5797_v7 = vmul.f32 0.70710677, %v12530_v41  ;;  %v13166_v40 = vld [vmem:[#allocation9_spill] sm:$0xff]  ;;  %v6276_v47 = vld [vmem:[%s6632_s21 + $0x140] sm:$0xff] }
 0x4cb   : > { %v6397_v48 = vpop.eup %6396  ;;  %v5672_v37 = vadd.f32 1.0, %v6395_v31  ;;  %6412 = verf.f32 %v5795_v43  ;;  %v12541_v16 = vadd.f32 %v6263_v11, %v5766_v60  ;;  %v12543_v26 = vadd.f32 %v6264_v19, %v5767_v25  ;;  %v13167_v60 = vld [vmem:[#allocation5_spill] sm:$0xff] }
 0x4cc   : > { %v6399_v33 = vpop.eup %6398  ;;  %6242 = vst [vmem:[%s12377_s26 + $0xb0] sm:$0xff] %v5679_v38  ;;  %v5738_v62 = vadd.f32 1.0, %v6397_v48  ;;  %6414 = verf.f32 %v5796_v45  ;;  %v5768_v6 = vadd.f32 %v12300_v56, %v13165_v24  ;;  %v5769_v49 = vadd.f32 %v12333_v52, %v13166_v40  ;;  %v6279_v40 = vld [vmem:[%s6632_s21 + $0x158] sm:$0xff] }
 0x4cd   : > { %v6401_v53 = vpop.eup %6400  ;;  %v5680_v55 = vmul.f32 %v5672_v37, %v5648_v36  ;;  %v5739_v50 = vadd.f32 1.0, %v6399_v33  ;;  %v5717_v10 = vmul.f32 0.5, %v12484_v23  ;;  %6416 = verf.f32 %v5797_v7 }
 0x4ce   : > { %v5746_v61 = vmul.f32 %v5738_v62, %v5714_v1  ;;  %v5740_v3 = vadd.f32 1.0, %v6401_v53  ;;  %v5718_v4 = vmul.f32 0.5, %v12488_v12  ;;  %v5798_v20 = vmul.f32 0.70710677, %v12541_v16  ;;  %v6278_v62 = vld [vmem:[%s6632_s21 + $0x150] sm:$0xff] }
 0x4cf   : > { %6243 = vst [vmem:[%s12377_s26 + $0xb8] sm:$0xff] %v5680_v55  ;;  %v5747_v28 = vmul.f32 %v5739_v50, %v5715_v5  ;;  %v5799_v59 = vmul.f32 0.70710677, %v12543_v26  ;;  %v12557_v44 = vadd.f32 %v6265_v30, %v5768_v6  ;;  %v12559_v0 = vadd.f32 %v6266_v51, %v5769_v49 }
 0x4d0   : > { %v6403_v23 = vpop.eup %6402  ;;  %6252 = vst [vmem:[%s12377_s26 + $0xc0] sm:$0xff] %v5746_v61  ;;  %v5748_v29 = vmul.f32 %v5740_v3, %v5716_v14  ;;  %6418 = verf.f32 %v5798_v20  ;;  %v5770_v12 = vadd.f32 %v12333_v52, %v13167_v60  ;;  %v5836_v42 = vadd.f32 %v12238_v54, %v12276_v34 }
 0x4d1   : > { %v6405_v57 = vpop.eup %6404  ;;  %6253 = vst [vmem:[%s12377_s26 + $0xc8] sm:$0xff] %v5747_v28  ;;  %v5741_v25 = vadd.f32 1.0, %v6403_v23  ;;  %v5719_v27 = vmul.f32 0.5, %v12490_v2  ;;  %6420 = verf.f32 %v5799_v59  ;;  %v5800_v36 = vmul.f32 0.70710677, %v12557_v44 }
 0x4d2   : > { %v6407_v18 = vpop.eup %6406  ;;  %6254 = vst [vmem:[%s12377_s26 + $0xd0] sm:$0xff] %v5748_v29  ;;  %v5742_v11 = vadd.f32 1.0, %v6405_v57  ;;  %v5720_v19 = vmul.f32 0.5, %v12495_v17  ;;  %v5801_v1 = vmul.f32 0.70710677, %v12559_v0  ;;  %v12574_v5 = vadd.f32 %v6267_v9, %v5770_v12  ;;  %v6277_v17 = vld [vmem:[%s6632_s21 + $0x148] sm:$0xff] }
 0x4d3   : > { %v6409_v34 = vpop.eup %6408  ;;  %v5749_v43 = vmul.f32 %v5741_v25, %v5717_v10  ;;  %v5743_v45 = vadd.f32 1.0, %v6407_v18  ;;  %6422 = verf.f32 %v5800_v36  ;;  %v12576_v2 = vadd.f32 %v6276_v47, %v5836_v42  ;;  %v6282_v57 = vld [vmem:[%s6632_s21 + $0x170] sm:$0xff] }
 0x4d4   : > { %v5750_v31 = vmul.f32 %v5742_v11, %v5718_v4  ;;  %v5744_v38 = vadd.f32 1.0, %v6409_v34  ;;  %v5721_v14 = vmul.f32 0.5, %v12516_v21  ;;  %6424 = verf.f32 %v5801_v1 }
 0x4d5   : > { %6255 = vst [vmem:[%s12377_s26 + $0xd8] sm:$0xff] %v5749_v43  ;;  %v5751_v7 = vmul.f32 %v5743_v45, %v5719_v27  ;;  %v5787_v48 = vmul.f32 0.5, %v12522_v35  ;;  %v5802_v37 = vmul.f32 0.70710677, %v12574_v5  ;;  %v5868_v33 = vmul.f32 0.70710677, %v12576_v2 }
 0x4d6   : > { %6256 = vst [vmem:[%s12377_s26 + $0xe0] sm:$0xff] %v5750_v31  ;;  %v5752_v24 = vmul.f32 %v5744_v38, %v5720_v19  ;;  %v5837_v6 = vadd.f32 %v12238_v54, %v12280_v13  ;;  %v5838_v21 = vadd.f32 %v12236_v58, %v12294_v32  ;;  %v5839_v30 = vadd.f32 %v12236_v58, %v12298_v22  ;;  %v6280_v35 = vld [vmem:[%s6632_s21 + $0x160] sm:$0xff]  ;;  %v6281_v13 = vld [vmem:[%s6632_s21 + $0x168] sm:$0xff]  ;;  %v6283_v43 = vld [vmem:[%s6632_s21 + $0x178] sm:$0xff] }
 0x4d7   : > { %v6411_v49 = vpop.eup %6410  ;;  %6257 = vst [vmem:[%s12377_s26 + $0xe8] sm:$0xff] %v5751_v7  ;;  %v5788_v51 = vmul.f32 0.5, %v12524_v63  ;;  %6426 = verf.f32 %v5802_v37  ;;  %v5840_v53 = vadd.f32 %v12300_v56, %v12302_v8  ;;  %v5841_v55 = vadd.f32 %v12300_v56, %v12304_v15 }
 0x4d8   : > { %v6413_v50 = vpop.eup %6412  ;;  %6258 = vst [vmem:[%s12377_s26 + $0xf0] sm:$0xff] %v5752_v24  ;;  %v5745_v32 = vadd.f32 1.0, %v6411_v49  ;;  %6428 = verf.f32 %v5868_v33  ;;  %v12602_v10 = vadd.f32 %v6277_v17, %v5837_v6  ;;  %v12604_v22 = vadd.f32 %v6278_v62, %v5838_v21 }
 0x4d9   : > { %v6415_v61 = vpop.eup %6414  ;;  %v5811_v3 = vadd.f32 1.0, %v6413_v50  ;;  %v5789_v63 = vmul.f32 0.5, %v12530_v41  ;;  %v12607_v4 = vadd.f32 %v6279_v40, %v5839_v30  ;;  %v12609_v8 = vadd.f32 %v6280_v35, %v5840_v53 }
 0x4da   : > { %v6417_v15 = vpop.eup %6416  ;;  %v5753_v20 = vmul.f32 %v5745_v32, %v5721_v14  ;;  %v5812_v28 = vadd.f32 1.0, %v6415_v61  ;;  %v5869_v59 = vmul.f32 0.70710677, %v12602_v10  ;;  %v12612_v9 = vadd.f32 %v6281_v13, %v5841_v55 }
 0x4db   : > { %v5819_v23 = vmul.f32 %v5811_v3, %v5787_v48  ;;  %v5813_v29 = vadd.f32 1.0, %v6417_v15  ;;  %v5870_v60 = vmul.f32 0.70710677, %v12604_v22  ;;  %v5842_v41 = vadd.f32 %v12333_v52, %v12461_v39 }
 0x4dc   : > { %6259 = vst [vmem:[%s12377_s26 + $0xf8] sm:$0xff] %v5753_v20  ;;  %v5820_v12 = vmul.f32 %v5812_v28, %v5788_v51  ;;  %v5790_v42 = vmul.f32 0.5, %v12541_v16  ;;  %6430 = verf.f32 %v5869_v59  ;;  %v5871_v47 = vmul.f32 0.70710677, %v12607_v4 }
 0x4dd   : > { %v6419_v25 = vpop.eup %6418  ;;  %6268 = vst [vmem:[%s12377_s26 + $0x100] sm:$0xff] %v5819_v23  ;;  %v5821_v27 = vmul.f32 %v5813_v29, %v5789_v63  ;;  %v5791_v36 = vmul.f32 0.5, %v12543_v26  ;;  %6432 = verf.f32 %v5870_v60  ;;  %v5872_v18 = vmul.f32 0.70710677, %v12609_v8 }
 0x4de   : > { %v6421_v11 = vpop.eup %6420  ;;  %6269 = vst [vmem:[%s12377_s26 + $0x108] sm:$0xff] %v5820_v12  ;;  %v5814_v39 = vadd.f32 1.0, %v6419_v25  ;;  %v5792_v19 = vmul.f32 0.5, %v12557_v44  ;;  %6434 = verf.f32 %v5871_v47  ;;  %v5873_v16 = vmul.f32 0.70710677, %v12612_v9  ;;  %v5247_v25 = vpop.f32.mrf.mxu0 }
 0x4df   : > { %6270 = vst [vmem:[%s12377_s26 + $0x110] sm:$0xff] %v5821_v27  ;;  %v5815_v1 = vadd.f32 1.0, %v6421_v11  ;;  %6436 = verf.f32 %v5872_v18  ;;  %v5858_v34 = vadd.f32 %v6282_v57, %v5842_v41  ;;  %v5843_v26 = vadd.f32 %v12333_v52, %v12465_v46 }
 0x4e0   : > { %v6423_v45 = vpop.eup %6422  ;;  %v5822_v31 = vmul.f32 %v5814_v39, %v5790_v42  ;;  %v5793_v38 = vmul.f32 0.5, %v12559_v0  ;;  %6438 = verf.f32 %v5873_v16  ;;  %v5794_v62 = vmul.f32 0.5, %v12574_v5  ;;  %v5249_v27 = vpop.f32.mrf.mxu0  ;;  %v6292_v16 = vld [vmem:[%s6632_s21 + $0x180] sm:$0xff] }
 0x4e1   : > { %v6425_v14 = vpop.eup %6424  ;;  %v5823_v44 = vmul.f32 %v5815_v1, %v5791_v36  ;;  %v5816_v17 = vadd.f32 1.0, %v6423_v45  ;;  %v5874_v7 = vmul.f32 0.70710677, %v5858_v34  ;;  %v5859_v37 = vadd.f32 %v6283_v43, %v5843_v26  ;;  %v6293_v43 = vld [vmem:[%s6632_s21 + $0x188] sm:$0xff] }
 0x4e2   : > { %6271 = vst [vmem:[%s12377_s26 + $0x118] sm:$0xff] %v5822_v31  ;;  %v5817_v48 = vadd.f32 1.0, %v6425_v14  ;;  %v5860_v0 = vmul.f32 0.5, %v12576_v2  ;;  %v5861_v51 = vmul.f32 0.5, %v12602_v10  ;;  %v5862_v5 = vmul.f32 0.5, %v12604_v22  ;;  %v5253_v36 = vpop.f32.mrf.mxu0 }
 0x4e3   : > { %6272 = vst [vmem:[%s12377_s26 + $0x120] sm:$0xff] %v5823_v44  ;;  %v5824_v33 = vmul.f32 %v5816_v17, %v5792_v19  ;;  %6440 = verf.f32 %v5874_v7  ;;  %v5875_v6 = vmul.f32 0.70710677, %v5859_v37  ;;  %v5863_v13 = vmul.f32 0.5, %v12607_v4  ;;  %v6294_v17 = vld [vmem:[%s6632_s21 + $0x190] sm:$0xff] }
 0x4e4   : > { %v6427_v46 = vpop.eup %6426  ;;  %v5825_v24 = vmul.f32 %v5817_v48, %v5793_v38  ;;  %v5864_v61 = vmul.f32 0.5, %v12609_v8  ;;  %v5865_v15 = vmul.f32 0.5, %v12612_v9  ;;  %v5866_v29 = vmul.f32 0.5, %v5858_v34  ;;  %v5255_v18 = vpop.f32.mrf.mxu0 }
 0x4e5   : > { %v6429_v21 = vpop.eup %6428  ;;  %6273 = vst [vmem:[%s12377_s26 + $0x128] sm:$0xff] %v5824_v33  ;;  %v5818_v30 = vadd.f32 1.0, %v6427_v46  ;;  %6442 = verf.f32 %v5875_v6  ;;  %v5867_v12 = vmul.f32 0.5, %v5859_v37 }
 0x4e6   : > { %6274 = vst [vmem:[%s12377_s26 + $0x130] sm:$0xff] %v5825_v24  ;;  %v5884_v40 = vadd.f32 1.0, %v6429_v21  ;;  %v5259_v39 = vpop.f32.mrf.mxu0  ;;  %v6295_v21 = vld [vmem:[%s6632_s21 + $0x198] sm:$0xff] }
 0x4e7   : > { %v5826_v35 = vmul.f32 %v5818_v30, %v5794_v62 }
 0x4e8   : > { %v5892_v49 = vmul.f32 %v5884_v40, %v5860_v0  ;;  %v5261_v31 = vpop.f32.mrf.mxu0 }
 0x4e9   : > { %v6431_v53 = vpop.eup %6430  ;;  %6275 = vst [vmem:[%s12377_s26 + $0x138] sm:$0xff] %v5826_v35 }
 0x4ea   : > { %v6433_v55 = vpop.eup %6432  ;;  %6284 = vst [vmem:[%s12377_s26 + $0x140] sm:$0xff] %v5892_v49  ;;  %v5885_v2 = vadd.f32 1.0, %v6431_v53  ;;  %v5265_v24 = vpop.f32.mrf.mxu0 }
 0x4eb   : > { %v6435_v50 = vpop.eup %6434  ;;  %v5886_v32 = vadd.f32 1.0, %v6433_v55 }
 0x4ec   : > { %v6437_v3 = vpop.eup %6436  ;;  %v5893_v63 = vmul.f32 %v5885_v2, %v5861_v51  ;;  %v5887_v10 = vadd.f32 1.0, %v6435_v50  ;;  %v6296_v51 = vld [vmem:[%s6632_s21 + $0x1a0] sm:$0xff]  ;;  %v6297_v2 = vld [vmem:[%s6632_s21 + $0x1a8] sm:$0xff]  ;;  %v5267_v50 = vpop.f32.mrf.mxu0 }
 0x4ed   : > { %v6439_v20 = vpop.eup %6438  ;;  %v5894_v22 = vmul.f32 %v5886_v32, %v5862_v5  ;;  %v5888_v28 = vadd.f32 1.0, %v6437_v3 }
 0x4ee   : > { %6285 = vst [vmem:[%s12377_s26 + $0x148] sm:$0xff] %v5893_v63  ;;  %v5895_v59 = vmul.f32 %v5887_v10, %v5863_v13  ;;  %v5889_v23 = vadd.f32 1.0, %v6439_v20  ;;  %v6298_v10 = vld [vmem:[%s6632_s21 + $0x1b0] sm:$0xff] }
 0x4ef   : > { %6286 = vst [vmem:[%s12377_s26 + $0x150] sm:$0xff] %v5894_v22  ;;  %v5896_v4 = vmul.f32 %v5888_v28, %v5864_v61 }
 0x4f0   : > { %v6441_v60 = vpop.eup %6440  ;;  %6287 = vst [vmem:[%s12377_s26 + $0x158] sm:$0xff] %v5895_v59  ;;  %v5897_v8 = vmul.f32 %v5889_v23, %v5865_v15  ;;  %v6299_v23 = vld [vmem:[%s6632_s21 + $0x1b8] sm:$0xff] }
 0x4f1   : > { %6288 = vst [vmem:[%s12377_s26 + $0x160] sm:$0xff] %v5896_v4  ;;  %v5890_v41 = vadd.f32 1.0, %v6441_v60 }
 0x4f2   : > { %6289 = vst [vmem:[%s12377_s26 + $0x168] sm:$0xff] %v5897_v8  ;;  %v6443_v9 = vpop.eup %6442 }
 0x4f3   : > { %v5898_v42 = vmul.f32 %v5890_v41, %v5866_v29  ;;  %v5891_v47 = vadd.f32 1.0, %v6443_v9 }
 0x4f5   : > { %6290 = vst [vmem:[%s12377_s26 + $0x170] sm:$0xff] %v5898_v42  ;;  %v5899_v57 = vmul.f32 %v5891_v47, %v5867_v12 }
 0x4f7   : > { %6291 = vst [vmem:[%s12377_s26 + $0x178] sm:$0xff] %v5899_v57 }
 0x51f   : > { %v5158_v11 = vpop.f32.mrf.mxu1 }
 0x520   : > { %v5248_v19 = vadd.f32 %v5247_v25, %v5158_v11 }
 0x521   : > { %v5160_v1 = vpop.f32.mrf.mxu1 }
 0x522   : > { %v5909_v34 = vadd.f32 %v12238_v54, %v5248_v19  ;;  %v5250_v26 = vadd.f32 %v5249_v27, %v5160_v1 }
 0x523   : > { %v5164_v45 = vpop.f32.mrf.mxu1 }
 0x524   : > { %v5925_v38 = vadd.f32 %v6292_v16, %v5909_v34  ;;  %v5910_v14 = vadd.f32 %v12238_v54, %v5250_v26  ;;  %v5254_v44 = vadd.f32 %v5253_v36, %v5164_v45 }
 0x525   : > { %v5166_v7 = vpop.f32.mrf.mxu1 }
 0x526   : > { %v5941_v48 = vmul.f32 0.70710677, %v5925_v38  ;;  %v5926_v37 = vadd.f32 %v6293_v43, %v5910_v14  ;;  %v5911_v33 = vadd.f32 %v12236_v58, %v5254_v44  ;;  %v5256_v62 = vadd.f32 %v5255_v18, %v5166_v7 }
 0x527   : > { %v5170_v46 = vpop.f32.mrf.mxu1  ;;  %v5933_v42 = vmul.f32 0.5, %v5925_v38 }
 0x528   : > { %6444 = verf.f32 %v5941_v48  ;;  %v5942_v0 = vmul.f32 0.70710677, %v5926_v37  ;;  %v5927_v6 = vadd.f32 %v6294_v17, %v5911_v33  ;;  %v5912_v30 = vadd.f32 %v12236_v58, %v5256_v62 }
 0x529   : > { %v5260_v40 = vadd.f32 %v5259_v39, %v5170_v46  ;;  %v5172_v35 = vpop.f32.mrf.mxu1  ;;  %v5934_v27 = vmul.f32 0.5, %v5926_v37 }
 0x52a   : > { %6446 = verf.f32 %v5942_v0  ;;  %v5943_v49 = vmul.f32 0.70710677, %v5927_v6  ;;  %v5262_v53 = vadd.f32 %v5261_v31, %v5172_v35  ;;  %v5928_v5 = vadd.f32 %v6295_v21, %v5912_v30 }
 0x52b   : > { %v5913_v55 = vadd.f32 %v12300_v56, %v5260_v40  ;;  %v5176_v13 = vpop.f32.mrf.mxu1  ;;  %v5935_v18 = vmul.f32 0.5, %v5927_v6 }
 0x52c   : > { %6448 = verf.f32 %v5943_v49  ;;  %v5914_v32 = vadd.f32 %v12300_v56, %v5262_v53  ;;  %v5266_v61 = vadd.f32 %v5265_v24, %v5176_v13  ;;  %v5944_v3 = vmul.f32 0.70710677, %v5928_v5 }
 0x52d   : > { %v5929_v63 = vadd.f32 %v6296_v51, %v5913_v55  ;;  %v5178_v15 = vpop.f32.mrf.mxu1  ;;  %v5936_v16 = vmul.f32 0.5, %v5928_v5  ;;  %v6308_v5 = vld [vmem:[%s6632_s21 + $0x1c0] sm:$0xff] }
 0x52e   : > { %v5930_v20 = vadd.f32 %v6297_v2, %v5914_v32  ;;  %v5915_v22 = vadd.f32 %v12333_v52, %v5266_v61  ;;  %v5268_v28 = vadd.f32 %v5267_v50, %v5178_v15  ;;  %6450 = verf.f32 %v5944_v3  ;;  %v6309_v32 = vld [vmem:[%s6632_s21 + $0x1c8] sm:$0xff]  ;;  %v6310_v15 = vld [vmem:[%s6632_s21 + $0x1d0] sm:$0xff] }
 0x52f   : > { %v5945_v59 = vmul.f32 0.70710677, %v5929_v63  ;;  %v5937_v43 = vmul.f32 0.5, %v5929_v63 }
 0x530   : > { %v5946_v4 = vmul.f32 0.70710677, %v5930_v20  ;;  %v5931_v29 = vadd.f32 %v6298_v10, %v5915_v22  ;;  %v5916_v60 = vadd.f32 %v12333_v52, %v5268_v28  ;;  %v5938_v31 = vmul.f32 0.5, %v5930_v20 }
 0x531   : > { %6452 = verf.f32 %v5945_v59 }
 0x532   : > { %6454 = verf.f32 %v5946_v4  ;;  %v5947_v8 = vmul.f32 0.70710677, %v5931_v29  ;;  %v5932_v41 = vadd.f32 %v6299_v23, %v5916_v60  ;;  %v5939_v7 = vmul.f32 0.5, %v5931_v29 }
 0x534   : > { %6456 = verf.f32 %v5947_v8  ;;  %v5948_v12 = vmul.f32 0.70710677, %v5932_v41  ;;  %v5940_v46 = vmul.f32 0.5, %v5932_v41  ;;  %v6311_v41 = vld [vmem:[%s6632_s21 + $0x1d8] sm:$0xff] }
 0x535   : > { %v6445_v9 = vpop.eup %6444 }
 0x536   : > { %v5957_v47 = vadd.f32 1.0, %v6445_v9  ;;  %6458 = verf.f32 %v5948_v12 }
 0x537   : > { %v6447_v57 = vpop.eup %6446 }
 0x538   : > { %v5965_v25 = vmul.f32 %v5957_v47, %v5933_v42  ;;  %v5958_v36 = vadd.f32 1.0, %v6447_v57  ;;  %v6312_v57 = vld [vmem:[%s6632_s21 + $0x1e0] sm:$0xff] }
 0x539   : > { %v6449_v11 = vpop.eup %6448 }
 0x53a   : > { %6300 = vst [vmem:[%s12377_s26 + $0x180] sm:$0xff] %v5965_v25  ;;  %v5966_v39 = vmul.f32 %v5958_v36, %v5934_v27  ;;  %v5959_v19 = vadd.f32 1.0, %v6449_v11 }
 0x53b   : > { %v6451_v1 = vpop.eup %6450 }
 0x53c   : > { %6301 = vst [vmem:[%s12377_s26 + $0x188] sm:$0xff] %v5966_v39  ;;  %v5967_v34 = vmul.f32 %v5959_v19, %v5935_v18  ;;  %v5960_v26 = vadd.f32 1.0, %v6451_v1  ;;  %v6313_v18 = vld [vmem:[%s6632_s21 + $0x1e8] sm:$0xff]  ;;  %v6314_v1 = vld [vmem:[%s6632_s21 + $0x1f0] sm:$0xff] }
 0x53e   : > { %v6453_v45 = vpop.eup %6452  ;;  %6302 = vst [vmem:[%s12377_s26 + $0x190] sm:$0xff] %v5967_v34  ;;  %v5968_v14 = vmul.f32 %v5960_v26, %v5936_v16 }
 0x53f   : > { %v6455_v38 = vpop.eup %6454  ;;  %v5961_v44 = vadd.f32 1.0, %v6453_v45 }
 0x540   : > { %v5962_v17 = vadd.f32 1.0, %v6455_v38  ;;  %6303 = vst [vmem:[%s12377_s26 + $0x198] sm:$0xff] %v5968_v14  ;;  %v6315_v14 = vld [vmem:[%s6632_s21 + $0x1f8] sm:$0xff] }
 0x541   : > { %v6457_v48 = vpop.eup %6456  ;;  %v5969_v37 = vmul.f32 %v5961_v44, %v5937_v43 }
 0x542   : > { %v5970_v33 = vmul.f32 %v5962_v17, %v5938_v31  ;;  %v5963_v62 = vadd.f32 1.0, %v6457_v48 }
 0x543   : > { %v6459_v24 = vpop.eup %6458  ;;  %6304 = vst [vmem:[%s12377_s26 + $0x1a0] sm:$0xff] %v5969_v37  ;;  %v5336_v0 = vpop.f32.mrf.mxu0 }
 0x544   : > { %6305 = vst [vmem:[%s12377_s26 + $0x1a8] sm:$0xff] %v5970_v33  ;;  %v5971_v6 = vmul.f32 %v5963_v62, %v5939_v7  ;;  %v5964_v21 = vadd.f32 1.0, %v6459_v24 }
 0x545   : > { %v5338_v30 = vpop.f32.mrf.mxu0 }
 0x546   : > { %6306 = vst [vmem:[%s12377_s26 + $0x1b0] sm:$0xff] %v5971_v6  ;;  %v5972_v40 = vmul.f32 %v5964_v21, %v5940_v46 }
 0x547   : > { %v5342_v35 = vpop.f32.mrf.mxu0 }
 0x548   : > { %6307 = vst [vmem:[%s12377_s26 + $0x1b8] sm:$0xff] %v5972_v40 }
 0x549   : > { %v5344_v49 = vpop.f32.mrf.mxu0 }
 0x54b   : > { %v5425_v51 = vpop.f32.mrf.mxu1  ;;  %v5348_v2 = vpop.f32.mrf.mxu0 }
 0x54c   : > { %v5426_v53 = vadd.f32 %v5425_v51, %v5336_v0 }
 0x54d   : > { %v5427_v55 = vpop.f32.mrf.mxu1  ;;  %v5350_v22 = vpop.f32.mrf.mxu0 }
 0x54e   : > { %v5982_v13 = vadd.f32 %v12238_v54, %v5426_v53  ;;  %v5428_v50 = vadd.f32 %v5427_v55, %v5338_v30 }
 0x54f   : > { %v5431_v61 = vpop.f32.mrf.mxu1  ;;  %v5354_v42 = vpop.f32.mrf.mxu0 }
 0x550   : > { %v5998_v3 = vadd.f32 %v6308_v5, %v5982_v13  ;;  %v5983_v63 = vadd.f32 %v12238_v54, %v5428_v50  ;;  %v5432_v10 = vadd.f32 %v5431_v61, %v5342_v35 }
 0x551   : > { %v5433_v20 = vpop.f32.mrf.mxu1  ;;  %v5356_v34 = vpop.f32.mrf.mxu0 }
 0x552   : > { %v6014_v28 = vmul.f32 0.70710677, %v5998_v3  ;;  %v5999_v59 = vadd.f32 %v6309_v32, %v5983_v63  ;;  %v5984_v23 = vadd.f32 %v12236_v58, %v5432_v10  ;;  %v5434_v4 = vadd.f32 %v5433_v20, %v5344_v49 }
 0x553   : > { %v6006_v62 = vmul.f32 0.5, %v5998_v3 }
 0x554   : > { %6460 = verf.f32 %v6014_v28  ;;  %v6015_v60 = vmul.f32 0.70710677, %v5999_v59  ;;  %v6000_v8 = vadd.f32 %v6310_v15, %v5984_v23  ;;  %v5985_v12 = vadd.f32 %v12236_v58, %v5434_v4 }
 0x555   : > { %v5437_v29 = vpop.f32.mrf.mxu1  ;;  %v6007_v6 = vmul.f32 0.5, %v5999_v59 }
 0x556   : > { %v5438_v9 = vadd.f32 %v5437_v29, %v5348_v2  ;;  %6462 = verf.f32 %v6015_v60  ;;  %v6016_v47 = vmul.f32 0.70710677, %v6000_v8  ;;  %v6001_v27 = vadd.f32 %v6311_v41, %v5985_v12 }
 0x557   : > { %v5439_v54 = vpop.f32.mrf.mxu1  ;;  %v6008_v40 = vmul.f32 0.5, %v6000_v8 }
 0x558   : > { %v5440_v25 = vadd.f32 %v5439_v54, %v5350_v22  ;;  %v5986_v36 = vadd.f32 %v12300_v56, %v5438_v9  ;;  %6464 = verf.f32 %v6016_v47  ;;  %v6017_v16 = vmul.f32 0.70710677, %v6001_v27 }
 0x559   : > { %v5443_v11 = vpop.f32.mrf.mxu1  ;;  %v6009_v53 = vmul.f32 0.5, %v6001_v27 }
 0x55a   : > { %v5987_v39 = vadd.f32 %v12300_v56, %v5440_v25  ;;  %v5444_v19 = vadd.f32 %v5443_v11, %v5354_v42  ;;  %v6002_v58 = vadd.f32 %v6312_v57, %v5986_v36  ;;  %6466 = verf.f32 %v6017_v16 }
 0x55b   : > { %v5445_v26 = vpop.f32.mrf.mxu1 }
 0x55c   : > { %v6003_v43 = vadd.f32 %v6313_v18, %v5987_v39  ;;  %v5988_v45 = vadd.f32 %v12333_v52, %v5444_v19  ;;  %v5446_v31 = vadd.f32 %v5445_v26, %v5356_v34  ;;  %v6018_v38 = vmul.f32 0.70710677, %v6002_v58 }
 0x55d   : > { %v6010_v50 = vmul.f32 0.5, %v6002_v58 }
 0x55e   : > { %v6019_v44 = vmul.f32 0.70710677, %v6003_v43  ;;  %v6004_v17 = vadd.f32 %v6314_v1, %v5988_v45  ;;  %v5989_v7 = vadd.f32 %v12333_v52, %v5446_v31  ;;  %6468 = verf.f32 %v6018_v38 }
 0x55f   : > { %v6011_v61 = vmul.f32 0.5, %v6003_v43 }
 0x560   : > { %6470 = verf.f32 %v6019_v44  ;;  %v6020_v56 = vmul.f32 0.70710677, %v6004_v17  ;;  %v6005_v48 = vadd.f32 %v6315_v14, %v5989_v7  ;;  %v6012_v20 = vmul.f32 0.5, %v6004_v17 }
 0x561   : > { %v6461_v33 = vpop.eup %6460 }
 0x562   : > { %6472 = verf.f32 %v6020_v56  ;;  %v6021_v37 = vmul.f32 0.70710677, %v6005_v48  ;;  %v6030_v46 = vadd.f32 1.0, %v6461_v33  ;;  %v6013_v23 = vmul.f32 0.5, %v6005_v48 }
 0x563   : > { %v6463_v24 = vpop.eup %6462 }
 0x564   : > { %6474 = verf.f32 %v6021_v37  ;;  %v6038_v0 = vmul.f32 %v6030_v46, %v6006_v62  ;;  %v6031_v21 = vadd.f32 1.0, %v6463_v24 }
 0x565   : > { %v6465_v30 = vpop.eup %6464 }
 0x566   : > { %6316 = vst [vmem:[%s12377_s26 + $0x1c0] sm:$0xff] %v6038_v0  ;;  %v6039_v52 = vmul.f32 %v6031_v21, %v6007_v6  ;;  %v6032_v35 = vadd.f32 1.0, %v6465_v30 }
 0x567   : > { %v6467_v49 = vpop.eup %6466 }
 0x568   : > { %6317 = vst [vmem:[%s12377_s26 + $0x1c8] sm:$0xff] %v6039_v52  ;;  %v6040_v51 = vmul.f32 %v6032_v35, %v6008_v40  ;;  %v6033_v5 = vadd.f32 1.0, %v6467_v49 }
 0x56a   : > { %6318 = vst [vmem:[%s12377_s26 + $0x1d0] sm:$0xff] %v6040_v51  ;;  %v6041_v13 = vmul.f32 %v6033_v5, %v6009_v53 }
 0x56b   : > { %v6469_v55 = vpop.eup %6468 }
 0x56c   : > { %v6034_v32 = vadd.f32 1.0, %v6469_v55  ;;  %6319 = vst [vmem:[%s12377_s26 + $0x1d8] sm:$0xff] %v6041_v13 }
 0x56d   : > { %v6471_v2 = vpop.eup %6470 }
 0x56e   : > { %v6035_v3 = vadd.f32 1.0, %v6471_v2  ;;  %v6042_v10 = vmul.f32 %v6034_v32, %v6010_v50 }
 0x56f   : > { %v6473_v63 = vpop.eup %6472 }
 0x570   : > { %v6043_v15 = vmul.f32 %v6035_v3, %v6011_v61  ;;  %v6036_v22 = vadd.f32 1.0, %v6473_v63  ;;  %6320 = vst [vmem:[%s12377_s26 + $0x1e0] sm:$0xff] %v6042_v10 }
 0x571   : > { %v6475_v28 = vpop.eup %6474 }
 0x572   : > { %6321 = vst [vmem:[%s12377_s26 + $0x1e8] sm:$0xff] %v6043_v15  ;;  %v6044_v59 = vmul.f32 %v6036_v22, %v6012_v20  ;;  %v6037_v4 = vadd.f32 1.0, %v6475_v28 }
 0x574   : > { %6322 = vst [vmem:[%s12377_s26 + $0x1f0] sm:$0xff] %v6044_v59  ;;  %v6045_v29 = vmul.f32 %v6037_v4, %v6013_v23 }
 0x576   : > { %6323 = vst [vmem:[%s12377_s26 + $0x1f8] sm:$0xff] %v6045_v29 }
 0x577 PF: > { %s14_s15 = sadd.s32 1, %s6579_s15  }
 0x578   : > { %p11_p4 = scmp.ge.s32.totalorder %s14_s15, 4  }
 0x57a   :  { %13 = sbr.rel (!%p11_p4) target bundleno = 1 (0x1), region = 80 }

</bundles_post_ra>
